<compile_context>
chip_gen: v7x
topology: tpu7x:2x2x1
jax: 0.10.0
libtpu: 0.0.40
codegen_flags: <defaults>
</compile_context>

<pallas_src>
import functools
import math

import jax
import jax.numpy as jnp
import numpy as np
from jax.experimental import pallas as pl
from jax.experimental.pallas import tpu as pltpu

# MXU operand dtype.  jnp.bfloat16 halves MXU passes / VMEM traffic on v6e/v7x
# (accumulation stays f32 either way); jnp.float32 matches the PyTorch reference
# numerics and is the safe default on v5e.
_MXU_DTYPE = jnp.float32


@functools.lru_cache(maxsize=None)
def _roll_matches_jnp_convention() -> bool:
    """One-time probe: does pltpu.roll follow jnp.roll's sign convention?

    Expected (and assumed on any failure): yes, i.e. roll(x, s)[i] == x[(i - s) % n].
    Probing once makes the 3x3-tap shift direction robust across backends.
    """
    try:
        def k(x_ref, o_ref):
            o_ref[...] = pltpu.roll(x_ref[...], shift=1, axis=1)

        x = jnp.tile(jnp.arange(128, dtype=jnp.float32)[None, :], (8, 1))
        y = pl.pallas_call(
            k, out_shape=jax.ShapeDtypeStruct((8, 128), jnp.float32))(x)
        return bool(float(y[0, 2]) == 1.0)
    except Exception:
        return True


def _tap_masks(H, W):
    """(9, H*W) f32 validity masks for the 3x3 taps, row-major (dy, dx) order."""
    idx = np.arange(H * W)
    h, w = idx // W, idx % W
    rows = []
    for dy in (-1, 0, 1):
        for dx in (-1, 0, 1):
            valid = (h + dy >= 0) & (h + dy < H) & (w + dx >= 0) & (w + dx < W)
            rows.append(valid.astype(np.float32))
    return np.stack(rows)


def _pool_matrix(H, W, Ho, Wo):
    """(H*W, Ho*Wo) matrix implementing AvgPool2d(3, stride=2, padding=1) with
    PyTorch's default count_include_pad=True (fixed 1/9 weights)."""
    P = np.zeros((H * W, Ho * Wo), np.float32)
    for oh in range(Ho):
        for ow in range(Wo):
            j = oh * Wo + ow
            for kh in range(3):
                for kw in range(3):
                    ih, iw = 2 * oh + kh - 1, 2 * ow + kw - 1
                    if 0 <= ih < H and 0 <= iw < W:
                        P[ih * W + iw, j] = 1.0 / 9.0
    return P


def _fused_block_kernel(x_ref, w1_ref, w2_ref, wd_ref, bias_ref, mask_ref,
                        pool_ref, o_ref, *, shifts, mxu_dtype):
    """One image of CondResBlockNoLatent, entirely in VMEM.

    Layout: channels on sublanes, pixels (H*W) on lanes.  Each 3x3 conv is nine
    MXU matmuls W_tap(Cout,Cin) @ shift(x)(Cin,HW); the spatial shift is a lane
    roll (XLU) and the zero padding is a precomputed mask multiply (VPU).
    """
    F, HW = x_ref.shape
    F2 = o_ref.shape[0]

    def swish(v):                       # v * sigmoid(v); f32 elementwise (EUP exp)
        return v * (1.0 / (1.0 + jnp.exp(-v)))

    def conv3x3(act, w_ref_, bias_col):
        cout = w_ref_.shape[1]
        acc = jnp.zeros((cout, HW), jnp.float32)
        for t in range(9):              # static unroll over the 9 taps
            s = shifts[t]
            shifted = pltpu.roll(act, shift=s, axis=1) if s else act
            shifted = shifted * mask_ref[pl.ds(t, 1), :]
            acc = acc + jnp.dot(w_ref_[t].astype(mxu_dtype),
                                shifted.astype(mxu_dtype),
                                preferred_element_type=jnp.float32)
        return acc + bias_col

    x = x_ref[...]
    b1 = bias_ref[pl.ds(0, F), pl.ds(0, 1)]        # (F, 1)
    b2 = bias_ref[pl.ds(F, F), pl.ds(0, 1)]        # (F, 1)
    bd = bias_ref[pl.ds(0, F2), pl.ds(1, 1)]       # (2F, 1)

    h = swish(conv3x3(x, w1_ref, b1))              # conv1 -> swish
    h = swish(conv3x3(h, w2_ref, b2))              # conv2 -> swish
    h = x + h                                      # residual add
    h = swish(conv3x3(h, wd_ref, bd))              # conv_downsample -> swish (2F, HW)
    # AvgPool2d(3, stride=2, padding=1), count_include_pad=True, as one matmul.
    o_ref[...] = jnp.dot(h.astype(mxu_dtype), pool_ref[...].astype(mxu_dtype),
                         preferred_element_type=jnp.float32)


def cond_res_block_no_latent_forward(x_nchw, params):
    """Fused forward of CondResBlockNoLatent (downsample=True, rescale=True,
    upsample=False).  x: (N, filters, H, W) f32 -> (N, 2*filters, Ho, Wo) f32."""
    N, F, H, W = x_nchw.shape
    HW = H * W
    Ho = (H - 1) // 2 + 1              # AvgPool2d(3, stride=2, padding=1) out size
    Wo = (W - 1) // 2 + 1
    HoWo = Ho * Wo
    F2 = 2 * F

    # Static constants (built with numpy at trace time; hoisted out of hot path).
    masks = jnp.asarray(_tap_masks(H, W))            # (9, HW)
    pool = jnp.asarray(_pool_matrix(H, W, Ho, Wo))   # (HW, HoWo)

    # Per-tap lane shifts so that shifted[i] == x[i + dy*W + dx] (before masking).
    jnp_sem = _roll_matches_jnp_convention()
    shifts = []
    for dy in (-1, 0, 1):
        for dx in (-1, 0, 1):
            d = dy * W + dx
            shifts.append(((-d) % HW) if jnp_sem else (d % HW))
    shifts = tuple(shifts)

    x3 = x_nchw.reshape(N, F, HW).astype(jnp.float32)   # metadata-only reshape

    kern = functools.partial(_fused_block_kernel, shifts=shifts,
                             mxu_dtype=_MXU_DTYPE)
    out = pl.pallas_call(
        kern,
        out_shape=jax.ShapeDtypeStruct((N, F2, HoWo), jnp.float32),
        grid=(N,),
        in_specs=[
            pl.BlockSpec((None, F, HW), lambda n: (n, 0, 0)),    # x (one image)
            pl.BlockSpec((9, F, F), lambda n: (0, 0, 0)),        # conv1 taps
            pl.BlockSpec((9, F, F), lambda n: (0, 0, 0)),        # conv2 taps
            pl.BlockSpec((9, F2, F), lambda n: (0, 0, 0)),       # conv_down taps
            pl.BlockSpec((F2, 2), lambda n: (0, 0)),             # packed biases
            pl.BlockSpec((9, HW), lambda n: (0, 0)),             # tap masks
            pl.BlockSpec((HW, HoWo), lambda n: (0, 0)),          # pooling matrix
        ],
        out_specs=pl.BlockSpec((None, F2, HoWo), lambda n: (n, 0, 0)),
        compiler_params=pltpu.CompilerParams(
            dimension_semantics=("parallel",)),  # batch images -> both TCs on v7x
    )(x3, params["w1"], params["w2"], params["wd"], params["bias"], masks, pool)

    return out.reshape(N, F2, Ho, Wo)    # metadata-only NCHW view


def init_params(key, filters=64, rescale=True):
    """PyTorch-default-style init, pre-packed into kernel-friendly layouts."""
    f = filters
    out_ch = 2 * f if rescale else f
    fan_in = f * 9
    bound = 1.0 / math.sqrt(fan_in)
    ks = jax.random.split(key, 6)

    def u(k, shape):
        return jax.random.uniform(k, shape, jnp.float32, -bound, bound)

    w1, b1 = u(ks[0], (f, f, 3, 3)), u(ks[1], (f,))
    w2, b2 = u(ks[2], (f, f, 3, 3)), u(ks[3], (f,))
    wd, bd = u(ks[4], (out_ch, f, 3, 3)), u(ks[5], (out_ch,))
    # TODO(synk): bn1/bn2 (GroupNorm) and the upsample branch exist in __init__
    # but are unused by forward() with the default flags, so no params are built.

    def taps(w):  # (Cout, Cin, 3, 3) -> (9, Cout, Cin), tap index = 3*ky + kx
        co, ci, kh, kw = w.shape
        return jnp.transpose(w, (2, 3, 0, 1)).reshape(kh * kw, co, ci)

    assert rescale, "bias packing assumes the default rescale=True (2*filters out)"
    bias = jnp.zeros((out_ch, 2), jnp.float32)
    bias = bias.at[0:f, 0].set(b1).at[f:2 * f, 0].set(b2).at[:, 1].set(bd)
    return {"w1": taps(w1), "w2": taps(w2), "wd": taps(wd), "bias": bias}


if __name__ == "__main__":
    key = jax.random.PRNGKey(0)
    k_param, k_x = jax.random.split(key)

    batch, filters, H, W = 2, 64, 16, 16            # module default: filters=64
    params = init_params(k_param, filters=filters, rescale=True)
    x = jax.random.normal(k_x, (batch, filters, H, W), dtype=jnp.float32)

    _roll_matches_jnp_convention()                  # run the tiny probe eagerly

    fwd = jax.jit(cond_res_block_no_latent_forward)
    out = jax.block_until_ready(fwd(x, params))

    Ho = (H - 1) // 2 + 1
    assert out.shape == (batch, 2 * filters, Ho, Ho), out.shape
    assert out.dtype == jnp.float32
    assert bool(jnp.all(jnp.isfinite(out)))
    print("KERNEL_OK")
</pallas_src>

<mosaic_0001>
module attributes {stable_mosaic.version = 11 : i64} {
  func.func @k(%arg0: memref<8x128xf32, #tpu.memory_space<vmem>>, %arg1: memref<8x128xf32, #tpu.memory_space<vmem>>) attributes {dimension_semantics = [], scalar_prefetch = 0 : i64, scratch_operands = 0 : i64, tpu.core_type = #tpu.core_type<tc>} {
    %c0 = arith.constant 0 : index
    %c0_0 = arith.constant 0 : index
    %0 = vector.load %arg0[%c0, %c0_0] : memref<8x128xf32, #tpu.memory_space<vmem>>, vector<8x128xf32>
    %c1_i32 = arith.constant 1 : i32
    %1 = tpu.dynamic_rotate %0 by %c1_i32 dim 1 : vector<8x128xf32>, i32 -> vector<8x128xf32>
    %c0_1 = arith.constant 0 : index
    %c0_2 = arith.constant 0 : index
    %2 = vector.load %arg1[%c0_1, %c0_2] : memref<8x128xf32, #tpu.memory_space<vmem>>, vector<8x128xf32>
    tpu.vector_store %arg1[%c0_1, %c0_2], %1 {strides = array<i32>} : memref<8x128xf32, #tpu.memory_space<vmem>>, vector<8x128xf32>,
    return
  }
}

module attributes {stable_mosaic.version = 11 : i64} {
  func.func @_fused_block_kernel(%arg0: i32, %arg1: memref<1x64x256xf32, #tpu.memory_space<vmem>>, %arg2: memref<9x64x64xf32, #tpu.memory_space<vmem>>, %arg3: memref<9x64x64xf32, #tpu.memory_space<vmem>>, %arg4: memref<9x128x64xf32, #tpu.memory_space<vmem>>, %arg5: memref<128x2xf32, #tpu.memory_space<vmem>>, %arg6: memref<9x256xf32, #tpu.memory_space<vmem>>, %arg7: memref<256x64xf32, #tpu.memory_space<vmem>>, %arg8: memref<1x128x64xf32, #tpu.memory_space<vmem>>) attributes {dimension_semantics = [#tpu.dimension_semantics<parallel>], iteration_bounds = array<i64: 2>, scalar_prefetch = 0 : i64, scratch_operands = 0 : i64, tpu.core_type = #tpu.core_type<tc>, window_params = [{transform_indices = @transform_0, window_bounds = array<i64: 1, 64, 256>}, {pipeline_mode = #tpu.pipeline_mode<synchronous>, transform_indices = @transform_1, window_bounds = array<i64: 9, 64, 64>}, {pipeline_mode = #tpu.pipeline_mode<synchronous>, transform_indices = @transform_2, window_bounds = array<i64: 9, 64, 64>}, {pipeline_mode = #tpu.pipeline_mode<synchronous>, transform_indices = @transform_3, window_bounds = array<i64: 9, 128, 64>}, {pipeline_mode = #tpu.pipeline_mode<synchronous>, transform_indices = @transform_4, window_bounds = array<i64: 128, 2>}, {pipeline_mode = #tpu.pipeline_mode<synchronous>, transform_indices = @transform_5, window_bounds = array<i64: 9, 256>}, {pipeline_mode = #tpu.pipeline_mode<synchronous>, transform_indices = @transform_6, window_bounds = array<i64: 256, 64>}, {transform_indices = @transform_7, window_bounds = array<i64: 1, 128, 64>}]} {
    %c0 = arith.constant 0 : index
    %c0_0 = arith.constant 0 : index
    %c0_1 = arith.constant 0 : index
    %0 = vector.load %arg1[%c0, %c0_0, %c0_1] : memref<1x64x256xf32, #tpu.memory_space<vmem>>, vector<1x64x256xf32>
    %1 = vector.shape_cast %0 : vector<1x64x256xf32> to vector<64x256xf32>
    %c0_2 = arith.constant 0 : index
    %c0_3 = arith.constant 0 : index
    %2 = vector.load %arg5[%c0_2, %c0_3] : memref<128x2xf32, #tpu.memory_space<vmem>>, vector<64x1xf32>
    %c64 = arith.constant 64 : index
    %c0_4 = arith.constant 0 : index
    %3 = vector.load %arg5[%c64, %c0_4] : memref<128x2xf32, #tpu.memory_space<vmem>>, vector<64x1xf32>
    %c0_5 = arith.constant 0 : index
    %c1 = arith.constant 1 : index
    %4 = vector.load %arg5[%c0_5, %c1] : memref<128x2xf32, #tpu.memory_space<vmem>>, vector<128x1xf32>
    %cst = arith.constant 0.000000e+00 : f32
    %5 = vector.broadcast %cst : f32 to vector<64x256xf32>
    %c17_i32 = arith.constant 17 : i32
    %6 = tpu.dynamic_rotate %1 by %c17_i32 dim 1 : vector<64x256xf32>, i32 -> vector<64x256xf32>
    %c0_6 = arith.constant 0 : index
    %c0_7 = arith.constant 0 : index
    %7 = vector.load %arg6[%c0_6, %c0_7] : memref<9x256xf32, #tpu.memory_space<vmem>>, vector<1x256xf32>
    %8 = vector.broadcast %7 : vector<1x256xf32> to vector<64x256xf32>
    %9 = arith.mulf %6, %8 : vector<64x256xf32>
    %c0_8 = arith.constant 0 : index
    %c0_9 = arith.constant 0 : index
    %c0_10 = arith.constant 0 : index
    %10 = vector.load %arg2[%c0_8, %c0_9, %c0_10] : memref<9x64x64xf32, #tpu.memory_space<vmem>>, vector<1x64x64xf32>
    %11 = vector.shape_cast %10 : vector<1x64x64xf32> to vector<64x64xf32>
    %cst_11 = arith.constant dense<0.000000e+00> : vector<64x256xf32>
    %12 = tpu.matmul %11, %9, %cst_11 {dimension_numbers = #tpu.dot_dimension_numbers<[1], [0], [0], [1], [0, 0, 1, 1], [], []>} : vector<64x64xf32>, vector<64x256xf32>, vector<64x256xf32> -> vector<64x256xf32>
    %13 = arith.addf %5, %12 : vector<64x256xf32>
    %c16_i32 = arith.constant 16 : i32
    %14 = tpu.dynamic_rotate %1 by %c16_i32 dim 1 : vector<64x256xf32>, i32 -> vector<64x256xf32>
    %c1_12 = arith.constant 1 : index
    %c0_13 = arith.constant 0 : index
    %15 = vector.load %arg6[%c1_12, %c0_13] : memref<9x256xf32, #tpu.memory_space<vmem>>, vector<1x256xf32>
    %16 = vector.broadcast %15 : vector<1x256xf32> to vector<64x256xf32>
    %17 = arith.mulf %14, %16 : vector<64x256xf32>
    %c1_14 = arith.constant 1 : index
    %c0_15 = arith.constant 0 : index
    %c0_16 = arith.constant 0 : index
    %18 = vector.load %arg2[%c1_14, %c0_15, %c0_16] : memref<9x64x64xf32, #tpu.memory_space<vmem>>, vector<1x64x64xf32>
    %19 = vector.shape_cast %18 : vector<1x64x64xf32> to vector<64x64xf32>
    %cst_17 = arith.constant dense<0.000000e+00> : vector<64x256xf32>
    %20 = tpu.matmul %19, %17, %cst_17 {dimension_numbers = #tpu.dot_dimension_numbers<[1], [0], [0], [1], [0, 0, 1, 1], [], []>} : vector<64x64xf32>, vector<64x256xf32>, vector<64x256xf32> -> vector<64x256xf32>
    %21 = arith.addf %13, %20 : vector<64x256xf32>
    %c15_i32 = arith.constant 15 : i32
    %22 = tpu.dynamic_rotate %1 by %c15_i32 dim 1 : vector<64x256xf32>, i32 -> vector<64x256xf32>
    %c2 = arith.constant 2 : index
    %c0_18 = arith.constant 0 : index
    %23 = vector.load %arg6[%c2, %c0_18] : memref<9x256xf32, #tpu.memory_space<vmem>>, vector<1x256xf32>
    %24 = vector.broadcast %23 : vector<1x256xf32> to vector<64x256xf32>
    %25 = arith.mulf %22, %24 : vector<64x256xf32>
    %c2_19 = arith.constant 2 : index
    %c0_20 = arith.constant 0 : index
    %c0_21 = arith.constant 0 : index
    %26 = vector.load %arg2[%c2_19, %c0_20, %c0_21] : memref<9x64x64xf32, #tpu.memory_space<vmem>>, vector<1x64x64xf32>
    %27 = vector.shape_cast %26 : vector<1x64x64xf32> to vector<64x64xf32>
    %cst_22 = arith.constant dense<0.000000e+00> : vector<64x256xf32>
    %28 = tpu.matmul %27, %25, %cst_22 {dimension_numbers = #tpu.dot_dimension_numbers<[1], [0], [0], [1], [0, 0, 1, 1], [], []>} : vector<64x64xf32>, vector<64x256xf32>, vector<64x256xf32> -> vector<64x256xf32>
    %29 = arith.addf %21, %28 : vector<64x256xf32>
    %c1_i32 = arith.constant 1 : i32
    %30 = tpu.dynamic_rotate %1 by %c1_i32 dim 1 : vector<64x256xf32>, i32 -> vector<64x256xf32>
    %c3 = arith.constant 3 : index
    %c0_23 = arith.constant 0 : index
    %31 = vector.load %arg6[%c3, %c0_23] : memref<9x256xf32, #tpu.memory_space<vmem>>, vector<1x256xf32>
    %32 = vector.broadcast %31 : vector<1x256xf32> to vector<64x256xf32>
    %33 = arith.mulf %30, %32 : vector<64x256xf32>
    %c3_24 = arith.constant 3 : index
    %c0_25 = arith.constant 0 : index
    %c0_26 = arith.constant 0 : index
    %34 = vector.load %arg2[%c3_24, %c0_25, %c0_26] : memref<9x64x64xf32, #tpu.memory_space<vmem>>, vector<1x64x64xf32>
    %35 = vector.shape_cast %34 : vector<1x64x64xf32> to vector<64x64xf32>
    %cst_27 = arith.constant dense<0.000000e+00> : vector<64x256xf32>
    %36 = tpu.matmul %35, %33, %cst_27 {dimension_numbers = #tpu.dot_dimension_numbers<[1], [0], [0], [1], [0, 0, 1, 1], [], []>} : vector<64x64xf32>, vector<64x256xf32>, vector<64x256xf32> -> vector<64x256xf32>
    %37 = arith.addf %29, %36 : vector<64x256xf32>
    %c4 = arith.constant 4 : index
    %c0_28 = arith.constant 0 : index
    %38 = vector.load %arg6[%c4, %c0_28] : memref<9x256xf32, #tpu.memory_space<vmem>>, vector<1x256xf32>
    %39 = vector.broadcast %38 : vector<1x256xf32> to vector<64x256xf32>
    %40 = arith.mulf %1, %39 : vector<64x256xf32>
    %c4_29 = arith.constant 4 : index
    %c0_30 = arith.constant 0 : index
    %c0_31 = arith.constant 0 : index
    %41 = vector.load %arg2[%c4_29, %c0_30, %c0_31] : memref<9x64x64xf32, #tpu.memory_space<vmem>>, vector<1x64x64xf32>
    %42 = vector.shape_cast %41 : vector<1x64x64xf32> to vector<64x64xf32>
    %cst_32 = arith.constant dense<0.000000e+00> : vector<64x256xf32>
    %43 = tpu.matmul %42, %40, %cst_32 {dimension_numbers = #tpu.dot_dimension_numbers<[1], [0], [0], [1], [0, 0, 1, 1], [], []>} : vector<64x64xf32>, vector<64x256xf32>, vector<64x256xf32> -> vector<64x256xf32>
    %44 = arith.addf %37, %43 : vector<64x256xf32>
    %c255_i32 = arith.constant 255 : i32
    %45 = tpu.dynamic_rotate %1 by %c255_i32 dim 1 : vector<64x256xf32>, i32 -> vector<64x256xf32>
    %c5 = arith.constant 5 : index
    %c0_33 = arith.constant 0 : index
    %46 = vector.load %arg6[%c5, %c0_33] : memref<9x256xf32, #tpu.memory_space<vmem>>, vector<1x256xf32>
    %47 = vector.broadcast %46 : vector<1x256xf32> to vector<64x256xf32>
    %48 = arith.mulf %45, %47 : vector<64x256xf32>
    %c5_34 = arith.constant 5 : index
    %c0_35 = arith.constant 0 : index
    %c0_36 = arith.constant 0 : index
    %49 = vector.load %arg2[%c5_34, %c0_35, %c0_36] : memref<9x64x64xf32, #tpu.memory_space<vmem>>, vector<1x64x64xf32>
    %50 = vector.shape_cast %49 : vector<1x64x64xf32> to vector<64x64xf32>
    %cst_37 = arith.constant dense<0.000000e+00> : vector<64x256xf32>
    %51 = tpu.matmul %50, %48, %cst_37 {dimension_numbers = #tpu.dot_dimension_numbers<[1], [0], [0], [1], [0, 0, 1, 1], [], []>} : vector<64x64xf32>, vector<64x256xf32>, vector<64x256xf32> -> vector<64x256xf32>
    %52 = arith.addf %44, %51 : vector<64x256xf32>
    %c241_i32 = arith.constant 241 : i32
    %53 = tpu.dynamic_rotate %1 by %c241_i32 dim 1 : vector<64x256xf32>, i32 -> vector<64x256xf32>
    %c6 = arith.constant 6 : index
    %c0_38 = arith.constant 0 : index
    %54 = vector.load %arg6[%c6, %c0_38] : memref<9x256xf32, #tpu.memory_space<vmem>>, vector<1x256xf32>
    %55 = vector.broadcast %54 : vector<1x256xf32> to vector<64x256xf32>
    %56 = arith.mulf %53, %55 : vector<64x256xf32>
    %c6_39 = arith.constant 6 : index
    %c0_40 = arith.constant 0 : index
    %c0_41 = arith.constant 0 : index
    %57 = vector.load %arg2[%c6_39, %c0_40, %c0_41] : memref<9x64x64xf32, #tpu.memory_space<vmem>>, vector<1x64x64xf32>
    %58 = vector.shape_cast %57 : vector<1x64x64xf32> to vector<64x64xf32>
    %cst_42 = arith.constant dense<0.000000e+00> : vector<64x256xf32>
    %59 = tpu.matmul %58, %56, %cst_42 {dimension_numbers = #tpu.dot_dimension_numbers<[1], [0], [0], [1], [0, 0, 1, 1], [], []>} : vector<64x64xf32>, vector<64x256xf32>, vector<64x256xf32> -> vector<64x256xf32>
    %60 = arith.addf %52, %59 : vector<64x256xf32>
    %c240_i32 = arith.constant 240 : i32
    %61 = tpu.dynamic_rotate %1 by %c240_i32 dim 1 : vector<64x256xf32>, i32 -> vector<64x256xf32>
    %c7 = arith.constant 7 : index
    %c0_43 = arith.constant 0 : index
    %62 = vector.load %arg6[%c7, %c0_43] : memref<9x256xf32, #tpu.memory_space<vmem>>, vector<1x256xf32>
    %63 = vector.broadcast %62 : vector<1x256xf32> to vector<64x256xf32>
    %64 = arith.mulf %61, %63 : vector<64x256xf32>
    %c7_44 = arith.constant 7 : index
    %c0_45 = arith.constant 0 : index
    %c0_46 = arith.constant 0 : index
    %65 = vector.load %arg2[%c7_44, %c0_45, %c0_46] : memref<9x64x64xf32, #tpu.memory_space<vmem>>, vector<1x64x64xf32>
    %66 = vector.shape_cast %65 : vector<1x64x64xf32> to vector<64x64xf32>
    %cst_47 = arith.constant dense<0.000000e+00> : vector<64x256xf32>
    %67 = tpu.matmul %66, %64, %cst_47 {dimension_numbers = #tpu.dot_dimension_numbers<[1], [0], [0], [1], [0, 0, 1, 1], [], []>} : vector<64x64xf32>, vector<64x256xf32>, vector<64x256xf32> -> vector<64x256xf32>
    %68 = arith.addf %60, %67 : vector<64x256xf32>
    %c239_i32 = arith.constant 239 : i32
    %69 = tpu.dynamic_rotate %1 by %c239_i32 dim 1 : vector<64x256xf32>, i32 -> vector<64x256xf32>
    %c8 = arith.constant 8 : index
    %c0_48 = arith.constant 0 : index
    %70 = vector.load %arg6[%c8, %c0_48] : memref<9x256xf32, #tpu.memory_space<vmem>>, vector<1x256xf32>
    %71 = vector.broadcast %70 : vector<1x256xf32> to vector<64x256xf32>
    %72 = arith.mulf %69, %71 : vector<64x256xf32>
    %c8_49 = arith.constant 8 : index
    %c0_50 = arith.constant 0 : index
    %c0_51 = arith.constant 0 : index
    %73 = vector.load %arg2[%c8_49, %c0_50, %c0_51] : memref<9x64x64xf32, #tpu.memory_space<vmem>>, vector<1x64x64xf32>
    %74 = vector.shape_cast %73 : vector<1x64x64xf32> to vector<64x64xf32>
    %cst_52 = arith.constant dense<0.000000e+00> : vector<64x256xf32>
    %75 = tpu.matmul %74, %72, %cst_52 {dimension_numbers = #tpu.dot_dimension_numbers<[1], [0], [0], [1], [0, 0, 1, 1], [], []>} : vector<64x64xf32>, vector<64x256xf32>, vector<64x256xf32> -> vector<64x256xf32>
    %76 = arith.addf %68, %75 : vector<64x256xf32>
    %77 = vector.broadcast %2 : vector<64x1xf32> to vector<64x256xf32>
    %78 = arith.addf %76, %77 : vector<64x256xf32>
    %cst_53 = arith.constant 0.000000e+00 : f32
    %79 = vector.broadcast %cst_53 : f32 to vector<64x256xf32>
    %80 = arith.subf %79, %78 : vector<64x256xf32>
    %81 = math.exp %80 : vector<64x256xf32>
    %cst_54 = arith.constant 1.000000e+00 : f32
    %82 = vector.broadcast %cst_54 : f32 to vector<64x256xf32>
    %83 = arith.addf %82, %81 : vector<64x256xf32>
    %cst_55 = arith.constant 1.000000e+00 : f32
    %84 = vector.broadcast %cst_55 : f32 to vector<64x256xf32>
    %85 = arith.divf %84, %83 : vector<64x256xf32>
    %86 = arith.mulf %78, %85 : vector<64x256xf32>
    %cst_56 = arith.constant 0.000000e+00 : f32
    %87 = vector.broadcast %cst_56 : f32 to vector<64x256xf32>
    %c17_i32_57 = arith.constant 17 : i32
    %88 = tpu.dynamic_rotate %86 by %c17_i32_57 dim 1 : vector<64x256xf32>, i32 -> vector<64x256xf32>
    %c0_58 = arith.constant 0 : index
    %c0_59 = arith.constant 0 : index
    %89 = vector.load %arg6[%c0_58, %c0_59] : memref<9x256xf32, #tpu.memory_space<vmem>>, vector<1x256xf32>
    %90 = vector.broadcast %89 : vector<1x256xf32> to vector<64x256xf32>
    %91 = arith.mulf %88, %90 : vector<64x256xf32>
    %c0_60 = arith.constant 0 : index
    %c0_61 = arith.constant 0 : index
    %c0_62 = arith.constant 0 : index
    %92 = vector.load %arg3[%c0_60, %c0_61, %c0_62] : memref<9x64x64xf32, #tpu.memory_space<vmem>>, vector<1x64x64xf32>
    %93 = vector.shape_cast %92 : vector<1x64x64xf32> to vector<64x64xf32>
    %cst_63 = arith.constant dense<0.000000e+00> : vector<64x256xf32>
    %94 = tpu.matmul %93, %91, %cst_63 {dimension_numbers = #tpu.dot_dimension_numbers<[1], [0], [0], [1], [0, 0, 1, 1], [], []>} : vector<64x64xf32>, vector<64x256xf32>, vector<64x256xf32> -> vector<64x256xf32>
    %95 = arith.addf %87, %94 : vector<64x256xf32>
    %c16_i32_64 = arith.constant 16 : i32
    %96 = tpu.dynamic_rotate %86 by %c16_i32_64 dim 1 : vector<64x256xf32>, i32 -> vector<64x256xf32>
    %c1_65 = arith.constant 1 : index
    %c0_66 = arith.constant 0 : index
    %97 = vector.load %arg6[%c1_65, %c0_66] : memref<9x256xf32, #tpu.memory_space<vmem>>, vector<1x256xf32>
    %98 = vector.broadcast %97 : vector<1x256xf32> to vector<64x256xf32>
    %99 = arith.mulf %96, %98 : vector<64x256xf32>
    %c1_67 = arith.constant 1 : index
    %c0_68 = arith.constant 0 : index
    %c0_69 = arith.constant 0 : index
    %100 = vector.load %arg3[%c1_67, %c0_68, %c0_69] : memref<9x64x64xf32, #tpu.memory_space<vmem>>, vector<1x64x64xf32>
    %101 = vector.shape_cast %100 : vector<1x64x64xf32> to vector<64x64xf32>
    %cst_70 = arith.constant dense<0.000000e+00> : vector<64x256xf32>
    %102 = tpu.matmul %101, %99, %cst_70 {dimension_numbers = #tpu.dot_dimension_numbers<[1], [0], [0], [1], [0, 0, 1, 1], [], []>} : vector<64x64xf32>, vector<64x256xf32>, vector<64x256xf32> -> vector<64x256xf32>
    %103 = arith.addf %95, %102 : vector<64x256xf32>
    %c15_i32_71 = arith.constant 15 : i32
    %104 = tpu.dynamic_rotate %86 by %c15_i32_71 dim 1 : vector<64x256xf32>, i32 -> vector<64x256xf32>
    %c2_72 = arith.constant 2 : index
    %c0_73 = arith.constant 0 : index
    %105 = vector.load %arg6[%c2_72, %c0_73] : memref<9x256xf32, #tpu.memory_space<vmem>>, vector<1x256xf32>
    %106 = vector.broadcast %105 : vector<1x256xf32> to vector<64x256xf32>
    %107 = arith.mulf %104, %106 : vector<64x256xf32>
    %c2_74 = arith.constant 2 : index
    %c0_75 = arith.constant 0 : index
    %c0_76 = arith.constant 0 : index
    %108 = vector.load %arg3[%c2_74, %c0_75, %c0_76] : memref<9x64x64xf32, #tpu.memory_space<vmem>>, vector<1x64x64xf32>
    %109 = vector.shape_cast %108 : vector<1x64x64xf32> to vector<64x64xf32>
    %cst_77 = arith.constant dense<0.000000e+00> : vector<64x256xf32>
    %110 = tpu.matmul %109, %107, %cst_77 {dimension_numbers = #tpu.dot_dimension_numbers<[1], [0], [0], [1], [0, 0, 1, 1], [], []>} : vector<64x64xf32>, vector<64x256xf32>, vector<64x256xf32> -> vector<64x256xf32>
    %111 = arith.addf %103, %110 : vector<64x256xf32>
    %c1_i32_78 = arith.constant 1 : i32
    %112 = tpu.dynamic_rotate %86 by %c1_i32_78 dim 1 : vector<64x256xf32>, i32 -> vector<64x256xf32>
    %c3_79 = arith.constant 3 : index
    %c0_80 = arith.constant 0 : index
    %113 = vector.load %arg6[%c3_79, %c0_80] : memref<9x256xf32, #tpu.memory_space<vmem>>, vector<1x256xf32>
    %114 = vector.broadcast %113 : vector<1x256xf32> to vector<64x256xf32>
    %115 = arith.mulf %112, %114 : vector<64x256xf32>
    %c3_81 = arith.constant 3 : index
    %c0_82 = arith.constant 0 : index
    %c0_83 = arith.constant 0 : index
    %116 = vector.load %arg3[%c3_81, %c0_82, %c0_83] : memref<9x64x64xf32, #tpu.memory_space<vmem>>, vector<1x64x64xf32>
    %117 = vector.shape_cast %116 : vector<1x64x64xf32> to vector<64x64xf32>
    %cst_84 = arith.constant dense<0.000000e+00> : vector<64x256xf32>
    %118 = tpu.matmul %117, %115, %cst_84 {dimension_numbers = #tpu.dot_dimension_numbers<[1], [0], [0], [1], [0, 0, 1, 1], [], []>} : vector<64x64xf32>, vector<64x256xf32>, vector<64x256xf32> -> vector<64x256xf32>
    %119 = arith.addf %111, %118 : vector<64x256xf32>
    %c4_85 = arith.constant 4 : index
    %c0_86 = arith.constant 0 : index
    %120 = vector.load %arg6[%c4_85, %c0_86] : memref<9x256xf32, #tpu.memory_space<vmem>>, vector<1x256xf32>
    %121 = vector.broadcast %120 : vector<1x256xf32> to vector<64x256xf32>
    %122 = arith.mulf %86, %121 : vector<64x256xf32>
    %c4_87 = arith.constant 4 : index
    %c0_88 = arith.constant 0 : index
    %c0_89 = arith.constant 0 : index
    %123 = vector.load %arg3[%c4_87, %c0_88, %c0_89] : memref<9x64x64xf32, #tpu.memory_space<vmem>>, vector<1x64x64xf32>
    %124 = vector.shape_cast %123 : vector<1x64x64xf32> to vector<64x64xf32>
    %cst_90 = arith.constant dense<0.000000e+00> : vector<64x256xf32>
    %125 = tpu.matmul %124, %122, %cst_90 {dimension_numbers = #tpu.dot_dimension_numbers<[1], [0], [0], [1], [0, 0, 1, 1], [], []>} : vector<64x64xf32>, vector<64x256xf32>, vector<64x256xf32> -> vector<64x256xf32>
    %126 = arith.addf %119, %125 : vector<64x256xf32>
    %c255_i32_91 = arith.constant 255 : i32
    %127 = tpu.dynamic_rotate %86 by %c255_i32_91 dim 1 : vector<64x256xf32>, i32 -> vector<64x256xf32>
    %c5_92 = arith.constant 5 : index
    %c0_93 = arith.constant 0 : index
    %128 = vector.load %arg6[%c5_92, %c0_93] : memref<9x256xf32, #tpu.memory_space<vmem>>, vector<1x256xf32>
    %129 = vector.broadcast %128 : vector<1x256xf32> to vector<64x256xf32>
    %130 = arith.mulf %127, %129 : vector<64x256xf32>
    %c5_94 = arith.constant 5 : index
    %c0_95 = arith.constant 0 : index
    %c0_96 = arith.constant 0 : index
    %131 = vector.load %arg3[%c5_94, %c0_95, %c0_96] : memref<9x64x64xf32, #tpu.memory_space<vmem>>, vector<1x64x64xf32>
    %132 = vector.shape_cast %131 : vector<1x64x64xf32> to vector<64x64xf32>
    %cst_97 = arith.constant dense<0.000000e+00> : vector<64x256xf32>
    %133 = tpu.matmul %132, %130, %cst_97 {dimension_numbers = #tpu.dot_dimension_numbers<[1], [0], [0], [1], [0, 0, 1, 1], [], []>} : vector<64x64xf32>, vector<64x256xf32>, vector<64x256xf32> -> vector<64x256xf32>
    %134 = arith.addf %126, %133 : vector<64x256xf32>
    %c241_i32_98 = arith.constant 241 : i32
    %135 = tpu.dynamic_rotate %86 by %c241_i32_98 dim 1 : vector<64x256xf32>, i32 -> vector<64x256xf32>
    %c6_99 = arith.constant 6 : index
    %c0_100 = arith.constant 0 : index
    %136 = vector.load %arg6[%c6_99, %c0_100] : memref<9x256xf32, #tpu.memory_space<vmem>>, vector<1x256xf32>
    %137 = vector.broadcast %136 : vector<1x256xf32> to vector<64x256xf32>
    %138 = arith.mulf %135, %137 : vector<64x256xf32>
    %c6_101 = arith.constant 6 : index
    %c0_102 = arith.constant 0 : index
    %c0_103 = arith.constant 0 : index
    %139 = vector.load %arg3[%c6_101, %c0_102, %c0_103] : memref<9x64x64xf32, #tpu.memory_space<vmem>>, vector<1x64x64xf32>
    %140 = vector.shape_cast %139 : vector<1x64x64xf32> to vector<64x64xf32>
    %cst_104 = arith.constant dense<0.000000e+00> : vector<64x256xf32>
    %141 = tpu.matmul %140, %138, %cst_104 {dimension_numbers = #tpu.dot_dimension_numbers<[1], [0], [0], [1], [0, 0, 1, 1], [], []>} : vector<64x64xf32>, vector<64x256xf32>, vector<64x256xf32> -> vector<64x256xf32>
    %142 = arith.addf %134, %141 : vector<64x256xf32>
    %c240_i32_105 = arith.constant 240 : i32
    %143 = tpu.dynamic_rotate %86 by %c240_i32_105 dim 1 : vector<64x256xf32>, i32 -> vector<64x256xf32>
    %c7_106 = arith.constant 7 : index
    %c0_107 = arith.constant 0 : index
    %144 = vector.load %arg6[%c7_106, %c0_107] : memref<9x256xf32, #tpu.memory_space<vmem>>, vector<1x256xf32>
    %145 = vector.broadcast %144 : vector<1x256xf32> to vector<64x256xf32>
    %146 = arith.mulf %143, %145 : vector<64x256xf32>
    %c7_108 = arith.constant 7 : index
    %c0_109 = arith.constant 0 : index
    %c0_110 = arith.constant 0 : index
    %147 = vector.load %arg3[%c7_108, %c0_109, %c0_110] : memref<9x64x64xf32, #tpu.memory_space<vmem>>, vector<1x64x64xf32>
    %148 = vector.shape_cast %147 : vector<1x64x64xf32> to vector<64x64xf32>
    %cst_111 = arith.constant dense<0.000000e+00> : vector<64x256xf32>
    %149 = tpu.matmul %148, %146, %cst_111 {dimension_numbers = #tpu.dot_dimension_numbers<[1], [0], [0], [1], [0, 0, 1, 1], [], []>} : vector<64x64xf32>, vector<64x256xf32>, vector<64x256xf32> -> vector<64x256xf32>
    %150 = arith.addf %142, %149 : vector<64x256xf32>
    %c239_i32_112 = arith.constant 239 : i32
    %151 = tpu.dynamic_rotate %86 by %c239_i32_112 dim 1 : vector<64x256xf32>, i32 -> vector<64x256xf32>
    %c8_113 = arith.constant 8 : index
    %c0_114 = arith.constant 0 : index
    %152 = vector.load %arg6[%c8_113, %c0_114] : memref<9x256xf32, #tpu.memory_space<vmem>>, vector<1x256xf32>
    %153 = vector.broadcast %152 : vector<1x256xf32> to vector<64x256xf32>
    %154 = arith.mulf %151, %153 : vector<64x256xf32>
    %c8_115 = arith.constant 8 : index
    %c0_116 = arith.constant 0 : index
    %c0_117 = arith.constant 0 : index
    %155 = vector.load %arg3[%c8_115, %c0_116, %c0_117] : memref<9x64x64xf32, #tpu.memory_space<vmem>>, vector<1x64x64xf32>
    %156 = vector.shape_cast %155 : vector<1x64x64xf32> to vector<64x64xf32>
    %cst_118 = arith.constant dense<0.000000e+00> : vector<64x256xf32>
    %157 = tpu.matmul %156, %154, %cst_118 {dimension_numbers = #tpu.dot_dimension_numbers<[1], [0], [0], [1], [0, 0, 1, 1], [], []>} : vector<64x64xf32>, vector<64x256xf32>, vector<64x256xf32> -> vector<64x256xf32>
    %158 = arith.addf %150, %157 : vector<64x256xf32>
    %159 = vector.broadcast %3 : vector<64x1xf32> to vector<64x256xf32>
    %160 = arith.addf %158, %159 : vector<64x256xf32>
    %cst_119 = arith.constant 0.000000e+00 : f32
    %161 = vector.broadcast %cst_119 : f32 to vector<64x256xf32>
    %162 = arith.subf %161, %160 : vector<64x256xf32>
    %163 = math.exp %162 : vector<64x256xf32>
    %cst_120 = arith.constant 1.000000e+00 : f32
    %164 = vector.broadcast %cst_120 : f32 to vector<64x256xf32>
    %165 = arith.addf %164, %163 : vector<64x256xf32>
    %cst_121 = arith.constant 1.000000e+00 : f32
    %166 = vector.broadcast %cst_121 : f32 to vector<64x256xf32>
    %167 = arith.divf %166, %165 : vector<64x256xf32>
    %168 = arith.mulf %160, %167 : vector<64x256xf32>
    %169 = arith.addf %1, %168 : vector<64x256xf32>
    %cst_122 = arith.constant 0.000000e+00 : f32
    %170 = vector.broadcast %cst_122 : f32 to vector<128x256xf32>
    %c17_i32_123 = arith.constant 17 : i32
    %171 = tpu.dynamic_rotate %169 by %c17_i32_123 dim 1 : vector<64x256xf32>, i32 -> vector<64x256xf32>
    %c0_124 = arith.constant 0 : index
    %c0_125 = arith.constant 0 : index
    %172 = vector.load %arg6[%c0_124, %c0_125] : memref<9x256xf32, #tpu.memory_space<vmem>>, vector<1x256xf32>
    %173 = vector.broadcast %172 : vector<1x256xf32> to vector<64x256xf32>
    %174 = arith.mulf %171, %173 : vector<64x256xf32>
    %c0_126 = arith.constant 0 : index
    %c0_127 = arith.constant 0 : index
    %c0_128 = arith.constant 0 : index
    %175 = vector.load %arg4[%c0_126, %c0_127, %c0_128] : memref<9x128x64xf32, #tpu.memory_space<vmem>>, vector<1x128x64xf32>
    %176 = vector.shape_cast %175 : vector<1x128x64xf32> to vector<128x64xf32>
    %cst_129 = arith.constant dense<0.000000e+00> : vector<128x256xf32>
    %177 = tpu.matmul %176, %174, %cst_129 {dimension_numbers = #tpu.dot_dimension_numbers<[1], [0], [0], [1], [0, 0, 1, 1], [], []>} : vector<128x64xf32>, vector<64x256xf32>, vector<128x256xf32> -> vector<128x256xf32>
    %178 = arith.addf %170, %177 : vector<128x256xf32>
    %c16_i32_130 = arith.constant 16 : i32
    %179 = tpu.dynamic_rotate %169 by %c16_i32_130 dim 1 : vector<64x256xf32>, i32 -> vector<64x256xf32>
    %c1_131 = arith.constant 1 : index
    %c0_132 = arith.constant 0 : index
    %180 = vector.load %arg6[%c1_131, %c0_132] : memref<9x256xf32, #tpu.memory_space<vmem>>, vector<1x256xf32>
    %181 = vector.broadcast %180 : vector<1x256xf32> to vector<64x256xf32>
    %182 = arith.mulf %179, %181 : vector<64x256xf32>
    %c1_133 = arith.constant 1 : index
    %c0_134 = arith.constant 0 : index
    %c0_135 = arith.constant 0 : index
    %183 = vector.load %arg4[%c1_133, %c0_134, %c0_135] : memref<9x128x64xf32, #tpu.memory_space<vmem>>, vector<1x128x64xf32>
    %184 = vector.shape_cast %183 : vector<1x128x64xf32> to vector<128x64xf32>
    %cst_136 = arith.constant dense<0.000000e+00> : vector<128x256xf32>
    %185 = tpu.matmul %184, %182, %cst_136 {dimension_numbers = #tpu.dot_dimension_numbers<[1], [0], [0], [1], [0, 0, 1, 1], [], []>} : vector<128x64xf32>, vector<64x256xf32>, vector<128x256xf32> -> vector<128x256xf32>
    %186 = arith.addf %178, %185 : vector<128x256xf32>
    %c15_i32_137 = arith.constant 15 : i32
    %187 = tpu.dynamic_rotate %169 by %c15_i32_137 dim 1 : vector<64x256xf32>, i32 -> vector<64x256xf32>
    %c2_138 = arith.constant 2 : index
    %c0_139 = arith.constant 0 : index
    %188 = vector.load %arg6[%c2_138, %c0_139] : memref<9x256xf32, #tpu.memory_space<vmem>>, vector<1x256xf32>
    %189 = vector.broadcast %188 : vector<1x256xf32> to vector<64x256xf32>
    %190 = arith.mulf %187, %189 : vector<64x256xf32>
    %c2_140 = arith.constant 2 : index
    %c0_141 = arith.constant 0 : index
    %c0_142 = arith.constant 0 : index
    %191 = vector.load %arg4[%c2_140, %c0_141, %c0_142] : memref<9x128x64xf32, #tpu.memory_space<vmem>>, vector<1x128x64xf32>
    %192 = vector.shape_cast %191 : vector<1x128x64xf32> to vector<128x64xf32>
    %cst_143 = arith.constant dense<0.000000e+00> : vector<128x256xf32>
    %193 = tpu.matmul %192, %190, %cst_143 {dimension_numbers = #tpu.dot_dimension_numbers<[1], [0], [0], [1], [0, 0, 1, 1], [], []>} : vector<128x64xf32>, vector<64x256xf32>, vector<128x256xf32> -> vector<128x256xf32>
    %194 = arith.addf %186, %193 : vector<128x256xf32>
    %c1_i32_144 = arith.constant 1 : i32
    %195 = tpu.dynamic_rotate %169 by %c1_i32_144 dim 1 : vector<64x256xf32>, i32 -> vector<64x256xf32>
    %c3_145 = arith.constant 3 : index
    %c0_146 = arith.constant 0 : index
    %196 = vector.load %arg6[%c3_145, %c0_146] : memref<9x256xf32, #tpu.memory_space<vmem>>, vector<1x256xf32>
    %197 = vector.broadcast %196 : vector<1x256xf32> to vector<64x256xf32>
    %198 = arith.mulf %195, %197 : vector<64x256xf32>
    %c3_147 = arith.constant 3 : index
    %c0_148 = arith.constant 0 : index
    %c0_149 = arith.constant 0 : index
    %199 = vector.load %arg4[%c3_147, %c0_148, %c0_149] : memref<9x128x64xf32, #tpu.memory_space<vmem>>, vector<1x128x64xf32>
    %200 = vector.shape_cast %199 : vector<1x128x64xf32> to vector<128x64xf32>
    %cst_150 = arith.constant dense<0.000000e+00> : vector<128x256xf32>
    %201 = tpu.matmul %200, %198, %cst_150 {dimension_numbers = #tpu.dot_dimension_numbers<[1], [0], [0], [1], [0, 0, 1, 1], [], []>} : vector<128x64xf32>, vector<64x256xf32>, vector<128x256xf32> -> vector<128x256xf32>
    %202 = arith.addf %194, %201 : vector<128x256xf32>
    %c4_151 = arith.constant 4 : index
    %c0_152 = arith.constant 0 : index
    %203 = vector.load %arg6[%c4_151, %c0_152] : memref<9x256xf32, #tpu.memory_space<vmem>>, vector<1x256xf32>
    %204 = vector.broadcast %203 : vector<1x256xf32> to vector<64x256xf32>
    %205 = arith.mulf %169, %204 : vector<64x256xf32>
    %c4_153 = arith.constant 4 : index
    %c0_154 = arith.constant 0 : index
    %c0_155 = arith.constant 0 : index
    %206 = vector.load %arg4[%c4_153, %c0_154, %c0_155] : memref<9x128x64xf32, #tpu.memory_space<vmem>>, vector<1x128x64xf32>
    %207 = vector.shape_cast %206 : vector<1x128x64xf32> to vector<128x64xf32>
    %cst_156 = arith.constant dense<0.000000e+00> : vector<128x256xf32>
    %208 = tpu.matmul %207, %205, %cst_156 {dimension_numbers = #tpu.dot_dimension_numbers<[1], [0], [0], [1], [0, 0, 1, 1], [], []>} : vector<128x64xf32>, vector<64x256xf32>, vector<128x256xf32> -> vector<128x256xf32>
    %209 = arith.addf %202, %208 : vector<128x256xf32>
    %c255_i32_157 = arith.constant 255 : i32
    %210 = tpu.dynamic_rotate %169 by %c255_i32_157 dim 1 : vector<64x256xf32>, i32 -> vector<64x256xf32>
    %c5_158 = arith.constant 5 : index
    %c0_159 = arith.constant 0 : index
    %211 = vector.load %arg6[%c5_158, %c0_159] : memref<9x256xf32, #tpu.memory_space<vmem>>, vector<1x256xf32>
    %212 = vector.broadcast %211 : vector<1x256xf32> to vector<64x256xf32>
    %213 = arith.mulf %210, %212 : vector<64x256xf32>
    %c5_160 = arith.constant 5 : index
    %c0_161 = arith.constant 0 : index
    %c0_162 = arith.constant 0 : index
    %214 = vector.load %arg4[%c5_160, %c0_161, %c0_162] : memref<9x128x64xf32, #tpu.memory_space<vmem>>, vector<1x128x64xf32>
    %215 = vector.shape_cast %214 : vector<1x128x64xf32> to vector<128x64xf32>
    %cst_163 = arith.constant dense<0.000000e+00> : vector<128x256xf32>
    %216 = tpu.matmul %215, %213, %cst_163 {dimension_numbers = #tpu.dot_dimension_numbers<[1], [0], [0], [1], [0, 0, 1, 1], [], []>} : vector<128x64xf32>, vector<64x256xf32>, vector<128x256xf32> -> vector<128x256xf32>
    %217 = arith.addf %209, %216 : vector<128x256xf32>
    %c241_i32_164 = arith.constant 241 : i32
    %218 = tpu.dynamic_rotate %169 by %c241_i32_164 dim 1 : vector<64x256xf32>, i32 -> vector<64x256xf32>
    %c6_165 = arith.constant 6 : index
    %c0_166 = arith.constant 0 : index
    %219 = vector.load %arg6[%c6_165, %c0_166] : memref<9x256xf32, #tpu.memory_space<vmem>>, vector<1x256xf32>
    %220 = vector.broadcast %219 : vector<1x256xf32> to vector<64x256xf32>
    %221 = arith.mulf %218, %220 : vector<64x256xf32>
    %c6_167 = arith.constant 6 : index
    %c0_168 = arith.constant 0 : index
    %c0_169 = arith.constant 0 : index
    %222 = vector.load %arg4[%c6_167, %c0_168, %c0_169] : memref<9x128x64xf32, #tpu.memory_space<vmem>>, vector<1x128x64xf32>
    %223 = vector.shape_cast %222 : vector<1x128x64xf32> to vector<128x64xf32>
    %cst_170 = arith.constant dense<0.000000e+00> : vector<128x256xf32>
    %224 = tpu.matmul %223, %221, %cst_170 {dimension_numbers = #tpu.dot_dimension_numbers<[1], [0], [0], [1], [0, 0, 1, 1], [], []>} : vector<128x64xf32>, vector<64x256xf32>, vector<128x256xf32> -> vector<128x256xf32>
    %225 = arith.addf %217, %224 : vector<128x256xf32>
    %c240_i32_171 = arith.constant 240 : i32
    %226 = tpu.dynamic_rotate %169 by %c240_i32_171 dim 1 : vector<64x256xf32>, i32 -> vector<64x256xf32>
    %c7_172 = arith.constant 7 : index
    %c0_173 = arith.constant 0 : index
    %227 = vector.load %arg6[%c7_172, %c0_173] : memref<9x256xf32, #tpu.memory_space<vmem>>, vector<1x256xf32>
    %228 = vector.broadcast %227 : vector<1x256xf32> to vector<64x256xf32>
    %229 = arith.mulf %226, %228 : vector<64x256xf32>
    %c7_174 = arith.constant 7 : index
    %c0_175 = arith.constant 0 : index
    %c0_176 = arith.constant 0 : index
    %230 = vector.load %arg4[%c7_174, %c0_175, %c0_176] : memref<9x128x64xf32, #tpu.memory_space<vmem>>, vector<1x128x64xf32>
    %231 = vector.shape_cast %230 : vector<1x128x64xf32> to vector<128x64xf32>
    %cst_177 = arith.constant dense<0.000000e+00> : vector<128x256xf32>
    %232 = tpu.matmul %231, %229, %cst_177 {dimension_numbers = #tpu.dot_dimension_numbers<[1], [0], [0], [1], [0, 0, 1, 1], [], []>} : vector<128x64xf32>, vector<64x256xf32>, vector<128x256xf32> -> vector<128x256xf32>
    %233 = arith.addf %225, %232 : vector<128x256xf32>
    %c239_i32_178 = arith.constant 239 : i32
    %234 = tpu.dynamic_rotate %169 by %c239_i32_178 dim 1 : vector<64x256xf32>, i32 -> vector<64x256xf32>
    %c8_179 = arith.constant 8 : index
    %c0_180 = arith.constant 0 : index
    %235 = vector.load %arg6[%c8_179, %c0_180] : memref<9x256xf32, #tpu.memory_space<vmem>>, vector<1x256xf32>
    %236 = vector.broadcast %235 : vector<1x256xf32> to vector<64x256xf32>
    %237 = arith.mulf %234, %236 : vector<64x256xf32>
    %c8_181 = arith.constant 8 : index
    %c0_182 = arith.constant 0 : index
    %c0_183 = arith.constant 0 : index
    %238 = vector.load %arg4[%c8_181, %c0_182, %c0_183] : memref<9x128x64xf32, #tpu.memory_space<vmem>>, vector<1x128x64xf32>
    %239 = vector.shape_cast %238 : vector<1x128x64xf32> to vector<128x64xf32>
    %cst_184 = arith.constant dense<0.000000e+00> : vector<128x256xf32>
    %240 = tpu.matmul %239, %237, %cst_184 {dimension_numbers = #tpu.dot_dimension_numbers<[1], [0], [0], [1], [0, 0, 1, 1], [], []>} : vector<128x64xf32>, vector<64x256xf32>, vector<128x256xf32> -> vector<128x256xf32>
    %241 = arith.addf %233, %240 : vector<128x256xf32>
    %242 = vector.broadcast %4 : vector<128x1xf32> to vector<128x256xf32>
    %243 = arith.addf %241, %242 : vector<128x256xf32>
    %cst_185 = arith.constant 0.000000e+00 : f32
    %244 = vector.broadcast %cst_185 : f32 to vector<128x256xf32>
    %245 = arith.subf %244, %243 : vector<128x256xf32>
    %246 = math.exp %245 : vector<128x256xf32>
    %cst_186 = arith.constant 1.000000e+00 : f32
    %247 = vector.broadcast %cst_186 : f32 to vector<128x256xf32>
    %248 = arith.addf %247, %246 : vector<128x256xf32>
    %cst_187 = arith.constant 1.000000e+00 : f32
    %249 = vector.broadcast %cst_187 : f32 to vector<128x256xf32>
    %250 = arith.divf %249, %248 : vector<128x256xf32>
    %251 = arith.mulf %243, %250 : vector<128x256xf32>
    %c0_188 = arith.constant 0 : index
    %c0_189 = arith.constant 0 : index
    %252 = vector.load %arg7[%c0_188, %c0_189] : memref<256x64xf32, #tpu.memory_space<vmem>>, vector<256x64xf32>
    %cst_190 = arith.constant dense<0.000000e+00> : vector<128x64xf32>
    %253 = tpu.matmul %251, %252, %cst_190 {dimension_numbers = #tpu.dot_dimension_numbers<[1], [0], [0], [1], [0, 0, 1, 1], [], []>} : vector<128x256xf32>, vector<256x64xf32>, vector<128x64xf32> -> vector<128x64xf32>
    %c0_191 = arith.constant 0 : index
    %c0_192 = arith.constant 0 : index
    %c0_193 = arith.constant 0 : index
    %254 = vector.load %arg8[%c0_191, %c0_192, %c0_193] : memref<1x128x64xf32, #tpu.memory_space<vmem>>, vector<1x128x64xf32>
    %255 = vector.shape_cast %254 : vector<1x128x64xf32> to vector<128x64xf32>
    %256 = vector.shape_cast %253 : vector<128x64xf32> to vector<1x128x64xf32>
    tpu.vector_store %arg8[%c0_191, %c0_192, %c0_193], %256 {strides = array<i32>} : memref<1x128x64xf32, #tpu.memory_space<vmem>>, vector<1x128x64xf32>,
    return
  }
  func.func @transform_0(%arg0: i32) -> (i32, i32, i32) {
    %c0_i32 = arith.constant 0 : i32
    %c0_i32_0 = arith.constant 0 : i32
    %c0_i32_1 = arith.constant 0 : i32
    return %arg0, %c0_i32, %c0_i32_0 : i32, i32, i32
  }
  func.func @transform_1(%arg0: i32) -> (i32, i32, i32) {
    %c0_i32 = arith.constant 0 : i32
    %c0_i32_0 = arith.constant 0 : i32
    %c0_i32_1 = arith.constant 0 : i32
    %c0_i32_2 = arith.constant 0 : i32
    return %c0_i32, %c0_i32_0, %c0_i32_1 : i32, i32, i32
  }
  func.func @transform_2(%arg0: i32) -> (i32, i32, i32) {
    %c0_i32 = arith.constant 0 : i32
    %c0_i32_0 = arith.constant 0 : i32
    %c0_i32_1 = arith.constant 0 : i32
    %c0_i32_2 = arith.constant 0 : i32
    return %c0_i32, %c0_i32_0, %c0_i32_1 : i32, i32, i32
  }
  func.func @transform_3(%arg0: i32) -> (i32, i32, i32) {
    %c0_i32 = arith.constant 0 : i32
    %c0_i32_0 = arith.constant 0 : i32
    %c0_i32_1 = arith.constant 0 : i32
    %c0_i32_2 = arith.constant 0 : i32
    return %c0_i32, %c0_i32_0, %c0_i32_1 : i32, i32, i32
  }
  func.func @transform_4(%arg0: i32) -> (i32, i32) {
    %c0_i32 = arith.constant 0 : i32
    %c0_i32_0 = arith.constant 0 : i32
    %c0_i32_1 = arith.constant 0 : i32
    return %c0_i32, %c0_i32_0 : i32, i32
  }
  func.func @transform_5(%arg0: i32) -> (i32, i32) {
    %c0_i32 = arith.constant 0 : i32
    %c0_i32_0 = arith.constant 0 : i32
    %c0_i32_1 = arith.constant 0 : i32
    return %c0_i32, %c0_i32_0 : i32, i32
  }
  func.func @transform_6(%arg0: i32) -> (i32, i32) {
    %c0_i32 = arith.constant 0 : i32
    %c0_i32_0 = arith.constant 0 : i32
    %c0_i32_1 = arith.constant 0 : i32
    return %c0_i32, %c0_i32_0 : i32, i32
  }
  func.func @transform_7(%arg0: i32) -> (i32, i32, i32) {
    %c0_i32 = arith.constant 0 : i32
    %c0_i32_0 = arith.constant 0 : i32
    %c0_i32_1 = arith.constant 0 : i32
    return %arg0, %c0_i32, %c0_i32_0 : i32, i32, i32
  }
}

</mosaic_0001>

<bundles_post_ra>
// kernel: tpu_custom_call.1
= control target key start
LH: loop header
LB: loop body
LE: loop exit
PB: predicated region body
PF: predicated region fallthrough
CT: control target
= control target key end

     0   :  { %6 = vsyncpa [#allocation3], 0  ;;  %s128_s0 = inlined_call_operand.hbm [shape: f32[8,128], index: 0, kind: input, shape index: {}]   ;;  %s129_s1 = inlined_call_operand.hbm [shape: f32[8,128], index: 1, kind: output, shape index: {}]  }
   0x1   :  { %7 = vsyncpa [#allocation4], 0  ;;  %s91_s6 = smov [#allocation2]   ;;  %s43_s10 = scalar_lea.hbm %s128_s0, 128 }
   0x2   :  { %s14_s7 = sshll.u32 %s91_s6, 4  ;;  %p44_p0 = scmp.ne.s32.totalorder %s128_s0, %s43_s10  ;;  %s15_s7 = int_to_ptr.vmem [resolvable:$true] %s14_s7 }
   0x3   :  { %p47_p1 = scmp.lt.u32.totalorder %s43_s10, %s128_s0 }
   0x5   :  { %p49_p2 = pnand %p47_p1, %p44_p0 }
   0x7   :  { %52 = shalt.err (!%p49_p2)
}
   0x8   :  { %s53_s15 = scalar_lea.vmem %s15_s7, 128  ;;  %p58_p4 = scmp.lt.s32.totalorder %s15_s7, %s15_s7 }
   0x9   :  { %p54_p3 = scmp.ne.s32.totalorder %s15_s7, %s53_s15  ;;  %p59_p5 = scmp.lt.s32.totalorder %s53_s15, %s53_s15 }
   0xb   :  { %p60_p6 = por %p59_p5, %p58_p4 }
   0xd   :  { %p61_p7 = pnand %p60_p6, %p54_p3 }
   0xf   :  { %64 = shalt.err (!%p61_p7)
}
  0x10   :  { %17 = dma.hbm_to_vmem [thread:$0]  %s128_s0, 128, %s15_s7, [#allocation3]  }
  0x11   :  { %87 = dma.done.wait [#allocation3], 128  }
  0x12   :  { %88 = vsyncadd [#allocation3], 4294967168  ;;  %v21_v0 = vld [vmem:[#allocation2] sm:$0xff]  ;;  %s92_s18 = smov 1   ;;  %s93_s19 = smov [#allocation5]  }
  0x13   :  { %22 = vrot.lane.b32.xlu0 %v21_v0, %s92_s18  ;;  %s31_s20 = sshll.u32 %s93_s19, 4  ;;  %s32_s20 = int_to_ptr.vmem [resolvable:$true] %s31_s20 }
  0x14   :  { %s65_s21 = scalar_lea.vmem %s32_s20, 128  ;;  %p70_p9 = scmp.lt.s32.totalorder %s32_s20, %s32_s20 }
  0x15   :  { %p66_p8 = scmp.ne.s32.totalorder %s32_s20, %s65_s21  ;;  %p71_p10 = scmp.lt.s32.totalorder %s65_s21, %s65_s21 }
  0x17   :  { %p72_p11 = por %p71_p10, %p70_p9 }
  0x19   :  { %p73_p12 = pnand %p72_p11, %p66_p8 }
  0x85   :  { %v23_v1 = vpop.permute.xlu0 %22 }
  0x86   :  { %24 = vst [vmem:[#allocation5] sm:$0xff] %v23_v1 }
  0x87   :  { %76 = shalt.err (!%p73_p12)
}
  0x88   :  { %s77_s0 = scalar_lea.hbm %s129_s1, 128 }
  0x89   :  { %p78_p13 = scmp.ne.s32.totalorder %s129_s1, %s77_s0  ;;  %p81_p0 = scmp.lt.u32.totalorder %s77_s0, %s129_s1 }
  0x8b   :  { %p83_p1 = pnand %p81_p0, %p78_p13 }
  0x8d   :  { %86 = shalt.err (!%p83_p1)
}
  0x8e   :  { %34 = dma.vmem_to_hbm [thread:$0]  %s32_s20, 128, %s129_s1, [#allocation4]  }
  0x8f   :  { %89 = dma.done.wait [#allocation4], 128  }
  0x90   :  { %90 = vsyncadd [#allocation4], 4294967168 }
  0x91   :  { %38 = vsyncpa [#allocation3], 1 }
  0x92   :  { %39 = vsyncpa [#allocation4], 1 }

// kernel: cond_res_block_no_latent_forward.1
= control target key start
LH: loop header
LB: loop body
LE: loop exit
PB: predicated region body
PF: predicated region fallthrough
CT: control target
= control target key end

     0   :  { %s10046_s24 = smov 0   ;;  %s14444_s0 = inlined_call_operand.vmem [shape: f32[2,64,256], index: 0, kind: input, shape index: {}]   ;;  %s14445_s1 = inlined_call_operand.vmem [shape: f32[9,64,64], index: 1, kind: input, shape index: {}]   ;;  %s14446_s2 = inlined_call_operand.vmem [shape: f32[9,64,64], index: 2, kind: input, shape index: {}]   ;;  %s14447_s3 = inlined_call_operand.vmem [shape: f32[9,128,64], index: 3, kind: input, shape index: {}]   ;;  %s14448_s4 = inlined_call_operand.vmem [shape: f32[128,2], index: 4, kind: input, shape index: {}]   ;;  %s14449_s5 = inlined_call_operand.vmem [shape: f32[9,256], index: 5, kind: input, shape index: {}]   ;;  %s14450_s6 = inlined_call_operand.vmem [shape: f32[256,64], index: 6, kind: input, shape index: {}]   ;;  %s14451_s7 = inlined_call_operand.vmem [shape: f32[2,128,64], index: 7, kind: output, shape index: {}]  }
   0x1 LB: > { %s8049_s25 = sadd.s32 4294967295, %s9993_s24   ;;  %p8053_p0 = scmp.ge.s32.totalorder %s9993_s24, 1  ;;  %s9993_s24 = sphi %s10046_s24, %s17_s24  }
   0x2   : > { %p237_p1 = scmp.lt.s32.totalorder %s9993_s24, 3 }
   0x4   : > { %p238_p2 = pnand %p8053_p0, %p237_p1 }
   0x5   : > { %p269_p3 = scmp.lt.s32.totalorder (!%p238_p2), %s8049_s25, 1  ;;  %s9995_s30 = smov (!%p238_p2), 16   ;;  %v9996_v16 = vmov (!%p238_p2), 0.0   ;;  %v343_v17 = vlaneseq (!%p238_p2)  ;;  %v8058_v21 = vld [vmem:[%s14449_s5 + $0x1] ss:$8 sm:$0x3] (!%p238_p2) }
   0x6   : > { %241 = sbr.rel (%p238_p2) target bundleno = 2242 (0x8c2), region = 48  ;;  %574 = vmatprep.mubr.f32.mxu0 (!%p238_p2), %v9996_v16  ;;  %2792 = vmatprep.mubr.f32.mxu1 (!%p238_p2), %v9996_v16  ;;  %s9997_s8 = smov (!%p238_p2), 17   ;;  %vm485_vm2 = vcmask (!%p238_p2), 523264  }
   0x7   : > { %s9998_s9 = smov (!%p238_p2), 15   ;;  %s9999_s10 = smov (!%p238_p2), 1   ;;  %v365_v18 = vshrl.u32 (!%p238_p2), %v343_v17, 7  ;;  %v10226_v19 = vand.u32 (!%p238_p2), 127, %v343_v17 }
   0x8   : > { %s10000_s13 = smov (!%p238_p2), 127   ;;  %s10001_s27 = smov (!%p238_p2), 113  }
   0x9   : > { %v10228_v20 = vsub.s32 (!%p238_p2), 1, %v365_v18  ;;  %v10237_v22 = vsub.s32 (!%p238_p2), 0, %v365_v18  ;;  %vm430_vm0 = vcmp.lt.s32.totalorder (!%p238_p2), %v10226_v19, 16  ;;  %vm345_vm1 = vcmp.lt.s32.totalorder (!%p238_p2), %v10226_v19, 17  ;;  %s10002_s16 = smov (!%p238_p2), 112   ;;  %s10003_s23 = smov (!%p238_p2), 111  }
   0xa   : > { %vm792_vm3 = vcmp.lt.s32.totalorder (!%p238_p2), %v10226_v19, 15  ;;  %vm1032_vm4 = vcmp.lt.s32.totalorder (!%p238_p2), %v10226_v19, 1  ;;  %vm1463_vm5 = vcmp.lt.s32.totalorder (!%p238_p2), %v10226_v19, 127  ;;  %vm1703_vm6 = vcmp.lt.s32.totalorder (!%p238_p2), %v10226_v19, 113 }
   0xb   : > { %v10241_v25 = vrot.slane (!%p238_p2), %v8058_v21, %v10228_v20  ;;  %v10250_v27 = vrot.slane (!%p238_p2), %v8058_v21, %v10237_v22  ;;  %vm1943_vm7 = vcmp.lt.s32.totalorder (!%p238_p2), %v10226_v19, 112  ;;  %vm2183_vm8 = vcmp.lt.s32.totalorder (!%p238_p2), %v10226_v19, 111  ;;  %v7801_v19 = vld [vmem:[%s14450_s6] sm:$0xff] (!%p238_p2) }
   0xd   : > { %s14453_s25 = smov (!%p269_p3, %s8049_s25), 1 }
   0xe   : > { %s8612_s26 = sshll.u32 %s14453_s25, 7 }
   0xf   : > { %s10062_s29 = scalar_lea.vmem %s14444_s0, %s8612_s26 }
  0x10   : > { %v10065_v0 = vld [vmem:[%s10062_s29 + $0x8] sm:$0xff]  ;;  %v10068_v1 = vld [vmem:[%s10062_s29] sm:$0xff]  ;;  %v10075_v2 = vld [vmem:[%s10062_s29 + $0x18] sm:$0xff] }
  0x11   : > { %414 = vrot.lane.b32.xlu1 %v10065_v0, %s9995_s30  ;;  %398 = vrot.lane.b32.xlu0 %v10068_v1, %s9995_s30  ;;  %v10078_v3 = vld [vmem:[%s10062_s29 + $0x10] sm:$0xff]  ;;  %v10088_v5 = vld [vmem:[%s10062_s29 + $0x20] sm:$0xff] }
  0x12   : > { %v10085_v4 = vld [vmem:[%s10062_s29 + $0x30] sm:$0xff]  ;;  %v10095_v6 = vld [vmem:[%s10062_s29 + $0x38] sm:$0xff]  ;;  %v10098_v7 = vld [vmem:[%s10062_s29 + $0x28] sm:$0xff] }
  0x13   : > { %v10105_v8 = vld [vmem:[%s10062_s29 + $0x50] sm:$0xff]  ;;  %v10108_v9 = vld [vmem:[%s10062_s29 + $0x40] sm:$0xff]  ;;  %v10115_v10 = vld [vmem:[%s10062_s29 + $0x58] sm:$0xff] }
  0x14   : > { %v10118_v11 = vld [vmem:[%s10062_s29 + $0x48] sm:$0xff]  ;;  %v10125_v12 = vld [vmem:[%s10062_s29 + $0x70] sm:$0xff]  ;;  %v10128_v13 = vld [vmem:[%s10062_s29 + $0x60] sm:$0xff] }
  0x15   : > { %416 = vrot.lane.b32.xlu1 %v10075_v2, %s9995_s30  ;;  %400 = vrot.lane.b32.xlu0 %v10078_v3, %s9995_s30  ;;  %v10135_v14 = vld [vmem:[%s10062_s29 + $0x78] sm:$0xff]  ;;  %v10138_v15 = vld [vmem:[%s10062_s29 + $0x68] sm:$0xff] }
  0x19   : > { %404 = vrot.lane.b32.xlu1 %v10085_v4, %s9995_s30  ;;  %402 = vrot.lane.b32.xlu0 %v10088_v5, %s9995_s30 }
  0x1d   : > { %420 = vrot.lane.b32.xlu1 %v10095_v6, %s9995_s30  ;;  %418 = vrot.lane.b32.xlu0 %v10098_v7, %s9995_s30 }
  0x21   : > { %408 = vrot.lane.b32.xlu1 %v10105_v8, %s9995_s30  ;;  %406 = vrot.lane.b32.xlu0 %v10108_v9, %s9995_s30 }
  0x25   : > { %424 = vrot.lane.b32.xlu1 %v10115_v10, %s9995_s30  ;;  %422 = vrot.lane.b32.xlu0 %v10118_v11, %s9995_s30 }
  0x29   : > { %412 = vrot.lane.b32.xlu1 %v10125_v12, %s9995_s30  ;;  %410 = vrot.lane.b32.xlu0 %v10128_v13, %s9995_s30 }
  0x2d   : > { %428 = vrot.lane.b32.xlu1 %v10135_v14, %s9995_s30  ;;  %426 = vrot.lane.b32.xlu0 %v10138_v15, %s9995_s30 }
  0x31   : > { %313 = vrot.lane.b32.xlu1 %v10078_v3, %s9997_s8  ;;  %311 = vrot.lane.b32.xlu0 %v10068_v1, %s9997_s8 }
  0x35   : > { %329 = vrot.lane.b32.xlu1 %v10075_v2, %s9997_s8  ;;  %327 = vrot.lane.b32.xlu0 %v10065_v0, %s9997_s8 }
  0x39   : > { %317 = vrot.lane.b32.xlu1 %v10085_v4, %s9997_s8  ;;  %315 = vrot.lane.b32.xlu0 %v10088_v5, %s9997_s8 }
  0x3d   : > { %333 = vrot.lane.b32.xlu1 %v10095_v6, %s9997_s8  ;;  %331 = vrot.lane.b32.xlu0 %v10098_v7, %s9997_s8 }
  0x41   : > { %321 = vrot.lane.b32.xlu1 %v10105_v8, %s9997_s8  ;;  %319 = vrot.lane.b32.xlu0 %v10108_v9, %s9997_s8 }
  0x45   : > { %337 = vrot.lane.b32.xlu1 %v10115_v10, %s9997_s8  ;;  %335 = vrot.lane.b32.xlu0 %v10118_v11, %s9997_s8 }
  0x49   : > { %325 = vrot.lane.b32.xlu1 %v10125_v12, %s9997_s8  ;;  %323 = vrot.lane.b32.xlu0 %v10128_v13, %s9997_s8 }
  0x4d   : > { %341 = vrot.lane.b32.xlu1 %v10135_v14, %s9997_s8  ;;  %339 = vrot.lane.b32.xlu0 %v10138_v15, %s9997_s8 }
  0x51   : > { %762 = vrot.lane.b32.xlu1 %v10078_v3, %s9998_s9  ;;  %760 = vrot.lane.b32.xlu0 %v10068_v1, %s9998_s9 }
  0x55   : > { %778 = vrot.lane.b32.xlu1 %v10075_v2, %s9998_s9  ;;  %776 = vrot.lane.b32.xlu0 %v10065_v0, %s9998_s9 }
  0x59   : > { %766 = vrot.lane.b32.xlu1 %v10085_v4, %s9998_s9  ;;  %764 = vrot.lane.b32.xlu0 %v10088_v5, %s9998_s9 }
  0x5d   : > { %782 = vrot.lane.b32.xlu1 %v10095_v6, %s9998_s9  ;;  %780 = vrot.lane.b32.xlu0 %v10098_v7, %s9998_s9 }
  0x61   : > { %770 = vrot.lane.b32.xlu1 %v10105_v8, %s9998_s9  ;;  %768 = vrot.lane.b32.xlu0 %v10108_v9, %s9998_s9 }
  0x65   : > { %786 = vrot.lane.b32.xlu1 %v10115_v10, %s9998_s9  ;;  %784 = vrot.lane.b32.xlu0 %v10118_v11, %s9998_s9 }
  0x69   : > { %774 = vrot.lane.b32.xlu1 %v10125_v12, %s9998_s9  ;;  %772 = vrot.lane.b32.xlu0 %v10128_v13, %s9998_s9 }
  0x6d   : > { %790 = vrot.lane.b32.xlu1 %v10135_v14, %s9998_s9  ;;  %788 = vrot.lane.b32.xlu0 %v10138_v15, %s9998_s9 }
  0x71   : > { %1002 = vrot.lane.b32.xlu1 %v10078_v3, %s9999_s10  ;;  %1000 = vrot.lane.b32.xlu0 %v10068_v1, %s9999_s10 }
  0x75   : > { %1018 = vrot.lane.b32.xlu1 %v10075_v2, %s9999_s10  ;;  %1016 = vrot.lane.b32.xlu0 %v10065_v0, %s9999_s10 }
  0x79   : > { %1006 = vrot.lane.b32.xlu1 %v10085_v4, %s9999_s10  ;;  %1004 = vrot.lane.b32.xlu0 %v10088_v5, %s9999_s10 }
  0x7d   : > { %1022 = vrot.lane.b32.xlu1 %v10095_v6, %s9999_s10  ;;  %1020 = vrot.lane.b32.xlu0 %v10098_v7, %s9999_s10 }
  0x81   : > { %1010 = vrot.lane.b32.xlu1 %v10105_v8, %s9999_s10  ;;  %1008 = vrot.lane.b32.xlu0 %v10108_v9, %s9999_s10 }
  0x83   : > { %v415_v23 = vpop.permute.xlu1 %414  ;;  %v399_v24 = vpop.permute.xlu0 %398 }
  0x84   : > { %v431_v26 = vsel %vm430_vm0, %v399_v24, %v415_v23  ;;  %v439_v28 = vsel %vm430_vm0, %v415_v23, %v399_v24 }
  0x85   : > { %1026 = vrot.lane.b32.xlu1 %v10115_v10, %s9999_s10  ;;  %1024 = vrot.lane.b32.xlu0 %v10118_v11, %s9999_s10  ;;  %v461_v33 = vmul.f32 %v10241_v25, %v431_v26  ;;  %v460_v35 = vmul.f32 %v10250_v27, %v439_v28 }
  0x87   : > { %v417_v29 = vpop.permute.xlu1 %416  ;;  %v401_v30 = vpop.permute.xlu0 %400 }
  0x88   : > { %v440_v31 = vsel %vm430_vm0, %v417_v29, %v401_v30  ;;  %v432_v32 = vsel %vm430_vm0, %v401_v30, %v417_v29 }
  0x89   : > { %1014 = vrot.lane.b32.xlu1 %v10125_v12, %s9999_s10  ;;  %1012 = vrot.lane.b32.xlu0 %v10128_v13, %s9999_s10  ;;  %v463_v34 = vmul.f32 %v10241_v25, %v432_v32  ;;  %v462_v36 = vmul.f32 %v10250_v27, %v440_v31 }
  0x8b   : > { %v405_v37 = vpop.permute.xlu1 %404  ;;  %v403_v38 = vpop.permute.xlu0 %402  ;;  %v8694_v39 = vpack.c.bf16 %v463_v34, %v461_v33  ;;  %v8696_v40 = vpack.c.bf16 %v462_v36, %v460_v35 }
  0x8d   : > { %1030 = vrot.lane.b32.xlu1 %v10135_v14, %s9999_s10  ;;  %1028 = vrot.lane.b32.xlu0 %v10138_v15, %s9999_s10 }
  0x8e   : > { %8695 = vmatprep.subr.bf16.mxu0 %v8694_v39 }
  0x8f   : > { %8697 = vmatpush1.bf16.msra.mxu0 %v8696_v40  ;;  %v421_v41 = vpop.permute.xlu1 %420  ;;  %v419_v42 = vpop.permute.xlu0 %418 }
  0x90   : > { %v434_v43 = vsel %vm430_vm0, %v405_v37, %v421_v41  ;;  %v442_v44 = vsel %vm430_vm0, %v421_v41, %v405_v37  ;;  %v433_v45 = vsel %vm430_vm0, %v403_v38, %v419_v42  ;;  %v441_v46 = vsel %vm430_vm0, %v419_v42, %v403_v38  ;;  %v362_v37 = vld [vmem:[%s14449_s5] ss:$8 sm:$0x3] }
  0x91   : > { %v466_v47 = vmul.f32 %v10250_v27, %v442_v44  ;;  %v467_v48 = vmul.f32 %v10241_v25, %v434_v43  ;;  %v464_v49 = vmul.f32 %v10250_v27, %v441_v46  ;;  %v465_v50 = vmul.f32 %v10241_v25, %v433_v45  ;;  %1433 = vrot.lane.b32.xlu1 %v10078_v3, %s10000_s13  ;;  %v8059_v44 = vld [vmem:[%s14445_s1 + $0x40] sm:$0xff] }
  0x92   : > { %1431 = vrot.lane.b32.xlu0 %v10068_v1, %s10000_s13  ;;  %v10331_v42 = vrot.slane %v362_v37, %v10237_v22  ;;  %v10334_v43 = vrot.slane %v362_v37, %v10228_v20 }
  0x93   : > { %v409_v51 = vpop.permute.xlu1 %408  ;;  %v407_v52 = vpop.permute.xlu0 %406  ;;  %v8698_v53 = vpack.c.bf16 %v467_v48, %v465_v50  ;;  %v8700_v54 = vpack.c.bf16 %v466_v47, %v464_v49 }
  0x95   : > { %8699 = vmatprep.subr.bf16.mxu0 %v8698_v53  ;;  %1449 = vrot.lane.b32.xlu1 %v10075_v2, %s10000_s13 }
  0x96   : > { %8701 = vmatpush1.bf16.msra.mxu0 %v8700_v54  ;;  %1447 = vrot.lane.b32.xlu0 %v10065_v0, %s10000_s13 }
  0x97   : > { %v425_v55 = vpop.permute.xlu1 %424  ;;  %v423_v56 = vpop.permute.xlu0 %422 }
  0x98   : > { %v436_v57 = vsel %vm430_vm0, %v409_v51, %v425_v55  ;;  %v444_v58 = vsel %vm430_vm0, %v425_v55, %v409_v51  ;;  %v435_v59 = vsel %vm430_vm0, %v407_v52, %v423_v56  ;;  %v443_v60 = vsel %vm430_vm0, %v423_v56, %v407_v52  ;;  %v8060_v55 = vld [vmem:[%s14445_s1 + $0x48] sm:$0xff] }
  0x99   : > { %v470_v61 = vmul.f32 %v10250_v27, %v444_v58  ;;  %v471_v62 = vmul.f32 %v10241_v25, %v436_v57  ;;  %v468_v63 = vmul.f32 %v10250_v27, %v443_v60  ;;  %v469_v17 = vmul.f32 %v10241_v25, %v435_v59  ;;  %1437 = vrot.lane.b32.xlu1 %v10085_v4, %s10000_s13  ;;  %v8061_v60 = vld [vmem:[%s14445_s1 + $0x50] sm:$0xff] }
  0x9a   : > { %1435 = vrot.lane.b32.xlu0 %v10088_v5, %s10000_s13 }
  0x9b   : > { %v413_v18 = vpop.permute.xlu1 %412  ;;  %v411_v21 = vpop.permute.xlu0 %410  ;;  %v8702_v23 = vpack.c.bf16 %v471_v62, %v469_v17  ;;  %v8704_v24 = vpack.c.bf16 %v470_v61, %v468_v63 }
  0x9d   : > { %8703 = vmatprep.subr.bf16.mxu0 %v8702_v23  ;;  %1453 = vrot.lane.b32.xlu1 %v10095_v6, %s10000_s13 }
  0x9e   : > { %8705 = vmatpush1.bf16.msra.mxu0 %v8704_v24  ;;  %1451 = vrot.lane.b32.xlu0 %v10098_v7, %s10000_s13 }
  0x9f   : > { %v429_v26 = vpop.permute.xlu1 %428  ;;  %v427_v28 = vpop.permute.xlu0 %426 }
  0xa0   : > { %v438_v29 = vsel %vm430_vm0, %v413_v18, %v429_v26  ;;  %v446_v30 = vsel %vm430_vm0, %v429_v26, %v413_v18  ;;  %v437_v31 = vsel %vm430_vm0, %v411_v21, %v427_v28  ;;  %v445_v32 = vsel %vm430_vm0, %v427_v28, %v411_v21 }
  0xa1   : > { %v474_v33 = vmul.f32 %v10250_v27, %v446_v30  ;;  %v475_v34 = vmul.f32 %v10241_v25, %v438_v29  ;;  %v472_v35 = vmul.f32 %v10250_v27, %v445_v32  ;;  %v473_v36 = vmul.f32 %v10241_v25, %v437_v31  ;;  %1441 = vrot.lane.b32.xlu1 %v10105_v8, %s10000_s13  ;;  %v8062_v29 = vld [vmem:[%s14445_s1 + $0x58] sm:$0xff] }
  0xa2   : > { %1439 = vrot.lane.b32.xlu0 %v10108_v9, %s10000_s13 }
  0xa3   : > { %v314_v38 = vpop.permute.xlu1 %313  ;;  %v312_v39 = vpop.permute.xlu0 %311  ;;  %v8706_v40 = vpack.c.bf16 %v475_v34, %v473_v36  ;;  %v8708_v41 = vpack.c.bf16 %v474_v33, %v472_v35  ;;  %v8063_v34 = vld [vmem:[%s14445_s1 + $0x60] sm:$0xff] }
  0xa5   : > { %8707 = vmatprep.subr.bf16.mxu0 %v8706_v40  ;;  %1457 = vrot.lane.b32.xlu1 %v10115_v10, %s10000_s13 }
  0xa6   : > { %8709 = vmatpush1.bf16.msra.mxu0 %v8708_v41  ;;  %1455 = vrot.lane.b32.xlu0 %v10118_v11, %s10000_s13 }
  0xa7   : > { %v330_v45 = vpop.permute.xlu1 %329  ;;  %v328_v46 = vpop.permute.xlu0 %327 }
  0xa8   : > { %v347_v47 = vsel %vm345_vm1, %v314_v38, %v330_v45  ;;  %v355_v48 = vsel %vm345_vm1, %v330_v45, %v314_v38  ;;  %v346_v49 = vsel %vm345_vm1, %v312_v39, %v328_v46  ;;  %v354_v50 = vsel %vm345_vm1, %v328_v46, %v312_v39 }
  0xa9   : > { %v376_v51 = vmul.f32 %v10331_v42, %v355_v48  ;;  %v377_v52 = vmul.f32 %v10334_v43, %v347_v47  ;;  %v374_v53 = vmul.f32 %v10331_v42, %v354_v50  ;;  %v375_v54 = vmul.f32 %v10334_v43, %v346_v49  ;;  %8067 = vmatmul.mubr.msk.f32.vlgmr.msra.gmra.mrb[0].mxu0 %vm485_vm2, %v8059_v44  ;;  %v8064_v47 = vld [vmem:[%s14445_s1 + $0x68] sm:$0xff] }
  0xaa   : > { %580 = vmatprep.mubr.f32.mxu0 %v9996_v16  ;;  %1445 = vrot.lane.b32.xlu1 %v10125_v12, %s10000_s13 }
  0xab   : > { %v8712_v56 = vpack.c.bf16 %v376_v51, %v374_v53  ;;  %v318_v57 = vpop.permute.xlu1 %317  ;;  %v316_v58 = vpop.permute.xlu0 %315  ;;  %v8710_v59 = vpack.c.bf16 %v377_v52, %v375_v54  ;;  %1443 = vrot.lane.b32.xlu0 %v10128_v13, %s10000_s13  ;;  %v8065_v52 = vld [vmem:[%s14445_s1 + $0x70] sm:$0xff] }
  0xad   : > { %8068 = vmatmul.mubr.msk.f32.gmra.mrb[2].mxu0 %vm485_vm2, %v8060_v55  ;;  %8711 = vmatprep.subr.bf16.mxu0 %v8710_v59 }
  0xae   : > { %8713 = vmatpush1.bf16.msra.mxu0 %v8712_v56  ;;  %586 = vmatprep.mubr.f32.mxu0 %v9996_v16 }
  0xaf   : > { %v334_v61 = vpop.permute.xlu1 %333  ;;  %v332_v62 = vpop.permute.xlu0 %331  ;;  %1461 = vrot.lane.b32.xlu1 %v10135_v14, %s10000_s13  ;;  %1459 = vrot.lane.b32.xlu0 %v10138_v15, %s10000_s13 }
  0xb0   : > { %v349_v63 = vsel %vm345_vm1, %v318_v57, %v334_v61  ;;  %v357_v17 = vsel %vm345_vm1, %v334_v61, %v318_v57  ;;  %v348_v18 = vsel %vm345_vm1, %v316_v58, %v332_v62  ;;  %v356_v21 = vsel %vm345_vm1, %v332_v62, %v316_v58 }
  0xb1   : > { %v380_v23 = vmul.f32 %v10331_v42, %v357_v17  ;;  %v381_v24 = vmul.f32 %v10334_v43, %v349_v63  ;;  %v378_v26 = vmul.f32 %v10331_v42, %v356_v21  ;;  %v379_v28 = vmul.f32 %v10334_v43, %v348_v18  ;;  %8069 = vmatmul.mubr.msk.f32.gmra.mrb[4].mxu0 %vm485_vm2, %v8061_v60  ;;  %v8066_v63 = vld [vmem:[%s14445_s1 + $0x78] sm:$0xff]  ;;  %v8083_v17 = vld [vmem:[%s14449_s5 + $0x2] ss:$8 sm:$0x3] }
  0xb2   : > { %592 = vmatprep.mubr.f32.mxu0 %v9996_v16 }
  0xb3   : > { %v8716_v30 = vpack.c.bf16 %v380_v23, %v378_v26  ;;  %v322_v31 = vpop.permute.xlu1 %321  ;;  %v320_v32 = vpop.permute.xlu0 %319  ;;  %v8714_v33 = vpack.c.bf16 %v381_v24, %v379_v28  ;;  %1673 = vrot.lane.b32.xlu1 %v10078_v3, %s10001_s27  ;;  %1671 = vrot.lane.b32.xlu0 %v10068_v1, %s10001_s27  ;;  %v10460_v26 = vrot.slane %v8083_v17, %v10237_v22 }
  0xb4   : > { %v10463_v28 = vrot.slane %v8083_v17, %v10228_v20 }
  0xb5   : > { %8070 = vmatmul.mubr.msk.f32.gmra.mrb[6].mxu0 %vm485_vm2, %v8062_v29  ;;  %8715 = vmatprep.subr.bf16.mxu0 %v8714_v33  ;;  %v390_v29 = vld [vmem:[%s14445_s1] sm:$0xff] }
  0xb6   : > { %8717 = vmatpush1.bf16.msra.mxu0 %v8716_v30  ;;  %598 = vmatprep.mubr.f32.mxu0 %v9996_v16 }
  0xb7   : > { %v338_v35 = vpop.permute.xlu1 %337  ;;  %v336_v36 = vpop.permute.xlu0 %335  ;;  %1689 = vrot.lane.b32.xlu1 %v10075_v2, %s10001_s27  ;;  %1687 = vrot.lane.b32.xlu0 %v10065_v0, %s10001_s27 }
  0xb8   : > { %v351_v37 = vsel %vm345_vm1, %v322_v31, %v338_v35  ;;  %v359_v38 = vsel %vm345_vm1, %v338_v35, %v322_v31  ;;  %v350_v39 = vsel %vm345_vm1, %v320_v32, %v336_v36  ;;  %v358_v40 = vsel %vm345_vm1, %v336_v36, %v320_v32 }
  0xb9   : > { %v384_v41 = vmul.f32 %v10331_v42, %v359_v38  ;;  %v385_v44 = vmul.f32 %v10334_v43, %v351_v37  ;;  %v382_v45 = vmul.f32 %v10331_v42, %v358_v40  ;;  %v383_v46 = vmul.f32 %v10334_v43, %v350_v39  ;;  %8071 = vmatmul.mubr.msk.f32.gmra.mrb[8].mxu0 %vm485_vm2, %v8063_v34  ;;  %v391_v40 = vld [vmem:[%s14445_s1 + $0x8] sm:$0xff] }
  0xba   : > { %604 = vmatprep.mubr.f32.mxu0 %v9996_v16 }
  0xbb   : > { %v8720_v48 = vpack.c.bf16 %v384_v41, %v382_v45  ;;  %v326_v49 = vpop.permute.xlu1 %325  ;;  %v324_v50 = vpop.permute.xlu0 %323  ;;  %v8718_v51 = vpack.c.bf16 %v385_v44, %v383_v46  ;;  %1677 = vrot.lane.b32.xlu1 %v10085_v4, %s10001_s27  ;;  %1675 = vrot.lane.b32.xlu0 %v10088_v5, %s10001_s27 }
  0xbd   : > { %8072 = vmatmul.mubr.msk.f32.gmra.mrb[10].mxu0 %vm485_vm2, %v8064_v47  ;;  %8719 = vmatprep.subr.bf16.mxu0 %v8718_v51  ;;  %v392_v47 = vld [vmem:[%s14445_s1 + $0x10] sm:$0xff] }
  0xbe   : > { %8721 = vmatpush1.bf16.msra.mxu0 %v8720_v48  ;;  %610 = vmatprep.mubr.f32.mxu0 %v9996_v16 }
  0xbf   : > { %v342_v53 = vpop.permute.xlu1 %341  ;;  %v340_v54 = vpop.permute.xlu0 %339  ;;  %1693 = vrot.lane.b32.xlu1 %v10095_v6, %s10001_s27  ;;  %1691 = vrot.lane.b32.xlu0 %v10098_v7, %s10001_s27 }
  0xc0   : > { %v353_v55 = vsel %vm345_vm1, %v326_v49, %v342_v53  ;;  %v361_v56 = vsel %vm345_vm1, %v342_v53, %v326_v49  ;;  %v352_v57 = vsel %vm345_vm1, %v324_v50, %v340_v54  ;;  %v360_v58 = vsel %vm345_vm1, %v340_v54, %v324_v50 }
  0xc1   : > { %v388_v59 = vmul.f32 %v10331_v42, %v361_v56  ;;  %v389_v60 = vmul.f32 %v10334_v43, %v353_v55  ;;  %v386_v61 = vmul.f32 %v10331_v42, %v360_v58  ;;  %v387_v62 = vmul.f32 %v10334_v43, %v352_v57  ;;  %8073 = vmatmul.mubr.msk.f32.gmra.mrb[12].mxu0 %vm485_vm2, %v8065_v52  ;;  %v393_v58 = vld [vmem:[%s14445_s1 + $0x18] sm:$0xff] }
  0xc2   : > { %616 = vmatprep.mubr.f32.mxu0 %v9996_v16 }
  0xc3   : > { %v8724_v18 = vpack.c.bf16 %v388_v59, %v386_v61  ;;  %v763_v21 = vpop.permute.xlu1 %762  ;;  %v761_v23 = vpop.permute.xlu0 %760  ;;  %v8722_v24 = vpack.c.bf16 %v389_v60, %v387_v62  ;;  %1681 = vrot.lane.b32.xlu1 %v10105_v8, %s10001_s27  ;;  %1679 = vrot.lane.b32.xlu0 %v10108_v9, %s10001_s27 }
  0xc5   : > { %8074 = vmatmul.mubr.msk.f32.gmra.mrb[14].mxu0 %vm485_vm2, %v8066_v63  ;;  %8723 = vmatprep.subr.bf16.mxu0 %v8722_v24  ;;  %v394_v63 = vld [vmem:[%s14445_s1 + $0x20] sm:$0xff] }
  0xc6   : > { %8725 = vmatpush1.bf16.msra.mxu0 %v8724_v18  ;;  %711 = vmatprep.mubr.f32.mxu0 %v9996_v16 }
  0xc7   : > { %v779_v30 = vpop.permute.xlu1 %778  ;;  %v777_v31 = vpop.permute.xlu0 %776  ;;  %1697 = vrot.lane.b32.xlu1 %v10115_v10, %s10001_s27  ;;  %1695 = vrot.lane.b32.xlu0 %v10118_v11, %s10001_s27 }
  0xc8   : > { %v794_v32 = vsel %vm792_vm3, %v763_v21, %v779_v30  ;;  %v802_v33 = vsel %vm792_vm3, %v779_v30, %v763_v21  ;;  %v793_v34 = vsel %vm792_vm3, %v761_v23, %v777_v31  ;;  %v801_v35 = vsel %vm792_vm3, %v777_v31, %v761_v23 }
  0xc9   : > { %v824_v36 = vmul.f32 %v10460_v26, %v802_v33  ;;  %v825_v37 = vmul.f32 %v10463_v28, %v794_v32  ;;  %v822_v38 = vmul.f32 %v10460_v26, %v801_v35  ;;  %v823_v39 = vmul.f32 %v10463_v28, %v793_v34  ;;  %8075 = vmatmul.mubr.msk.f32.vlgmr.msra.gmra.mrb[0].mxu0 %vm485_vm2, %v390_v29  ;;  %v395_v34 = vld [vmem:[%s14445_s1 + $0x28] sm:$0xff] }
  0xca   : > { %717 = vmatprep.mubr.f32.mxu0 %v9996_v16 }
  0xcb   : > { %v8728_v41 = vpack.c.bf16 %v824_v36, %v822_v38  ;;  %v767_v44 = vpop.permute.xlu1 %766  ;;  %v765_v45 = vpop.permute.xlu0 %764  ;;  %v8726_v46 = vpack.c.bf16 %v825_v37, %v823_v39  ;;  %1685 = vrot.lane.b32.xlu1 %v10125_v12, %s10001_s27  ;;  %1683 = vrot.lane.b32.xlu0 %v10128_v13, %s10001_s27  ;;  %v396_v39 = vld [vmem:[%s14445_s1 + $0x30] sm:$0xff] }
  0xcd   : > { %8076 = vmatmul.mubr.msk.f32.gmra.mrb[2].mxu0 %vm485_vm2, %v391_v40  ;;  %8727 = vmatprep.subr.bf16.mxu0 %v8726_v46 }
  0xce   : > { %8729 = vmatpush1.bf16.msra.mxu0 %v8728_v41  ;;  %723 = vmatprep.mubr.f32.mxu0 %v9996_v16 }
  0xcf   : > { %v783_v48 = vpop.permute.xlu1 %782  ;;  %v781_v49 = vpop.permute.xlu0 %780  ;;  %1701 = vrot.lane.b32.xlu1 %v10135_v14, %s10001_s27  ;;  %1699 = vrot.lane.b32.xlu0 %v10138_v15, %s10001_s27 }
  0xd0   : > { %v796_v50 = vsel %vm792_vm3, %v767_v44, %v783_v48  ;;  %v804_v51 = vsel %vm792_vm3, %v783_v48, %v767_v44  ;;  %v795_v52 = vsel %vm792_vm3, %v765_v45, %v781_v49  ;;  %v803_v53 = vsel %vm792_vm3, %v781_v49, %v765_v45 }
  0xd1   : > { %v828_v54 = vmul.f32 %v10460_v26, %v804_v51  ;;  %v829_v55 = vmul.f32 %v10463_v28, %v796_v50  ;;  %v826_v56 = vmul.f32 %v10460_v26, %v803_v53  ;;  %v827_v57 = vmul.f32 %v10463_v28, %v795_v52  ;;  %8077 = vmatmul.mubr.msk.f32.gmra.mrb[4].mxu0 %vm485_vm2, %v392_v47  ;;  %v397_v52 = vld [vmem:[%s14445_s1 + $0x38] sm:$0xff]  ;;  %v8100_v53 = vld [vmem:[%s14449_s5 + $0x3] ss:$8 sm:$0x3] }
  0xd2   : > { %729 = vmatprep.mubr.f32.mxu0 %v9996_v16 }
  0xd3   : > { %v8732_v59 = vpack.c.bf16 %v828_v54, %v826_v56  ;;  %v771_v60 = vpop.permute.xlu1 %770  ;;  %v769_v61 = vpop.permute.xlu0 %768  ;;  %v8730_v62 = vpack.c.bf16 %v829_v55, %v827_v57  ;;  %1913 = vrot.lane.b32.xlu1 %v10078_v3, %s10002_s16  ;;  %1911 = vrot.lane.b32.xlu0 %v10068_v1, %s10002_s16 }
  0xd5   : > { %8078 = vmatmul.mubr.msk.f32.gmra.mrb[6].mxu0 %vm485_vm2, %v393_v58  ;;  %8731 = vmatprep.subr.bf16.mxu0 %v8730_v62  ;;  %v10590_v58 = vrot.slane %v8100_v53, %v10237_v22 }
  0xd6   : > { %8733 = vmatpush1.bf16.msra.mxu0 %v8732_v59  ;;  %735 = vmatprep.mubr.f32.mxu0 %v9996_v16  ;;  %v10593_v59 = vrot.slane %v8100_v53, %v10228_v20  ;;  %v8088_v53 = vld [vmem:[%s14445_s1 + $0xa0] sm:$0xff] }
  0xd7   : > { %v787_v17 = vpop.permute.xlu1 %786  ;;  %v785_v18 = vpop.permute.xlu0 %784  ;;  %1929 = vrot.lane.b32.xlu1 %v10075_v2, %s10002_s16  ;;  %1927 = vrot.lane.b32.xlu0 %v10065_v0, %s10002_s16 }
  0xd8   : > { %v798_v21 = vsel %vm792_vm3, %v771_v60, %v787_v17  ;;  %v806_v23 = vsel %vm792_vm3, %v787_v17, %v771_v60  ;;  %v797_v24 = vsel %vm792_vm3, %v769_v61, %v785_v18  ;;  %v805_v29 = vsel %vm792_vm3, %v785_v18, %v769_v61  ;;  %v8084_v60 = vld [vmem:[%s14445_s1 + $0x80] sm:$0xff] }
  0xd9   : > { %v832_v30 = vmul.f32 %v10460_v26, %v806_v23  ;;  %v833_v31 = vmul.f32 %v10463_v28, %v798_v21  ;;  %v830_v32 = vmul.f32 %v10460_v26, %v805_v29  ;;  %v831_v33 = vmul.f32 %v10463_v28, %v797_v24  ;;  %8079 = vmatmul.mubr.msk.f32.gmra.mrb[8].mxu0 %vm485_vm2, %v394_v63 }
  0xda   : > { %741 = vmatprep.mubr.f32.mxu0 %v9996_v16 }
  0xdb   : > { %v8736_v35 = vpack.c.bf16 %v832_v30, %v830_v32  ;;  %v775_v36 = vpop.permute.xlu1 %774  ;;  %v773_v37 = vpop.permute.xlu0 %772  ;;  %v8734_v38 = vpack.c.bf16 %v833_v31, %v831_v33  ;;  %1917 = vrot.lane.b32.xlu1 %v10085_v4, %s10002_s16  ;;  %1915 = vrot.lane.b32.xlu0 %v10088_v5, %s10002_s16  ;;  %v8085_v31 = vld [vmem:[%s14445_s1 + $0x88] sm:$0xff] }
  0xdd   : > { %8080 = vmatmul.mubr.msk.f32.gmra.mrb[10].mxu0 %vm485_vm2, %v395_v34  ;;  %8735 = vmatprep.subr.bf16.mxu0 %v8734_v38 }
  0xde   : > { %8737 = vmatpush1.bf16.msra.mxu0 %v8736_v35  ;;  %747 = vmatprep.mubr.f32.mxu0 %v9996_v16 }
  0xdf   : > { %v791_v40 = vpop.permute.xlu1 %790  ;;  %v789_v41 = vpop.permute.xlu0 %788  ;;  %1933 = vrot.lane.b32.xlu1 %v10095_v6, %s10002_s16  ;;  %1931 = vrot.lane.b32.xlu0 %v10098_v7, %s10002_s16 }
  0xe0   : > { %v800_v44 = vsel %vm792_vm3, %v775_v36, %v791_v40  ;;  %v808_v45 = vsel %vm792_vm3, %v791_v40, %v775_v36  ;;  %v799_v46 = vsel %vm792_vm3, %v773_v37, %v789_v41  ;;  %v807_v47 = vsel %vm792_vm3, %v789_v41, %v773_v37  ;;  %v8086_v36 = vld [vmem:[%s14445_s1 + $0x90] sm:$0xff] }
  0xe1   : > { %v836_v48 = vmul.f32 %v10460_v26, %v808_v45  ;;  %v837_v49 = vmul.f32 %v10463_v28, %v800_v44  ;;  %v834_v50 = vmul.f32 %v10460_v26, %v807_v47  ;;  %v835_v51 = vmul.f32 %v10463_v28, %v799_v46  ;;  %8081 = vmatmul.mubr.msk.f32.gmra.mrb[12].mxu0 %vm485_vm2, %v396_v39 }
  0xe2   : > { %753 = vmatprep.mubr.f32.mxu0 %v9996_v16 }
  0xe3   : > { %v8740_v54 = vpack.c.bf16 %v836_v48, %v834_v50  ;;  %v1003_v55 = vpop.permute.xlu1 %1002  ;;  %v1001_v56 = vpop.permute.xlu0 %1000  ;;  %v8738_v57 = vpack.c.bf16 %v837_v49, %v835_v51  ;;  %1921 = vrot.lane.b32.xlu1 %v10105_v8, %s10002_s16  ;;  %1919 = vrot.lane.b32.xlu0 %v10108_v9, %s10002_s16  ;;  %v8087_v48 = vld [vmem:[%s14445_s1 + $0x98] sm:$0xff] }
  0xe5   : > { %8082 = vmatmul.mubr.msk.f32.gmra.mrb[14].mxu0 %vm485_vm2, %v397_v52  ;;  %8739 = vmatprep.subr.bf16.mxu0 %v8738_v57 }
  0xe6   : > { %8741 = vmatpush1.bf16.msra.mxu0 %v8740_v54  ;;  %935 = vmatprep.mubr.f32.mxu0 %v9996_v16 }
  0xe7   : > { %v1019_v61 = vpop.permute.xlu1 %1018  ;;  %v1017_v62 = vpop.permute.xlu0 %1016  ;;  %1937 = vrot.lane.b32.xlu1 %v10115_v10, %s10002_s16  ;;  %1935 = vrot.lane.b32.xlu0 %v10118_v11, %s10002_s16 }
  0xe8   : > { %v1034_v63 = vsel %vm1032_vm4, %v1003_v55, %v1019_v61  ;;  %v1042_v17 = vsel %vm1032_vm4, %v1019_v61, %v1003_v55  ;;  %v1033_v18 = vsel %vm1032_vm4, %v1001_v56, %v1017_v62  ;;  %v1041_v21 = vsel %vm1032_vm4, %v1017_v62, %v1001_v56  ;;  %v8117_v56 = vld [vmem:[%s14449_s5 + $0x4] ss:$8 sm:$0x3] }
  0xe9   : > { %v1064_v23 = vmul.f32 %v10590_v58, %v1042_v17  ;;  %v1065_v24 = vmul.f32 %v10593_v59, %v1034_v63  ;;  %v1062_v29 = vmul.f32 %v10590_v58, %v1041_v21  ;;  %v1063_v30 = vmul.f32 %v10593_v59, %v1033_v18  ;;  %8092 = vmatmul.mubr.msk.f32.vlgmr.msra.gmra.mrb[0].mxu0 %vm485_vm2, %v8084_v60 }
  0xea   : > { %941 = vmatprep.mubr.f32.mxu0 %v9996_v16 }
  0xeb   : > { %v8744_v32 = vpack.c.bf16 %v1064_v23, %v1062_v29  ;;  %v1007_v33 = vpop.permute.xlu1 %1006  ;;  %v1005_v34 = vpop.permute.xlu0 %1004  ;;  %v8742_v35 = vpack.c.bf16 %v1065_v24, %v1063_v30  ;;  %1925 = vrot.lane.b32.xlu1 %v10125_v12, %s10002_s16  ;;  %1923 = vrot.lane.b32.xlu0 %v10128_v13, %s10002_s16  ;;  %v8089_v23 = vld [vmem:[%s14445_s1 + $0xa8] sm:$0xff]  ;;  %v10684_v24 = vrot.slane %v8117_v56, %v10228_v20 }
  0xed   : > { %8093 = vmatmul.mubr.msk.f32.gmra.mrb[2].mxu0 %vm485_vm2, %v8085_v31  ;;  %8743 = vmatprep.subr.bf16.mxu0 %v8742_v35  ;;  %v1254_v35 = vmul.f32 %v10684_v24, %v10065_v0 }
  0xee   : > { %8745 = vmatpush1.bf16.msra.mxu0 %v8744_v32  ;;  %947 = vmatprep.mubr.f32.mxu0 %v9996_v16 }
  0xef   : > { %v1023_v37 = vpop.permute.xlu1 %1022  ;;  %v1021_v38 = vpop.permute.xlu0 %1020  ;;  %1941 = vrot.lane.b32.xlu1 %v10135_v14, %s10002_s16  ;;  %1939 = vrot.lane.b32.xlu0 %v10138_v15, %s10002_s16 }
  0xf0   : > { %v1036_v13 = vsel %vm1032_vm4, %v1007_v33, %v1023_v37  ;;  %v1044_v39 = vsel %vm1032_vm4, %v1023_v37, %v1007_v33  ;;  %v1035_v40 = vsel %vm1032_vm4, %v1005_v34, %v1021_v38  ;;  %v1043_v41 = vsel %vm1032_vm4, %v1021_v38, %v1005_v34  ;;  %v8090_v33 = vld [vmem:[%s14445_s1 + $0xb0] sm:$0xff] }
  0xf1   : > { %v1068_v44 = vmul.f32 %v10590_v58, %v1044_v39  ;;  %v1069_v45 = vmul.f32 %v10593_v59, %v1036_v13  ;;  %v1066_v46 = vmul.f32 %v10590_v58, %v1043_v41  ;;  %v1067_v47 = vmul.f32 %v10593_v59, %v1035_v40  ;;  %8094 = vmatmul.mubr.msk.f32.gmra.mrb[4].mxu0 %vm485_vm2, %v8086_v36 }
  0xf2   : > { %953 = vmatprep.mubr.f32.mxu0 %v9996_v16  ;;  %v10696_v34 = vrot.slane %v8117_v56, %v10237_v22  ;;  %v1256_v36 = vmul.f32 %v10684_v24, %v10075_v2  ;;  %v10761_v56 = vld [vmem:[%s14449_s5 + $0x5] ss:$8 sm:$0x3] }
  0xf3   : > { %v8748_v49 = vpack.c.bf16 %v1068_v44, %v1066_v46  ;;  %v1011_v50 = vpop.permute.xlu1 %1010  ;;  %v1009_v51 = vpop.permute.xlu0 %1008  ;;  %v8746_v52 = vpack.c.bf16 %v1069_v45, %v1067_v47  ;;  %2153 = vrot.lane.b32.xlu1 %v10078_v3, %s10003_s23  ;;  %2151 = vrot.lane.b32.xlu0 %v10068_v1, %s10003_s23  ;;  %v8091_v46 = vld [vmem:[%s14445_s1 + $0xb8] sm:$0xff] }
  0xf4   : > { %v8758_v47 = vpack.c.bf16 %v1256_v36, %v1254_v35  ;;  %v9952_v35 = vld [vmem:[%s10062_s29 + $0x70] sm:$0xff] }
  0xf5   : > { %8095 = vmatmul.mubr.msk.f32.gmra.mrb[6].mxu0 %vm485_vm2, %v8087_v48  ;;  %8747 = vmatprep.subr.bf16.mxu0 %v8746_v52  ;;  %v1253_v48 = vmul.f32 %v10696_v34, %v10068_v1  ;;  %v1267_v36 = vmul.f32 %v9952_v35, %v10696_v34 }
  0xf6   : > { %8749 = vmatpush1.bf16.msra.mxu0 %v8748_v49  ;;  %959 = vmatprep.mubr.f32.mxu0 %v9996_v16  ;;  %v1255_v49 = vmul.f32 %v10696_v34, %v10078_v3  ;;  %v1257_v3 = vmul.f32 %v10696_v34, %v10088_v5 }
  0xf7   : > { %v1027_v54 = vpop.permute.xlu1 %1026  ;;  %v1025_v55 = vpop.permute.xlu0 %1024  ;;  %2169 = vrot.lane.b32.xlu1 %v10075_v2, %s10003_s23  ;;  %2167 = vrot.lane.b32.xlu0 %v10065_v0, %s10003_s23 }
  0xf8   : > { %v1038_v57 = vsel %vm1032_vm4, %v1011_v50, %v1027_v54  ;;  %v1046_v60 = vsel %vm1032_vm4, %v1027_v54, %v1011_v50  ;;  %v1037_v61 = vsel %vm1032_vm4, %v1009_v51, %v1025_v55  ;;  %v1045_v62 = vsel %vm1032_vm4, %v1025_v55, %v1009_v51 }
  0xf9   : > { %v1072_v63 = vmul.f32 %v10590_v58, %v1046_v60  ;;  %v1073_v17 = vmul.f32 %v10593_v59, %v1038_v57  ;;  %v1070_v18 = vmul.f32 %v10590_v58, %v1045_v62  ;;  %v1071_v21 = vmul.f32 %v10593_v59, %v1037_v61  ;;  %8096 = vmatmul.mubr.msk.f32.gmra.mrb[8].mxu0 %vm485_vm2, %v8088_v53  ;;  %v9949_v61 = vld [vmem:[%s10062_s29 + $0x40] sm:$0xff] }
  0xfa   : > { %965 = vmatprep.mubr.f32.mxu0 %v9996_v16  ;;  %v1258_v50 = vmul.f32 %v10684_v24, %v10098_v7  ;;  %v1260_v53 = vmul.f32 %v10684_v24, %v10095_v6  ;;  %v1264_v55 = vmul.f32 %v10684_v24, %v10115_v10  ;;  %v1261_v62 = vmul.f32 %v9949_v61, %v10696_v34 }
  0xfb   : > { %v8752_v29 = vpack.c.bf16 %v1072_v63, %v1070_v18  ;;  %v1015_v30 = vpop.permute.xlu1 %1014  ;;  %v1013_v31 = vpop.permute.xlu0 %1012  ;;  %v8750_v32 = vpack.c.bf16 %v1073_v17, %v1071_v21  ;;  %2157 = vrot.lane.b32.xlu1 %v10085_v4, %s10003_s23  ;;  %2155 = vrot.lane.b32.xlu0 %v10088_v5, %s10003_s23  ;;  %v9950_v63 = vld [vmem:[%s10062_s29 + $0x50] sm:$0xff]  ;;  %v10777_v18 = vrot.slane %v10761_v56, %v10228_v20 }
  0xfc   : > { %v8762_v5 = vpack.c.bf16 %v1260_v53, %v1258_v50  ;;  %v1263_v17 = vmul.f32 %v9950_v63, %v10696_v34  ;;  %v1266_v21 = vmul.f32 %v10684_v24, %v10138_v15 }
  0xfd   : > { %8097 = vmatmul.mubr.msk.f32.gmra.mrb[10].mxu0 %vm485_vm2, %v8089_v23  ;;  %8751 = vmatprep.subr.bf16.mxu0 %v8750_v32  ;;  %v1268_v23 = vmul.f32 %v10684_v24, %v10135_v14  ;;  %v9951_v32 = vld [vmem:[%s10062_s29 + $0x60] sm:$0xff]  ;;  %v8103_v14 = vld [vmem:[%s14445_s1 + $0xd0] sm:$0xff] }
  0xfe   : > { %8753 = vmatpush1.bf16.msra.mxu0 %v8752_v29  ;;  %971 = vmatprep.mubr.f32.mxu0 %v9996_v16  ;;  %v8768_v15 = vpack.c.bf16 %v1263_v17, %v1261_v62 }
  0xff   : > { %v1031_v37 = vpop.permute.xlu1 %1030  ;;  %v1029_v38 = vpop.permute.xlu0 %1028  ;;  %2173 = vrot.lane.b32.xlu1 %v10095_v6, %s10003_s23  ;;  %2171 = vrot.lane.b32.xlu0 %v10098_v7, %s10003_s23  ;;  %v1259_v7 = vmul.f32 %v10696_v34, %v10085_v4  ;;  %v8101_v6 = vld [vmem:[%s14445_s1 + $0xc0] sm:$0xff] }
 0x100   : > { %v1040_v13 = vsel %vm1032_vm4, %v1015_v30, %v1031_v37  ;;  %v1048_v39 = vsel %vm1032_vm4, %v1031_v37, %v1015_v30  ;;  %v1039_v0 = vsel %vm1032_vm4, %v1013_v31, %v1029_v38  ;;  %v1047_v2 = vsel %vm1032_vm4, %v1029_v38, %v1013_v31 }
 0x101   : > { %v1076_v40 = vmul.f32 %v10590_v58, %v1048_v39  ;;  %v1077_v41 = vmul.f32 %v10593_v59, %v1040_v13  ;;  %v1074_v44 = vmul.f32 %v10590_v58, %v1047_v2  ;;  %v1075_v45 = vmul.f32 %v10593_v59, %v1039_v0  ;;  %8098 = vmatmul.mubr.msk.f32.gmra.mrb[12].mxu0 %vm485_vm2, %v8090_v33  ;;  %v9953_v39 = vld [vmem:[%s10062_s29 + $0x78] sm:$0xff]  ;;  %v9954_v2 = vld [vmem:[%s10062_s29 + $0x68] sm:$0xff] }
 0x102   : > { %977 = vmatprep.mubr.f32.mxu0 %v9996_v16  ;;  %v8764_v60 = vpack.c.bf16 %v1259_v7, %v1257_v3  ;;  %v1265_v33 = vmul.f32 %v9951_v32, %v10696_v34  ;;  %v8770_v13 = vpack.c.bf16 %v1268_v23, %v1266_v21  ;;  %v8107_v3 = vld [vmem:[%s14445_s1 + $0xf0] sm:$0xff]  ;;  %v10831_v7 = vrot.slane %v10761_v56, %v10237_v22 }
 0x103   : > { %v8756_v51 = vpack.c.bf16 %v1076_v40, %v1074_v44  ;;  %v8754_v52 = vpack.c.bf16 %v1077_v41, %v1075_v45  ;;  %2161 = vrot.lane.b32.xlu1 %v10105_v8, %s10003_s23  ;;  %2159 = vrot.lane.b32.xlu0 %v10108_v9, %s10003_s23  ;;  %v10735_v54 = vpop.permute.xlu1 %1433  ;;  %v8760_v8 = vpack.c.bf16 %v1255_v49, %v1253_v48  ;;  %v8104_v41 = vld [vmem:[%s14445_s1 + $0xd8] sm:$0xff]  ;;  %v8105_v48 = vld [vmem:[%s14445_s1 + $0xe0] sm:$0xff] }
 0x104   : > { %v10737_v1 = vpop.permute.xlu0 %1431  ;;  %v1262_v9 = vmul.f32 %v10684_v24, %v10118_v11  ;;  %v8772_v44 = vpack.c.bf16 %v1267_v36, %v1265_v33 }
 0x105   : > { %8099 = vmatmul.mubr.msk.f32.gmra.mrb[14].mxu0 %vm485_vm2, %v8091_v46  ;;  %8755 = vmatprep.subr.bf16.mxu0 %v8754_v52 }
 0x106   : > { %8757 = vmatpush1.bf16.msra.mxu0 %v8756_v51  ;;  %1175 = vmatprep.mubr.f32.mxu0 %v9996_v16  ;;  %v8106_v51 = vld [vmem:[%s14445_s1 + $0xe8] sm:$0xff] }
 0x107   : > { %8759 = vmatprep.subr.bf16.mxu0 %v8758_v47  ;;  %2177 = vrot.lane.b32.xlu1 %v10115_v10, %s10003_s23  ;;  %v10754_v4 = vpop.permute.xlu1 %1449  ;;  %v8102_v10 = vld [vmem:[%s14445_s1 + $0xc8] sm:$0xff] }
 0x108   : > { %2175 = vrot.lane.b32.xlu0 %v10118_v11, %s10003_s23  ;;  %v10763_v57 = vpop.permute.xlu0 %1447  ;;  %v8766_v11 = vpack.c.bf16 %v1264_v55, %v1262_v9  ;;  %v1473_v30 = vsel %vm1463_vm5, %v10754_v4, %v10735_v54 }
 0x109   : > { %8109 = vmatmul.mubr.msk.f32.vlgmr.msra.gmra.mrb[0].mxu0 %vm485_vm2, %v8101_v6  ;;  %v1472_v31 = vsel %vm1463_vm5, %v10763_v57, %v10737_v1  ;;  %v1496_v37 = vmul.f32 %v10777_v18, %v1473_v30  ;;  %v1465_v6 = vsel %vm1463_vm5, %v10735_v54, %v10754_v4  ;;  %v8108_v54 = vld [vmem:[%s14445_s1 + $0xf8] sm:$0xff]  ;;  %v8118_v30 = vld [vmem:[%s14445_s1 + $0x100] sm:$0xff] }
 0x10a   : > { %1181 = vmatprep.mubr.f32.mxu0 %v9996_v16  ;;  %8761 = vmatpush1.bf16.msra.mxu0 %v8760_v8  ;;  %v1494_v38 = vmul.f32 %v10777_v18, %v1472_v31  ;;  %v1464_v8 = vsel %vm1463_vm5, %v10737_v1, %v10763_v57 }
 0x10b   : > { %8763 = vmatprep.subr.bf16.mxu0 %v8762_v5  ;;  %2165 = vrot.lane.b32.xlu1 %v10125_v12, %s10003_s23  ;;  %v1438_v29 = vpop.permute.xlu1 %1437 }
 0x10c   : > { %2163 = vrot.lane.b32.xlu0 %v9951_v32, %s10003_s23  ;;  %v1436_v12 = vpop.permute.xlu0 %1435  ;;  %v8774_v45 = vpack.c.bf16 %v1496_v37, %v1494_v38 }
 0x10d   : > { %8110 = vmatmul.mubr.msk.f32.gmra.mrb[2].mxu0 %vm485_vm2, %v8102_v10  ;;  %v1493_v10 = vmul.f32 %v10831_v7, %v1464_v8 }
 0x10e   : > { %1187 = vmatprep.mubr.f32.mxu0 %v9996_v16  ;;  %8765 = vmatpush1.bf16.msra.mxu0 %v8764_v60  ;;  %v1495_v60 = vmul.f32 %v10831_v7, %v1465_v6 }
 0x10f   : > { %8767 = vmatprep.subr.bf16.mxu0 %v8766_v11  ;;  %2181 = vrot.lane.b32.xlu1 %v9953_v39, %s10003_s23  ;;  %v1454_v0 = vpop.permute.xlu1 %1453 }
 0x110   : > { %2179 = vrot.lane.b32.xlu0 %v9954_v2, %s10003_s23  ;;  %v1452_v40 = vpop.permute.xlu0 %1451  ;;  %v1475_v9 = vsel %vm1463_vm5, %v1454_v0, %v1438_v29  ;;  %v1467_v1 = vsel %vm1463_vm5, %v1438_v29, %v1454_v0  ;;  %v8776_v29 = vpack.c.bf16 %v1495_v60, %v1493_v10  ;;  %v8119_v0 = vld [vmem:[%s14445_s1 + $0x108] sm:$0xff]  ;;  %v8121_v60 = vld [vmem:[%s14445_s1 + $0x118] sm:$0xff] }
 0x111   : > { %8111 = vmatmul.mubr.msk.f32.gmra.mrb[4].mxu0 %vm485_vm2, %v8103_v14  ;;  %v1474_v55 = vsel %vm1463_vm5, %v1452_v40, %v1436_v12  ;;  %v1466_v4 = vsel %vm1463_vm5, %v1436_v12, %v1452_v40  ;;  %v1500_v57 = vmul.f32 %v10777_v18, %v1475_v9  ;;  %v1499_v63 = vmul.f32 %v10831_v7, %v1467_v1  ;;  %v10878_v12 = vld [vmem:[%s14449_s5 + $0x6] ss:$8 sm:$0x3] }
 0x112   : > { %1193 = vmatprep.mubr.f32.mxu0 %v9996_v16  ;;  %8769 = vmatpush1.bf16.msra.mxu0 %v8768_v15  ;;  %v1498_v11 = vmul.f32 %v10777_v18, %v1474_v55  ;;  %v1497_v17 = vmul.f32 %v10831_v7, %v1466_v4  ;;  %v10892_v38 = vrot.slane %v10878_v12, %v10228_v20 }
 0x113   : > { %8771 = vmatprep.subr.bf16.mxu0 %v8770_v13  ;;  %v1442_v46 = vpop.permute.xlu1 %1441 }
 0x114   : > { %v1440_v47 = vpop.permute.xlu0 %1439  ;;  %v8778_v14 = vpack.c.bf16 %v1500_v57, %v1498_v11  ;;  %v8780_v37 = vpack.c.bf16 %v1499_v63, %v1497_v17  ;;  %v8122_v57 = vld [vmem:[%s14445_s1 + $0x120] sm:$0xff] }
 0x115   : > { %8112 = vmatmul.mubr.msk.f32.gmra.mrb[6].mxu0 %vm485_vm2, %v8104_v41 }
 0x116   : > { %1199 = vmatprep.mubr.f32.mxu0 %v9996_v16  ;;  %8773 = vmatpush1.bf16.msra.mxu0 %v8772_v44 }
 0x117   : > { %8775 = vmatprep.subr.bf16.mxu0 %v8774_v45  ;;  %v1458_v49 = vpop.permute.xlu1 %1457 }
 0x118   : > { %v1456_v50 = vpop.permute.xlu0 %1455  ;;  %v1477_v61 = vsel %vm1463_vm5, %v1458_v49, %v1442_v46  ;;  %v1469_v15 = vsel %vm1463_vm5, %v1442_v46, %v1458_v49 }
 0x119   : > { %8113 = vmatmul.mubr.msk.f32.gmra.mrb[8].mxu0 %vm485_vm2, %v8105_v48  ;;  %v1476_v62 = vsel %vm1463_vm5, %v1456_v50, %v1440_v47  ;;  %v1504_v31 = vmul.f32 %v10777_v18, %v1477_v61  ;;  %v1468_v33 = vsel %vm1463_vm5, %v1440_v47, %v1456_v50  ;;  %v1503_v2 = vmul.f32 %v10831_v7, %v1469_v15 }
 0x11a   : > { %1205 = vmatprep.mubr.f32.mxu0 %v9996_v16  ;;  %v1502_v32 = vmul.f32 %v10777_v18, %v1476_v62  ;;  %v1501_v40 = vmul.f32 %v10831_v7, %v1468_v33  ;;  %v8123_v62 = vld [vmem:[%s14445_s1 + $0x128] sm:$0xff] }
 0x11c   : > { %v1446_v52 = vpop.permute.xlu1 %1445  ;;  %v8782_v41 = vpack.c.bf16 %v1504_v31, %v1502_v32 }
 0x11d   : > { %8114 = vmatmul.mubr.msk.f32.gmra.mrb[10].mxu0 %vm485_vm2, %v8106_v51  ;;  %v1444_v53 = vpop.permute.xlu0 %1443 }
 0x11e   : > { %1211 = vmatprep.mubr.f32.mxu0 %v9996_v16 }
 0x121   : > { %8115 = vmatmul.mubr.msk.f32.gmra.mrb[12].mxu0 %vm485_vm2, %v8107_v3  ;;  %v1462_v5 = vpop.permute.xlu1 %1461  ;;  %v1460_v56 = vpop.permute.xlu0 %1459 }
 0x122   : > { %1217 = vmatprep.mubr.f32.mxu0 %v9996_v16  ;;  %v1479_v35 = vsel %vm1463_vm5, %v1462_v5, %v1446_v52  ;;  %v1478_v36 = vsel %vm1463_vm5, %v1460_v56, %v1444_v53  ;;  %v1471_v44 = vsel %vm1463_vm5, %v1446_v52, %v1462_v5  ;;  %v1470_v46 = vsel %vm1463_vm5, %v1444_v53, %v1460_v56  ;;  %v8120_v52 = vld [vmem:[%s14445_s1 + $0x110] sm:$0xff] }
 0x123   : > { %v1508_v45 = vmul.f32 %v10777_v18, %v1479_v35  ;;  %v1506_v47 = vmul.f32 %v10777_v18, %v1478_v36  ;;  %v8784_v53 = vpack.c.bf16 %v1503_v2, %v1501_v40  ;;  %v1507_v3 = vmul.f32 %v10831_v7, %v1471_v44 }
 0x124   : > { %v1505_v6 = vmul.f32 %v10831_v7, %v1470_v46  ;;  %v296_v46 = vld [vmem:[%s14448_s4 + $0x8] sm:$0xff] }
 0x125   : > { %8116 = vmatmul.mubr.msk.f32.gmra.mrb[14].mxu0 %vm485_vm2, %v8108_v54  ;;  %v10865_v21 = vpop.permute.xlu1 %1673  ;;  %v10867_v23 = vpop.permute.xlu0 %1671  ;;  %v8786_v8 = vpack.c.bf16 %v1508_v45, %v1506_v47  ;;  %v295_v47 = vld [vmem:[%s14448_s4] sm:$0xff] }
 0x126   : > { %1366 = vmatprep.mubr.f32.mxu0 %v9996_v16  ;;  %v8788_v10 = vpack.c.bf16 %v1507_v3, %v1505_v6 }
 0x129   : > { %8126 = vmatmul.mubr.msk.f32.vlgmr.msra.gmra.mrb[0].mxu0 %vm485_vm2, %v8118_v30  ;;  %v1690_v13 = vpop.permute.xlu1 %1689  ;;  %v1688_v39 = vpop.permute.xlu0 %1687  ;;  %v10943_v30 = vrot.slane %v10878_v12, %v10237_v22 }
 0x12a   : > { %8777 = vmatpush1.bf16.msra.mxu0 %v8776_v29  ;;  %1372 = vmatprep.mubr.f32.mxu0 %v9996_v16  ;;  %v1713_v48 = vsel %vm1703_vm6, %v1690_v13, %v10865_v21  ;;  %v1712_v49 = vsel %vm1703_vm6, %v1688_v39, %v10867_v23  ;;  %v8124_v29 = vld [vmem:[%s14445_s1 + $0x130] sm:$0xff]  ;;  %v1705_v31 = vsel %vm1703_vm6, %v10865_v21, %v1690_v13  ;;  %v8125_v21 = vld [vmem:[%s14445_s1 + $0x138] sm:$0xff] }
 0x12b   : > { %8779 = vmatprep.subr.bf16.mxu0 %v8778_v14  ;;  %v1736_v9 = vmul.f32 %v10892_v38, %v1713_v48  ;;  %v1734_v55 = vmul.f32 %v10892_v38, %v1712_v49  ;;  %v1704_v32 = vsel %vm1703_vm6, %v10867_v23, %v1688_v39  ;;  %v1735_v12 = vmul.f32 %v10943_v30, %v1705_v31  ;;  %v8135_v49 = vld [vmem:[%s14445_s1 + $0x140] sm:$0xff] }
 0x12c   : > { %v1733_v36 = vmul.f32 %v10943_v30, %v1704_v32 }
 0x12d   : > { %8127 = vmatmul.mubr.msk.f32.gmra.mrb[2].mxu0 %vm485_vm2, %v8119_v0  ;;  %v1678_v50 = vpop.permute.xlu1 %1677  ;;  %v1676_v51 = vpop.permute.xlu0 %1675  ;;  %v8790_v54 = vpack.c.bf16 %v1736_v9, %v1734_v55 }
 0x12e   : > { %1378 = vmatprep.mubr.f32.mxu0 %v9996_v16  ;;  %8781 = vmatpush1.bf16.msra.mxu0 %v8780_v37  ;;  %v8792_v48 = vpack.c.bf16 %v1735_v12, %v1733_v36  ;;  %v8137_v12 = vld [vmem:[%s14445_s1 + $0x150] sm:$0xff] }
 0x12f   : > { %8783 = vmatprep.subr.bf16.mxu0 %v8782_v41 }
 0x131   : > { %8128 = vmatmul.mubr.msk.f32.gmra.mrb[4].mxu0 %vm485_vm2, %v8120_v52  ;;  %v1694_v5 = vpop.permute.xlu1 %1693  ;;  %v1692_v56 = vpop.permute.xlu0 %1691  ;;  %v10994_v52 = vld [vmem:[%s14449_s5 + $0x7] ss:$8 sm:$0x3] }
 0x132   : > { %1384 = vmatprep.mubr.f32.mxu0 %v9996_v16  ;;  %8785 = vmatpush1.bf16.msra.mxu0 %v8784_v53  ;;  %v1715_v14 = vsel %vm1703_vm6, %v1694_v5, %v1678_v50  ;;  %v1714_v15 = vsel %vm1703_vm6, %v1692_v56, %v1676_v51  ;;  %v1707_v23 = vsel %vm1703_vm6, %v1678_v50, %v1694_v5  ;;  %v10004_v53 = vmov 0  }
 0x133   : > { %8787 = vmatprep.subr.bf16.mxu0 %v8786_v8  ;;  %v1706_v37 = vsel %vm1703_vm6, %v1676_v51, %v1692_v56  ;;  %v1740_v13 = vmul.f32 %v10892_v38, %v1715_v14  ;;  %v1738_v39 = vmul.f32 %v10892_v38, %v1714_v15  ;;  %v1739_v40 = vmul.f32 %v10943_v30, %v1707_v23 }
 0x134   : > { %v1737_v41 = vmul.f32 %v10943_v30, %v1706_v37  ;;  %9690 = vset.pattern.permute.xlu1 %v10004_v53  ;;  %9689 = vset.pattern.permute.xlu0 %v10004_v53  ;;  %v11008_v56 = vrot.slane %v10994_v52, %v10228_v20 }
 0x135   : > { %8129 = vmatmul.mubr.msk.f32.gmra.mrb[6].mxu0 %vm485_vm2, %v8121_v60  ;;  %v1682_v1 = vpop.permute.xlu1 %1681  ;;  %v1680_v4 = vpop.permute.xlu0 %1679  ;;  %v8794_v3 = vpack.c.bf16 %v1740_v13, %v1738_v39  ;;  %2398 = vperm.xlu1 %9690, %v296_v46   ;;  %v8138_v46 = vld [vmem:[%s14445_s1 + $0x158] sm:$0xff] }
 0x136   : > { %1390 = vmatprep.mubr.f32.mxu0 %v9996_v16  ;;  %8789 = vmatpush1.bf16.msra.mxu0 %v8788_v10  ;;  %v8796_v5 = vpack.c.bf16 %v1739_v40, %v1737_v41  ;;  %v301_v40 = vld [vmem:[%s14448_s4 + $0x30] sm:$0xff]  ;;  %v302_v41 = vld [vmem:[%s14448_s4 + $0x38] sm:$0xff] }
 0x137   : > { %8791 = vmatprep.subr.bf16.mxu0 %v8790_v54  ;;  %2393 = vperm.xlu0 %9689, %v295_v47   ;;  %v297_v54 = vld [vmem:[%s14448_s4 + $0x10] sm:$0xff] }
 0x139   : > { %8130 = vmatmul.mubr.msk.f32.gmra.mrb[8].mxu0 %vm485_vm2, %v8122_v57  ;;  %v1698_v11 = vpop.permute.xlu1 %1697  ;;  %v1696_v61 = vpop.permute.xlu0 %1695  ;;  %2403 = vperm.xlu1 %9690, %v297_v54  }
 0x13a   : > { %1396 = vmatprep.mubr.f32.mxu0 %v9996_v16  ;;  %v1717_v0 = vsel %vm1703_vm6, %v1698_v11, %v1682_v1  ;;  %v1716_v2 = vsel %vm1703_vm6, %v1696_v61, %v1680_v4  ;;  %v1709_v6 = vsel %vm1703_vm6, %v1682_v1, %v1698_v11  ;;  %v1708_v8 = vsel %vm1703_vm6, %v1680_v4, %v1696_v61  ;;  %v298_v1 = vld [vmem:[%s14448_s4 + $0x18] sm:$0xff]  ;;  %v8136_v4 = vld [vmem:[%s14445_s1 + $0x148] sm:$0xff] }
 0x13b   : > { %v1744_v50 = vmul.f32 %v10892_v38, %v1717_v0  ;;  %v1742_v51 = vmul.f32 %v10892_v38, %v1716_v2  ;;  %v1743_v57 = vmul.f32 %v10943_v30, %v1709_v6  ;;  %v1741_v11 = vmul.f32 %v10943_v30, %v1708_v8  ;;  %2408 = vperm.xlu0 %9689, %v298_v1   ;;  %v8140_v6 = vld [vmem:[%s14445_s1 + $0x168] sm:$0xff] }
 0x13d   : > { %8131 = vmatmul.mubr.msk.f32.gmra.mrb[10].mxu0 %vm485_vm2, %v8123_v62  ;;  %v1686_v63 = vpop.permute.xlu1 %1685  ;;  %v1684_v17 = vpop.permute.xlu0 %1683  ;;  %v8798_v61 = vpack.c.bf16 %v1744_v50, %v1742_v51  ;;  %v8800_v36 = vpack.c.bf16 %v1743_v57, %v1741_v11  ;;  %v8139_v51 = vld [vmem:[%s14445_s1 + $0x160] sm:$0xff] }
 0x13e   : > { %1402 = vmatprep.mubr.f32.mxu0 %v9996_v16 }
 0x141   : > { %8132 = vmatmul.mubr.msk.f32.gmra.mrb[12].mxu0 %vm485_vm2, %v8124_v29  ;;  %v1702_v33 = vpop.permute.xlu1 %1701  ;;  %v1700_v35 = vpop.permute.xlu0 %1699 }
 0x142   : > { %1408 = vmatprep.mubr.f32.mxu0 %v9996_v16  ;;  %v1719_v9 = vsel %vm1703_vm6, %v1702_v33, %v1686_v63  ;;  %v1718_v55 = vsel %vm1703_vm6, %v1700_v35, %v1684_v17  ;;  %v1711_v62 = vsel %vm1703_vm6, %v1686_v63, %v1702_v33  ;;  %v1710_v31 = vsel %vm1703_vm6, %v1684_v17, %v1700_v35  ;;  %v299_v17 = vld [vmem:[%s14448_s4 + $0x20] sm:$0xff]  ;;  %v300_v35 = vld [vmem:[%s14448_s4 + $0x28] sm:$0xff] }
 0x143   : > { %v1748_v29 = vmul.f32 %v10892_v38, %v1719_v9  ;;  %v1746_v32 = vmul.f32 %v10892_v38, %v1718_v55  ;;  %v1745_v23 = vmul.f32 %v10943_v30, %v1710_v31  ;;  %2413 = vperm.xlu1 %9690, %v299_v17   ;;  %2418 = vperm.xlu0 %9689, %v300_v35   ;;  %v8141_v55 = vld [vmem:[%s14445_s1 + $0x170] sm:$0xff]  ;;  %v8152_v35 = vld [vmem:[%s14445_s1 + $0x180] sm:$0xff] }
 0x145   : > { %8133 = vmatmul.mubr.msk.f32.gmra.mrb[14].mxu0 %vm485_vm2, %v8125_v21  ;;  %v10975_v44 = vpop.permute.xlu1 %1913  ;;  %v10977_v45 = vpop.permute.xlu0 %1911  ;;  %v1747_v21 = vmul.f32 %v10943_v30, %v1711_v62  ;;  %v8802_v37 = vpack.c.bf16 %v1748_v29, %v1746_v32 }
 0x146   : > { %1606 = vmatprep.mubr.f32.mxu0 %v9996_v16 }
 0x147   : > { %v8804_v47 = vpack.c.bf16 %v1747_v21, %v1745_v23  ;;  %2423 = vperm.xlu1 %9690, %v301_v40   ;;  %2428 = vperm.xlu0 %9689, %v302_v41   ;;  %v8185_v21 = vld [vmem:[%s14449_s5 + $0x10] ss:$8 sm:$0x3] }
 0x148   : > { %v11141_v40 = vrot.slane %v8185_v21, %v10228_v20 }
 0x149   : > { %8143 = vmatmul.mubr.msk.f32.vlgmr.msra.gmra.mrb[0].mxu0 %vm485_vm2, %v8135_v49  ;;  %v11010_v60 = vpop.permute.xlu1 %1929  ;;  %v11012_v10 = vpop.permute.xlu0 %1927 }
 0x14a   : > { %8793 = vmatpush1.bf16.msra.mxu0 %v8792_v48  ;;  %1612 = vmatprep.mubr.f32.mxu0 %v9996_v16  ;;  %v1953_v14 = vsel %vm1943_vm7, %v11010_v60, %v10975_v44  ;;  %v1952_v15 = vsel %vm1943_vm7, %v11012_v10, %v10977_v45  ;;  %v1945_v54 = vsel %vm1943_vm7, %v10975_v44, %v11010_v60  ;;  %v8142_v44 = vld [vmem:[%s14445_s1 + $0x178] sm:$0xff] }
 0x14b   : > { %8795 = vmatprep.subr.bf16.mxu0 %v8794_v3  ;;  %v1976_v13 = vmul.f32 %v11008_v56, %v1953_v14  ;;  %v1974_v39 = vmul.f32 %v11008_v56, %v1952_v15  ;;  %v1944_v1 = vsel %vm1943_vm7, %v10977_v45, %v11012_v10 }
 0x14d   : > { %8144 = vmatmul.mubr.msk.f32.gmra.mrb[2].mxu0 %vm485_vm2, %v8136_v4  ;;  %v1918_v63 = vpop.permute.xlu1 %1917  ;;  %v1916_v33 = vpop.permute.xlu0 %1915  ;;  %v8806_v48 = vpack.c.bf16 %v1976_v13, %v1974_v39 }
 0x14e   : > { %1618 = vmatprep.mubr.f32.mxu0 %v9996_v16  ;;  %8797 = vmatpush1.bf16.msra.mxu0 %v8796_v5  ;;  %v11083_v5 = vrot.slane %v10994_v52, %v10237_v22 }
 0x14f   : > { %8799 = vmatprep.subr.bf16.mxu0 %v8798_v61 }
 0x150   : > { %v1975_v61 = vmul.f32 %v11083_v5, %v1945_v54  ;;  %v1973_v62 = vmul.f32 %v11083_v5, %v1944_v1 }
 0x151   : > { %8145 = vmatmul.mubr.msk.f32.gmra.mrb[4].mxu0 %vm485_vm2, %v8137_v12  ;;  %v1934_v0 = vpop.permute.xlu1 %1933  ;;  %v1932_v2 = vpop.permute.xlu0 %1931 }
 0x152   : > { %1624 = vmatprep.mubr.f32.mxu0 %v9996_v16  ;;  %8801 = vmatpush1.bf16.msra.mxu0 %v8800_v36  ;;  %v1955_v4 = vsel %vm1943_vm7, %v1934_v0, %v1918_v63  ;;  %v1954_v57 = vsel %vm1943_vm7, %v1932_v2, %v1916_v33  ;;  %v1947_v45 = vsel %vm1943_vm7, %v1918_v63, %v1934_v0 }
 0x153   : > { %8803 = vmatprep.subr.bf16.mxu0 %v8802_v37  ;;  %v1946_v60 = vsel %vm1943_vm7, %v1916_v33, %v1932_v2  ;;  %v1980_v10 = vmul.f32 %v11008_v56, %v1955_v4  ;;  %v1978_v29 = vmul.f32 %v11008_v56, %v1954_v57  ;;  %v1979_v14 = vmul.f32 %v11083_v5, %v1947_v45  ;;  %v8155_v45 = vld [vmem:[%s14445_s1 + $0x198] sm:$0xff] }
 0x154   : > { %v1977_v15 = vmul.f32 %v11083_v5, %v1946_v60  ;;  %v8808_v33 = vpack.c.bf16 %v1975_v61, %v1973_v62 }
 0x155   : > { %8146 = vmatmul.mubr.msk.f32.gmra.mrb[6].mxu0 %vm485_vm2, %v8138_v46  ;;  %v1922_v49 = vpop.permute.xlu1 %1921  ;;  %v1920_v50 = vpop.permute.xlu0 %1919  ;;  %v8810_v23 = vpack.c.bf16 %v1980_v10, %v1978_v29 }
 0x156   : > { %1630 = vmatprep.mubr.f32.mxu0 %v9996_v16  ;;  %8805 = vmatpush1.bf16.msra.mxu0 %v8804_v47  ;;  %v8812_v2 = vpack.c.bf16 %v1979_v14, %v1977_v15  ;;  %v8153_v47 = vld [vmem:[%s14445_s1 + $0x188] sm:$0xff] }
 0x157   : > { %8807 = vmatprep.subr.bf16.mxu0 %v8806_v48  ;;  %v8157_v15 = vld [vmem:[%s14445_s1 + $0x1a8] sm:$0xff] }
 0x159   : > { %8147 = vmatmul.mubr.msk.f32.gmra.mrb[8].mxu0 %vm485_vm2, %v8139_v51  ;;  %v1938_v53 = vpop.permute.xlu1 %1937  ;;  %v1936_v3 = vpop.permute.xlu0 %1935 }
 0x15a   : > { %1636 = vmatprep.mubr.f32.mxu0 %v9996_v16  ;;  %v1957_v31 = vsel %vm1943_vm7, %v1938_v53, %v1922_v49  ;;  %v1956_v32 = vsel %vm1943_vm7, %v1936_v3, %v1920_v50  ;;  %v1949_v37 = vsel %vm1943_vm7, %v1922_v49, %v1938_v53  ;;  %v1948_v13 = vsel %vm1943_vm7, %v1920_v50, %v1936_v3 }
 0x15b   : > { %v1984_v12 = vmul.f32 %v11008_v56, %v1957_v31  ;;  %v1982_v36 = vmul.f32 %v11008_v56, %v1956_v32  ;;  %v1983_v48 = vmul.f32 %v11083_v5, %v1949_v37  ;;  %v1981_v49 = vmul.f32 %v11083_v5, %v1948_v13  ;;  %v8156_v32 = vld [vmem:[%s14445_s1 + $0x1a0] sm:$0xff] }
 0x15d   : > { %8148 = vmatmul.mubr.msk.f32.gmra.mrb[10].mxu0 %vm485_vm2, %v8140_v6  ;;  %v1926_v8 = vpop.permute.xlu1 %1925  ;;  %v1924_v9 = vpop.permute.xlu0 %1923  ;;  %v8814_v50 = vpack.c.bf16 %v1984_v12, %v1982_v36  ;;  %v11191_v12 = vrot.slane %v8185_v21, %v10237_v22 }
 0x15e   : > { %1642 = vmatprep.mubr.f32.mxu0 %v9996_v16 }
 0x161   : > { %8149 = vmatmul.mubr.msk.f32.gmra.mrb[12].mxu0 %vm485_vm2, %v8141_v55  ;;  %v1942_v52 = vpop.permute.xlu1 %1941  ;;  %v1940_v11 = vpop.permute.xlu0 %1939 }
 0x162   : > { %1648 = vmatprep.mubr.f32.mxu0 %v9996_v16  ;;  %v1959_v39 = vsel %vm1943_vm7, %v1942_v52, %v1926_v8  ;;  %v1958_v0 = vsel %vm1943_vm7, %v1940_v11, %v1924_v9  ;;  %v1951_v51 = vsel %vm1943_vm7, %v1926_v8, %v1942_v52  ;;  %v1950_v53 = vsel %vm1943_vm7, %v1924_v9, %v1940_v11  ;;  %v8154_v8 = vld [vmem:[%s14445_s1 + $0x190] sm:$0xff] }
 0x163   : > { %v1988_v20 = vmul.f32 %v11008_v56, %v1959_v39  ;;  %v1986_v3 = vmul.f32 %v11008_v56, %v1958_v0  ;;  %v8816_v9 = vpack.c.bf16 %v1983_v48, %v1981_v49  ;;  %v1987_v4 = vmul.f32 %v11083_v5, %v1951_v51 }
 0x164   : > { %v1985_v57 = vmul.f32 %v11083_v5, %v1950_v53 }
 0x165   : > { %8150 = vmatmul.mubr.msk.f32.gmra.mrb[14].mxu0 %vm485_vm2, %v8142_v44  ;;  %v11117_v63 = vpop.permute.xlu1 %2153  ;;  %v11119_v17 = vpop.permute.xlu0 %2151  ;;  %v8818_v52 = vpack.c.bf16 %v1988_v20, %v1986_v3  ;;  %v8169_v3 = vld [vmem:[%s14445_s1 + $0x1c0] sm:$0xff] }
 0x166   : > { %1846 = vmatprep.mubr.f32.mxu0 %v9996_v16  ;;  %v8820_v60 = vpack.c.bf16 %v1987_v4, %v1985_v57 }
 0x169   : > { %8160 = vmatmul.mubr.msk.f32.vlgmr.msra.gmra.mrb[0].mxu0 %vm485_vm2, %v8152_v35  ;;  %v2170_v41 = vpop.permute.xlu1 %2169  ;;  %v2168_v46 = vpop.permute.xlu0 %2167  ;;  %v8158_v35 = vld [vmem:[%s14445_s1 + $0x1b0] sm:$0xff] }
 0x16a   : > { %8809 = vmatpush1.bf16.msra.mxu0 %v8808_v33  ;;  %1852 = vmatprep.mubr.f32.mxu0 %v9996_v16  ;;  %v2193_v6 = vsel %vm2183_vm8, %v2170_v41, %v11117_v63  ;;  %v2192_v55 = vsel %vm2183_vm8, %v2168_v46, %v11119_v17  ;;  %v2185_v36 = vsel %vm2183_vm8, %v11117_v63, %v2170_v41  ;;  %v8159_v63 = vld [vmem:[%s14445_s1 + $0x1b8] sm:$0xff] }
 0x16b   : > { %8811 = vmatprep.subr.bf16.mxu0 %v8810_v23  ;;  %v2216_v11 = vmul.f32 %v11141_v40, %v2193_v6  ;;  %v2214_v61 = vmul.f32 %v11141_v40, %v2192_v55  ;;  %v2184_v23 = vsel %vm2183_vm8, %v11119_v17, %v2168_v46  ;;  %v2215_v22 = vmul.f32 %v11191_v12, %v2185_v36  ;;  %v8173_v36 = vld [vmem:[%s14445_s1 + $0x1e0] sm:$0xff] }
 0x16c   : > { %v2213_v21 = vmul.f32 %v11191_v12, %v2184_v23  ;;  %v8174_v23 = vld [vmem:[%s14445_s1 + $0x1e8] sm:$0xff] }
 0x16d   : > { %8161 = vmatmul.mubr.msk.f32.gmra.mrb[2].mxu0 %vm485_vm2, %v8153_v47  ;;  %v2158_v54 = vpop.permute.xlu1 %2157  ;;  %v2156_v1 = vpop.permute.xlu0 %2155  ;;  %v8822_v10 = vpack.c.bf16 %v2216_v11, %v2214_v61 }
 0x16e   : > { %1858 = vmatprep.mubr.f32.mxu0 %v9996_v16  ;;  %8813 = vmatpush1.bf16.msra.mxu0 %v8812_v2  ;;  %v8824_v53 = vpack.c.bf16 %v2215_v22, %v2213_v21  ;;  %v8188_v22 = vld [vmem:[%s14445_s1 + $0x210] sm:$0xff]  ;;  %v8189_v21 = vld [vmem:[%s14445_s1 + $0x218] sm:$0xff] }
 0x16f   : > { %8815 = vmatprep.subr.bf16.mxu0 %v8814_v50 }
 0x171   : > { %8162 = vmatmul.mubr.msk.f32.gmra.mrb[4].mxu0 %vm485_vm2, %v8154_v8  ;;  %v2174_v62 = vpop.permute.xlu1 %2173  ;;  %v2172_v44 = vpop.permute.xlu0 %2171 }
 0x172   : > { %1864 = vmatprep.mubr.f32.mxu0 %v9996_v16  ;;  %8817 = vmatpush1.bf16.msra.mxu0 %v8816_v9  ;;  %v2195_v39 = vsel %vm2183_vm8, %v2174_v62, %v2158_v54  ;;  %v2194_v0 = vsel %vm2183_vm8, %v2172_v44, %v2156_v1  ;;  %v2187_v17 = vsel %vm2183_vm8, %v2158_v54, %v2174_v62 }
 0x173   : > { %8819 = vmatprep.subr.bf16.mxu0 %v8818_v52  ;;  %v2186_v2 = vsel %vm2183_vm8, %v2156_v1, %v2172_v44  ;;  %v2220_v41 = vmul.f32 %v11141_v40, %v2195_v39  ;;  %v2218_v46 = vmul.f32 %v11141_v40, %v2194_v0  ;;  %v2219_v49 = vmul.f32 %v11191_v12, %v2187_v17  ;;  %v8170_v52 = vld [vmem:[%s14445_s1 + $0x1c8] sm:$0xff]  ;;  %v8186_v39 = vld [vmem:[%s14445_s1 + $0x200] sm:$0xff] }
 0x174   : > { %v2217_v50 = vmul.f32 %v11191_v12, %v2186_v2  ;;  %v8187_v0 = vld [vmem:[%s14445_s1 + $0x208] sm:$0xff]  ;;  %v8192_v2 = vld [vmem:[%s14445_s1 + $0x230] sm:$0xff] }
 0x175   : > { %8163 = vmatmul.mubr.msk.f32.gmra.mrb[6].mxu0 %vm485_vm2, %v8155_v45  ;;  %v2162_v29 = vpop.permute.xlu1 %2161  ;;  %v2160_v31 = vpop.permute.xlu0 %2159  ;;  %v8826_v54 = vpack.c.bf16 %v2220_v41, %v2218_v46  ;;  %v8191_v17 = vld [vmem:[%s14445_s1 + $0x228] sm:$0xff]  ;;  %v8193_v41 = vld [vmem:[%s14445_s1 + $0x238] sm:$0xff] }
 0x176   : > { %1870 = vmatprep.mubr.f32.mxu0 %v9996_v16  ;;  %8821 = vmatpush1.bf16.msra.mxu0 %v8820_v60  ;;  %v8828_v57 = vpack.c.bf16 %v2219_v49, %v2217_v50 }
 0x177   : > { %8823 = vmatprep.subr.bf16.mxu0 %v8822_v10 }
 0x179   : > { %8164 = vmatmul.mubr.msk.f32.gmra.mrb[8].mxu0 %vm485_vm2, %v8156_v32  ;;  %v2178_v14 = vpop.permute.xlu1 %2177 }
 0x17a   : > { %1876 = vmatprep.mubr.f32.mxu0 %v9996_v16  ;;  %v2176_v33 = vpop.permute.xlu0 %2175  ;;  %v2197_v47 = vsel %vm2183_vm8, %v2178_v14, %v2162_v29  ;;  %v2189_v1 = vsel %vm2183_vm8, %v2162_v29, %v2178_v14  ;;  %v8171_v29 = vld [vmem:[%s14445_s1 + $0x1d0] sm:$0xff] }
 0x17b   : > { %v2196_v48 = vsel %vm2183_vm8, %v2176_v33, %v2160_v31  ;;  %v2224_v6 = vmul.f32 %v11141_v40, %v2197_v47  ;;  %v2188_v8 = vsel %vm2183_vm8, %v2160_v31, %v2176_v33  ;;  %v2223_v11 = vmul.f32 %v11191_v12, %v2189_v1  ;;  %v8172_v33 = vld [vmem:[%s14445_s1 + $0x1d8] sm:$0xff] }
 0x17c   : > { %v2222_v55 = vmul.f32 %v11141_v40, %v2196_v48  ;;  %v2221_v61 = vmul.f32 %v11191_v12, %v2188_v8 }
 0x17d   : > { %8165 = vmatmul.mubr.msk.f32.gmra.mrb[10].mxu0 %vm485_vm2, %v8157_v15  ;;  %v2166_v37 = vpop.permute.xlu1 %2165 }
 0x17e   : > { %1882 = vmatprep.mubr.f32.mxu0 %v9996_v16  ;;  %v2164_v13 = vpop.permute.xlu0 %2163  ;;  %v8830_v62 = vpack.c.bf16 %v2224_v6, %v2222_v55  ;;  %v8832_v31 = vpack.c.bf16 %v2223_v11, %v2221_v61 }
 0x181   : > { %8166 = vmatmul.mubr.msk.f32.gmra.mrb[12].mxu0 %vm485_vm2, %v8158_v35  ;;  %v2182_v51 = vpop.permute.xlu1 %2181 }
 0x182   : > { %1888 = vmatprep.mubr.f32.mxu0 %v9996_v16  ;;  %v2180_v20 = vpop.permute.xlu0 %2179  ;;  %v2199_v9 = vsel %vm2183_vm8, %v2182_v51, %v2166_v37  ;;  %v2191_v44 = vsel %vm2183_vm8, %v2166_v37, %v2182_v51  ;;  %v8175_v37 = vld [vmem:[%s14445_s1 + $0x1f0] sm:$0xff] }
 0x183   : > { %v2198_v4 = vsel %vm2183_vm8, %v2180_v20, %v2164_v13  ;;  %v2228_v45 = vmul.f32 %v11141_v40, %v2199_v9  ;;  %v2190_v60 = vsel %vm2183_vm8, %v2164_v13, %v2180_v20  ;;  %v2227_v32 = vmul.f32 %v11191_v12, %v2191_v44  ;;  %v8176_v13 = vld [vmem:[%s14445_s1 + $0x1f8] sm:$0xff] }
 0x184   : > { %v2226_v10 = vmul.f32 %v11141_v40, %v2198_v4  ;;  %v2225_v14 = vmul.f32 %v11191_v12, %v2190_v60 }
 0x185   : > { %8167 = vmatmul.mubr.msk.f32.gmra.mrb[14].mxu0 %vm485_vm2, %v8159_v63  ;;  %v8190_v63 = vld [vmem:[%s14445_s1 + $0x220] sm:$0xff] }
 0x186   : > { %2086 = vmatprep.mubr.f32.mxu0 %v9996_v16  ;;  %v8834_v15 = vpack.c.bf16 %v2228_v45, %v2226_v10  ;;  %v8836_v35 = vpack.c.bf16 %v2227_v32, %v2225_v14 }
 0x189   : > { %8177 = vmatmul.mubr.msk.f32.vlgmr.msra.gmra.mrb[0].mxu0 %vm485_vm2, %v8169_v3 }
 0x18a   : > { %8825 = vmatpush1.bf16.msra.mxu0 %v8824_v53  ;;  %2092 = vmatprep.mubr.f32.mxu0 %v9996_v16 }
 0x18b   : > { %8827 = vmatprep.subr.bf16.mxu0 %v8826_v54 }
 0x18d   : > { %8178 = vmatmul.mubr.msk.f32.gmra.mrb[2].mxu0 %vm485_vm2, %v8170_v52 }
 0x18e   : > { %2098 = vmatprep.mubr.f32.mxu0 %v9996_v16  ;;  %8829 = vmatpush1.bf16.msra.mxu0 %v8828_v57 }
 0x18f   : > { %8831 = vmatprep.subr.bf16.mxu0 %v8830_v62 }
 0x191   : > { %8179 = vmatmul.mubr.msk.f32.gmra.mrb[4].mxu0 %vm485_vm2, %v8171_v29 }
 0x192   : > { %2104 = vmatprep.mubr.f32.mxu0 %v9996_v16  ;;  %8833 = vmatpush1.bf16.msra.mxu0 %v8832_v31 }
 0x193   : > { %8835 = vmatprep.subr.bf16.mxu0 %v8834_v15 }
 0x195   : > { %8180 = vmatmul.mubr.msk.f32.gmra.mrb[6].mxu0 %vm485_vm2, %v8172_v33 }
 0x196   : > { %2110 = vmatprep.mubr.f32.mxu0 %v9996_v16  ;;  %8837 = vmatpush1.bf16.msra.mxu0 %v8836_v35 }
 0x199   : > { %8181 = vmatmul.mubr.msk.f32.gmra.mrb[8].mxu0 %vm485_vm2, %v8173_v36 }
 0x19a   : > { %2116 = vmatprep.mubr.f32.mxu0 %v9996_v16 }
 0x19d   : > { %8182 = vmatmul.mubr.msk.f32.gmra.mrb[10].mxu0 %vm485_vm2, %v8174_v23 }
 0x19e   : > { %2122 = vmatprep.mubr.f32.mxu0 %v9996_v16 }
 0x1a1   : > { %8183 = vmatmul.mubr.msk.f32.gmra.mrb[12].mxu0 %vm485_vm2, %v8175_v37 }
 0x1a2   : > { %2128 = vmatprep.mubr.f32.mxu0 %v9996_v16 }
 0x1a5   : > { %8184 = vmatmul.mubr.msk.f32.gmra.mrb[14].mxu0 %vm485_vm2, %v8176_v13 }
 0x1a6   : > { %2326 = vmatprep.mubr.f32.mxu0 %v9996_v16 }
 0x1a9   : > { %8194 = vmatmul.mubr.msk.f32.vlgmr.msra.gmra.mrb[0].mxu0 %vm485_vm2, %v8186_v39 }
 0x1aa   : > { %2332 = vmatprep.mubr.f32.mxu0 %v9996_v16 }
 0x1ad   : > { %8195 = vmatmul.mubr.msk.f32.gmra.mrb[2].mxu0 %vm485_vm2, %v8187_v0 }
 0x1ae   : > { %2338 = vmatprep.mubr.f32.mxu0 %v9996_v16 }
 0x1b1   : > { %8196 = vmatmul.mubr.msk.f32.gmra.mrb[4].mxu0 %vm485_vm2, %v8188_v22 }
 0x1b2   : > { %2344 = vmatprep.mubr.f32.mxu0 %v9996_v16 }
 0x1b4   : > { %v2399_v50 = vpop.permute.xlu1 %2398 }
 0x1b5   : > { %8197 = vmatmul.mubr.msk.f32.gmra.mrb[6].mxu0 %vm485_vm2, %v8189_v21 }
 0x1b6   : > { %2350 = vmatprep.mubr.f32.mxu0 %v9996_v16  ;;  %v2394_v46 = vpop.permute.xlu0 %2393 }
 0x1b8   : > { %v2404_v4 = vpop.permute.xlu1 %2403 }
 0x1b9   : > { %8198 = vmatmul.mubr.msk.f32.gmra.mrb[8].mxu0 %vm485_vm2, %v8190_v63 }
 0x1ba   : > { %2356 = vmatprep.mubr.f32.mxu0 %v9996_v16  ;;  %v2409_v10 = vpop.permute.xlu0 %2408 }
 0x1bd   : > { %8199 = vmatmul.mubr.msk.f32.gmra.mrb[10].mxu0 %vm485_vm2, %v8191_v17 }
 0x1be   : > { %2362 = vmatprep.mubr.f32.mxu0 %v9996_v16 }
 0x1c1   : > { %8200 = vmatmul.mubr.msk.f32.gmra.mrb[12].mxu0 %vm485_vm2, %v8192_v2 }
 0x1c2   : > { %2368 = vmatprep.mubr.f32.mxu0 %v9996_v16  ;;  %v2414_v23 = vpop.permute.xlu1 %2413 }
 0x1c5   : > { %8201 = vmatmul.mubr.msk.f32.gmra.mrb[14].mxu0 %vm485_vm2, %v8193_v41 }
 0x1c6   : > { %6064 = vmatprep.mubr.f32.mxu0 %v9996_v16 }
 0x27c   : > { %v2328_v47 = vpop.f32.mrb[0].mxu0 }
 0x27d   : > { %v11324_v48 = vadd.f32 %v2394_v46, %v2328_v47  ;;  %v2330_v49 = vpop.f32.mrb[1].mxu0 }
 0x27e   : > { %v11326_v51 = vadd.f32 %v2394_v46, %v2330_v49  ;;  %v2419_v49 = vpop.permute.xlu0 %2418 }
 0x27f   : > { %v2447_v20 = vsub.f32 0.0, %v11324_v48 }
 0x280   : > { %v2448_v53 = vsub.f32 0.0, %v11326_v51  ;;  %v2334_v3 = vpop.f32.mrb[2].mxu0 }
 0x281   : > { %v2463_v6 = vmul.f32 1.442695, %v2447_v20  ;;  %v11330_v55 = vadd.f32 %v2399_v50, %v2334_v3  ;;  %v2336_v54 = vpop.f32.mrb[3].mxu0 }
 0x282   : > { %v2465_v1 = vmul.f32 1.442695, %v2448_v53  ;;  %v11332_v8 = vadd.f32 %v2399_v50, %v2336_v54 }
 0x283   : > { %9693 = vpow2.f32 %v2463_v6  ;;  %v2449_v9 = vsub.f32 0.0, %v11330_v55 }
 0x284   : > { %9695 = vpow2.f32 %v2465_v1  ;;  %v2450_v57 = vsub.f32 0.0, %v11332_v8  ;;  %v2340_v52 = vpop.f32.mrb[4].mxu0 }
 0x285   : > { %v2467_v11 = vmul.f32 1.442695, %v2449_v9  ;;  %v11336_v61 = vadd.f32 %v2404_v4, %v2340_v52  ;;  %v2342_v62 = vpop.f32.mrb[5].mxu0 }
 0x286   : > { %v2469_v44 = vmul.f32 1.442695, %v2450_v57  ;;  %v11338_v45 = vadd.f32 %v2404_v4, %v2342_v62  ;;  %v2424_v62 = vpop.permute.xlu1 %2423 }
 0x287   : > { %9697 = vpow2.f32 %v2467_v11  ;;  %v2451_v60 = vsub.f32 0.0, %v11336_v61 }
 0x288   : > { %9699 = vpow2.f32 %v2469_v44  ;;  %v2452_v29 = vsub.f32 0.0, %v11338_v45  ;;  %v2346_v31 = vpop.f32.mrb[6].mxu0 }
 0x289   : > { %v2471_v32 = vmul.f32 1.442695, %v2451_v60  ;;  %v11342_v14 = vadd.f32 %v2409_v10, %v2346_v31  ;;  %v2348_v15 = vpop.f32.mrb[7].mxu0 }
 0x28a   : > { %v2473_v33 = vmul.f32 1.442695, %v2452_v29  ;;  %v11344_v35 = vadd.f32 %v2409_v10, %v2348_v15 }
 0x28b   : > { %9701 = vpow2.f32 %v2471_v32  ;;  %v2453_v36 = vsub.f32 0.0, %v11342_v14 }
 0x28c   : > { %9703 = vpow2.f32 %v2473_v33  ;;  %v2454_v37 = vsub.f32 0.0, %v11344_v35  ;;  %v2352_v13 = vpop.f32.mrb[8].mxu0 }
 0x28d   : > { %v9694_v39 = vpop.eup %9693  ;;  %v2475_v0 = vmul.f32 1.442695, %v2453_v36  ;;  %v11348_v22 = vadd.f32 %v2414_v23, %v2352_v13  ;;  %v2354_v21 = vpop.f32.mrb[9].mxu0 }
 0x28e   : > { %v9696_v63 = vpop.eup %9695  ;;  %v2495_v17 = vadd.f32 1.0, %v9694_v39  ;;  %v2477_v2 = vmul.f32 1.442695, %v2454_v37  ;;  %v11350_v41 = vadd.f32 %v2414_v23, %v2354_v21  ;;  %v2429_v39 = vpop.permute.xlu0 %2428 }
 0x28f   : > { %v2496_v46 = vadd.f32 1.0, %v9696_v63  ;;  %9705 = vpow2.f32 %v2475_v0  ;;  %v2455_v47 = vsub.f32 0.0, %v11348_v22 }
 0x290   : > { %9707 = vrcp.f32 %v2495_v17  ;;  %v2456_v50 = vsub.f32 0.0, %v11350_v41  ;;  %v2358_v20 = vpop.f32.mrb[10].mxu0 }
 0x291   : > { %v9698_v53 = vpop.eup %9697  ;;  %9709 = vrcp.f32 %v2496_v46  ;;  %v2479_v3 = vmul.f32 1.442695, %v2455_v47  ;;  %v11354_v6 = vadd.f32 %v2419_v49, %v2358_v20  ;;  %v2360_v54 = vpop.f32.mrb[11].mxu0 }
 0x292   : > { %v9700_v1 = vpop.eup %9699  ;;  %v2497_v9 = vadd.f32 1.0, %v9698_v53  ;;  %9711 = vpow2.f32 %v2477_v2  ;;  %v2481_v4 = vmul.f32 1.442695, %v2456_v50  ;;  %v11356_v57 = vadd.f32 %v2419_v49, %v2360_v54 }
 0x293   : > { %v2498_v52 = vadd.f32 1.0, %v9700_v1  ;;  %9713 = vpow2.f32 %v2479_v3  ;;  %v2457_v11 = vsub.f32 0.0, %v11354_v6 }
 0x294   : > { %9715 = vrcp.f32 %v2497_v9  ;;  %v2458_v44 = vsub.f32 0.0, %v11356_v57  ;;  %v2364_v60 = vpop.f32.mrb[12].mxu0 }
 0x295   : > { %v9702_v10 = vpop.eup %9701  ;;  %9717 = vrcp.f32 %v2498_v52  ;;  %v2483_v29 = vmul.f32 1.442695, %v2457_v11  ;;  %v11360_v31 = vadd.f32 %v2424_v62, %v2364_v60  ;;  %v2366_v32 = vpop.f32.mrb[13].mxu0 }
 0x296   : > { %v9704_v15 = vpop.eup %9703  ;;  %v2499_v33 = vadd.f32 1.0, %v9702_v10  ;;  %9719 = vpow2.f32 %v2481_v4  ;;  %v2485_v36 = vmul.f32 1.442695, %v2458_v44  ;;  %v11362_v23 = vadd.f32 %v2424_v62, %v2366_v32 }
 0x297   : > { %v2500_v37 = vadd.f32 1.0, %v9704_v15  ;;  %9721 = vpow2.f32 %v2483_v29  ;;  %v2459_v13 = vsub.f32 0.0, %v11360_v31 }
 0x298   : > { %9723 = vrcp.f32 %v2499_v33  ;;  %v2460_v0 = vsub.f32 0.0, %v11362_v23  ;;  %v2370_v21 = vpop.f32.mrb[14].mxu0 }
 0x299   : > { %v9706_v63 = vpop.eup %9705  ;;  %9725 = vrcp.f32 %v2500_v37  ;;  %v2487_v17 = vmul.f32 1.442695, %v2459_v13  ;;  %v11366_v2 = vadd.f32 %v2429_v39, %v2370_v21  ;;  %v2372_v46 = vpop.f32.mrb[15].mxu0 }
 0x29a   : > { %v9708_v47 = vpop.eup %9707  ;;  %v2501_v49 = vadd.f32 1.0, %v9706_v63  ;;  %9727 = vpow2.f32 %v2485_v36  ;;  %v2489_v50 = vmul.f32 1.442695, %v2460_v0  ;;  %v11368_v20 = vadd.f32 %v2429_v39, %v2372_v46 }
 0x29b   : > { %v9710_v53 = vpop.eup %9709  ;;  %v11371_v3 = vmul.f32 %v9708_v47, %v11324_v48  ;;  %9729 = vpow2.f32 %v2487_v17  ;;  %v2461_v54 = vsub.f32 0.0, %v11366_v2 }
 0x29c   : > { %v9712_v1 = vpop.eup %9711  ;;  %9731 = vrcp.f32 %v2501_v49  ;;  %v2462_v9 = vsub.f32 0.0, %v11368_v20  ;;  %v11378_v48 = vmul.f32 %v9710_v53, %v11326_v51 }
 0x29d   : > { %v9714_v4 = vpop.eup %9713  ;;  %v2502_v52 = vadd.f32 1.0, %v9712_v1  ;;  %9733 = vpow2.f32 %v2489_v50  ;;  %v2491_v11 = vmul.f32 1.442695, %v2461_v54  ;;  %2631 = vrot.lane.b32.xlu1 %v11371_v3, %s9995_s30 }
 0x29e   : > { %v9716_v62 = vpop.eup %9715  ;;  %v2503_v44 = vadd.f32 1.0, %v9714_v4  ;;  %v2493_v60 = vmul.f32 1.442695, %v2462_v9 }
 0x29f   : > { %v9718_v10 = vpop.eup %9717  ;;  %v11381_v29 = vmul.f32 %v9716_v62, %v11330_v55  ;;  %9735 = vrcp.f32 %v2502_v52 }
 0x2a0   : > { %v9720_v32 = vpop.eup %9719  ;;  %9737 = vrcp.f32 %v2503_v44  ;;  %v11388_v13 = vmul.f32 %v9718_v10, %v11332_v8 }
 0x2a1   : > { %v9722_v15 = vpop.eup %9721  ;;  %v2504_v33 = vadd.f32 1.0, %v9720_v32  ;;  %9739 = vpow2.f32 %v2491_v11  ;;  %2647 = vrot.lane.b32.xlu1 %v11378_v48, %s9995_s30  ;;  %2633 = vrot.lane.b32.xlu0 %v11381_v29, %s9995_s30 }
 0x2a2   : > { %v9724_v36 = vpop.eup %9723  ;;  %v2505_v37 = vadd.f32 1.0, %v9722_v15  ;;  %9741 = vpow2.f32 %v2493_v60 }
 0x2a3   : > { %v9726_v51 = vpop.eup %9725  ;;  %v11391_v55 = vmul.f32 %v9724_v36, %v11336_v61  ;;  %9743 = vrcp.f32 %v2504_v33 }
 0x2a4   : > { %v9728_v39 = vpop.eup %9727  ;;  %9745 = vrcp.f32 %v2505_v37  ;;  %v11398_v8 = vmul.f32 %v9726_v51, %v11338_v45 }
 0x2a5   : > { %v9730_v0 = vpop.eup %9729  ;;  %v2506_v21 = vadd.f32 1.0, %v9728_v39  ;;  %2649 = vrot.lane.b32.xlu0 %v11388_v13, %s9995_s30  ;;  %2635 = vrot.lane.b32.xlu1 %v11391_v55, %s9995_s30 }
 0x2a6   : > { %v9732_v63 = vpop.eup %9731  ;;  %v2507_v17 = vadd.f32 1.0, %v9730_v0 }
 0x2a7   : > { %v9734_v46 = vpop.eup %9733  ;;  %v11401_v61 = vmul.f32 %v9732_v63, %v11342_v14  ;;  %9747 = vrcp.f32 %v2506_v21 }
 0x2a8   : > { %9749 = vrcp.f32 %v2507_v17  ;;  %v2508_v47 = vadd.f32 1.0, %v9734_v46 }
 0x2a9   : > { %v9736_v49 = vpop.eup %9735  ;;  %2651 = vrot.lane.b32.xlu1 %v11398_v8, %s9995_s30  ;;  %2637 = vrot.lane.b32.xlu0 %v11401_v61, %s9995_s30 }
 0x2aa   : > { %v9738_v50 = vpop.eup %9737  ;;  %9751 = vrcp.f32 %v2508_v47  ;;  %v11408_v54 = vmul.f32 %v9736_v49, %v11344_v35 }
 0x2ab   : > { %v9740_v53 = vpop.eup %9739  ;;  %v11411_v45 = vmul.f32 %v9738_v50, %v11348_v22 }
 0x2ac   : > { %v9742_v14 = vpop.eup %9741  ;;  %v2509_v1 = vadd.f32 1.0, %v9740_v53 }
 0x2ad   : > { %v9744_v9 = vpop.eup %9743  ;;  %v2510_v4 = vadd.f32 1.0, %v9742_v14  ;;  %2653 = vrot.lane.b32.xlu0 %v11408_v54, %s9995_s30  ;;  %2639 = vrot.lane.b32.xlu1 %v11411_v45, %s9995_s30 }
 0x2ae   : > { %v9746_v52 = vpop.eup %9745  ;;  %9753 = vrcp.f32 %v2509_v1  ;;  %v11418_v11 = vmul.f32 %v9744_v9, %v11350_v41 }
 0x2af   : > { %v11421_v35 = vmul.f32 %v9746_v52, %v11354_v6  ;;  %9755 = vrcp.f32 %v2510_v4 }
 0x2b1   : > { %v9748_v22 = vpop.eup %9747  ;;  %2655 = vrot.lane.b32.xlu1 %v11418_v11, %s9995_s30  ;;  %2641 = vrot.lane.b32.xlu0 %v11421_v35, %s9995_s30 }
 0x2b2   : > { %v9750_v62 = vpop.eup %9749  ;;  %v11428_v44 = vmul.f32 %v9748_v22, %v11356_v57 }
 0x2b3   : > { %v11431_v60 = vmul.f32 %v9750_v62, %v11360_v31 }
 0x2b4   : > { %v9752_v41 = vpop.eup %9751 }
 0x2b5   : > { %2657 = vrot.lane.b32.xlu0 %v11428_v44, %s9995_s30  ;;  %2643 = vrot.lane.b32.xlu1 %v11431_v60, %s9995_s30  ;;  %v11438_v6 = vmul.f32 %v9752_v41, %v11362_v23 }
 0x2b8   : > { %v9754_v10 = vpop.eup %9753 }
 0x2b9   : > { %v11441_v32 = vmul.f32 %v9754_v10, %v11366_v2  ;;  %2659 = vrot.lane.b32.xlu1 %v11438_v6, %s9995_s30  ;;  %v9756_v57 = vpop.eup %9755 }
 0x2ba   : > { %v11448_v31 = vmul.f32 %v9756_v57, %v11368_v20 }
 0x2bb   : > { %2645 = vrot.lane.b32.xlu0 %v11441_v32, %s9995_s30 }
 0x2bd   : > { %2559 = vrot.lane.b32.xlu1 %v11371_v3, %s9997_s8 }
 0x2bf   : > { %2661 = vrot.lane.b32.xlu0 %v11448_v31, %s9995_s30 }
 0x2c1   : > { %2575 = vrot.lane.b32.xlu1 %v11378_v48, %s9997_s8 }
 0x2c3   : > { %2561 = vrot.lane.b32.xlu0 %v11381_v29, %s9997_s8 }
 0x2c5   : > { %2563 = vrot.lane.b32.xlu1 %v11391_v55, %s9997_s8 }
 0x2c7   : > { %2577 = vrot.lane.b32.xlu0 %v11388_v13, %s9997_s8 }
 0x2c9   : > { %2579 = vrot.lane.b32.xlu1 %v11398_v8, %s9997_s8 }
 0x2cb   : > { %2565 = vrot.lane.b32.xlu0 %v11401_v61, %s9997_s8 }
 0x2cd   : > { %2567 = vrot.lane.b32.xlu1 %v11411_v45, %s9997_s8 }
 0x2cf   : > { %2581 = vrot.lane.b32.xlu0 %v11408_v54, %s9997_s8 }
 0x2d1   : > { %2583 = vrot.lane.b32.xlu1 %v11418_v11, %s9997_s8 }
 0x2d3   : > { %2569 = vrot.lane.b32.xlu0 %v11421_v35, %s9997_s8 }
 0x2d5   : > { %2571 = vrot.lane.b32.xlu1 %v11431_v60, %s9997_s8 }
 0x2d7   : > { %2585 = vrot.lane.b32.xlu0 %v11428_v44, %s9997_s8 }
 0x2d9   : > { %2587 = vrot.lane.b32.xlu1 %v11438_v6, %s9997_s8 }
 0x2db   : > { %2573 = vrot.lane.b32.xlu0 %v11441_v32, %s9997_s8 }
 0x2dd   : > { %2978 = vrot.lane.b32.xlu1 %v11371_v3, %s9998_s9 }
 0x2df   : > { %2589 = vrot.lane.b32.xlu0 %v11448_v31, %s9997_s8 }
 0x2e1   : > { %2994 = vrot.lane.b32.xlu1 %v11378_v48, %s9998_s9 }
 0x2e3   : > { %2980 = vrot.lane.b32.xlu0 %v11381_v29, %s9998_s9 }
 0x2e5   : > { %2982 = vrot.lane.b32.xlu1 %v11391_v55, %s9998_s9 }
 0x2e7   : > { %2996 = vrot.lane.b32.xlu0 %v11388_v13, %s9998_s9 }
 0x2e9   : > { %2998 = vrot.lane.b32.xlu1 %v11398_v8, %s9998_s9 }
 0x2eb   : > { %2984 = vrot.lane.b32.xlu0 %v11401_v61, %s9998_s9 }
 0x2ed   : > { %2986 = vrot.lane.b32.xlu1 %v11411_v45, %s9998_s9 }
 0x2ef   : > { %3000 = vrot.lane.b32.xlu0 %v11408_v54, %s9998_s9 }
 0x2f1   : > { %3002 = vrot.lane.b32.xlu1 %v11418_v11, %s9998_s9 }
 0x2f3   : > { %2988 = vrot.lane.b32.xlu0 %v11421_v35, %s9998_s9 }
 0x2f5   : > { %2990 = vrot.lane.b32.xlu1 %v11431_v60, %s9998_s9 }
 0x2f7   : > { %3004 = vrot.lane.b32.xlu0 %v11428_v44, %s9998_s9 }
 0x2f9   : > { %3006 = vrot.lane.b32.xlu1 %v11438_v6, %s9998_s9 }
 0x2fb   : > { %2992 = vrot.lane.b32.xlu0 %v11441_v32, %s9998_s9 }
 0x2fd   : > { %3204 = vrot.lane.b32.xlu1 %v11371_v3, %s9999_s10 }
 0x2ff   : > { %3008 = vrot.lane.b32.xlu0 %v11448_v31, %s9998_s9 }
 0x301   : > { %3220 = vrot.lane.b32.xlu1 %v11378_v48, %s9999_s10 }
 0x303   : > { %3206 = vrot.lane.b32.xlu0 %v11381_v29, %s9999_s10 }
 0x305   : > { %3208 = vrot.lane.b32.xlu1 %v11391_v55, %s9999_s10 }
 0x307   : > { %3222 = vrot.lane.b32.xlu0 %v11388_v13, %s9999_s10 }
 0x309   : > { %3224 = vrot.lane.b32.xlu1 %v11398_v8, %s9999_s10 }
 0x30b   : > { %3210 = vrot.lane.b32.xlu0 %v11401_v61, %s9999_s10 }
 0x30d   : > { %3212 = vrot.lane.b32.xlu1 %v11411_v45, %s9999_s10 }
 0x30f   : > { %3226 = vrot.lane.b32.xlu0 %v11408_v54, %s9999_s10  ;;  %v2632_v23 = vpop.permute.xlu1 %2631 }
 0x311   : > { %3228 = vrot.lane.b32.xlu1 %v11418_v11, %s9999_s10 }
 0x313   : > { %3214 = vrot.lane.b32.xlu0 %v11421_v35, %s9999_s10  ;;  %v2648_v2 = vpop.permute.xlu1 %2647  ;;  %v2634_v20 = vpop.permute.xlu0 %2633 }
 0x314   : > { %v2671_v15 = vsel %vm430_vm0, %v2648_v2, %v2632_v23  ;;  %v2663_v33 = vsel %vm430_vm0, %v2632_v23, %v2648_v2 }
 0x315   : > { %3216 = vrot.lane.b32.xlu1 %v11431_v60, %s9999_s10  ;;  %v2680_v0 = vmul.f32 %v2663_v33, %v10241_v25  ;;  %v2679_v63 = vmul.f32 %v2671_v15, %v10250_v27 }
 0x317   : > { %3230 = vrot.lane.b32.xlu0 %v11428_v44, %s9999_s10  ;;  %v2650_v36 = vpop.permute.xlu0 %2649  ;;  %v2636_v37 = vpop.permute.xlu1 %2635 }
 0x318   : > { %v2672_v51 = vsel %vm430_vm0, %v2650_v36, %v2634_v20  ;;  %v2664_v39 = vsel %vm430_vm0, %v2634_v20, %v2650_v36 }
 0x319   : > { %3232 = vrot.lane.b32.xlu1 %v11438_v6, %s9999_s10  ;;  %v2682_v21 = vmul.f32 %v2664_v39, %v10241_v25  ;;  %v2681_v17 = vmul.f32 %v2672_v51, %v10250_v27 }
 0x31b   : > { %3218 = vrot.lane.b32.xlu0 %v11441_v32, %s9999_s10  ;;  %v2652_v46 = vpop.permute.xlu1 %2651  ;;  %v2638_v47 = vpop.permute.xlu0 %2637  ;;  %v8838_v49 = vpack.c.bf16 %v2682_v21, %v2680_v0  ;;  %v8840_v50 = vpack.c.bf16 %v2681_v17, %v2679_v63 }
 0x31c   : > { %v2665_v53 = vsel %vm430_vm0, %v2636_v37, %v2652_v46  ;;  %v2673_v14 = vsel %vm430_vm0, %v2652_v46, %v2636_v37 }
 0x31d   : > { %8839 = vmatprep.subr.bf16.mxu1 %v8838_v49  ;;  %3608 = vrot.lane.b32.xlu1 %v11371_v3, %s10000_s13  ;;  %v2683_v22 = vmul.f32 %v2673_v14, %v10250_v27  ;;  %v2684_v62 = vmul.f32 %v2665_v53, %v10241_v25 }
 0x31e   : > { %8841 = vmatpush1.bf16.msra.mxu1 %v8840_v50 }
 0x31f   : > { %3234 = vrot.lane.b32.xlu0 %v11448_v31, %s9999_s10  ;;  %v2654_v1 = vpop.permute.xlu0 %2653  ;;  %v2640_v9 = vpop.permute.xlu1 %2639 }
 0x320   : > { %v2666_v4 = vsel %vm430_vm0, %v2638_v47, %v2654_v1  ;;  %v2674_v52 = vsel %vm430_vm0, %v2654_v1, %v2638_v47 }
 0x321   : > { %v2685_v41 = vmul.f32 %v2674_v52, %v10250_v27  ;;  %v2686_v10 = vmul.f32 %v2666_v4, %v10241_v25  ;;  %3624 = vrot.lane.b32.xlu1 %v11378_v48, %s10000_s13 }
 0x323   : > { %3610 = vrot.lane.b32.xlu0 %v11381_v29, %s10000_s13  ;;  %v2656_v57 = vpop.permute.xlu1 %2655  ;;  %v2642_v23 = vpop.permute.xlu0 %2641  ;;  %v8842_v2 = vpack.c.bf16 %v2686_v10, %v2684_v62  ;;  %v8844_v20 = vpack.c.bf16 %v2685_v41, %v2683_v22 }
 0x324   : > { %v2667_v15 = vsel %vm430_vm0, %v2640_v9, %v2656_v57  ;;  %v2675_v33 = vsel %vm430_vm0, %v2656_v57, %v2640_v9 }
 0x325   : > { %8843 = vmatprep.subr.bf16.mxu1 %v8842_v2  ;;  %3612 = vrot.lane.b32.xlu1 %v11391_v55, %s10000_s13  ;;  %v2687_v0 = vmul.f32 %v2675_v33, %v10250_v27  ;;  %v2688_v21 = vmul.f32 %v2667_v15, %v10241_v25 }
 0x326   : > { %8845 = vmatpush1.bf16.msra.mxu1 %v8844_v20 }
 0x327   : > { %3626 = vrot.lane.b32.xlu0 %v11388_v13, %s10000_s13  ;;  %v2658_v36 = vpop.permute.xlu0 %2657  ;;  %v2644_v37 = vpop.permute.xlu1 %2643 }
 0x328   : > { %v2668_v51 = vsel %vm430_vm0, %v2642_v23, %v2658_v36  ;;  %v2676_v39 = vsel %vm430_vm0, %v2658_v36, %v2642_v23 }
 0x329   : > { %v2689_v63 = vmul.f32 %v2676_v39, %v10250_v27  ;;  %v2690_v17 = vmul.f32 %v2668_v51, %v10241_v25  ;;  %3628 = vrot.lane.b32.xlu1 %v11398_v8, %s10000_s13 }
 0x32b   : > { %3614 = vrot.lane.b32.xlu0 %v11401_v61, %s10000_s13  ;;  %v2660_v46 = vpop.permute.xlu1 %2659  ;;  %v8846_v47 = vpack.c.bf16 %v2690_v17, %v2688_v21  ;;  %v8848_v49 = vpack.c.bf16 %v2689_v63, %v2687_v0 }
 0x32c   : > { %v2669_v14 = vsel %vm430_vm0, %v2644_v37, %v2660_v46  ;;  %v2677_v1 = vsel %vm430_vm0, %v2660_v46, %v2644_v37  ;;  %v8202_v37 = vld [vmem:[%s14446_s2 + $0x40] sm:$0xff] }
 0x32d   : > { %v2646_v50 = vpop.permute.xlu0 %2645  ;;  %8847 = vmatprep.subr.bf16.mxu1 %v8846_v47  ;;  %3616 = vrot.lane.b32.xlu1 %v11411_v45, %s10000_s13  ;;  %v2691_v22 = vmul.f32 %v2677_v1, %v10250_v27  ;;  %v2692_v62 = vmul.f32 %v2669_v14, %v10241_v25 }
 0x32e   : > { %8849 = vmatpush1.bf16.msra.mxu1 %v8848_v49  ;;  %v8203_v49 = vld [vmem:[%s14446_s2 + $0x48] sm:$0xff] }
 0x32f   : > { %3630 = vrot.lane.b32.xlu0 %v11408_v54, %s10000_s13  ;;  %v2560_v53 = vpop.permute.xlu1 %2559 }
 0x331   : > { %v2662_v9 = vpop.permute.xlu0 %2661  ;;  %3632 = vrot.lane.b32.xlu1 %v11418_v11, %s10000_s13 }
 0x332   : > { %v2670_v4 = vsel %vm430_vm0, %v2646_v50, %v2662_v9  ;;  %v2678_v52 = vsel %vm430_vm0, %v2662_v9, %v2646_v50 }
 0x333   : > { %v2693_v41 = vmul.f32 %v2678_v52, %v10250_v27  ;;  %v2694_v10 = vmul.f32 %v2670_v4, %v10241_v25  ;;  %3618 = vrot.lane.b32.xlu0 %v11421_v35, %s10000_s13  ;;  %v2576_v57 = vpop.permute.xlu1 %2575  ;;  %v8204_v52 = vld [vmem:[%s14446_s2 + $0x50] sm:$0xff] }
 0x334   : > { %v2599_v15 = vsel %vm345_vm1, %v2576_v57, %v2560_v53  ;;  %v2591_v36 = vsel %vm345_vm1, %v2560_v53, %v2576_v57 }
 0x335   : > { %v2562_v23 = vpop.permute.xlu0 %2561  ;;  %3620 = vrot.lane.b32.xlu1 %v11431_v60, %s10000_s13  ;;  %v8850_v2 = vpack.c.bf16 %v2694_v10, %v2692_v62  ;;  %v8852_v20 = vpack.c.bf16 %v2693_v41, %v2691_v22  ;;  %v2607_v39 = vmul.f32 %v2599_v15, %v10331_v42  ;;  %v2608_v63 = vmul.f32 %v2591_v36, %v10334_v43  ;;  %v8205_v15 = vld [vmem:[%s14446_s2 + $0x58] sm:$0xff] }
 0x337   : > { %3634 = vrot.lane.b32.xlu0 %v11428_v44, %s10000_s13  ;;  %8851 = vmatprep.subr.bf16.mxu1 %v8850_v2  ;;  %v2564_v33 = vpop.permute.xlu1 %2563 }
 0x338   : > { %8853 = vmatpush1.bf16.msra.mxu1 %v8852_v20 }
 0x339   : > { %v2578_v51 = vpop.permute.xlu0 %2577  ;;  %3636 = vrot.lane.b32.xlu1 %v11438_v6, %s10000_s13 }
 0x33a   : > { %v2592_v0 = vsel %vm345_vm1, %v2562_v23, %v2578_v51  ;;  %v2600_v21 = vsel %vm345_vm1, %v2578_v51, %v2562_v23 }
 0x33b   : > { %v2609_v17 = vmul.f32 %v2600_v21, %v10331_v42  ;;  %v2610_v46 = vmul.f32 %v2592_v0, %v10334_v43  ;;  %3622 = vrot.lane.b32.xlu0 %v11441_v32, %s10000_s13  ;;  %8210 = vmatmul.mubr.msk.f32.vlgmr.msra.gmra.mrb[0].mxu1 %vm485_vm2, %v8202_v37  ;;  %v2580_v47 = vpop.permute.xlu1 %2579  ;;  %v8206_v21 = vld [vmem:[%s14446_s2 + $0x60] sm:$0xff] }
 0x33c   : > { %2798 = vmatprep.mubr.f32.mxu1 %v9996_v16  ;;  %v2601_v1 = vsel %vm345_vm1, %v2580_v47, %v2564_v33  ;;  %v2593_v4 = vsel %vm345_vm1, %v2564_v33, %v2580_v47 }
 0x33d   : > { %v8856_v50 = vpack.c.bf16 %v2609_v17, %v2607_v39  ;;  %v2566_v53 = vpop.permute.xlu0 %2565  ;;  %3834 = vrot.lane.b32.xlu1 %v11371_v3, %s10001_s27  ;;  %v8854_v14 = vpack.c.bf16 %v2610_v46, %v2608_v63  ;;  %v2611_v62 = vmul.f32 %v2601_v1, %v10331_v42  ;;  %v2612_v57 = vmul.f32 %v2593_v4, %v10334_v43  ;;  %v8207_v1 = vld [vmem:[%s14446_s2 + $0x68] sm:$0xff] }
 0x33f   : > { %3638 = vrot.lane.b32.xlu0 %v11448_v31, %s10000_s13  ;;  %8211 = vmatmul.mubr.msk.f32.gmra.mrb[2].mxu1 %vm485_vm2, %v8203_v49  ;;  %v2568_v9 = vpop.permute.xlu1 %2567 }
 0x340   : > { %8855 = vmatprep.subr.bf16.mxu1 %v8854_v14  ;;  %2804 = vmatprep.mubr.f32.mxu1 %v9996_v16 }
 0x341   : > { %8857 = vmatpush1.bf16.msra.mxu1 %v8856_v50  ;;  %v2582_v22 = vpop.permute.xlu0 %2581  ;;  %3850 = vrot.lane.b32.xlu1 %v11378_v48, %s10001_s27 }
 0x342   : > { %v2594_v41 = vsel %vm345_vm1, %v2566_v53, %v2582_v22  ;;  %v2602_v10 = vsel %vm345_vm1, %v2582_v22, %v2566_v53 }
 0x343   : > { %v2613_v23 = vmul.f32 %v2602_v10, %v10331_v42  ;;  %v2614_v2 = vmul.f32 %v2594_v41, %v10334_v43  ;;  %3836 = vrot.lane.b32.xlu0 %v11381_v29, %s10001_s27  ;;  %8212 = vmatmul.mubr.msk.f32.gmra.mrb[4].mxu1 %vm485_vm2, %v8204_v52  ;;  %v2584_v20 = vpop.permute.xlu1 %2583  ;;  %v8208_v10 = vld [vmem:[%s14446_s2 + $0x70] sm:$0xff] }
 0x344   : > { %2810 = vmatprep.mubr.f32.mxu1 %v9996_v16  ;;  %v2603_v51 = vsel %vm345_vm1, %v2584_v20, %v2568_v9  ;;  %v2595_v0 = vsel %vm345_vm1, %v2568_v9, %v2584_v20 }
 0x345   : > { %v8860_v33 = vpack.c.bf16 %v2613_v23, %v2611_v62  ;;  %v2570_v36 = vpop.permute.xlu0 %2569  ;;  %3838 = vrot.lane.b32.xlu1 %v11391_v55, %s10001_s27  ;;  %v8858_v37 = vpack.c.bf16 %v2614_v2, %v2612_v57  ;;  %v2615_v17 = vmul.f32 %v2603_v51, %v10331_v42  ;;  %v2616_v49 = vmul.f32 %v2595_v0, %v10334_v43  ;;  %v8209_v51 = vld [vmem:[%s14446_s2 + $0x78] sm:$0xff] }
 0x347   : > { %3852 = vrot.lane.b32.xlu0 %v11388_v13, %s10001_s27  ;;  %8213 = vmatmul.mubr.msk.f32.gmra.mrb[6].mxu1 %vm485_vm2, %v8205_v15  ;;  %v2572_v39 = vpop.permute.xlu1 %2571 }
 0x348   : > { %8859 = vmatprep.subr.bf16.mxu1 %v8858_v37  ;;  %2816 = vmatprep.mubr.f32.mxu1 %v9996_v16 }
 0x349   : > { %8861 = vmatpush1.bf16.msra.mxu1 %v8860_v33  ;;  %v2586_v63 = vpop.permute.xlu0 %2585  ;;  %3854 = vrot.lane.b32.xlu1 %v11398_v8, %s10001_s27 }
 0x34a   : > { %v2596_v46 = vsel %vm345_vm1, %v2570_v36, %v2586_v63  ;;  %v2604_v47 = vsel %vm345_vm1, %v2586_v63, %v2570_v36 }
 0x34b   : > { %v2617_v50 = vmul.f32 %v2604_v47, %v10331_v42  ;;  %v2618_v53 = vmul.f32 %v2596_v46, %v10334_v43  ;;  %3840 = vrot.lane.b32.xlu0 %v11401_v61, %s10001_s27  ;;  %8214 = vmatmul.mubr.msk.f32.gmra.mrb[8].mxu1 %vm485_vm2, %v8206_v21  ;;  %v2588_v14 = vpop.permute.xlu1 %2587 }
 0x34c   : > { %2822 = vmatprep.mubr.f32.mxu1 %v9996_v16  ;;  %v2605_v22 = vsel %vm345_vm1, %v2588_v14, %v2572_v39  ;;  %v2597_v41 = vsel %vm345_vm1, %v2572_v39, %v2588_v14 }
 0x34d   : > { %v8864_v9 = vpack.c.bf16 %v2617_v50, %v2615_v17  ;;  %v2574_v4 = vpop.permute.xlu0 %2573  ;;  %3842 = vrot.lane.b32.xlu1 %v11411_v45, %s10001_s27  ;;  %v8862_v52 = vpack.c.bf16 %v2618_v53, %v2616_v49  ;;  %v2619_v23 = vmul.f32 %v2605_v22, %v10331_v42  ;;  %v2620_v15 = vmul.f32 %v2597_v41, %v10334_v43  ;;  %v2623_v49 = vld [vmem:[%s14446_s2] sm:$0xff]  ;;  %v2624_v41 = vld [vmem:[%s14446_s2 + $0x8] sm:$0xff] }
 0x34f   : > { %3856 = vrot.lane.b32.xlu0 %v11408_v54, %s10001_s27  ;;  %8215 = vmatmul.mubr.msk.f32.gmra.mrb[10].mxu1 %vm485_vm2, %v8207_v1  ;;  %v2979_v62 = vpop.permute.xlu1 %2978 }
 0x350   : > { %8863 = vmatprep.subr.bf16.mxu1 %v8862_v52  ;;  %2828 = vmatprep.mubr.f32.mxu1 %v9996_v16 }
 0x351   : > { %8865 = vmatpush1.bf16.msra.mxu1 %v8864_v9  ;;  %v2590_v57 = vpop.permute.xlu0 %2589  ;;  %3858 = vrot.lane.b32.xlu1 %v11418_v11, %s10001_s27 }
 0x352   : > { %v2598_v2 = vsel %vm345_vm1, %v2574_v4, %v2590_v57  ;;  %v2606_v20 = vsel %vm345_vm1, %v2590_v57, %v2574_v4 }
 0x353   : > { %v2621_v33 = vmul.f32 %v2606_v20, %v10331_v42  ;;  %v2622_v36 = vmul.f32 %v2598_v2, %v10334_v43  ;;  %3844 = vrot.lane.b32.xlu0 %v11421_v35, %s10001_s27  ;;  %8216 = vmatmul.mubr.msk.f32.gmra.mrb[12].mxu1 %vm485_vm2, %v8208_v10  ;;  %v2995_v37 = vpop.permute.xlu1 %2994 }
 0x354   : > { %2834 = vmatprep.mubr.f32.mxu1 %v9996_v16  ;;  %v3018_v17 = vsel %vm792_vm3, %v2995_v37, %v2979_v62  ;;  %v3010_v46 = vsel %vm792_vm3, %v2979_v62, %v2995_v37 }
 0x355   : > { %v8868_v39 = vpack.c.bf16 %v2621_v33, %v2619_v23  ;;  %v2981_v0 = vpop.permute.xlu0 %2980  ;;  %3846 = vrot.lane.b32.xlu1 %v11431_v60, %s10001_s27  ;;  %v8866_v21 = vpack.c.bf16 %v2622_v36, %v2620_v15  ;;  %v3026_v14 = vmul.f32 %v3018_v17, %v10460_v26  ;;  %v3027_v52 = vmul.f32 %v3010_v46, %v10463_v28  ;;  %v2625_v15 = vld [vmem:[%s14446_s2 + $0x10] sm:$0xff]  ;;  %v2626_v46 = vld [vmem:[%s14446_s2 + $0x18] sm:$0xff] }
 0x357   : > { %3860 = vrot.lane.b32.xlu0 %v11428_v44, %s10001_s27  ;;  %8217 = vmatmul.mubr.msk.f32.gmra.mrb[14].mxu1 %vm485_vm2, %v8209_v51  ;;  %v2983_v63 = vpop.permute.xlu1 %2982 }
 0x358   : > { %8867 = vmatprep.subr.bf16.mxu1 %v8866_v21  ;;  %2929 = vmatprep.mubr.f32.mxu1 %v9996_v16 }
 0x359   : > { %8869 = vmatpush1.bf16.msra.mxu1 %v8868_v39  ;;  %v2997_v47 = vpop.permute.xlu0 %2996  ;;  %3862 = vrot.lane.b32.xlu1 %v11438_v6, %s10001_s27 }
 0x35a   : > { %v3011_v50 = vsel %vm792_vm3, %v2981_v0, %v2997_v47  ;;  %v3019_v53 = vsel %vm792_vm3, %v2997_v47, %v2981_v0 }
 0x35b   : > { %v3028_v1 = vmul.f32 %v3019_v53, %v10460_v26  ;;  %v3029_v9 = vmul.f32 %v3011_v50, %v10463_v28  ;;  %3848 = vrot.lane.b32.xlu0 %v11441_v32, %s10001_s27  ;;  %v2999_v4 = vpop.permute.xlu1 %2998 }
 0x35c   : > { %8218 = vmatmul.mubr.msk.f32.vlgmr.msra.gmra.mrb[0].mxu1 %vm485_vm2, %v2623_v49  ;;  %v3012_v23 = vsel %vm792_vm3, %v2983_v63, %v2999_v4  ;;  %v3020_v2 = vsel %vm792_vm3, %v2999_v4, %v2983_v63 }
 0x35d   : > { %v8872_v22 = vpack.c.bf16 %v3028_v1, %v3026_v14  ;;  %v2985_v62 = vpop.permute.xlu0 %2984  ;;  %2935 = vmatprep.mubr.f32.mxu1 %v9996_v16  ;;  %4060 = vrot.lane.b32.xlu1 %v11371_v3, %s10002_s16  ;;  %v8870_v10 = vpack.c.bf16 %v3029_v9, %v3027_v52  ;;  %v3030_v37 = vmul.f32 %v3020_v2, %v10460_v26  ;;  %v2627_v1 = vld [vmem:[%s14446_s2 + $0x20] sm:$0xff]  ;;  %v2628_v2 = vld [vmem:[%s14446_s2 + $0x28] sm:$0xff] }
 0x35e   : > { %v3031_v51 = vmul.f32 %v3012_v23, %v10463_v28 }
 0x35f   : > { %3864 = vrot.lane.b32.xlu0 %v11448_v31, %s10001_s27  ;;  %v2987_v57 = vpop.permute.xlu1 %2986  ;;  %8871 = vmatprep.subr.bf16.mxu1 %v8870_v10 }
 0x360   : > { %8219 = vmatmul.mubr.msk.f32.gmra.mrb[2].mxu1 %vm485_vm2, %v2624_v41 }
 0x361   : > { %8873 = vmatpush1.bf16.msra.mxu1 %v8872_v22  ;;  %v3001_v20 = vpop.permute.xlu0 %3000  ;;  %2941 = vmatprep.mubr.f32.mxu1 %v9996_v16 }
 0x362   : > { %v3013_v33 = vsel %vm792_vm3, %v2985_v62, %v3001_v20  ;;  %v3021_v36 = vsel %vm792_vm3, %v3001_v20, %v2985_v62  ;;  %4076 = vrot.lane.b32.xlu1 %v11378_v48, %s10002_s16 }
 0x363   : > { %v3032_v39 = vmul.f32 %v3021_v36, %v10460_v26  ;;  %v3033_v0 = vmul.f32 %v3013_v33, %v10463_v28  ;;  %4062 = vrot.lane.b32.xlu0 %v11381_v29, %s10002_s16  ;;  %v3003_v21 = vpop.permute.xlu1 %3002 }
 0x364   : > { %8220 = vmatmul.mubr.msk.f32.gmra.mrb[4].mxu1 %vm485_vm2, %v2625_v15  ;;  %v3014_v50 = vsel %vm792_vm3, %v2987_v57, %v3003_v21  ;;  %v3022_v53 = vsel %vm792_vm3, %v3003_v21, %v2987_v57 }
 0x365   : > { %v8876_v63 = vpack.c.bf16 %v3032_v39, %v3030_v37  ;;  %v2989_v17 = vpop.permute.xlu0 %2988  ;;  %2947 = vmatprep.mubr.f32.mxu1 %v9996_v16  ;;  %v8874_v47 = vpack.c.bf16 %v3033_v0, %v3031_v51  ;;  %v3034_v52 = vmul.f32 %v3022_v53, %v10460_v26  ;;  %v3035_v22 = vmul.f32 %v3014_v50, %v10463_v28  ;;  %v2629_v51 = vld [vmem:[%s14446_s2 + $0x30] sm:$0xff]  ;;  %v2630_v53 = vld [vmem:[%s14446_s2 + $0x38] sm:$0xff] }
 0x366   : > { %4064 = vrot.lane.b32.xlu1 %v11391_v55, %s10002_s16 }
 0x367   : > { %4078 = vrot.lane.b32.xlu0 %v11388_v13, %s10002_s16  ;;  %8875 = vmatprep.subr.bf16.mxu1 %v8874_v47  ;;  %v2991_v49 = vpop.permute.xlu1 %2990 }
 0x368   : > { %8221 = vmatmul.mubr.msk.f32.gmra.mrb[6].mxu1 %vm485_vm2, %v2626_v46 }
 0x369   : > { %8877 = vmatpush1.bf16.msra.mxu1 %v8876_v63  ;;  %v3005_v14 = vpop.permute.xlu0 %3004  ;;  %2953 = vmatprep.mubr.f32.mxu1 %v9996_v16 }
 0x36a   : > { %v3015_v9 = vsel %vm792_vm3, %v2989_v17, %v3005_v14  ;;  %v3023_v4 = vsel %vm792_vm3, %v3005_v14, %v2989_v17  ;;  %4080 = vrot.lane.b32.xlu1 %v11398_v8, %s10002_s16 }
 0x36b   : > { %v3036_v62 = vmul.f32 %v3023_v4, %v10460_v26  ;;  %v3037_v41 = vmul.f32 %v3015_v9, %v10463_v28  ;;  %4066 = vrot.lane.b32.xlu0 %v11401_v61, %s10002_s16  ;;  %v3007_v10 = vpop.permute.xlu1 %3006 }
 0x36c   : > { %8222 = vmatmul.mubr.msk.f32.gmra.mrb[8].mxu1 %vm485_vm2, %v2627_v1  ;;  %v3016_v33 = vsel %vm792_vm3, %v2991_v49, %v3007_v10  ;;  %v3024_v36 = vsel %vm792_vm3, %v3007_v10, %v2991_v49 }
 0x36d   : > { %v8880_v57 = vpack.c.bf16 %v3036_v62, %v3034_v52  ;;  %v2993_v23 = vpop.permute.xlu0 %2992  ;;  %2959 = vmatprep.mubr.f32.mxu1 %v9996_v16  ;;  %v8878_v20 = vpack.c.bf16 %v3037_v41, %v3035_v22  ;;  %v3038_v21 = vmul.f32 %v3024_v36, %v10460_v26  ;;  %v3039_v63 = vmul.f32 %v3016_v33, %v10463_v28  ;;  %v8226_v22 = vld [vmem:[%s14446_s2 + $0x80] sm:$0xff]  ;;  %v8227_v36 = vld [vmem:[%s14446_s2 + $0x88] sm:$0xff] }
 0x36e   : > { %4068 = vrot.lane.b32.xlu1 %v11411_v45, %s10002_s16 }
 0x36f   : > { %4082 = vrot.lane.b32.xlu0 %v11408_v54, %s10002_s16  ;;  %8879 = vmatprep.subr.bf16.mxu1 %v8878_v20  ;;  %v3205_v15 = vpop.permute.xlu1 %3204 }
 0x370   : > { %8223 = vmatmul.mubr.msk.f32.gmra.mrb[10].mxu1 %vm485_vm2, %v2628_v2 }
 0x371   : > { %8881 = vmatpush1.bf16.msra.mxu1 %v8880_v57  ;;  %v3009_v37 = vpop.permute.xlu0 %3008  ;;  %2965 = vmatprep.mubr.f32.mxu1 %v9996_v16 }
 0x372   : > { %v3017_v39 = vsel %vm792_vm3, %v2993_v23, %v3009_v37  ;;  %v3025_v0 = vsel %vm792_vm3, %v3009_v37, %v2993_v23  ;;  %4084 = vrot.lane.b32.xlu1 %v11418_v11, %s10002_s16 }
 0x373   : > { %v3040_v17 = vmul.f32 %v3025_v0, %v10460_v26  ;;  %v3041_v46 = vmul.f32 %v3017_v39, %v10463_v28  ;;  %4070 = vrot.lane.b32.xlu0 %v11421_v35, %s10002_s16  ;;  %v3221_v47 = vpop.permute.xlu1 %3220 }
 0x374   : > { %8224 = vmatmul.mubr.msk.f32.gmra.mrb[12].mxu1 %vm485_vm2, %v2629_v51  ;;  %v3236_v9 = vsel %vm1032_vm4, %v3205_v15, %v3221_v47  ;;  %v3244_v4 = vsel %vm1032_vm4, %v3221_v47, %v3205_v15 }
 0x375   : > { %v8884_v49 = vpack.c.bf16 %v3040_v17, %v3038_v21  ;;  %v3207_v50 = vpop.permute.xlu0 %3206  ;;  %2971 = vmatprep.mubr.f32.mxu1 %v9996_v16  ;;  %v8882_v14 = vpack.c.bf16 %v3041_v46, %v3039_v63  ;;  %v3252_v10 = vmul.f32 %v3244_v4, %v10590_v58  ;;  %v3253_v57 = vmul.f32 %v3236_v9, %v10593_v59  ;;  %v8228_v63 = vld [vmem:[%s14446_s2 + $0x90] sm:$0xff]  ;;  %v8229_v4 = vld [vmem:[%s14446_s2 + $0x98] sm:$0xff] }
 0x376   : > { %4072 = vrot.lane.b32.xlu1 %v11431_v60, %s10002_s16 }
 0x377   : > { %4086 = vrot.lane.b32.xlu0 %v11428_v44, %s10002_s16  ;;  %8883 = vmatprep.subr.bf16.mxu1 %v8882_v14  ;;  %v3209_v1 = vpop.permute.xlu1 %3208 }
 0x378   : > { %8225 = vmatmul.mubr.msk.f32.gmra.mrb[14].mxu1 %vm485_vm2, %v2630_v53 }
 0x379   : > { %8885 = vmatpush1.bf16.msra.mxu1 %v8884_v49  ;;  %v3223_v52 = vpop.permute.xlu0 %3222  ;;  %3139 = vmatprep.mubr.f32.mxu1 %v9996_v16 }
 0x37a   : > { %v3237_v62 = vsel %vm1032_vm4, %v3207_v50, %v3223_v52  ;;  %v3245_v41 = vsel %vm1032_vm4, %v3223_v52, %v3207_v50  ;;  %4088 = vrot.lane.b32.xlu1 %v11438_v6, %s10002_s16 }
 0x37b   : > { %v3254_v23 = vmul.f32 %v3245_v41, %v10590_v58  ;;  %v3255_v2 = vmul.f32 %v3237_v62, %v10593_v59  ;;  %4074 = vrot.lane.b32.xlu0 %v11441_v32, %s10002_s16  ;;  %v3225_v20 = vpop.permute.xlu1 %3224 }
 0x37c   : > { %8234 = vmatmul.mubr.msk.f32.vlgmr.msra.gmra.mrb[0].mxu1 %vm485_vm2, %v8226_v22  ;;  %v3238_v39 = vsel %vm1032_vm4, %v3209_v1, %v3225_v20  ;;  %v3246_v0 = vsel %vm1032_vm4, %v3225_v20, %v3209_v1 }
 0x37d   : > { %v8888_v15 = vpack.c.bf16 %v3254_v23, %v3252_v10  ;;  %v3211_v33 = vpop.permute.xlu0 %3210  ;;  %3145 = vmatprep.mubr.f32.mxu1 %v9996_v16  ;;  %v8886_v37 = vpack.c.bf16 %v3255_v2, %v3253_v57  ;;  %v3256_v47 = vmul.f32 %v3246_v0, %v10590_v58  ;;  %v3257_v49 = vmul.f32 %v3238_v39, %v10593_v59  ;;  %v8230_v57 = vld [vmem:[%s14446_s2 + $0xa0] sm:$0xff]  ;;  %v8231_v0 = vld [vmem:[%s14446_s2 + $0xa8] sm:$0xff] }
 0x37e   : > { %4286 = vrot.lane.b32.xlu1 %v11371_v3, %s10003_s23 }
 0x37f   : > { %4090 = vrot.lane.b32.xlu0 %v11448_v31, %s10002_s16  ;;  %8887 = vmatprep.subr.bf16.mxu1 %v8886_v37  ;;  %v3213_v51 = vpop.permute.xlu1 %3212 }
 0x380   : > { %8235 = vmatmul.mubr.msk.f32.gmra.mrb[2].mxu1 %vm485_vm2, %v8227_v36 }
 0x381   : > { %8889 = vmatpush1.bf16.msra.mxu1 %v8888_v15  ;;  %v3227_v21 = vpop.permute.xlu0 %3226  ;;  %3151 = vmatprep.mubr.f32.mxu1 %v9996_v16 }
 0x382   : > { %v3239_v17 = vsel %vm1032_vm4, %v3211_v33, %v3227_v21  ;;  %v3247_v46 = vsel %vm1032_vm4, %v3227_v21, %v3211_v33  ;;  %4302 = vrot.lane.b32.xlu1 %v11378_v48, %s10003_s23 }
 0x383   : > { %v3258_v50 = vmul.f32 %v3247_v46, %v10590_v58  ;;  %v3259_v53 = vmul.f32 %v3239_v17, %v10593_v59  ;;  %4288 = vrot.lane.b32.xlu0 %v11381_v29, %s10003_s23  ;;  %v3229_v14 = vpop.permute.xlu1 %3228 }
 0x384   : > { %8236 = vmatmul.mubr.msk.f32.gmra.mrb[4].mxu1 %vm485_vm2, %v8228_v63  ;;  %v3240_v62 = vsel %vm1032_vm4, %v3213_v51, %v3229_v14  ;;  %v3248_v41 = vsel %vm1032_vm4, %v3229_v14, %v3213_v51 }
 0x385   : > { %v8892_v1 = vpack.c.bf16 %v3258_v50, %v3256_v47  ;;  %v3215_v9 = vpop.permute.xlu0 %3214  ;;  %3157 = vmatprep.mubr.f32.mxu1 %v9996_v16  ;;  %v8890_v52 = vpack.c.bf16 %v3259_v53, %v3257_v49  ;;  %v3260_v20 = vmul.f32 %v3248_v41, %v10590_v58  ;;  %v3261_v15 = vmul.f32 %v3240_v62, %v10593_v59  ;;  %v8232_v49 = vld [vmem:[%s14446_s2 + $0xb0] sm:$0xff] }
 0x386   : > { %4290 = vrot.lane.b32.xlu1 %v11391_v55, %s10003_s23 }
 0x387   : > { %4304 = vrot.lane.b32.xlu0 %v11388_v13, %s10003_s23  ;;  %8891 = vmatprep.subr.bf16.mxu1 %v8890_v52  ;;  %v3217_v22 = vpop.permute.xlu1 %3216 }
 0x388   : > { %8237 = vmatmul.mubr.msk.f32.gmra.mrb[6].mxu1 %vm485_vm2, %v8229_v4 }
 0x389   : > { %8893 = vmatpush1.bf16.msra.mxu1 %v8892_v1  ;;  %v3231_v10 = vpop.permute.xlu0 %3230  ;;  %3163 = vmatprep.mubr.f32.mxu1 %v9996_v16 }
 0x38a   : > { %v3241_v23 = vsel %vm1032_vm4, %v3215_v9, %v3231_v10  ;;  %v3249_v2 = vsel %vm1032_vm4, %v3231_v10, %v3215_v9  ;;  %4306 = vrot.lane.b32.xlu1 %v11398_v8, %s10003_s23  ;;  %v8233_v10 = vld [vmem:[%s14446_s2 + $0xb8] sm:$0xff] }
 0x38b   : > { %v3262_v33 = vmul.f32 %v3249_v2, %v10590_v58  ;;  %v3263_v36 = vmul.f32 %v3241_v23, %v10593_v59  ;;  %4292 = vrot.lane.b32.xlu0 %v11401_v61, %s10003_s23  ;;  %v3233_v37 = vpop.permute.xlu1 %3232  ;;  %v3431_v23 = vmul.f32 %v11378_v48, %v10684_v24  ;;  %v3432_v2 = vmul.f32 %v11381_v29, %v10696_v34  ;;  %v8242_v48 = vld [vmem:[%s14446_s2 + $0xc0] sm:$0xff] }
 0x38c   : > { %8238 = vmatmul.mubr.msk.f32.gmra.mrb[8].mxu1 %vm485_vm2, %v8230_v57  ;;  %v3242_v17 = vsel %vm1032_vm4, %v3217_v22, %v3233_v37  ;;  %v3250_v46 = vsel %vm1032_vm4, %v3233_v37, %v3217_v22  ;;  %v3433_v22 = vmul.f32 %v11388_v13, %v10684_v24  ;;  %v3435_v29 = vmul.f32 %v11398_v8, %v10684_v24 }
 0x38d   : > { %v8896_v51 = vpack.c.bf16 %v3262_v33, %v3260_v20  ;;  %v3219_v39 = vpop.permute.xlu0 %3218  ;;  %3169 = vmatprep.mubr.f32.mxu1 %v9996_v16  ;;  %v8894_v21 = vpack.c.bf16 %v3263_v36, %v3261_v15  ;;  %v3264_v14 = vmul.f32 %v3250_v46, %v10590_v58  ;;  %v3265_v1 = vmul.f32 %v3242_v17, %v10593_v59 }
 0x38e   : > { %4294 = vrot.lane.b32.xlu1 %v11411_v45, %s10003_s23  ;;  %v8902_v20 = vpack.c.bf16 %v3433_v22, %v3431_v23  ;;  %v3437_v15 = vmul.f32 %v11408_v54, %v10684_v24  ;;  %v3430_v36 = vmul.f32 %v11371_v3, %v10696_v34  ;;  %v3436_v3 = vmul.f32 %v11401_v61, %v10696_v34 }
 0x38f   : > { %4308 = vrot.lane.b32.xlu0 %v11408_v54, %s10003_s23  ;;  %8895 = vmatprep.subr.bf16.mxu1 %v8894_v21  ;;  %v11950_v63 = vpop.permute.xlu1 %3608  ;;  %v8243_v21 = vld [vmem:[%s14446_s2 + $0xc8] sm:$0xff]  ;;  %v3434_v17 = vmul.f32 %v11391_v55, %v10696_v34  ;;  %v3439_v61 = vmul.f32 %v11418_v11, %v10684_v24 }
 0x390   : > { %8239 = vmatmul.mubr.msk.f32.gmra.mrb[10].mxu1 %vm485_vm2, %v8231_v0  ;;  %v8904_v54 = vpack.c.bf16 %v3432_v2, %v3430_v36  ;;  %v3441_v0 = vmul.f32 %v11428_v44, %v10684_v24  ;;  %v8245_v2 = vld [vmem:[%s14446_s2 + $0xd8] sm:$0xff]  ;;  %v309_v36 = vld [vmem:[%s14448_s4 + $0x70] sm:$0xff] }
 0x391   : > { %8897 = vmatpush1.bf16.msra.mxu1 %v8896_v51  ;;  %v3235_v47 = vpop.permute.xlu0 %3234  ;;  %3175 = vmatprep.mubr.f32.mxu1 %v9996_v16  ;;  %v303_v51 = vld [vmem:[%s14448_s4 + $0x40] sm:$0xff] }
 0x392   : > { %v3243_v50 = vsel %vm1032_vm4, %v3219_v39, %v3235_v47  ;;  %v3251_v53 = vsel %vm1032_vm4, %v3235_v47, %v3219_v39  ;;  %4310 = vrot.lane.b32.xlu1 %v11418_v11, %s10003_s23  ;;  %v8906_v39 = vpack.c.bf16 %v3437_v15, %v3435_v29  ;;  %v305_v47 = vld [vmem:[%s14448_s4 + $0x50] sm:$0xff]  ;;  %v8910_v55 = vpack.c.bf16 %v3441_v0, %v3439_v61  ;;  %v304_v11 = vld [vmem:[%s14448_s4 + $0x48] sm:$0xff] }
 0x393   : > { %v3266_v9 = vmul.f32 %v3251_v53, %v10590_v58  ;;  %v3267_v4 = vmul.f32 %v3243_v50, %v10593_v59  ;;  %4296 = vrot.lane.b32.xlu0 %v11421_v35, %s10003_s23  ;;  %v11973_v52 = vpop.permute.xlu1 %3624  ;;  %v3445_v50 = vmul.f32 %v11448_v31, %v10684_v24 }
 0x394   : > { %8240 = vmatmul.mubr.msk.f32.gmra.mrb[12].mxu1 %vm485_vm2, %v8232_v49  ;;  %v3440_v49 = vmul.f32 %v11421_v35, %v10696_v34  ;;  %v8244_v35 = vld [vmem:[%s14446_s2 + $0xd0] sm:$0xff] }
 0x395   : > { %v8900_v62 = vpack.c.bf16 %v3266_v9, %v3264_v14  ;;  %v11978_v41 = vpop.permute.xlu0 %3610  ;;  %3181 = vmatprep.mubr.f32.mxu1 %v9996_v16  ;;  %v8898_v57 = vpack.c.bf16 %v3267_v4, %v3265_v1  ;;  %v3438_v1 = vmul.f32 %v11411_v45, %v10696_v34  ;;  %v3648_v9 = vsel %vm1463_vm5, %v11973_v52, %v11950_v63 }
 0x396   : > { %4298 = vrot.lane.b32.xlu1 %v11431_v60, %s10003_s23  ;;  %v3444_v45 = vmul.f32 %v11441_v32, %v10696_v34 }
 0x397   : > { %4312 = vrot.lane.b32.xlu0 %v11428_v44, %s10003_s23  ;;  %8899 = vmatprep.subr.bf16.mxu1 %v8898_v57  ;;  %v11990_v13 = vpop.permute.xlu1 %3612  ;;  %v8908_v44 = vpack.c.bf16 %v3436_v3, %v3434_v17  ;;  %v8912_v4 = vpack.c.bf16 %v3440_v49, %v3438_v1  ;;  %v306_v57 = vld [vmem:[%s14448_s4 + $0x58] sm:$0xff] }
 0x398   : > { %8241 = vmatmul.mubr.msk.f32.gmra.mrb[14].mxu1 %vm485_vm2, %v8233_v10 }
 0x399   : > { %8901 = vmatpush1.bf16.msra.mxu1 %v8900_v62  ;;  %v11997_v33 = vpop.permute.xlu0 %3626  ;;  %3365 = vmatprep.mubr.f32.mxu1 %v9996_v16  ;;  %v307_v62 = vld [vmem:[%s14448_s4 + $0x60] sm:$0xff] }
 0x39a   : > { %8903 = vmatprep.subr.bf16.mxu1 %v8902_v20  ;;  %4314 = vrot.lane.b32.xlu1 %v11438_v6, %s10003_s23  ;;  %v3649_v53 = vsel %vm1463_vm5, %v11997_v33, %v11978_v41  ;;  %v3657_v20 = vmul.f32 %v3648_v9, %v10777_v18  ;;  %v3641_v49 = vsel %vm1463_vm5, %v11978_v41, %v11997_v33 }
 0x39b   : > { %4300 = vrot.lane.b32.xlu0 %v11441_v32, %s10003_s23  ;;  %v12011_v37 = vpop.permute.xlu1 %3628  ;;  %v3659_v10 = vmul.f32 %v3649_v53, %v10777_v18  ;;  %v3442_v32 = vmul.f32 %v11431_v60, %v10696_v34  ;;  %v3640_v41 = vsel %vm1463_vm5, %v11950_v63, %v11973_v52  ;;  %v3658_v33 = vmul.f32 %v3641_v49, %v10831_v7 }
 0x39c   : > { %8250 = vmatmul.mubr.msk.f32.vlgmr.msra.gmra.mrb[0].mxu1 %vm485_vm2, %v8242_v48  ;;  %v3650_v53 = vsel %vm1463_vm5, %v12011_v37, %v11990_v13  ;;  %v3656_v63 = vmul.f32 %v3640_v41, %v10831_v7 }
 0x39d   : > { %8905 = vmatpush1.bf16.msra.mxu1 %v8904_v54  ;;  %v12021_v8 = vpop.permute.xlu0 %3614  ;;  %3371 = vmatprep.mubr.f32.mxu1 %v9996_v16  ;;  %v8916_v15 = vpack.c.bf16 %v3444_v45, %v3442_v32  ;;  %v8918_v29 = vpack.c.bf16 %v3659_v10, %v3657_v20  ;;  %v308_v54 = vld [vmem:[%s14448_s4 + $0x68] sm:$0xff] }
 0x39e   : > { %8907 = vmatprep.subr.bf16.mxu1 %v8906_v39  ;;  %4514 = vperm.xlu1 %9690, %v303_v51   ;;  %v8246_v51 = vld [vmem:[%s14446_s2 + $0xe0] sm:$0xff]  ;;  %v310_v39 = vld [vmem:[%s14448_s4 + $0x78] sm:$0xff] }
 0x39f   : > { %4316 = vrot.lane.b32.xlu0 %v11448_v31, %s10003_s23  ;;  %v12033_v46 = vpop.permute.xlu1 %3616  ;;  %v3443_v31 = vmul.f32 %v11438_v6, %v10684_v24 }
 0x3a0   : > { %8251 = vmatmul.mubr.msk.f32.gmra.mrb[2].mxu1 %vm485_vm2, %v8243_v21  ;;  %v8247_v21 = vld [vmem:[%s14446_s2 + $0xe8] sm:$0xff] }
 0x3a1   : > { %8909 = vmatpush1.bf16.msra.mxu1 %v8908_v44  ;;  %v12050_v14 = vpop.permute.xlu0 %3630  ;;  %3377 = vmatprep.mubr.f32.mxu1 %v9996_v16  ;;  %v8914_v6 = vpack.c.bf16 %v3445_v50, %v3443_v31  ;;  %v8248_v44 = vld [vmem:[%s14446_s2 + $0xf0] sm:$0xff]  ;;  %v8249_v50 = vld [vmem:[%s14446_s2 + $0xf8] sm:$0xff] }
 0x3a2   : > { %8911 = vmatprep.subr.bf16.mxu1 %v8910_v55  ;;  %4524 = vperm.xlu1 %9690, %v305_v47   ;;  %v3651_v55 = vsel %vm1463_vm5, %v12050_v14, %v12021_v8  ;;  %v3643_v1 = vsel %vm1463_vm5, %v12021_v8, %v12050_v14  ;;  %v3642_v8 = vsel %vm1463_vm5, %v11990_v13, %v12011_v37 }
 0x3a3   : > { %4519 = vperm.xlu0 %9689, %v304_v11   ;;  %v12064_v22 = vpop.permute.xlu1 %3632  ;;  %v3663_v31 = vmul.f32 %v3651_v55, %v10777_v18  ;;  %v3661_v14 = vmul.f32 %v3650_v53, %v10777_v18  ;;  %v3662_v45 = vmul.f32 %v3643_v1, %v10831_v7  ;;  %v3660_v37 = vmul.f32 %v3642_v8, %v10831_v7 }
 0x3a4   : > { %8252 = vmatmul.mubr.msk.f32.gmra.mrb[4].mxu1 %vm485_vm2, %v8244_v35  ;;  %v3652_v10 = vsel %vm1463_vm5, %v12064_v22, %v12033_v46 }
 0x3a5   : > { %8913 = vmatpush1.bf16.msra.mxu1 %v8912_v4  ;;  %v3619_v23 = vpop.permute.xlu0 %3618  ;;  %3383 = vmatprep.mubr.f32.mxu1 %v9996_v16  ;;  %v8258_v4 = vld [vmem:[%s14446_s2 + $0x100] sm:$0xff]  ;;  %v8922_v13 = vpack.c.bf16 %v3663_v31, %v3661_v14 }
 0x3a6   : > { %8915 = vmatprep.subr.bf16.mxu1 %v8914_v6  ;;  %4534 = vperm.xlu1 %9690, %v307_v62   ;;  %v8920_v62 = vpack.c.bf16 %v3658_v33, %v3656_v63  ;;  %v8261_v63 = vld [vmem:[%s14446_s2 + $0x118] sm:$0xff] }
 0x3a7   : > { %4529 = vperm.xlu0 %9689, %v306_v57   ;;  %v12083_v48 = vpop.permute.xlu1 %3620 }
 0x3a8   : > { %8253 = vmatmul.mubr.msk.f32.gmra.mrb[6].mxu1 %vm485_vm2, %v8245_v2 }
 0x3a9   : > { %8917 = vmatpush1.bf16.msra.mxu1 %v8916_v15  ;;  %v3635_v60 = vpop.permute.xlu0 %3634  ;;  %3389 = vmatprep.mubr.f32.mxu1 %v9996_v16  ;;  %v8259_v15 = vld [vmem:[%s14446_s2 + $0x108] sm:$0xff] }
 0x3aa   : > { %8919 = vmatprep.subr.bf16.mxu1 %v8918_v29  ;;  %4544 = vperm.xlu1 %9690, %v309_v36   ;;  %v3653_v52 = vsel %vm1463_vm5, %v3635_v60, %v3619_v23  ;;  %v3645_v57 = vsel %vm1463_vm5, %v3619_v23, %v3635_v60  ;;  %v3644_v23 = vsel %vm1463_vm5, %v12033_v46, %v12064_v22 }
 0x3ab   : > { %4539 = vperm.xlu0 %9689, %v308_v54   ;;  %v12096_v3 = vpop.permute.xlu1 %3636  ;;  %v3667_v2 = vmul.f32 %v3653_v52, %v10777_v18  ;;  %v3665_v36 = vmul.f32 %v3652_v10, %v10777_v18  ;;  %v8924_v29 = vpack.c.bf16 %v3662_v45, %v3660_v37  ;;  %v3666_v54 = vmul.f32 %v3645_v57, %v10831_v7  ;;  %v8262_v45 = vld [vmem:[%s14446_s2 + $0x120] sm:$0xff] }
 0x3ac   : > { %8254 = vmatmul.mubr.msk.f32.gmra.mrb[8].mxu1 %vm485_vm2, %v8246_v51  ;;  %v3654_v60 = vsel %vm1463_vm5, %v12096_v3, %v12083_v48  ;;  %v3664_v22 = vmul.f32 %v3644_v23, %v10831_v7 }
 0x3ad   : > { %v3623_v0 = vpop.permute.xlu0 %3622  ;;  %3395 = vmatprep.mubr.f32.mxu1 %v9996_v16  ;;  %v8926_v46 = vpack.c.bf16 %v3667_v2, %v3665_v36  ;;  %v3669_v55 = vmul.f32 %v3654_v60, %v10777_v18  ;;  %v8263_v2 = vld [vmem:[%s14446_s2 + $0x128] sm:$0xff] }
 0x3af   : > { %4549 = vperm.xlu0 %9689, %v310_v39   ;;  %v12106_v17 = vpop.permute.xlu1 %3834 }
 0x3b0   : > { %8255 = vmatmul.mubr.msk.f32.gmra.mrb[10].mxu1 %vm485_vm2, %v8247_v21 }
 0x3b1   : > { %v3639_v61 = vpop.permute.xlu0 %3638  ;;  %3401 = vmatprep.mubr.f32.mxu1 %v9996_v16 }
 0x3b2   : > { %v3655_v32 = vsel %vm1463_vm5, %v3639_v61, %v3623_v0  ;;  %v3647_v39 = vsel %vm1463_vm5, %v3623_v0, %v3639_v61  ;;  %v8260_v0 = vld [vmem:[%s14446_s2 + $0x110] sm:$0xff]  ;;  %v3646_v61 = vsel %vm1463_vm5, %v12083_v48, %v12096_v3 }
 0x3b3   : > { %v12113_v47 = vpop.permute.xlu1 %3850  ;;  %v3671_v21 = vmul.f32 %v3655_v32, %v10777_v18  ;;  %v3670_v41 = vmul.f32 %v3647_v39, %v10831_v7  ;;  %v3668_v48 = vmul.f32 %v3646_v61, %v10831_v7  ;;  %v8264_v32 = vld [vmem:[%s14446_s2 + $0x130] sm:$0xff] }
 0x3b4   : > { %8256 = vmatmul.mubr.msk.f32.gmra.mrb[12].mxu1 %vm485_vm2, %v8248_v44  ;;  %v3874_v33 = vsel %vm1703_vm6, %v12113_v47, %v12106_v17 }
 0x3b5   : > { %v12124_v11 = vpop.permute.xlu0 %3836  ;;  %3407 = vmatprep.mubr.f32.mxu1 %v9996_v16  ;;  %v8930_v31 = vpack.c.bf16 %v3671_v21, %v3669_v55  ;;  %v3883_v52 = vmul.f32 %v3874_v33, %v10892_v38 }
 0x3b7   : > { %v12139_v35 = vpop.permute.xlu1 %3838 }
 0x3b8   : > { %8257 = vmatmul.mubr.msk.f32.gmra.mrb[14].mxu1 %vm485_vm2, %v8249_v50  ;;  %v8928_v50 = vpack.c.bf16 %v3666_v54, %v3664_v22  ;;  %v8265_v54 = vld [vmem:[%s14446_s2 + $0x138] sm:$0xff] }
 0x3b9   : > { %v12150_v9 = vpop.permute.xlu0 %3852  ;;  %3543 = vmatprep.mubr.f32.mxu1 %v9996_v16 }
 0x3ba   : > { %v3875_v44 = vsel %vm1703_vm6, %v12150_v9, %v12124_v11 }
 0x3bb   : > { %v12166_v6 = vpop.permute.xlu1 %3854  ;;  %v3885_v1 = vmul.f32 %v3875_v44, %v10892_v38  ;;  %v8274_v44 = vld [vmem:[%s14446_s2 + $0x140] sm:$0xff] }
 0x3bc   : > { %8266 = vmatmul.mubr.msk.f32.vlgmr.msra.gmra.mrb[0].mxu1 %vm485_vm2, %v8258_v4  ;;  %v8932_v4 = vpack.c.bf16 %v3670_v41, %v3668_v48  ;;  %v3876_v60 = vsel %vm1703_vm6, %v12166_v6, %v12139_v35  ;;  %v8275_v48 = vld [vmem:[%s14446_s2 + $0x148] sm:$0xff] }
 0x3bd   : > { %8921 = vmatpush1.bf16.msra.mxu1 %v8920_v62  ;;  %v12175_v20 = vpop.permute.xlu0 %3840  ;;  %3549 = vmatprep.mubr.f32.mxu1 %v9996_v16  ;;  %v8934_v14 = vpack.c.bf16 %v3885_v1, %v3883_v52 }
 0x3be   : > { %8923 = vmatprep.subr.bf16.mxu1 %v8922_v13 }
 0x3bf   : > { %v12191_v51 = vpop.permute.xlu1 %3842 }
 0x3c0   : > { %8267 = vmatmul.mubr.msk.f32.gmra.mrb[2].mxu1 %vm485_vm2, %v8259_v15  ;;  %v3867_v15 = vsel %vm1703_vm6, %v12124_v11, %v12150_v9  ;;  %v3866_v11 = vsel %vm1703_vm6, %v12106_v17, %v12113_v47 }
 0x3c1   : > { %8925 = vmatpush1.bf16.msra.mxu1 %v8924_v29  ;;  %v3857_v49 = vpop.permute.xlu0 %3856  ;;  %3555 = vmatprep.mubr.f32.mxu1 %v9996_v16  ;;  %v3884_v9 = vmul.f32 %v3867_v15, %v10943_v30  ;;  %v3882_v22 = vmul.f32 %v3866_v11, %v10943_v30 }
 0x3c2   : > { %8927 = vmatprep.subr.bf16.mxu1 %v8926_v46  ;;  %v3877_v36 = vsel %vm1703_vm6, %v3857_v49, %v12175_v20  ;;  %v3869_v39 = vsel %vm1703_vm6, %v12175_v20, %v3857_v49  ;;  %v3868_v20 = vsel %vm1703_vm6, %v12139_v35, %v12166_v6  ;;  %v3887_v49 = vmul.f32 %v3876_v60, %v10892_v38 }
 0x3c3   : > { %v12216_v53 = vpop.permute.xlu1 %3858  ;;  %v3889_v21 = vmul.f32 %v3877_v36, %v10892_v38  ;;  %v3888_v61 = vmul.f32 %v3869_v39, %v10943_v30  ;;  %v3886_v35 = vmul.f32 %v3868_v20, %v10943_v30 }
 0x3c4   : > { %8268 = vmatmul.mubr.msk.f32.gmra.mrb[4].mxu1 %vm485_vm2, %v8260_v0  ;;  %v8936_v0 = vpack.c.bf16 %v3884_v9, %v3882_v22  ;;  %v3878_v55 = vsel %vm1703_vm6, %v12216_v53, %v12191_v51 }
 0x3c5   : > { %8929 = vmatpush1.bf16.msra.mxu1 %v8928_v50  ;;  %v3845_v3 = vpop.permute.xlu0 %3844  ;;  %3561 = vmatprep.mubr.f32.mxu1 %v9996_v16  ;;  %v8938_v33 = vpack.c.bf16 %v3889_v21, %v3887_v49  ;;  %v8940_v52 = vpack.c.bf16 %v3888_v61, %v3886_v35  ;;  %v8278_v61 = vld [vmem:[%s14446_s2 + $0x160] sm:$0xff]  ;;  %v8280_v35 = vld [vmem:[%s14446_s2 + $0x170] sm:$0xff] }
 0x3c6   : > { %8931 = vmatprep.subr.bf16.mxu1 %v8930_v31 }
 0x3c7   : > { %v12226_v8 = vpop.permute.xlu1 %3846 }
 0x3c8   : > { %8269 = vmatmul.mubr.msk.f32.gmra.mrb[6].mxu1 %vm485_vm2, %v8261_v63  ;;  %v3891_v63 = vmul.f32 %v3878_v55, %v10892_v38 }
 0x3c9   : > { %8933 = vmatpush1.bf16.msra.mxu1 %v8932_v4  ;;  %v3861_v62 = vpop.permute.xlu0 %3860  ;;  %3567 = vmatprep.mubr.f32.mxu1 %v9996_v16 }
 0x3ca   : > { %8935 = vmatprep.subr.bf16.mxu1 %v8934_v14  ;;  %v3879_v17 = vsel %vm1703_vm6, %v3861_v62, %v3845_v3  ;;  %v3871_v50 = vsel %vm1703_vm6, %v3845_v3, %v3861_v62  ;;  %v3870_v3 = vsel %vm1703_vm6, %v12191_v51, %v12216_v53 }
 0x3cb   : > { %v12233_v10 = vpop.permute.xlu1 %3862  ;;  %v3893_v41 = vmul.f32 %v3879_v17, %v10892_v38  ;;  %v3892_v4 = vmul.f32 %v3871_v50, %v10943_v30  ;;  %v3890_v53 = vmul.f32 %v3870_v3, %v10943_v30 }
 0x3cc   : > { %8270 = vmatmul.mubr.msk.f32.gmra.mrb[8].mxu1 %vm485_vm2, %v8262_v45  ;;  %v3880_v14 = vsel %vm1703_vm6, %v12233_v10, %v12226_v8 }
 0x3cd   : > { %v3849_v57 = vpop.permute.xlu0 %3848  ;;  %3573 = vmatprep.mubr.f32.mxu1 %v9996_v16  ;;  %v3895_v36 = vmul.f32 %v3880_v14, %v10892_v38 }
 0x3cf   : > { %v12240_v13 = vpop.permute.xlu1 %4060 }
 0x3d0   : > { %8271 = vmatmul.mubr.msk.f32.gmra.mrb[10].mxu1 %vm485_vm2, %v8263_v2  ;;  %v8942_v2 = vpack.c.bf16 %v3893_v41, %v3891_v63  ;;  %v8279_v41 = vld [vmem:[%s14446_s2 + $0x168] sm:$0xff] }
 0x3d1   : > { %v3865_v37 = vpop.permute.xlu0 %3864  ;;  %3579 = vmatprep.mubr.f32.mxu1 %v9996_v16 }
 0x3d2   : > { %v3881_v6 = vsel %vm1703_vm6, %v3865_v37, %v3849_v57  ;;  %v3873_v62 = vsel %vm1703_vm6, %v3849_v57, %v3865_v37  ;;  %v8276_v57 = vld [vmem:[%s14446_s2 + $0x150] sm:$0xff]  ;;  %v3872_v37 = vsel %vm1703_vm6, %v12226_v8, %v12233_v10  ;;  %v8277_v10 = vld [vmem:[%s14446_s2 + $0x158] sm:$0xff] }
 0x3d3   : > { %v3897_v45 = vmul.f32 %v3881_v6, %v10892_v38  ;;  %v3896_v11 = vmul.f32 %v3873_v62, %v10943_v30  ;;  %v3894_v22 = vmul.f32 %v3872_v37, %v10943_v30 }
 0x3d4   : > { %8272 = vmatmul.mubr.msk.f32.gmra.mrb[12].mxu1 %vm485_vm2, %v8264_v32  ;;  %v12252_v23 = vpop.permute.xlu1 %4076 }
 0x3d5   : > { %v12257_v29 = vpop.permute.xlu0 %4062  ;;  %3585 = vmatprep.mubr.f32.mxu1 %v9996_v16  ;;  %v4100_v9 = vsel %vm1943_vm7, %v12252_v23, %v12240_v13  ;;  %v8946_v39 = vpack.c.bf16 %v3897_v45, %v3895_v36 }
 0x3d6   : > { %v4109_v17 = vmul.f32 %v4100_v9, %v11008_v56 }
 0x3d8   : > { %8273 = vmatmul.mubr.msk.f32.gmra.mrb[14].mxu1 %vm485_vm2, %v8265_v54  ;;  %v12277_v46 = vpop.permute.xlu1 %4064  ;;  %v8944_v54 = vpack.c.bf16 %v3892_v4, %v3890_v53  ;;  %v4092_v4 = vsel %vm1943_vm7, %v12240_v13, %v12252_v23  ;;  %v8290_v53 = vld [vmem:[%s14446_s2 + $0x180] sm:$0xff] }
 0x3d9   : > { %v12282_v47 = vpop.permute.xlu0 %4078  ;;  %3769 = vmatprep.mubr.f32.mxu1 %v9996_v16 }
 0x3da   : > { %v4101_v32 = vsel %vm1943_vm7, %v12282_v47, %v12257_v29 }
 0x3db   : > { %v4111_v60 = vmul.f32 %v4101_v32, %v11008_v56 }
 0x3dc   : > { %8282 = vmatmul.mubr.msk.f32.vlgmr.msra.gmra.mrb[0].mxu1 %vm485_vm2, %v8274_v44  ;;  %v12302_v1 = vpop.permute.xlu1 %4080  ;;  %v8948_v44 = vpack.c.bf16 %v3896_v11, %v3894_v22 }
 0x3dd   : > { %8937 = vmatpush1.bf16.msra.mxu1 %v8936_v0  ;;  %v12307_v31 = vpop.permute.xlu0 %4066  ;;  %3775 = vmatprep.mubr.f32.mxu1 %v9996_v16  ;;  %v8950_v20 = vpack.c.bf16 %v4111_v60, %v4109_v17  ;;  %v8291_v60 = vld [vmem:[%s14446_s2 + $0x188] sm:$0xff] }
 0x3de   : > { %8939 = vmatprep.subr.bf16.mxu1 %v8938_v33 }
 0x3e0   : > { %8283 = vmatmul.mubr.msk.f32.gmra.mrb[2].mxu1 %vm485_vm2, %v8275_v48  ;;  %v12327_v51 = vpop.permute.xlu1 %4068  ;;  %v4093_v48 = vsel %vm1943_vm7, %v12257_v29, %v12282_v47  ;;  %v4102_v47 = vsel %vm1943_vm7, %v12302_v1, %v12277_v46 }
 0x3e1   : > { %8941 = vmatpush1.bf16.msra.mxu1 %v8940_v52  ;;  %v4083_v15 = vpop.permute.xlu0 %4082  ;;  %3781 = vmatprep.mubr.f32.mxu1 %v9996_v16  ;;  %v8281_v52 = vld [vmem:[%s14446_s2 + $0x178] sm:$0xff]  ;;  %v4110_v29 = vmul.f32 %v4093_v48, %v11083_v5  ;;  %v4113_v32 = vmul.f32 %v4102_v47, %v11008_v56 }
 0x3e2   : > { %8943 = vmatprep.subr.bf16.mxu1 %v8942_v2  ;;  %v4103_v3 = vsel %vm1943_vm7, %v4083_v15, %v12307_v31  ;;  %v4095_v14 = vsel %vm1943_vm7, %v12307_v31, %v4083_v15  ;;  %v4108_v2 = vmul.f32 %v4092_v4, %v11083_v5  ;;  %v4094_v31 = vsel %vm1943_vm7, %v12277_v46, %v12302_v1 }
 0x3e3   : > { %v4115_v62 = vmul.f32 %v4103_v3, %v11008_v56  ;;  %v4112_v9 = vmul.f32 %v4094_v31, %v11083_v5 }
 0x3e4   : > { %8284 = vmatmul.mubr.msk.f32.gmra.mrb[4].mxu1 %vm485_vm2, %v8276_v57  ;;  %v4085_v21 = vpop.permute.xlu1 %4084  ;;  %v8952_v15 = vpack.c.bf16 %v4110_v29, %v4108_v2  ;;  %v4114_v57 = vmul.f32 %v4095_v14, %v11083_v5 }
 0x3e5   : > { %8945 = vmatpush1.bf16.msra.mxu1 %v8944_v54  ;;  %v4071_v8 = vpop.permute.xlu0 %4070  ;;  %3787 = vmatprep.mubr.f32.mxu1 %v9996_v16  ;;  %v4104_v37 = vsel %vm1943_vm7, %v4085_v21, %v12327_v51  ;;  %v8954_v11 = vpack.c.bf16 %v4115_v62, %v4113_v32  ;;  %v8295_v32 = vld [vmem:[%s14446_s2 + $0x1a8] sm:$0xff] }
 0x3e6   : > { %8947 = vmatprep.subr.bf16.mxu1 %v8946_v39  ;;  %v4096_v39 = vsel %vm1943_vm7, %v12327_v51, %v4085_v21  ;;  %v4117_v22 = vmul.f32 %v4104_v37, %v11008_v56  ;;  %v8296_v37 = vld [vmem:[%s14446_s2 + $0x1b0] sm:$0xff] }
 0x3e7   : > { %v4116_v21 = vmul.f32 %v4096_v39, %v11083_v5 }
 0x3e8   : > { %8285 = vmatmul.mubr.msk.f32.gmra.mrb[6].mxu1 %vm485_vm2, %v8277_v10  ;;  %v12357_v49 = vpop.permute.xlu1 %4072  ;;  %v8956_v10 = vpack.c.bf16 %v4114_v57, %v4112_v9  ;;  %v8297_v9 = vld [vmem:[%s14446_s2 + $0x1b8] sm:$0xff] }
 0x3e9   : > { %8949 = vmatpush1.bf16.msra.mxu1 %v8948_v44  ;;  %v4087_v0 = vpop.permute.xlu0 %4086  ;;  %3793 = vmatprep.mubr.f32.mxu1 %v9996_v16 }
 0x3ea   : > { %8951 = vmatprep.subr.bf16.mxu1 %v8950_v20  ;;  %v4105_v13 = vsel %vm1943_vm7, %v4087_v0, %v4071_v8  ;;  %v4097_v36 = vsel %vm1943_vm7, %v4071_v8, %v4087_v0 }
 0x3eb   : > { %v4119_v54 = vmul.f32 %v4105_v13, %v11008_v56  ;;  %v4118_v17 = vmul.f32 %v4097_v36, %v11083_v5 }
 0x3ec   : > { %8286 = vmatmul.mubr.msk.f32.gmra.mrb[8].mxu1 %vm485_vm2, %v8278_v61  ;;  %v4089_v55 = vpop.permute.xlu1 %4088 }
 0x3ed   : > { %v4075_v50 = vpop.permute.xlu0 %4074  ;;  %3799 = vmatprep.mubr.f32.mxu1 %v9996_v16  ;;  %v4106_v44 = vsel %vm1943_vm7, %v4089_v55, %v12357_v49  ;;  %v8958_v51 = vpack.c.bf16 %v4119_v54, %v4117_v22  ;;  %v8960_v48 = vpack.c.bf16 %v4118_v17, %v4116_v21 }
 0x3f0   : > { %8287 = vmatmul.mubr.msk.f32.gmra.mrb[10].mxu1 %vm485_vm2, %v8279_v41  ;;  %v12373_v6 = vpop.permute.xlu1 %4286  ;;  %v8292_v41 = vld [vmem:[%s14446_s2 + $0x190] sm:$0xff] }
 0x3f1   : > { %v4091_v33 = vpop.permute.xlu0 %4090  ;;  %3805 = vmatprep.mubr.f32.mxu1 %v9996_v16 }
 0x3f2   : > { %v4107_v46 = vsel %vm1943_vm7, %v4091_v33, %v4075_v50  ;;  %v4099_v20 = vsel %vm1943_vm7, %v4075_v50, %v4091_v33  ;;  %v4098_v50 = vsel %vm1943_vm7, %v12357_v49, %v4089_v55  ;;  %v4121_v33 = vmul.f32 %v4106_v44, %v11008_v56  ;;  %v8293_v55 = vld [vmem:[%s14446_s2 + $0x198] sm:$0xff] }
 0x3f3   : > { %v4123_v0 = vmul.f32 %v4107_v46, %v11008_v56  ;;  %v4122_v3 = vmul.f32 %v4099_v20, %v11083_v5  ;;  %v4120_v49 = vmul.f32 %v4098_v50, %v11083_v5 }
 0x3f4   : > { %8288 = vmatmul.mubr.msk.f32.gmra.mrb[12].mxu1 %vm485_vm2, %v8280_v35  ;;  %v12402_v45 = vpop.permute.xlu1 %4302 }
 0x3f5   : > { %v12383_v63 = vpop.permute.xlu0 %4288  ;;  %3811 = vmatprep.mubr.f32.mxu1 %v9996_v16  ;;  %v8962_v47 = vpack.c.bf16 %v4123_v0, %v4121_v33  ;;  %v8964_v62 = vpack.c.bf16 %v4122_v3, %v4120_v49  ;;  %v4318_v46 = vsel %vm2183_vm8, %v12373_v6, %v12402_v45 }
 0x3f8   : > { %8289 = vmatmul.mubr.msk.f32.gmra.mrb[14].mxu1 %vm485_vm2, %v8281_v52  ;;  %v12440_v8 = vpop.permute.xlu1 %4290  ;;  %v4326_v52 = vsel %vm2183_vm8, %v12402_v45, %v12373_v6  ;;  %v8306_v45 = vld [vmem:[%s14446_s2 + $0x1c0] sm:$0xff] }
 0x3f9   : > { %v12408_v23 = vpop.permute.xlu0 %4304  ;;  %3995 = vmatprep.mubr.f32.mxu1 %v9996_v16  ;;  %v4335_v14 = vmul.f32 %v4326_v52, %v11141_v40 }
 0x3fa   : > { %v4327_v61 = vsel %vm2183_vm8, %v12408_v23, %v12383_v63  ;;  %v4319_v36 = vsel %vm2183_vm8, %v12383_v63, %v12408_v23 }
 0x3fb   : > { %v4337_v4 = vmul.f32 %v4327_v61, %v11141_v40  ;;  %v4336_v63 = vmul.f32 %v4319_v36, %v11191_v12  ;;  %v8310_v36 = vld [vmem:[%s14446_s2 + $0x1e0] sm:$0xff] }
 0x3fc   : > { %8298 = vmatmul.mubr.msk.f32.vlgmr.msra.gmra.mrb[0].mxu1 %vm485_vm2, %v8290_v53  ;;  %v4307_v29 = vpop.permute.xlu1 %4306  ;;  %v8294_v53 = vld [vmem:[%s14446_s2 + $0x1a0] sm:$0xff] }
 0x3fd   : > { %8953 = vmatpush1.bf16.msra.mxu1 %v8952_v15  ;;  %v12430_v1 = vpop.permute.xlu0 %4292  ;;  %4001 = vmatprep.mubr.f32.mxu1 %v9996_v16  ;;  %v8966_v13 = vpack.c.bf16 %v4337_v4, %v4335_v14  ;;  %v4328_v23 = vsel %vm2183_vm8, %v4307_v29, %v12440_v8  ;;  %v4320_v17 = vsel %vm2183_vm8, %v12440_v8, %v4307_v29 }
 0x3fe   : > { %8955 = vmatprep.subr.bf16.mxu1 %v8954_v11  ;;  %v4338_v8 = vmul.f32 %v4320_v17, %v11191_v12 }
 0x400   : > { %8299 = vmatmul.mubr.msk.f32.gmra.mrb[2].mxu1 %vm485_vm2, %v8291_v60  ;;  %v4295_v31 = vpop.permute.xlu1 %4294 }
 0x401   : > { %8957 = vmatpush1.bf16.msra.mxu1 %v8956_v10  ;;  %4007 = vmatprep.mubr.f32.mxu1 %v9996_v16  ;;  %v4309_v35 = vpop.permute.xlu0 %4308  ;;  %v4334_v10 = vmul.f32 %v4318_v46, %v11191_v12  ;;  %v8322_v46 = vld [vmem:[%s14446_s2 + $0x200] sm:$0xff] }
 0x402   : > { %8959 = vmatprep.subr.bf16.mxu1 %v8958_v51  ;;  %v4329_v11 = vsel %vm2183_vm8, %v4309_v35, %v12430_v1  ;;  %v4321_v39 = vsel %vm2183_vm8, %v12430_v1, %v4309_v35  ;;  %v4339_v1 = vmul.f32 %v4328_v23, %v11141_v40  ;;  %v8307_v35 = vld [vmem:[%s14446_s2 + $0x1c8] sm:$0xff]  ;;  %v8325_v23 = vld [vmem:[%s14446_s2 + $0x218] sm:$0xff] }
 0x403   : > { %v4341_v22 = vmul.f32 %v4329_v11, %v11141_v40  ;;  %v8968_v20 = vpack.c.bf16 %v4336_v63, %v4334_v10  ;;  %v4340_v0 = vmul.f32 %v4321_v39, %v11191_v12  ;;  %v8312_v11 = vld [vmem:[%s14446_s2 + $0x1f0] sm:$0xff]  ;;  %v8326_v39 = vld [vmem:[%s14446_s2 + $0x220] sm:$0xff] }
 0x404   : > { %8300 = vmatmul.mubr.msk.f32.gmra.mrb[4].mxu1 %vm485_vm2, %v8292_v41  ;;  %v4311_v57 = vpop.permute.xlu1 %4310  ;;  %v8324_v63 = vld [vmem:[%s14446_s2 + $0x210] sm:$0xff] }
 0x405   : > { %8961 = vmatpush1.bf16.msra.mxu1 %v8960_v48  ;;  %4013 = vmatprep.mubr.f32.mxu1 %v9996_v16  ;;  %v4297_v2 = vpop.permute.xlu0 %4296  ;;  %v4330_v51 = vsel %vm2183_vm8, %v4311_v57, %v4295_v31  ;;  %v8970_v50 = vpack.c.bf16 %v4341_v22, %v4339_v1  ;;  %v4322_v48 = vsel %vm2183_vm8, %v4295_v31, %v4311_v57  ;;  %v8309_v57 = vld [vmem:[%s14446_s2 + $0x1d8] sm:$0xff]  ;;  %v8327_v22 = vld [vmem:[%s14446_s2 + $0x228] sm:$0xff]  ;;  %v8328_v10 = vld [vmem:[%s14446_s2 + $0x230] sm:$0xff] }
 0x406   : > { %8963 = vmatprep.subr.bf16.mxu1 %v8962_v47  ;;  %v4343_v3 = vmul.f32 %v4330_v51, %v11141_v40  ;;  %v8972_v52 = vpack.c.bf16 %v4340_v0, %v4338_v8  ;;  %v4342_v14 = vmul.f32 %v4322_v48, %v11191_v12 }
 0x408   : > { %8301 = vmatmul.mubr.msk.f32.gmra.mrb[6].mxu1 %vm485_vm2, %v8293_v55  ;;  %v4299_v60 = vpop.permute.xlu1 %4298 }
 0x409   : > { %8965 = vmatpush1.bf16.msra.mxu1 %v8964_v62  ;;  %4019 = vmatprep.mubr.f32.mxu1 %v9996_v16  ;;  %v4313_v15 = vpop.permute.xlu0 %4312  ;;  %v8308_v62 = vld [vmem:[%s14446_s2 + $0x1d0] sm:$0xff] }
 0x40a   : > { %8967 = vmatprep.subr.bf16.mxu1 %v8966_v13  ;;  %v4331_v6 = vsel %vm2183_vm8, %v4313_v15, %v4297_v2  ;;  %v4323_v21 = vsel %vm2183_vm8, %v4297_v2, %v4313_v15 }
 0x40b   : > { %v4345_v61 = vmul.f32 %v4331_v6, %v11141_v40  ;;  %v4344_v4 = vmul.f32 %v4323_v21, %v11191_v12  ;;  %v8329_v6 = vld [vmem:[%s14446_s2 + $0x238] sm:$0xff] }
 0x40c   : > { %8302 = vmatmul.mubr.msk.f32.gmra.mrb[8].mxu1 %vm485_vm2, %v8294_v53  ;;  %v4315_v41 = vpop.permute.xlu1 %4314 }
 0x40d   : > { %4025 = vmatprep.mubr.f32.mxu1 %v9996_v16  ;;  %v4301_v54 = vpop.permute.xlu0 %4300  ;;  %v4332_v29 = vsel %vm2183_vm8, %v4315_v41, %v4299_v60  ;;  %v8974_v55 = vpack.c.bf16 %v4345_v61, %v4343_v3  ;;  %v4324_v2 = vsel %vm2183_vm8, %v4299_v60, %v4315_v41  ;;  %v8976_v53 = vpack.c.bf16 %v4344_v4, %v4342_v14  ;;  %v8323_v60 = vld [vmem:[%s14446_s2 + $0x208] sm:$0xff] }
 0x40e   : > { %v4347_v13 = vmul.f32 %v4332_v29, %v11141_v40  ;;  %v4346_v15 = vmul.f32 %v4324_v2, %v11191_v12 }
 0x410   : > { %8303 = vmatmul.mubr.msk.f32.gmra.mrb[10].mxu1 %vm485_vm2, %v8295_v32 }
 0x411   : > { %4031 = vmatprep.mubr.f32.mxu1 %v9996_v16  ;;  %v4317_v44 = vpop.permute.xlu0 %4316 }
 0x412   : > { %v4333_v33 = vsel %vm2183_vm8, %v4317_v44, %v4301_v54  ;;  %v4325_v47 = vsel %vm2183_vm8, %v4301_v54, %v4317_v44  ;;  %v8311_v54 = vld [vmem:[%s14446_s2 + $0x1e8] sm:$0xff] }
 0x413   : > { %v4349_v49 = vmul.f32 %v4333_v33, %v11141_v40  ;;  %v4348_v31 = vmul.f32 %v4325_v47, %v11191_v12 }
 0x414   : > { %8304 = vmatmul.mubr.msk.f32.gmra.mrb[12].mxu1 %vm485_vm2, %v8296_v37 }
 0x415   : > { %4037 = vmatprep.mubr.f32.mxu1 %v9996_v16  ;;  %v8978_v32 = vpack.c.bf16 %v4349_v49, %v4347_v13  ;;  %v8980_v37 = vpack.c.bf16 %v4348_v31, %v4346_v15 }
 0x418   : > { %8305 = vmatmul.mubr.msk.f32.gmra.mrb[14].mxu1 %vm485_vm2, %v8297_v9  ;;  %v8313_v9 = vld [vmem:[%s14446_s2 + $0x1f8] sm:$0xff] }
 0x419   : > { %4221 = vmatprep.mubr.f32.mxu1 %v9996_v16 }
 0x41c   : > { %8314 = vmatmul.mubr.msk.f32.vlgmr.msra.gmra.mrb[0].mxu1 %vm485_vm2, %v8306_v45 }
 0x41d   : > { %8969 = vmatpush1.bf16.msra.mxu1 %v8968_v20  ;;  %4227 = vmatprep.mubr.f32.mxu1 %v9996_v16  ;;  %v4515_v45 = vpop.permute.xlu1 %4514 }
 0x41e   : > { %8971 = vmatprep.subr.bf16.mxu1 %v8970_v50 }
 0x420   : > { %8315 = vmatmul.mubr.msk.f32.gmra.mrb[2].mxu1 %vm485_vm2, %v8307_v35 }
 0x421   : > { %8973 = vmatpush1.bf16.msra.mxu1 %v8972_v52  ;;  %4233 = vmatprep.mubr.f32.mxu1 %v9996_v16  ;;  %v4525_v3 = vpop.permute.xlu1 %4524 }
 0x422   : > { %8975 = vmatprep.subr.bf16.mxu1 %v8974_v55  ;;  %v4520_v51 = vpop.permute.xlu0 %4519 }
 0x424   : > { %8316 = vmatmul.mubr.msk.f32.gmra.mrb[4].mxu1 %vm485_vm2, %v8308_v62 }
 0x425   : > { %8977 = vmatpush1.bf16.msra.mxu1 %v8976_v53  ;;  %4239 = vmatprep.mubr.f32.mxu1 %v9996_v16 }
 0x426   : > { %8979 = vmatprep.subr.bf16.mxu1 %v8978_v32  ;;  %v4530_v2 = vpop.permute.xlu0 %4529 }
 0x428   : > { %8317 = vmatmul.mubr.msk.f32.gmra.mrb[6].mxu1 %vm485_vm2, %v8309_v57 }
 0x429   : > { %8981 = vmatpush1.bf16.msra.mxu1 %v8980_v37  ;;  %4245 = vmatprep.mubr.f32.mxu1 %v9996_v16 }
 0x42c   : > { %8318 = vmatmul.mubr.msk.f32.gmra.mrb[8].mxu1 %vm485_vm2, %v8310_v36 }
 0x42d   : > { %4251 = vmatprep.mubr.f32.mxu1 %v9996_v16 }
 0x430   : > { %8319 = vmatmul.mubr.msk.f32.gmra.mrb[10].mxu1 %vm485_vm2, %v8311_v54  ;;  %v4535_v54 = vpop.permute.xlu1 %4534 }
 0x431   : > { %4257 = vmatprep.mubr.f32.mxu1 %v9996_v16 }
 0x434   : > { %8320 = vmatmul.mubr.msk.f32.gmra.mrb[12].mxu1 %vm485_vm2, %v8312_v11 }
 0x435   : > { %4263 = vmatprep.mubr.f32.mxu1 %v9996_v16 }
 0x438   : > { %8321 = vmatmul.mubr.msk.f32.gmra.mrb[14].mxu1 %vm485_vm2, %v8313_v9 }
 0x439   : > { %4447 = vmatprep.mubr.f32.mxu1 %v9996_v16 }
 0x43c   : > { %8330 = vmatmul.mubr.msk.f32.vlgmr.msra.gmra.mrb[0].mxu1 %vm485_vm2, %v8322_v46 }
 0x43d   : > { %4453 = vmatprep.mubr.f32.mxu1 %v9996_v16 }
 0x440   : > { %8331 = vmatmul.mubr.msk.f32.gmra.mrb[2].mxu1 %vm485_vm2, %v8323_v60 }
 0x441   : > { %4459 = vmatprep.mubr.f32.mxu1 %v9996_v16 }
 0x444   : > { %8332 = vmatmul.mubr.msk.f32.gmra.mrb[4].mxu1 %vm485_vm2, %v8324_v63 }
 0x445   : > { %4465 = vmatprep.mubr.f32.mxu1 %v9996_v16 }
 0x448   : > { %8333 = vmatmul.mubr.msk.f32.gmra.mrb[6].mxu1 %vm485_vm2, %v8325_v23 }
 0x449   : > { %4471 = vmatprep.mubr.f32.mxu1 %v9996_v16 }
 0x44c   : > { %8334 = vmatmul.mubr.msk.f32.gmra.mrb[8].mxu1 %vm485_vm2, %v8326_v39 }
 0x44d   : > { %4477 = vmatprep.mubr.f32.mxu1 %v9996_v16 }
 0x450   : > { %8335 = vmatmul.mubr.msk.f32.gmra.mrb[10].mxu1 %vm485_vm2, %v8327_v22 }
 0x451   : > { %4483 = vmatprep.mubr.f32.mxu1 %v9996_v16 }
 0x454   : > { %8336 = vmatmul.mubr.msk.f32.gmra.mrb[12].mxu1 %vm485_vm2, %v8328_v10 }
 0x455   : > { %4489 = vmatprep.mubr.f32.mxu1 %v9996_v16 }
 0x458   : > { %8337 = vmatmul.mubr.msk.f32.gmra.mrb[14].mxu1 %vm485_vm2, %v8329_v6 }
 0x459   : > { %4969 = vmatprep.mubr.f32.mxu1 %v9996_v16 }
 0x50f   : > { %v4449_v17 = vpop.f32.mrb[0].mxu1 }
 0x510   : > { %v12628_v1 = vadd.f32 %v4515_v45, %v4449_v17  ;;  %v4451_v44 = vpop.f32.mrb[1].mxu1 }
 0x511   : > { %v12630_v20 = vadd.f32 %v4515_v45, %v4451_v44  ;;  %v4540_v44 = vpop.permute.xlu0 %4539 }
 0x512   : > { %v4568_v0 = vsub.f32 0.0, %v12628_v1 }
 0x513   : > { %v4569_v21 = vsub.f32 0.0, %v12630_v20  ;;  %v4455_v61 = vpop.f32.mrb[2].mxu1 }
 0x514   : > { %v4584_v41 = vmul.f32 1.442695, %v4568_v0  ;;  %v12634_v50 = vadd.f32 %v4520_v51, %v4455_v61  ;;  %v4457_v8 = vpop.f32.mrb[3].mxu1 }
 0x515   : > { %v4586_v33 = vmul.f32 1.442695, %v4569_v21  ;;  %v12636_v35 = vadd.f32 %v4520_v51, %v4457_v8 }
 0x516   : > { %9757 = vpow2.f32 %v4584_v41  ;;  %v4570_v48 = vsub.f32 0.0, %v12634_v50 }
 0x517   : > { %9759 = vpow2.f32 %v4586_v33  ;;  %v4571_v52 = vsub.f32 0.0, %v12636_v35  ;;  %v4461_v4 = vpop.f32.mrb[4].mxu1 }
 0x518   : > { %v4588_v29 = vmul.f32 1.442695, %v4570_v48  ;;  %v12640_v47 = vadd.f32 %v4525_v3, %v4461_v4  ;;  %v4463_v49 = vpop.f32.mrb[5].mxu1 }
 0x519   : > { %v4590_v55 = vmul.f32 1.442695, %v4571_v52  ;;  %v12642_v14 = vadd.f32 %v4525_v3, %v4463_v49  ;;  %v4545_v49 = vpop.permute.xlu1 %4544 }
 0x51a   : > { %9761 = vpow2.f32 %v4588_v29  ;;  %v4572_v62 = vsub.f32 0.0, %v12640_v47 }
 0x51b   : > { %9763 = vpow2.f32 %v4590_v55  ;;  %v4573_v13 = vsub.f32 0.0, %v12642_v14  ;;  %v4467_v53 = vpop.f32.mrb[6].mxu1 }
 0x51c   : > { %v4592_v31 = vmul.f32 1.442695, %v4572_v62  ;;  %v12646_v32 = vadd.f32 %v4530_v2, %v4467_v53  ;;  %v4469_v15 = vpop.f32.mrb[7].mxu1 }
 0x51d   : > { %v4594_v57 = vmul.f32 1.442695, %v4573_v13  ;;  %v12648_v37 = vadd.f32 %v4530_v2, %v4469_v15 }
 0x51e   : > { %9765 = vpow2.f32 %v4592_v31  ;;  %v4574_v36 = vsub.f32 0.0, %v12646_v32 }
 0x51f   : > { %9767 = vpow2.f32 %v4594_v57  ;;  %v4575_v11 = vsub.f32 0.0, %v12648_v37  ;;  %v4473_v9 = vpop.f32.mrb[8].mxu1 }
 0x520   : > { %v9758_v46 = vpop.eup %9757  ;;  %v4596_v60 = vmul.f32 1.442695, %v4574_v36  ;;  %v12652_v63 = vadd.f32 %v4535_v54, %v4473_v9  ;;  %v4475_v23 = vpop.f32.mrb[9].mxu1 }
 0x521   : > { %v9760_v39 = vpop.eup %9759  ;;  %v4616_v22 = vadd.f32 1.0, %v9758_v46  ;;  %v4598_v10 = vmul.f32 1.442695, %v4575_v11  ;;  %v12654_v6 = vadd.f32 %v4535_v54, %v4475_v23  ;;  %v4550_v46 = vpop.permute.xlu0 %4549 }
 0x522   : > { %v4617_v45 = vadd.f32 1.0, %v9760_v39  ;;  %9769 = vpow2.f32 %v4596_v60  ;;  %v4576_v17 = vsub.f32 0.0, %v12652_v63 }
 0x523   : > { %9771 = vrcp.f32 %v4616_v22  ;;  %v4577_v0 = vsub.f32 0.0, %v12654_v6  ;;  %v4479_v51 = vpop.f32.mrb[10].mxu1 }
 0x524   : > { %v9762_v21 = vpop.eup %9761  ;;  %9773 = vrcp.f32 %v4617_v45  ;;  %v4600_v61 = vmul.f32 1.442695, %v4576_v17  ;;  %v12658_v41 = vadd.f32 %v4540_v44, %v4479_v51  ;;  %v4481_v8 = vpop.f32.mrb[11].mxu1 }
 0x525   : > { %v9764_v33 = vpop.eup %9763  ;;  %v4618_v48 = vadd.f32 1.0, %v9762_v21  ;;  %9775 = vpow2.f32 %v4598_v10  ;;  %v4602_v3 = vmul.f32 1.442695, %v4577_v0  ;;  %v12660_v52 = vadd.f32 %v4540_v44, %v4481_v8 }
 0x526   : > { %v4619_v4 = vadd.f32 1.0, %v9764_v33  ;;  %9777 = vpow2.f32 %v4600_v61  ;;  %v4578_v29 = vsub.f32 0.0, %v12658_v41 }
 0x527   : > { %9779 = vrcp.f32 %v4618_v48  ;;  %v4579_v55 = vsub.f32 0.0, %v12660_v52  ;;  %v4485_v62 = vpop.f32.mrb[12].mxu1 }
 0x528   : > { %v9766_v2 = vpop.eup %9765  ;;  %9781 = vrcp.f32 %v4619_v4  ;;  %v4604_v13 = vmul.f32 1.442695, %v4578_v29  ;;  %v12664_v53 = vadd.f32 %v4545_v49, %v4485_v62  ;;  %v4487_v31 = vpop.f32.mrb[13].mxu1  ;;  %v9955_v29 = vld [vmem:[%s10062_s29] sm:$0xff] }
 0x529   : > { %v9768_v15 = vpop.eup %9767  ;;  %v4620_v57 = vadd.f32 1.0, %v9766_v2  ;;  %9783 = vpow2.f32 %v4602_v3  ;;  %v4606_v36 = vmul.f32 1.442695, %v4579_v55  ;;  %v12666_v54 = vadd.f32 %v4545_v49, %v4487_v31 }
 0x52a   : > { %v4621_v11 = vadd.f32 1.0, %v9768_v15  ;;  %9785 = vpow2.f32 %v4604_v13  ;;  %v4580_v9 = vsub.f32 0.0, %v12664_v53 }
 0x52b   : > { %9787 = vrcp.f32 %v4620_v57  ;;  %v4581_v60 = vsub.f32 0.0, %v12666_v54  ;;  %v4491_v23 = vpop.f32.mrb[14].mxu1  ;;  %v9956_v57 = vld [vmem:[%s10062_s29 + $0x8] sm:$0xff] }
 0x52c   : > { %v9770_v39 = vpop.eup %9769  ;;  %9789 = vrcp.f32 %v4621_v11  ;;  %v4608_v22 = vmul.f32 1.442695, %v4580_v9  ;;  %v12670_v10 = vadd.f32 %v4550_v46, %v4491_v23  ;;  %v4493_v45 = vpop.f32.mrb[15].mxu1 }
 0x52d   : > { %v9772_v17 = vpop.eup %9771  ;;  %v4622_v44 = vadd.f32 1.0, %v9770_v39  ;;  %9791 = vpow2.f32 %v4606_v36  ;;  %v4610_v0 = vmul.f32 1.442695, %v4581_v60  ;;  %v12672_v51 = vadd.f32 %v4550_v46, %v4493_v45  ;;  %v9957_v46 = vld [vmem:[%s10062_s29 + $0x10] sm:$0xff] }
 0x52e   : > { %v9774_v21 = vpop.eup %9773  ;;  %v4664_v61 = vmul.f32 %v9772_v17, %v12628_v1  ;;  %9793 = vpow2.f32 %v4608_v22  ;;  %v4582_v8 = vsub.f32 0.0, %v12670_v10  ;;  %v9958_v22 = vld [vmem:[%s10062_s29 + $0x18] sm:$0xff] }
 0x52f   : > { %v9776_v33 = vpop.eup %9775  ;;  %v4665_v48 = vmul.f32 %v9774_v21, %v12630_v20  ;;  %9795 = vrcp.f32 %v4622_v44  ;;  %v4583_v3 = vsub.f32 0.0, %v12672_v51 }
 0x530   : > { %v9778_v4 = vpop.eup %9777  ;;  %v12679_v49 = vadd.f32 %v9955_v29, %v4664_v61  ;;  %v4623_v55 = vadd.f32 1.0, %v9776_v33  ;;  %9797 = vpow2.f32 %v4610_v0  ;;  %v4612_v62 = vmul.f32 1.442695, %v4582_v8 }
 0x531   : > { %v9780_v2 = vpop.eup %9779  ;;  %v4624_v1 = vadd.f32 1.0, %v9778_v4  ;;  %v4614_v13 = vmul.f32 1.442695, %v4583_v3  ;;  %v12685_v36 = vadd.f32 %v9956_v57, %v4665_v48 }
 0x532   : > { %v9782_v31 = vpop.eup %9781  ;;  %v4666_v15 = vmul.f32 %v9780_v2, %v12634_v50  ;;  %9799 = vrcp.f32 %v4623_v55  ;;  %4776 = vrot.lane.b32.xlu1 %v12679_v49, %s9995_s30  ;;  %v5919_v33 = vmul.f32 %v12679_v49, %v10696_v34 }
 0x533   : > { %v9784_v20 = vpop.eup %9783  ;;  %v4667_v11 = vmul.f32 %v9782_v31, %v12636_v35  ;;  %9801 = vrcp.f32 %v4624_v1  ;;  %v5920_v0 = vmul.f32 %v12685_v36, %v10684_v24  ;;  %v9959_v31 = vld [vmem:[%s10062_s29 + $0x30] sm:$0xff] }
 0x534   : > { %v9786_v9 = vpop.eup %9785  ;;  %v12689_v60 = vadd.f32 %v9957_v46, %v4666_v15  ;;  %v4625_v23 = vadd.f32 1.0, %v9784_v20  ;;  %9803 = vpow2.f32 %v4612_v62 }
 0x535   : > { %v9788_v39 = vpop.eup %9787  ;;  %v12692_v50 = vadd.f32 %v9958_v22, %v4667_v11  ;;  %v4626_v45 = vadd.f32 1.0, %v9786_v9  ;;  %9805 = vpow2.f32 %v4614_v13  ;;  %v9961_v9 = vld [vmem:[%s10062_s29 + $0x20] sm:$0xff] }
 0x536   : > { %v9790_v17 = vpop.eup %9789  ;;  %9807 = vrcp.f32 %v4625_v23  ;;  %6193 = vrot.lane.b32.xlu1 %v12679_v49, %s10000_s13  ;;  %4778 = vrot.lane.b32.xlu0 %v12689_v60, %s9995_s30  ;;  %v5921_v35 = vmul.f32 %v12689_v60, %v10696_v34  ;;  %v4668_v62 = vmul.f32 %v9788_v39, %v12640_v47  ;;  %v9962_v39 = vld [vmem:[%s10062_s29 + $0x38] sm:$0xff] }
 0x537   : > { %v9792_v44 = vpop.eup %9791  ;;  %9809 = vrcp.f32 %v4626_v45  ;;  %v5922_v21 = vmul.f32 %v12692_v50, %v10684_v24  ;;  %v4669_v3 = vmul.f32 %v9790_v17, %v12642_v14 }
 0x538   : > { %v9794_v61 = vpop.eup %9793  ;;  %v4627_v8 = vadd.f32 1.0, %v9792_v44  ;;  %v9048_v1 = vpack.c.bf16 %v5921_v35, %v5919_v33  ;;  %v12721_v46 = vadd.f32 %v9961_v9, %v4668_v62 }
 0x539   : > { %v9796_v48 = vpop.eup %9795  ;;  %v4628_v4 = vadd.f32 1.0, %v9794_v61  ;;  %v9046_v29 = vpack.c.bf16 %v5922_v21, %v5920_v0 }
 0x53a   : > { %v9798_v55 = vpop.eup %9797  ;;  %v4670_v2 = vmul.f32 %v9796_v48, %v12646_v32  ;;  %9811 = vrcp.f32 %v4627_v8  ;;  %4792 = vrot.lane.b32.xlu1 %v12685_v36, %s9995_s30  ;;  %6195 = vrot.lane.b32.xlu0 %v12689_v60, %s10000_s13  ;;  %v9960_v32 = vld [vmem:[%s10062_s29 + $0x28] sm:$0xff] }
 0x53b   : > { %v4629_v13 = vadd.f32 1.0, %v9798_v55  ;;  %9047 = vmatprep.subr.bf16.mxu0 %v9046_v29  ;;  %9813 = vrcp.f32 %v4628_v4  ;;  %v12717_v20 = vadd.f32 %v9960_v32, %v4669_v3  ;;  %v9963_v4 = vld [vmem:[%s10062_s29 + $0x50] sm:$0xff]  ;;  %v9964_v55 = vld [vmem:[%s10062_s29 + $0x48] sm:$0xff] }
 0x53c   : > { %v9800_v14 = vpop.eup %9799  ;;  %v12714_v15 = vadd.f32 %v9959_v31, %v4670_v2  ;;  %9049 = vmatpush1.bf16.msra.mxu0 %v9048_v1  ;;  %v9965_v1 = vld [vmem:[%s10062_s29 + $0x40] sm:$0xff]  ;;  %v9966_v31 = vld [vmem:[%s10062_s29 + $0x58] sm:$0xff] }
 0x53d   : > { %v9802_v47 = vpop.eup %9801  ;;  %v4671_v57 = vmul.f32 %v9800_v14, %v12648_v37  ;;  %9815 = vrcp.f32 %v4629_v13  ;;  %v5924_v21 = vmul.f32 %v12717_v20, %v10684_v24 }
 0x53e   : > { %v9804_v11 = vpop.eup %9803  ;;  %6209 = vrot.lane.b32.xlu1 %v12685_v36, %s10000_s13  ;;  %4794 = vrot.lane.b32.xlu0 %v12692_v50, %s9995_s30  ;;  %v5925_v37 = vmul.f32 %v12714_v15, %v10696_v34  ;;  %v4672_v8 = vmul.f32 %v9802_v47, %v12652_v63 }
 0x53f   : > { %v9806_v23 = vpop.eup %9805  ;;  %v12728_v22 = vadd.f32 %v9962_v39, %v4671_v57  ;;  %v4630_v45 = vadd.f32 1.0, %v9804_v11 }
 0x540   : > { %v9808_v17 = vpop.eup %9807  ;;  %v4631_v35 = vadd.f32 1.0, %v9806_v23  ;;  %v12753_v13 = vadd.f32 %v9965_v1, %v4672_v8  ;;  %v8455_v1 = vld [vmem:[%s14447_s3 + $0x228] sm:$0xff] }
 0x541   : > { %v9810_v44 = vpop.eup %9809  ;;  %v4673_v0 = vmul.f32 %v9808_v17, %v12654_v6  ;;  %9817 = vrcp.f32 %v4630_v45  ;;  %v5926_v61 = vmul.f32 %v12728_v22, %v10684_v24  ;;  %v5923_v6 = vmul.f32 %v12721_v46, %v10696_v34 }
 0x542   : > { %v4674_v33 = vmul.f32 %v9810_v44, %v12658_v41  ;;  %9819 = vrcp.f32 %v4631_v35  ;;  %6211 = vrot.lane.b32.xlu0 %v12692_v50, %s10000_s13  ;;  %4780 = vrot.lane.b32.xlu1 %v12721_v46, %s9995_s30  ;;  %v5927_v23 = vmul.f32 %v12753_v13, %v10696_v34 }
 0x543   : > { %v9050_v48 = vpack.c.bf16 %v5926_v61, %v5924_v21  ;;  %v9052_v63 = vpack.c.bf16 %v5925_v37, %v5923_v6  ;;  %v12749_v62 = vadd.f32 %v9964_v55, %v4673_v0  ;;  %v9967_v37 = vld [vmem:[%s10062_s29 + $0x68] sm:$0xff]  ;;  %v9968_v0 = vld [vmem:[%s10062_s29 + $0x60] sm:$0xff]  ;;  %v9969_v61 = vld [vmem:[%s10062_s29 + $0x70] sm:$0xff] }
 0x544   : > { %v9812_v3 = vpop.eup %9811  ;;  %v12746_v29 = vadd.f32 %v9963_v4, %v4674_v33  ;;  %v9970_v33 = vld [vmem:[%s10062_s29 + $0x78] sm:$0xff]  ;;  %v8452_v55 = vld [vmem:[%s14447_s3 + $0x210] sm:$0xff] }
 0x545   : > { %v4675_v41 = vmul.f32 %v9812_v3, %v12660_v52  ;;  %9051 = vmatprep.subr.bf16.mxu0 %v9050_v48  ;;  %v9814_v2 = vpop.eup %9813  ;;  %v5928_v57 = vmul.f32 %v12749_v62, %v10684_v24 }
 0x546   : > { %9053 = vmatpush1.bf16.msra.mxu0 %v9052_v63  ;;  %6197 = vrot.lane.b32.xlu1 %v12721_v46, %s10000_s13  ;;  %v5929_v52 = vmul.f32 %v12746_v29, %v10696_v34  ;;  %v4676_v9 = vmul.f32 %v9814_v2, %v12664_v53  ;;  %v8454_v2 = vld [vmem:[%s14447_s3 + $0x220] sm:$0xff] }
 0x547   : > { %v9816_v14 = vpop.eup %9815  ;;  %v12758_v47 = vadd.f32 %v9966_v31, %v4675_v41  ;;  %4782 = vrot.lane.b32.xlu0 %v12714_v15, %s9995_s30  ;;  %v8453_v41 = vld [vmem:[%s14447_s3 + $0x218] sm:$0xff] }
 0x548   : > { %v4677_v32 = vmul.f32 %v9816_v14, %v12666_v54  ;;  %v9056_v35 = vpack.c.bf16 %v5929_v52, %v5927_v23  ;;  %v12782_v21 = vadd.f32 %v9968_v0, %v4676_v9  ;;  %v8456_v14 = vld [vmem:[%s14447_s3 + $0x230] sm:$0xff]  ;;  %v8457_v31 = vld [vmem:[%s14447_s3 + $0x238] sm:$0xff]  ;;  %v8458_v52 = vld [vmem:[%s14447_s3 + $0x240] sm:$0xff] }
 0x549   : > { %v5930_v11 = vmul.f32 %v12758_v47, %v10684_v24  ;;  %v8462_v9 = vld [vmem:[%s14447_s3 + $0x260] sm:$0xff]  ;;  %v8463_v23 = vld [vmem:[%s14447_s3 + $0x268] sm:$0xff] }
 0x54a   : > { %4796 = vrot.lane.b32.xlu1 %v12717_v20, %s9995_s30  ;;  %v12778_v44 = vadd.f32 %v9967_v37, %v4677_v32  ;;  %v5931_v3 = vmul.f32 %v12782_v21, %v10696_v34  ;;  %v8459_v32 = vld [vmem:[%s14447_s3 + $0x248] sm:$0xff] }
 0x54b   : > { %v9818_v39 = vpop.eup %9817  ;;  %6199 = vrot.lane.b32.xlu0 %v12714_v15, %s10000_s13  ;;  %v9054_v54 = vpack.c.bf16 %v5930_v11, %v5928_v57  ;;  %v8460_v57 = vld [vmem:[%s14447_s3 + $0x250] sm:$0xff]  ;;  %v8461_v11 = vld [vmem:[%s14447_s3 + $0x258] sm:$0xff] }
 0x54c   : > { %v9820_v45 = vpop.eup %9819  ;;  %v4678_v17 = vmul.f32 %v9818_v39, %v12670_v10  ;;  %v8464_v39 = vld [vmem:[%s14447_s3 + $0x270] sm:$0xff] }
 0x54d   : > { %v4679_v53 = vmul.f32 %v9820_v45, %v12672_v51  ;;  %9055 = vmatprep.subr.bf16.mxu0 %v9054_v54  ;;  %v5932_v51 = vmul.f32 %v12778_v44, %v10684_v24  ;;  %v8465_v54 = vld [vmem:[%s14447_s3 + $0x278] sm:$0xff] }
 0x54e   : > { %v12785_v8 = vadd.f32 %v9969_v61, %v4678_v17  ;;  %9057 = vmatpush1.bf16.msra.mxu0 %v9056_v35  ;;  %6213 = vrot.lane.b32.xlu1 %v12717_v20, %s10000_s13 }
 0x54f   : > { %v12790_v6 = vadd.f32 %v9970_v33, %v4679_v53  ;;  %4798 = vrot.lane.b32.xlu0 %v12728_v22, %s9995_s30 }
 0x550   : > { %v5933_v10 = vmul.f32 %v12785_v8, %v10696_v34  ;;  %v8451_v34 = vld [vmem:[%s14447_s3 + $0x208] sm:$0xff] }
 0x551   : > { %v5934_v48 = vmul.f32 %v12790_v6, %v10684_v24  ;;  %v8450_v24 = vld [vmem:[%s14447_s3 + $0x200] sm:$0xff] }
 0x552   : > { %4784 = vrot.lane.b32.xlu1 %v12753_v13, %s9995_s30  ;;  %v9060_v63 = vpack.c.bf16 %v5933_v10, %v5931_v3 }
 0x553   : > { %6215 = vrot.lane.b32.xlu0 %v12728_v22, %s10000_s13  ;;  %v9058_v4 = vpack.c.bf16 %v5934_v48, %v5932_v51 }
 0x555   : > { %9059 = vmatprep.subr.bf16.mxu0 %v9058_v4 }
 0x556   : > { %9061 = vmatpush1.bf16.msra.mxu0 %v9060_v63  ;;  %6201 = vrot.lane.b32.xlu1 %v12753_v13, %s10000_s13 }
 0x557   : > { %4786 = vrot.lane.b32.xlu0 %v12746_v29, %s9995_s30 }
 0x559   : > { %8466 = vmatmul.mubr.msk.f32.vlgmr.msra.gmra.mrb[16].mxu0 %vm485_vm2, %v8450_v24 }
 0x55a   : > { %4800 = vrot.lane.b32.xlu1 %v12749_v62, %s9995_s30  ;;  %6070 = vmatprep.mubr.f32.mxu0 %v9996_v16 }
 0x55b   : > { %6203 = vrot.lane.b32.xlu0 %v12746_v29, %s10000_s13 }
 0x55d   : > { %8467 = vmatmul.mubr.msk.f32.gmra.mrb[18].mxu0 %vm485_vm2, %v8451_v34 }
 0x55e   : > { %6217 = vrot.lane.b32.xlu1 %v12749_v62, %s10000_s13  ;;  %6076 = vmatprep.mubr.f32.mxu0 %v9996_v16 }
 0x55f   : > { %4802 = vrot.lane.b32.xlu0 %v12758_v47, %s9995_s30 }
 0x561   : > { %8468 = vmatmul.mubr.msk.f32.gmra.mrb[20].mxu0 %vm485_vm2, %v8452_v55 }
 0x562   : > { %4788 = vrot.lane.b32.xlu1 %v12782_v21, %s9995_s30  ;;  %6082 = vmatprep.mubr.f32.mxu0 %v9996_v16 }
 0x563   : > { %6219 = vrot.lane.b32.xlu0 %v12758_v47, %s10000_s13 }
 0x565   : > { %8469 = vmatmul.mubr.msk.f32.gmra.mrb[22].mxu0 %vm485_vm2, %v8453_v41 }
 0x566   : > { %6205 = vrot.lane.b32.xlu1 %v12782_v21, %s10000_s13  ;;  %6088 = vmatprep.mubr.f32.mxu0 %v9996_v16 }
 0x567   : > { %4790 = vrot.lane.b32.xlu0 %v12785_v8, %s9995_s30 }
 0x569   : > { %8470 = vmatmul.mubr.msk.f32.gmra.mrb[24].mxu0 %vm485_vm2, %v8454_v2 }
 0x56a   : > { %4804 = vrot.lane.b32.xlu1 %v12778_v44, %s9995_s30  ;;  %6094 = vmatprep.mubr.f32.mxu0 %v9996_v16 }
 0x56b   : > { %6207 = vrot.lane.b32.xlu0 %v12785_v8, %s10000_s13 }
 0x56d   : > { %8471 = vmatmul.mubr.msk.f32.gmra.mrb[26].mxu0 %vm485_vm2, %v8455_v1 }
 0x56e   : > { %6221 = vrot.lane.b32.xlu1 %v12778_v44, %s10000_s13  ;;  %6100 = vmatprep.mubr.f32.mxu0 %v9996_v16 }
 0x56f   : > { %4806 = vrot.lane.b32.xlu0 %v12790_v6, %s9995_s30 }
 0x571   : > { %8472 = vmatmul.mubr.msk.f32.gmra.mrb[28].mxu0 %vm485_vm2, %v8456_v14 }
 0x572   : > { %4696 = vrot.lane.b32.xlu1 %v12679_v49, %s9997_s8  ;;  %6106 = vmatprep.mubr.f32.mxu0 %v9996_v16 }
 0x573   : > { %6223 = vrot.lane.b32.xlu0 %v12790_v6, %s10000_s13 }
 0x575   : > { %8473 = vmatmul.mubr.msk.f32.gmra.mrb[30].mxu0 %vm485_vm2, %v8457_v31 }
 0x576   : > { %4712 = vrot.lane.b32.xlu1 %v12685_v36, %s9997_s8  ;;  %6112 = vmatprep.mubr.f32.mxu0 %v9996_v16 }
 0x577   : > { %4698 = vrot.lane.b32.xlu0 %v12689_v60, %s9997_s8 }
 0x579   : > { %8474 = vmatmul.mubr.msk.f32.gmra.mrb[32].mxu0 %vm485_vm2, %v8458_v52 }
 0x57a   : > { %6515 = vrot.lane.b32.xlu1 %v12679_v49, %s10001_s27  ;;  %6118 = vmatprep.mubr.f32.mxu0 %v9996_v16 }
 0x57b   : > { %4714 = vrot.lane.b32.xlu0 %v12692_v50, %s9997_s8 }
 0x57d   : > { %8475 = vmatmul.mubr.msk.f32.gmra.mrb[34].mxu0 %vm485_vm2, %v8459_v32 }
 0x57e   : > { %6531 = vrot.lane.b32.xlu1 %v12685_v36, %s10001_s27  ;;  %6124 = vmatprep.mubr.f32.mxu0 %v9996_v16 }
 0x57f   : > { %6517 = vrot.lane.b32.xlu0 %v12689_v60, %s10001_s27 }
 0x581   : > { %8476 = vmatmul.mubr.msk.f32.gmra.mrb[36].mxu0 %vm485_vm2, %v8460_v57 }
 0x582   : > { %4700 = vrot.lane.b32.xlu1 %v12721_v46, %s9997_s8  ;;  %6130 = vmatprep.mubr.f32.mxu0 %v9996_v16 }
 0x583   : > { %6533 = vrot.lane.b32.xlu0 %v12692_v50, %s10001_s27 }
 0x585   : > { %8477 = vmatmul.mubr.msk.f32.gmra.mrb[38].mxu0 %vm485_vm2, %v8461_v11 }
 0x586   : > { %4716 = vrot.lane.b32.xlu1 %v12717_v20, %s9997_s8  ;;  %6136 = vmatprep.mubr.f32.mxu0 %v9996_v16 }
 0x587   : > { %4702 = vrot.lane.b32.xlu0 %v12714_v15, %s9997_s8 }
 0x589   : > { %8478 = vmatmul.mubr.msk.f32.gmra.mrb[40].mxu0 %vm485_vm2, %v8462_v9 }
 0x58a   : > { %6519 = vrot.lane.b32.xlu1 %v12721_v46, %s10001_s27  ;;  %6142 = vmatprep.mubr.f32.mxu0 %v9996_v16 }
 0x58b   : > { %4718 = vrot.lane.b32.xlu0 %v12728_v22, %s9997_s8 }
 0x58d   : > { %8479 = vmatmul.mubr.msk.f32.gmra.mrb[42].mxu0 %vm485_vm2, %v8463_v23 }
 0x58e   : > { %6535 = vrot.lane.b32.xlu1 %v12717_v20, %s10001_s27  ;;  %6148 = vmatprep.mubr.f32.mxu0 %v9996_v16 }
 0x58f   : > { %6521 = vrot.lane.b32.xlu0 %v12714_v15, %s10001_s27 }
 0x591   : > { %8480 = vmatmul.mubr.msk.f32.gmra.mrb[44].mxu0 %vm485_vm2, %v8464_v39 }
 0x592   : > { %4704 = vrot.lane.b32.xlu1 %v12753_v13, %s9997_s8  ;;  %6154 = vmatprep.mubr.f32.mxu0 %v9996_v16 }
 0x593   : > { %6537 = vrot.lane.b32.xlu0 %v12728_v22, %s10001_s27 }
 0x595   : > { %8481 = vmatmul.mubr.msk.f32.gmra.mrb[46].mxu0 %vm485_vm2, %v8465_v54 }
 0x596   : > { %4720 = vrot.lane.b32.xlu1 %v12749_v62, %s9997_s8  ;;  %6386 = vmatprep.mubr.f32.mxu0 %v9996_v16 }
 0x597   : > { %4706 = vrot.lane.b32.xlu0 %v12746_v29, %s9997_s8 }
 0x59a   : > { %6523 = vrot.lane.b32.xlu1 %v12753_v13, %s10001_s27 }
 0x59b   : > { %4722 = vrot.lane.b32.xlu0 %v12758_v47, %s9997_s8 }
 0x59e   : > { %6539 = vrot.lane.b32.xlu1 %v12749_v62, %s10001_s27 }
 0x59f   : > { %6525 = vrot.lane.b32.xlu0 %v12746_v29, %s10001_s27 }
 0x5a2   : > { %4708 = vrot.lane.b32.xlu1 %v12782_v21, %s9997_s8 }
 0x5a3   : > { %6541 = vrot.lane.b32.xlu0 %v12758_v47, %s10001_s27 }
 0x5a4   : > { %v4777_v45 = vpop.permute.xlu1 %4776 }
 0x5a6   : > { %4724 = vrot.lane.b32.xlu1 %v12778_v44, %s9997_s8 }
 0x5a7   : > { %4710 = vrot.lane.b32.xlu0 %v12785_v8, %s9997_s8 }
 0x5a8   : > { %v6194_v17 = vpop.permute.xlu1 %6193  ;;  %v4779_v35 = vpop.permute.xlu0 %4778 }
 0x5aa   : > { %6527 = vrot.lane.b32.xlu1 %v12782_v21, %s10001_s27 }
 0x5ab   : > { %6529 = vrot.lane.b32.xlu0 %v12785_v8, %s10001_s27 }
 0x5ac   : > { %v4793_v37 = vpop.permute.xlu1 %4792  ;;  %v6196_v53 = vpop.permute.xlu0 %6195 }
 0x5ad   : > { %v4816_v0 = vsel %vm430_vm0, %v4793_v37, %v4777_v45  ;;  %v4808_v61 = vsel %vm430_vm0, %v4777_v45, %v4793_v37 }
 0x5ae   : > { %6543 = vrot.lane.b32.xlu1 %v12778_v44, %s10001_s27  ;;  %v4824_v51 = vmul.f32 %v4816_v0, %v10250_v27  ;;  %v4825_v4 = vmul.f32 %v4808_v61, %v10241_v25 }
 0x5af   : > { %4726 = vrot.lane.b32.xlu0 %v12790_v6, %s9997_s8 }
 0x5b0   : > { %v6210_v33 = vpop.permute.xlu1 %6209  ;;  %v4795_v10 = vpop.permute.xlu0 %4794 }
 0x5b1   : > { %v4809_v48 = vsel %vm430_vm0, %v4779_v35, %v4795_v10  ;;  %v4817_v3 = vsel %vm430_vm0, %v4795_v10, %v4779_v35  ;;  %v6225_v63 = vsel %vm1463_vm5, %v6194_v17, %v6210_v33  ;;  %v6233_v55 = vsel %vm1463_vm5, %v6210_v33, %v6194_v17 }
 0x5b2   : > { %v4826_v24 = vmul.f32 %v4817_v3, %v10250_v27  ;;  %v4827_v34 = vmul.f32 %v4809_v48, %v10241_v25  ;;  %5275 = vrot.lane.b32.xlu1 %v12679_v49, %s9998_s9  ;;  %v6241_v31 = vmul.f32 %v6225_v63, %v10831_v7  ;;  %v6242_v57 = vmul.f32 %v6233_v55, %v10777_v18 }
 0x5b3   : > { %6545 = vrot.lane.b32.xlu0 %v12790_v6, %s10001_s27  ;;  %s14407_s27 = scalar_lea.vmem %s14451_s7, %s8612_s26 }
 0x5b4   : > { %v8984_v41 = vpack.c.bf16 %v4826_v24, %v4824_v51  ;;  %v6212_v2 = vpop.permute.xlu0 %6211  ;;  %v4781_v1 = vpop.permute.xlu1 %4780  ;;  %v8982_v14 = vpack.c.bf16 %v4827_v34, %v4825_v4 }
 0x5b5   : > { %v6226_v52 = vsel %vm1463_vm5, %v6196_v53, %v6212_v2  ;;  %v6234_v32 = vsel %vm1463_vm5, %v6212_v2, %v6196_v53 }
 0x5b6   : > { %v6243_v11 = vmul.f32 %v6226_v52, %v10831_v7  ;;  %v6244_v9 = vmul.f32 %v6234_v32, %v10777_v18  ;;  %8983 = vmatprep.subr.bf16.mxu1 %v8982_v14  ;;  %5291 = vrot.lane.b32.xlu1 %v12685_v36, %s9998_s9 }
 0x5b7   : > { %5277 = vrot.lane.b32.xlu0 %v12689_v60, %s9998_s9  ;;  %8985 = vmatpush1.bf16.msra.mxu1 %v8984_v41 }
 0x5b8   : > { %v9064_v23 = vpack.c.bf16 %v6243_v11, %v6241_v31  ;;  %v6198_v39 = vpop.permute.xlu1 %6197  ;;  %v9062_v54 = vpack.c.bf16 %v6244_v9, %v6242_v57 }
 0x5b9   : > { %v4783_v45 = vpop.permute.xlu0 %4782 }
 0x5ba   : > { %6837 = vrot.lane.b32.xlu1 %v12679_v49, %s10002_s16  ;;  %9063 = vmatprep.subr.bf16.mxu0 %v9062_v54 }
 0x5bb   : > { %5293 = vrot.lane.b32.xlu0 %v12692_v50, %s9998_s9  ;;  %9065 = vmatpush1.bf16.msra.mxu0 %v9064_v23 }
 0x5bc   : > { %v4797_v17 = vpop.permute.xlu1 %4796 }
 0x5bd   : > { %v6200_v35 = vpop.permute.xlu0 %6199  ;;  %v4818_v37 = vsel %vm430_vm0, %v4797_v17, %v4781_v1  ;;  %v4810_v53 = vsel %vm430_vm0, %v4781_v1, %v4797_v17 }
 0x5be   : > { %6853 = vrot.lane.b32.xlu1 %v12685_v36, %s10002_s16  ;;  %v4828_v33 = vmul.f32 %v4818_v37, %v10250_v27  ;;  %v4829_v48 = vmul.f32 %v4810_v53, %v10241_v25 }
 0x5bf   : > { %6839 = vrot.lane.b32.xlu0 %v12689_v60, %s10002_s16 }
 0x5c0   : > { %v6214_v0 = vpop.permute.xlu1 %6213 }
 0x5c1   : > { %v4799_v61 = vpop.permute.xlu0 %4798  ;;  %v6227_v3 = vsel %vm1463_vm5, %v6198_v39, %v6214_v0  ;;  %v6235_v24 = vsel %vm1463_vm5, %v6214_v0, %v6198_v39 }
 0x5c2   : > { %v4811_v10 = vsel %vm430_vm0, %v4783_v45, %v4799_v61  ;;  %v4819_v51 = vsel %vm430_vm0, %v4799_v61, %v4783_v45  ;;  %5279 = vrot.lane.b32.xlu1 %v12721_v46, %s9998_s9  ;;  %v6245_v1 = vmul.f32 %v6227_v3, %v10831_v7  ;;  %v6246_v52 = vmul.f32 %v6235_v24, %v10777_v18 }
 0x5c3   : > { %v4830_v4 = vmul.f32 %v4819_v51, %v10250_v27  ;;  %v4831_v63 = vmul.f32 %v4811_v10, %v10241_v25  ;;  %6855 = vrot.lane.b32.xlu0 %v12692_v50, %s10002_s16 }
 0x5c4   : > { %v4785_v34 = vpop.permute.xlu1 %4784 }
 0x5c5   : > { %v8988_v55 = vpack.c.bf16 %v4830_v4, %v4828_v33  ;;  %v6216_v41 = vpop.permute.xlu0 %6215  ;;  %v8986_v2 = vpack.c.bf16 %v4831_v63, %v4829_v48 }
 0x5c6   : > { %v6228_v14 = vsel %vm1463_vm5, %v6200_v35, %v6216_v41  ;;  %v6236_v31 = vsel %vm1463_vm5, %v6216_v41, %v6200_v35  ;;  %5295 = vrot.lane.b32.xlu1 %v12717_v20, %s9998_s9 }
 0x5c7   : > { %v6247_v32 = vmul.f32 %v6228_v14, %v10831_v7  ;;  %v6248_v57 = vmul.f32 %v6236_v31, %v10777_v18  ;;  %8987 = vmatprep.subr.bf16.mxu1 %v8986_v2  ;;  %5281 = vrot.lane.b32.xlu0 %v12714_v15, %s9998_s9 }
 0x5c8   : > { %8989 = vmatpush1.bf16.msra.mxu1 %v8988_v55  ;;  %v6202_v11 = vpop.permute.xlu1 %6201 }
 0x5c9   : > { %v9068_v9 = vpack.c.bf16 %v6247_v32, %v6245_v1  ;;  %v4787_v23 = vpop.permute.xlu0 %4786  ;;  %v9066_v39 = vpack.c.bf16 %v6248_v57, %v6246_v52 }
 0x5ca   : > { %6841 = vrot.lane.b32.xlu1 %v12721_v46, %s10002_s16 }
 0x5cb   : > { %5297 = vrot.lane.b32.xlu0 %v12728_v22, %s9998_s9  ;;  %9067 = vmatprep.subr.bf16.mxu0 %v9066_v39 }
 0x5cc   : > { %9069 = vmatpush1.bf16.msra.mxu0 %v9068_v9  ;;  %v4801_v54 = vpop.permute.xlu1 %4800 }
 0x5cd   : > { %v6204_v45 = vpop.permute.xlu0 %6203  ;;  %v4820_v17 = vsel %vm430_vm0, %v4801_v54, %v4785_v34  ;;  %v4812_v35 = vsel %vm430_vm0, %v4785_v34, %v4801_v54 }
 0x5ce   : > { %6857 = vrot.lane.b32.xlu1 %v12717_v20, %s10002_s16  ;;  %v4832_v0 = vmul.f32 %v4820_v17, %v10250_v27  ;;  %v4833_v10 = vmul.f32 %v4812_v35, %v10241_v25 }
 0x5cf   : > { %6843 = vrot.lane.b32.xlu0 %v12714_v15, %s10002_s16 }
 0x5d0   : > { %v6218_v37 = vpop.permute.xlu1 %6217 }
 0x5d1   : > { %v4803_v53 = vpop.permute.xlu0 %4802  ;;  %v6229_v51 = vsel %vm1463_vm5, %v6202_v11, %v6218_v37  ;;  %v6237_v4 = vsel %vm1463_vm5, %v6218_v37, %v6202_v11 }
 0x5d2   : > { %v4813_v61 = vsel %vm430_vm0, %v4787_v23, %v4803_v53  ;;  %v4821_v33 = vsel %vm430_vm0, %v4803_v53, %v4787_v23  ;;  %5283 = vrot.lane.b32.xlu1 %v12753_v13, %s9998_s9  ;;  %v6249_v41 = vmul.f32 %v6229_v51, %v10831_v7  ;;  %v6250_v14 = vmul.f32 %v6237_v4, %v10777_v18 }
 0x5d3   : > { %v4834_v48 = vmul.f32 %v4821_v33, %v10250_v27  ;;  %v4835_v3 = vmul.f32 %v4813_v61, %v10241_v25  ;;  %6859 = vrot.lane.b32.xlu0 %v12728_v22, %s10002_s16 }
 0x5d4   : > { %v4789_v63 = vpop.permute.xlu1 %4788 }
 0x5d5   : > { %v8992_v24 = vpack.c.bf16 %v4834_v48, %v4832_v0  ;;  %v6220_v34 = vpop.permute.xlu0 %6219  ;;  %v8990_v55 = vpack.c.bf16 %v4835_v3, %v4833_v10 }
 0x5d6   : > { %v6230_v2 = vsel %vm1463_vm5, %v6204_v45, %v6220_v34  ;;  %v6238_v1 = vsel %vm1463_vm5, %v6220_v34, %v6204_v45  ;;  %5299 = vrot.lane.b32.xlu1 %v12749_v62, %s9998_s9 }
 0x5d7   : > { %v6251_v31 = vmul.f32 %v6230_v2, %v10831_v7  ;;  %v6252_v52 = vmul.f32 %v6238_v1, %v10777_v18  ;;  %8991 = vmatprep.subr.bf16.mxu1 %v8990_v55  ;;  %5285 = vrot.lane.b32.xlu0 %v12746_v29, %s9998_s9 }
 0x5d8   : > { %8993 = vmatpush1.bf16.msra.mxu1 %v8992_v24  ;;  %v6206_v32 = vpop.permute.xlu1 %6205 }
 0x5d9   : > { %v9072_v57 = vpack.c.bf16 %v6251_v31, %v6249_v41  ;;  %v4791_v11 = vpop.permute.xlu0 %4790  ;;  %v9070_v9 = vpack.c.bf16 %v6252_v52, %v6250_v14  ;;  %v8338_v14 = vld [vmem:[%s14447_s3 + $0x80] sm:$0xff] }
 0x5da   : > { %6845 = vrot.lane.b32.xlu1 %v12753_v13, %s10002_s16 }
 0x5db   : > { %5301 = vrot.lane.b32.xlu0 %v12758_v47, %s9998_s9  ;;  %9071 = vmatprep.subr.bf16.mxu0 %v9070_v9 }
 0x5dc   : > { %9073 = vmatpush1.bf16.msra.mxu0 %v9072_v57  ;;  %v4805_v23 = vpop.permute.xlu1 %4804 }
 0x5dd   : > { %v6208_v39 = vpop.permute.xlu0 %6207  ;;  %v4822_v54 = vsel %vm430_vm0, %v4805_v23, %v4789_v63  ;;  %v4814_v45 = vsel %vm430_vm0, %v4789_v63, %v4805_v23  ;;  %v8482_v23 = vld [vmem:[%s14447_s3 + $0x280] sm:$0xff] }
 0x5de   : > { %6861 = vrot.lane.b32.xlu1 %v12749_v62, %s10002_s16  ;;  %v4836_v37 = vmul.f32 %v4822_v54, %v10250_v27  ;;  %v4837_v61 = vmul.f32 %v4814_v45, %v10241_v25 }
 0x5df   : > { %6847 = vrot.lane.b32.xlu0 %v12746_v29, %s10002_s16 }
 0x5e0   : > { %v6222_v17 = vpop.permute.xlu1 %6221 }
 0x5e1   : > { %v4807_v35 = vpop.permute.xlu0 %4806  ;;  %v6231_v33 = vsel %vm1463_vm5, %v6206_v32, %v6222_v17  ;;  %v6239_v48 = vsel %vm1463_vm5, %v6222_v17, %v6206_v32 }
 0x5e2   : > { %v4815_v53 = vsel %vm430_vm0, %v4791_v11, %v4807_v35  ;;  %v4823_v0 = vsel %vm430_vm0, %v4807_v35, %v4791_v11  ;;  %5287 = vrot.lane.b32.xlu1 %v12782_v21, %s9998_s9  ;;  %v6253_v34 = vmul.f32 %v6231_v33, %v10831_v7  ;;  %v8339_v11 = vld [vmem:[%s14447_s3 + $0x88] sm:$0xff] }
 0x5e3   : > { %v4838_v10 = vmul.f32 %v4823_v0, %v10250_v27  ;;  %v4839_v51 = vmul.f32 %v4815_v53, %v10241_v25  ;;  %6863 = vrot.lane.b32.xlu0 %v12758_v47, %s10002_s16  ;;  %v6254_v25 = vmul.f32 %v6239_v48, %v10777_v18  ;;  %v8340_v0 = vld [vmem:[%s14447_s3 + $0x90] sm:$0xff] }
 0x5e4   : > { %v4697_v3 = vpop.permute.xlu1 %4696 }
 0x5e5   : > { %v8996_v4 = vpack.c.bf16 %v4838_v10, %v4836_v37  ;;  %v6224_v63 = vpop.permute.xlu0 %6223  ;;  %v8994_v24 = vpack.c.bf16 %v4839_v51, %v4837_v61  ;;  %v8483_v51 = vld [vmem:[%s14447_s3 + $0x288] sm:$0xff] }
 0x5e6   : > { %v6232_v55 = vsel %vm1463_vm5, %v6208_v39, %v6224_v63  ;;  %v6240_v27 = vsel %vm1463_vm5, %v6224_v63, %v6208_v39  ;;  %5303 = vrot.lane.b32.xlu1 %v12778_v44, %s9998_s9  ;;  %v8341_v63 = vld [vmem:[%s14447_s3 + $0x98] sm:$0xff] }
 0x5e7   : > { %v6255_v41 = vmul.f32 %v6232_v55, %v10831_v7  ;;  %v6256_v2 = vmul.f32 %v6240_v27, %v10777_v18  ;;  %5289 = vrot.lane.b32.xlu0 %v12785_v8, %s9998_s9  ;;  %8995 = vmatprep.subr.bf16.mxu1 %v8994_v24 }
 0x5e8   : > { %8997 = vmatpush1.bf16.msra.mxu1 %v8996_v4  ;;  %v4713_v1 = vpop.permute.xlu1 %4712 }
 0x5e9   : > { %v9076_v31 = vpack.c.bf16 %v6255_v41, %v6253_v34  ;;  %v4699_v52 = vpop.permute.xlu0 %4698  ;;  %v9074_v32 = vpack.c.bf16 %v6256_v2, %v6254_v25  ;;  %v4736_v7 = vsel %vm345_vm1, %v4713_v1, %v4697_v3  ;;  %v4728_v18 = vsel %vm345_vm1, %v4697_v3, %v4713_v1  ;;  %v8484_v34 = vld [vmem:[%s14447_s3 + $0x290] sm:$0xff] }
 0x5ea   : > { %6849 = vrot.lane.b32.xlu1 %v12782_v21, %s10002_s16  ;;  %v4744_v39 = vmul.f32 %v4736_v7, %v10331_v42  ;;  %v4745_v17 = vmul.f32 %v4728_v18, %v10334_v43  ;;  %v8485_v7 = vld [vmem:[%s14447_s3 + $0x298] sm:$0xff] }
 0x5eb   : > { %6851 = vrot.lane.b32.xlu0 %v12785_v8, %s10002_s16  ;;  %8354 = vmatmul.mubr.msk.f32.vlgmr.msra.gmra.mrb[16].mxu1 %vm485_vm2, %v8338_v14 }
 0x5ec   : > { %9075 = vmatprep.subr.bf16.mxu0 %v9074_v32  ;;  %v6516_v57 = vpop.permute.xlu1 %6515  ;;  %4975 = vmatprep.mubr.f32.mxu1 %v9996_v16 }
 0x5ed   : > { %9077 = vmatpush1.bf16.msra.mxu0 %v9076_v31  ;;  %v4715_v9 = vpop.permute.xlu0 %4714  ;;  %v8342_v31 = vld [vmem:[%s14447_s3 + $0xa0] sm:$0xff] }
 0x5ee   : > { %v4729_v54 = vsel %vm345_vm1, %v4699_v52, %v4715_v9  ;;  %v4737_v45 = vsel %vm345_vm1, %v4715_v9, %v4699_v52  ;;  %6865 = vrot.lane.b32.xlu1 %v12778_v44, %s10002_s16 }
 0x5ef   : > { %v4746_v35 = vmul.f32 %v4737_v45, %v10331_v42  ;;  %v4747_v37 = vmul.f32 %v4729_v54, %v10334_v43  ;;  %5305 = vrot.lane.b32.xlu0 %v12790_v6, %s9998_s9  ;;  %8355 = vmatmul.mubr.msk.f32.gmra.mrb[18].mxu1 %vm485_vm2, %v8339_v11 }
 0x5f0   : > { %8498 = vmatmul.mubr.msk.f32.vlgmr.msra.gmra.mrb[16].mxu0 %vm485_vm2, %v8482_v23  ;;  %v6532_v53 = vpop.permute.xlu1 %6531  ;;  %4981 = vmatprep.mubr.f32.mxu1 %v9996_v16  ;;  %v8343_v23 = vld [vmem:[%s14447_s3 + $0xa8] sm:$0xff] }
 0x5f1   : > { %v9000_v61 = vpack.c.bf16 %v4746_v35, %v4744_v39  ;;  %v6518_v33 = vpop.permute.xlu0 %6517  ;;  %6392 = vmatprep.mubr.f32.mxu0 %v9996_v16  ;;  %v8998_v10 = vpack.c.bf16 %v4747_v37, %v4745_v17  ;;  %v6547_v48 = vsel %vm1703_vm6, %v6516_v57, %v6532_v53  ;;  %v6555_v3 = vsel %vm1703_vm6, %v6532_v53, %v6516_v57  ;;  %v8486_v39 = vld [vmem:[%s14447_s3 + $0x2a0] sm:$0xff] }
 0x5f2   : > { %5597 = vrot.lane.b32.xlu1 %v12679_v49, %s9999_s10  ;;  %v6563_v55 = vmul.f32 %v6547_v48, %v10943_v30  ;;  %v6564_v41 = vmul.f32 %v6555_v3, %v10892_v38 }
 0x5f3   : > { %6867 = vrot.lane.b32.xlu0 %v12790_v6, %s10002_s16  ;;  %8356 = vmatmul.mubr.msk.f32.gmra.mrb[20].mxu1 %vm485_vm2, %v8340_v0 }
 0x5f4   : > { %8999 = vmatprep.subr.bf16.mxu1 %v8998_v10  ;;  %8499 = vmatmul.mubr.msk.f32.gmra.mrb[18].mxu0 %vm485_vm2, %v8483_v51  ;;  %v4701_v4 = vpop.permute.xlu1 %4700 }
 0x5f5   : > { %9001 = vmatpush1.bf16.msra.mxu1 %v9000_v61  ;;  %v6534_v24 = vpop.permute.xlu0 %6533  ;;  %4987 = vmatprep.mubr.f32.mxu1 %v9996_v16 }
 0x5f6   : > { %v6548_v27 = vsel %vm1703_vm6, %v6518_v33, %v6534_v24  ;;  %v6556_v25 = vsel %vm1703_vm6, %v6534_v24, %v6518_v33  ;;  %6398 = vmatprep.mubr.f32.mxu0 %v9996_v16  ;;  %5613 = vrot.lane.b32.xlu1 %v12685_v36, %s9999_s10 }
 0x5f7   : > { %v6565_v2 = vmul.f32 %v6548_v27, %v10943_v30  ;;  %v6566_v1 = vmul.f32 %v6556_v25, %v10892_v38  ;;  %5599 = vrot.lane.b32.xlu0 %v12689_v60, %s9999_s10  ;;  %8357 = vmatmul.mubr.msk.f32.gmra.mrb[22].mxu1 %vm485_vm2, %v8341_v63 }
 0x5f8   : > { %8500 = vmatmul.mubr.msk.f32.gmra.mrb[20].mxu0 %vm485_vm2, %v8484_v34  ;;  %v4717_v14 = vpop.permute.xlu1 %4716  ;;  %4993 = vmatprep.mubr.f32.mxu1 %v9996_v16 }
 0x5f9   : > { %v9080_v52 = vpack.c.bf16 %v6565_v2, %v6563_v55  ;;  %v4703_v32 = vpop.permute.xlu0 %4702  ;;  %6404 = vmatprep.mubr.f32.mxu0 %v9996_v16  ;;  %v9078_v18 = vpack.c.bf16 %v6566_v1, %v6564_v41  ;;  %v4738_v57 = vsel %vm345_vm1, %v4717_v14, %v4701_v4  ;;  %v4730_v11 = vsel %vm345_vm1, %v4701_v4, %v4717_v14  ;;  %v8345_v4 = vld [vmem:[%s14447_s3 + $0xb8] sm:$0xff]  ;;  %v8346_v1 = vld [vmem:[%s14447_s3 + $0xc0] sm:$0xff] }
 0x5fa   : > { %7159 = vrot.lane.b32.xlu1 %v12679_v49, %s10003_s23  ;;  %v4748_v54 = vmul.f32 %v4738_v57, %v10331_v42  ;;  %v4749_v35 = vmul.f32 %v4730_v11, %v10334_v43  ;;  %v8347_v11 = vld [vmem:[%s14447_s3 + $0xc8] sm:$0xff] }
 0x5fb   : > { %5615 = vrot.lane.b32.xlu0 %v12692_v50, %s9999_s10  ;;  %8358 = vmatmul.mubr.msk.f32.gmra.mrb[24].mxu1 %vm485_vm2, %v8342_v31 }
 0x5fc   : > { %8501 = vmatmul.mubr.msk.f32.gmra.mrb[22].mxu0 %vm485_vm2, %v8485_v7  ;;  %9079 = vmatprep.subr.bf16.mxu0 %v9078_v18  ;;  %v6520_v9 = vpop.permute.xlu1 %6519 }
 0x5fd   : > { %9081 = vmatpush1.bf16.msra.mxu0 %v9080_v52  ;;  %v4719_v49 = vpop.permute.xlu0 %4718  ;;  %4999 = vmatprep.mubr.f32.mxu1 %v9996_v16  ;;  %v8489_v52 = vld [vmem:[%s14447_s3 + $0x2b8] sm:$0xff] }
 0x5fe   : > { %v4731_v45 = vsel %vm345_vm1, %v4703_v32, %v4719_v49  ;;  %v4739_v17 = vsel %vm345_vm1, %v4719_v49, %v4703_v32  ;;  %6410 = vmatprep.mubr.f32.mxu0 %v9996_v16  ;;  %7175 = vrot.lane.b32.xlu1 %v12685_v36, %s10003_s23  ;;  %v8344_v36 = vld [vmem:[%s14447_s3 + $0xb0] sm:$0xff] }
 0x5ff   : > { %v4750_v37 = vmul.f32 %v4739_v17, %v10331_v42  ;;  %v4751_v53 = vmul.f32 %v4731_v45, %v10334_v43  ;;  %7161 = vrot.lane.b32.xlu0 %v12689_v60, %s10003_s23  ;;  %8359 = vmatmul.mubr.msk.f32.gmra.mrb[26].mxu1 %vm485_vm2, %v8343_v23  ;;  %v8487_v60 = vld [vmem:[%s14447_s3 + $0x2a8] sm:$0xff] }
 0x600   : > { %8502 = vmatmul.mubr.msk.f32.gmra.mrb[24].mxu0 %vm485_vm2, %v8486_v39  ;;  %v6536_v0 = vpop.permute.xlu1 %6535  ;;  %5005 = vmatprep.mubr.f32.mxu1 %v9996_v16 }
 0x601   : > { %v9004_v61 = vpack.c.bf16 %v4750_v37, %v4748_v54  ;;  %v6522_v33 = vpop.permute.xlu0 %6521  ;;  %6416 = vmatprep.mubr.f32.mxu0 %v9996_v16  ;;  %v9002_v10 = vpack.c.bf16 %v4751_v53, %v4749_v35  ;;  %v6549_v51 = vsel %vm1703_vm6, %v6520_v9, %v6536_v0  ;;  %v6557_v48 = vsel %vm1703_vm6, %v6536_v0, %v6520_v9  ;;  %v8490_v9 = vld [vmem:[%s14447_s3 + $0x2c0] sm:$0xff] }
 0x602   : > { %5601 = vrot.lane.b32.xlu1 %v12721_v46, %s9999_s10  ;;  %v6567_v24 = vmul.f32 %v6549_v51, %v10943_v30  ;;  %v6568_v27 = vmul.f32 %v6557_v48, %v10892_v38 }
 0x603   : > { %7177 = vrot.lane.b32.xlu0 %v12692_v50, %s10003_s23  ;;  %8360 = vmatmul.mubr.msk.f32.gmra.mrb[28].mxu1 %vm485_vm2, %v8344_v36  ;;  %v8488_v50 = vld [vmem:[%s14447_s3 + $0x2b0] sm:$0xff] }
 0x604   : > { %9003 = vmatprep.subr.bf16.mxu1 %v9002_v10  ;;  %8503 = vmatmul.mubr.msk.f32.gmra.mrb[26].mxu0 %vm485_vm2, %v8487_v60  ;;  %v4705_v3 = vpop.permute.xlu1 %4704  ;;  %v8349_v10 = vld [vmem:[%s14447_s3 + $0xd8] sm:$0xff] }
 0x605   : > { %9005 = vmatpush1.bf16.msra.mxu1 %v9004_v61  ;;  %v6538_v63 = vpop.permute.xlu0 %6537  ;;  %5011 = vmatprep.mubr.f32.mxu1 %v9996_v16 }
 0x606   : > { %v6550_v34 = vsel %vm1703_vm6, %v6522_v33, %v6538_v63  ;;  %v6558_v55 = vsel %vm1703_vm6, %v6538_v63, %v6522_v33  ;;  %6422 = vmatprep.mubr.f32.mxu0 %v9996_v16  ;;  %5617 = vrot.lane.b32.xlu1 %v12717_v20, %s9999_s10 }
 0x607   : > { %v6569_v25 = vmul.f32 %v6550_v34, %v10943_v30  ;;  %v6570_v41 = vmul.f32 %v6558_v55, %v10892_v38  ;;  %5603 = vrot.lane.b32.xlu0 %v12714_v15, %s9999_s10  ;;  %8361 = vmatmul.mubr.msk.f32.gmra.mrb[30].mxu1 %vm485_vm2, %v8345_v4  ;;  %v8350_v34 = vld [vmem:[%s14447_s3 + $0xe0] sm:$0xff] }
 0x608   : > { %8504 = vmatmul.mubr.msk.f32.gmra.mrb[28].mxu0 %vm485_vm2, %v8488_v50  ;;  %v4721_v2 = vpop.permute.xlu1 %4720  ;;  %5017 = vmatprep.mubr.f32.mxu1 %v9996_v16 }
 0x609   : > { %v9084_v14 = vpack.c.bf16 %v6569_v25, %v6567_v24  ;;  %v4707_v31 = vpop.permute.xlu0 %4706  ;;  %6428 = vmatprep.mubr.f32.mxu0 %v9996_v16  ;;  %v9082_v32 = vpack.c.bf16 %v6570_v41, %v6568_v27  ;;  %v4740_v7 = vsel %vm345_vm1, %v4721_v2, %v4705_v3  ;;  %v4732_v18 = vsel %vm345_vm1, %v4705_v3, %v4721_v2  ;;  %v8493_v25 = vld [vmem:[%s14447_s3 + $0x2d8] sm:$0xff] }
 0x60a   : > { %7163 = vrot.lane.b32.xlu1 %v12721_v46, %s10003_s23  ;;  %v4752_v23 = vmul.f32 %v4740_v7, %v10331_v42  ;;  %v4753_v54 = vmul.f32 %v4732_v18, %v10334_v43 }
 0x60b   : > { %5619 = vrot.lane.b32.xlu0 %v12728_v22, %s9999_s10  ;;  %8362 = vmatmul.mubr.msk.f32.gmra.mrb[32].mxu1 %vm485_vm2, %v8346_v1  ;;  %v8351_v1 = vld [vmem:[%s14447_s3 + $0xe8] sm:$0xff] }
 0x60c   : > { %8505 = vmatmul.mubr.msk.f32.gmra.mrb[30].mxu0 %vm485_vm2, %v8489_v52  ;;  %9083 = vmatprep.subr.bf16.mxu0 %v9082_v32  ;;  %v6524_v57 = vpop.permute.xlu1 %6523 }
 0x60d   : > { %9085 = vmatpush1.bf16.msra.mxu0 %v9084_v14  ;;  %v4723_v46 = vpop.permute.xlu0 %4722  ;;  %5023 = vmatprep.mubr.f32.mxu1 %v9996_v16 }
 0x60e   : > { %v4733_v49 = vsel %vm345_vm1, %v4707_v31, %v4723_v46  ;;  %v4741_v39 = vsel %vm345_vm1, %v4723_v46, %v4707_v31  ;;  %6434 = vmatprep.mubr.f32.mxu0 %v9996_v16  ;;  %7179 = vrot.lane.b32.xlu1 %v12717_v20, %s10003_s23  ;;  %v8348_v20 = vld [vmem:[%s14447_s3 + $0xd0] sm:$0xff] }
 0x60f   : > { %v4754_v45 = vmul.f32 %v4741_v39, %v10331_v42  ;;  %v4755_v17 = vmul.f32 %v4733_v49, %v10334_v43  ;;  %7165 = vrot.lane.b32.xlu0 %v12714_v15, %s10003_s23  ;;  %8363 = vmatmul.mubr.msk.f32.gmra.mrb[34].mxu1 %vm485_vm2, %v8347_v11  ;;  %v8491_v15 = vld [vmem:[%s14447_s3 + $0x2c8] sm:$0xff]  ;;  %v8353_v39 = vld [vmem:[%s14447_s3 + $0xf8] sm:$0xff] }
 0x610   : > { %8506 = vmatmul.mubr.msk.f32.gmra.mrb[32].mxu0 %vm485_vm2, %v8490_v9  ;;  %v6540_v35 = vpop.permute.xlu1 %6539  ;;  %5029 = vmatprep.mubr.f32.mxu1 %v9996_v16 }
 0x611   : > { %v9008_v37 = vpack.c.bf16 %v4754_v45, %v4752_v23  ;;  %v6526_v53 = vpop.permute.xlu0 %6525  ;;  %6440 = vmatprep.mubr.f32.mxu0 %v9996_v16  ;;  %v9006_v0 = vpack.c.bf16 %v4755_v17, %v4753_v54  ;;  %v6551_v36 = vsel %vm1703_vm6, %v6524_v57, %v6540_v35  ;;  %v6559_v61 = vsel %vm1703_vm6, %v6540_v35, %v6524_v57  ;;  %v8496_v17 = vld [vmem:[%s14447_s3 + $0x2f0] sm:$0xff] }
 0x612   : > { %5605 = vrot.lane.b32.xlu1 %v12753_v13, %s9999_s10  ;;  %v6571_v51 = vmul.f32 %v6551_v36, %v10943_v30  ;;  %v6572_v4 = vmul.f32 %v6559_v61, %v10892_v38 }
 0x613   : > { %7181 = vrot.lane.b32.xlu0 %v12728_v22, %s10003_s23  ;;  %8364 = vmatmul.mubr.msk.f32.gmra.mrb[36].mxu1 %vm485_vm2, %v8348_v20  ;;  %v8492_v22 = vld [vmem:[%s14447_s3 + $0x2d0] sm:$0xff] }
 0x614   : > { %9007 = vmatprep.subr.bf16.mxu1 %v9006_v0  ;;  %8507 = vmatmul.mubr.msk.f32.gmra.mrb[34].mxu0 %vm485_vm2, %v8491_v15  ;;  %v4709_v33 = vpop.permute.xlu1 %4708 }
 0x615   : > { %9009 = vmatpush1.bf16.msra.mxu1 %v9008_v37  ;;  %v6542_v60 = vpop.permute.xlu0 %6541  ;;  %5035 = vmatprep.mubr.f32.mxu1 %v9996_v16 }
 0x616   : > { %v6552_v48 = vsel %vm1703_vm6, %v6526_v53, %v6542_v60  ;;  %v6560_v3 = vsel %vm1703_vm6, %v6542_v60, %v6526_v53  ;;  %6446 = vmatprep.mubr.f32.mxu0 %v9996_v16  ;;  %5621 = vrot.lane.b32.xlu1 %v12749_v62, %s9999_s10 }
 0x617   : > { %v6573_v63 = vmul.f32 %v6552_v48, %v10943_v30  ;;  %v6574_v50 = vmul.f32 %v6560_v3, %v10892_v38  ;;  %5607 = vrot.lane.b32.xlu0 %v12746_v29, %s9999_s10  ;;  %8365 = vmatmul.mubr.msk.f32.gmra.mrb[38].mxu1 %vm485_vm2, %v8349_v10  ;;  %v8497_v10 = vld [vmem:[%s14447_s3 + $0x2f8] sm:$0xff] }
 0x618   : > { %8508 = vmatmul.mubr.msk.f32.gmra.mrb[36].mxu0 %vm485_vm2, %v8492_v22  ;;  %v4725_v24 = vpop.permute.xlu1 %4724  ;;  %5041 = vmatprep.mubr.f32.mxu1 %v9996_v16 }
 0x619   : > { %v9088_v55 = vpack.c.bf16 %v6573_v63, %v6571_v51  ;;  %v4711_v27 = vpop.permute.xlu0 %4710  ;;  %6452 = vmatprep.mubr.f32.mxu0 %v9996_v16  ;;  %v9086_v41 = vpack.c.bf16 %v6574_v50, %v6572_v4  ;;  %v4742_v31 = vsel %vm345_vm1, %v4725_v24, %v4709_v33  ;;  %v4734_v52 = vsel %vm345_vm1, %v4709_v33, %v4725_v24  ;;  %v4760_v33 = vld [vmem:[%s14447_s3] sm:$0xff] }
 0x61a   : > { %7167 = vrot.lane.b32.xlu1 %v12753_v13, %s10003_s23  ;;  %v8494_v13 = vld [vmem:[%s14447_s3 + $0x2e0] sm:$0xff]  ;;  %v4756_v18 = vmul.f32 %v4742_v31, %v10331_v42  ;;  %v4757_v46 = vmul.f32 %v4734_v52, %v10334_v43  ;;  %v4763_v52 = vld [vmem:[%s14447_s3 + $0x18] sm:$0xff] }
 0x61b   : > { %5623 = vrot.lane.b32.xlu0 %v12758_v47, %s9999_s10  ;;  %8366 = vmatmul.mubr.msk.f32.gmra.mrb[40].mxu1 %vm485_vm2, %v8350_v34  ;;  %v8514_v4 = vld [vmem:[%s14447_s3 + $0x300] sm:$0xff] }
 0x61c   : > { %8509 = vmatmul.mubr.msk.f32.gmra.mrb[38].mxu0 %vm485_vm2, %v8493_v25  ;;  %9087 = vmatprep.subr.bf16.mxu0 %v9086_v41  ;;  %v6528_v2 = vpop.permute.xlu1 %6527  ;;  %v4762_v41 = vld [vmem:[%s14447_s3 + $0x10] sm:$0xff] }
 0x61d   : > { %9089 = vmatpush1.bf16.msra.mxu0 %v9088_v55  ;;  %v6530_v14 = vpop.permute.xlu0 %6529  ;;  %5047 = vmatprep.mubr.f32.mxu1 %v9996_v16 }
 0x61e   : > { %6458 = vmatprep.mubr.f32.mxu0 %v9996_v16  ;;  %7183 = vrot.lane.b32.xlu1 %v12749_v62, %s10003_s23  ;;  %v8352_v62 = vld [vmem:[%s14447_s3 + $0xf0] sm:$0xff] }
 0x61f   : > { %7169 = vrot.lane.b32.xlu0 %v12746_v29, %s10003_s23  ;;  %8367 = vmatmul.mubr.msk.f32.gmra.mrb[42].mxu1 %vm485_vm2, %v8351_v1  ;;  %v8495_v29 = vld [vmem:[%s14447_s3 + $0x2e8] sm:$0xff] }
 0x620   : > { %8510 = vmatmul.mubr.msk.f32.gmra.mrb[40].mxu0 %vm485_vm2, %v8494_v13  ;;  %v6544_v32 = vpop.permute.xlu1 %6543  ;;  %5053 = vmatprep.mubr.f32.mxu1 %v9996_v16 }
 0x621   : > { %v4727_v7 = vpop.permute.xlu0 %4726  ;;  %6464 = vmatprep.mubr.f32.mxu0 %v9996_v16  ;;  %v6553_v54 = vsel %vm1703_vm6, %v6528_v2, %v6544_v32 }
 0x622   : > { %v4735_v57 = vsel %vm345_vm1, %v4711_v27, %v4727_v7  ;;  %v4743_v11 = vsel %vm345_vm1, %v4727_v7, %v4711_v27  ;;  %5609 = vrot.lane.b32.xlu1 %v12782_v21, %s9999_s10  ;;  %v6575_v0 = vmul.f32 %v6553_v54, %v10943_v30 }
 0x623   : > { %v4758_v9 = vmul.f32 %v4743_v11, %v10331_v42  ;;  %v4759_v23 = vmul.f32 %v4735_v57, %v10334_v43  ;;  %7185 = vrot.lane.b32.xlu0 %v12758_v47, %s10003_s23  ;;  %8368 = vmatmul.mubr.msk.f32.gmra.mrb[44].mxu1 %vm485_vm2, %v8352_v62  ;;  %v6561_v42 = vsel %vm1703_vm6, %v6544_v32, %v6528_v2  ;;  %v8515_v2 = vld [vmem:[%s14447_s3 + $0x308] sm:$0xff]  ;;  %v8516_v62 = vld [vmem:[%s14447_s3 + $0x310] sm:$0xff] }
 0x624   : > { %8511 = vmatmul.mubr.msk.f32.gmra.mrb[42].mxu0 %vm485_vm2, %v8495_v29  ;;  %v5276_v49 = vpop.permute.xlu1 %5275  ;;  %5059 = vmatprep.mubr.f32.mxu1 %v9996_v16  ;;  %v6576_v15 = vmul.f32 %v6561_v42, %v10892_v38 }
 0x625   : > { %v9012_v43 = vpack.c.bf16 %v4758_v9, %v4756_v18  ;;  %v6546_v45 = vpop.permute.xlu0 %6545  ;;  %6470 = vmatprep.mubr.f32.mxu0 %v9996_v16  ;;  %v9010_v47 = vpack.c.bf16 %v4759_v23, %v4757_v46  ;;  %v4764_v9 = vld [vmem:[%s14447_s3 + $0x20] sm:$0xff] }
 0x626   : > { %v6554_v35 = vsel %vm1703_vm6, %v6530_v14, %v6546_v45  ;;  %v6562_v20 = vsel %vm1703_vm6, %v6546_v45, %v6530_v14  ;;  %5625 = vrot.lane.b32.xlu1 %v12778_v44, %s9999_s10 }
 0x627   : > { %v6577_v37 = vmul.f32 %v6554_v35, %v10943_v30  ;;  %v6578_v53 = vmul.f32 %v6562_v20, %v10892_v38  ;;  %5611 = vrot.lane.b32.xlu0 %v12785_v8, %s9999_s10  ;;  %8369 = vmatmul.mubr.msk.f32.gmra.mrb[46].mxu1 %vm485_vm2, %v8353_v39  ;;  %v8518_v20 = vld [vmem:[%s14447_s3 + $0x320] sm:$0xff] }
 0x628   : > { %9011 = vmatprep.subr.bf16.mxu1 %v9010_v47  ;;  %8512 = vmatmul.mubr.msk.f32.gmra.mrb[44].mxu0 %vm485_vm2, %v8496_v17  ;;  %v5292_v36 = vpop.permute.xlu1 %5291  ;;  %v4765_v47 = vld [vmem:[%s14447_s3 + $0x28] sm:$0xff] }
 0x629   : > { %9013 = vmatpush1.bf16.msra.mxu1 %v9012_v43  ;;  %v5278_v61 = vpop.permute.xlu0 %5277  ;;  %5178 = vmatprep.mubr.f32.mxu1 %v9996_v16  ;;  %v9092_v60 = vpack.c.bf16 %v6577_v37, %v6575_v0  ;;  %v9090_v38 = vpack.c.bf16 %v6578_v53, %v6576_v15  ;;  %v5315_v30 = vsel %vm792_vm3, %v5292_v36, %v5276_v49 }
 0x62a   : > { %6476 = vmatprep.mubr.f32.mxu0 %v9996_v16  ;;  %7171 = vrot.lane.b32.xlu1 %v12782_v21, %s10003_s23  ;;  %v5307_v51 = vsel %vm792_vm3, %v5276_v49, %v5292_v36  ;;  %v4761_v21 = vld [vmem:[%s14447_s3 + $0x8] sm:$0xff]  ;;  %v5323_v63 = vmul.f32 %v5315_v30, %v10460_v26  ;;  %v8517_v49 = vld [vmem:[%s14447_s3 + $0x318] sm:$0xff] }
 0x62b   : > { %7173 = vrot.lane.b32.xlu0 %v12785_v8, %s10003_s23  ;;  %9091 = vmatprep.subr.bf16.mxu0 %v9090_v38  ;;  %v5324_v34 = vmul.f32 %v5307_v51, %v10463_v28  ;;  %v8519_v38 = vld [vmem:[%s14447_s3 + $0x328] sm:$0xff] }
 0x62c   : > { %8370 = vmatmul.mubr.msk.f32.vlgmr.msra.gmra.mrb[16].mxu1 %vm485_vm2, %v4760_v33  ;;  %8513 = vmatmul.mubr.msk.f32.gmra.mrb[46].mxu0 %vm485_vm2, %v8497_v10  ;;  %v6838_v22 = vpop.permute.xlu1 %6837  ;;  %v4766_v10 = vld [vmem:[%s14447_s3 + $0x30] sm:$0xff] }
 0x62d   : > { %v5294_v48 = vpop.permute.xlu0 %5293  ;;  %5184 = vmatprep.mubr.f32.mxu1 %v9996_v16  ;;  %9093 = vmatpush1.bf16.msra.mxu0 %v9092_v60 }
 0x62e   : > { %v5308_v8 = vsel %vm792_vm3, %v5278_v61, %v5294_v48  ;;  %v5316_v3 = vsel %vm792_vm3, %v5294_v48, %v5278_v61  ;;  %6708 = vmatprep.mubr.f32.mxu0 %v9996_v16  ;;  %7187 = vrot.lane.b32.xlu1 %v12778_v44, %s10003_s23 }
 0x62f   : > { %v5325_v50 = vmul.f32 %v5316_v3, %v10460_v26  ;;  %v5326_v24 = vmul.f32 %v5308_v8, %v10463_v28  ;;  %5627 = vrot.lane.b32.xlu0 %v12790_v6, %s9999_s10 }
 0x630   : > { %8371 = vmatmul.mubr.msk.f32.gmra.mrb[18].mxu1 %vm485_vm2, %v4761_v21  ;;  %v6854_v55 = vpop.permute.xlu1 %6853  ;;  %8530 = vmatmul.mubr.msk.f32.vlgmr.msra.gmra.mrb[16].mxu0 %vm485_vm2, %v8514_v4  ;;  %v4767_v21 = vld [vmem:[%s14447_s3 + $0x38] sm:$0xff]  ;;  %v8520_v4 = vld [vmem:[%s14447_s3 + $0x330] sm:$0xff] }
 0x631   : > { %v9016_v27 = vpack.c.bf16 %v5325_v50, %v5323_v63  ;;  %v6840_v25 = vpop.permute.xlu0 %6839  ;;  %5190 = vmatprep.mubr.f32.mxu1 %v9996_v16  ;;  %6714 = vmatprep.mubr.f32.mxu0 %v9996_v16  ;;  %v9014_v44 = vpack.c.bf16 %v5326_v24, %v5324_v34  ;;  %v6869_v14 = vsel %vm1943_vm7, %v6838_v22, %v6854_v55 }
 0x632   : > { %v6877_v13 = vsel %vm1943_vm7, %v6854_v55, %v6838_v22  ;;  %v6885_v18 = vmul.f32 %v6869_v14, %v11083_v5 }
 0x633   : > { %7189 = vrot.lane.b32.xlu0 %v12790_v6, %s10003_s23  ;;  %9015 = vmatprep.subr.bf16.mxu1 %v9014_v44  ;;  %v6886_v57 = vmul.f32 %v6877_v13, %v11008_v56  ;;  %v8521_v44 = vld [vmem:[%s14447_s3 + $0x338] sm:$0xff] }
 0x634   : > { %8372 = vmatmul.mubr.msk.f32.gmra.mrb[20].mxu1 %vm485_vm2, %v4762_v41  ;;  %v5280_v1 = vpop.permute.xlu1 %5279  ;;  %8531 = vmatmul.mubr.msk.f32.gmra.mrb[18].mxu0 %vm485_vm2, %v8515_v2 }
 0x635   : > { %9017 = vmatpush1.bf16.msra.mxu1 %v9016_v27  ;;  %v6856_v31 = vpop.permute.xlu0 %6855  ;;  %5196 = vmatprep.mubr.f32.mxu1 %v9996_v16 }
 0x636   : > { %v6870_v6 = vsel %vm1943_vm7, %v6840_v25, %v6856_v31  ;;  %v6878_v32 = vsel %vm1943_vm7, %v6856_v31, %v6840_v25  ;;  %6720 = vmatprep.mubr.f32.mxu0 %v9996_v16  ;;  %v4768_v25 = vld [vmem:[%s14447_s3 + $0x40] sm:$0xff] }
 0x637   : > { %v6887_v7 = vmul.f32 %v6870_v6, %v11083_v5  ;;  %v6888_v29 = vmul.f32 %v6878_v32, %v11008_v56 }
 0x638   : > { %8373 = vmatmul.mubr.msk.f32.gmra.mrb[22].mxu1 %vm485_vm2, %v4763_v52  ;;  %v5296_v11 = vpop.permute.xlu1 %5295  ;;  %8532 = vmatmul.mubr.msk.f32.gmra.mrb[20].mxu0 %vm485_vm2, %v8516_v62  ;;  %v4769_v52 = vld [vmem:[%s14447_s3 + $0x48] sm:$0xff]  ;;  %v8522_v62 = vld [vmem:[%s14447_s3 + $0x340] sm:$0xff] }
 0x639   : > { %v5282_v46 = vpop.permute.xlu0 %5281  ;;  %5202 = vmatprep.mubr.f32.mxu1 %v9996_v16  ;;  %v9096_v23 = vpack.c.bf16 %v6887_v7, %v6885_v18  ;;  %6726 = vmatprep.mubr.f32.mxu0 %v9996_v16  ;;  %v9094_v39 = vpack.c.bf16 %v6888_v29, %v6886_v57  ;;  %v5317_v54 = vsel %vm792_vm3, %v5296_v11, %v5280_v1 }
 0x63a   : > { %v5309_v43 = vsel %vm792_vm3, %v5280_v1, %v5296_v11  ;;  %v5327_v37 = vmul.f32 %v5317_v54, %v10460_v26 }
 0x63b   : > { %9095 = vmatprep.subr.bf16.mxu0 %v9094_v39  ;;  %v5328_v15 = vmul.f32 %v5309_v43, %v10463_v28  ;;  %v8523_v39 = vld [vmem:[%s14447_s3 + $0x348] sm:$0xff] }
 0x63c   : > { %8374 = vmatmul.mubr.msk.f32.gmra.mrb[24].mxu1 %vm485_vm2, %v4764_v9  ;;  %v6842_v42 = vpop.permute.xlu1 %6841  ;;  %8533 = vmatmul.mubr.msk.f32.gmra.mrb[22].mxu0 %vm485_vm2, %v8517_v49 }
 0x63d   : > { %v5298_v45 = vpop.permute.xlu0 %5297  ;;  %5208 = vmatprep.mubr.f32.mxu1 %v9996_v16  ;;  %9097 = vmatpush1.bf16.msra.mxu0 %v9096_v23  ;;  %v4770_v23 = vld [vmem:[%s14447_s3 + $0x50] sm:$0xff] }
 0x63e   : > { %v5310_v17 = vsel %vm792_vm3, %v5282_v46, %v5298_v45  ;;  %v5318_v35 = vsel %vm792_vm3, %v5298_v45, %v5282_v46  ;;  %6732 = vmatprep.mubr.f32.mxu0 %v9996_v16 }
 0x63f   : > { %v5329_v53 = vmul.f32 %v5318_v35, %v10460_v26  ;;  %v5330_v0 = vmul.f32 %v5310_v17, %v10463_v28 }
 0x640   : > { %8375 = vmatmul.mubr.msk.f32.gmra.mrb[26].mxu1 %vm485_vm2, %v4765_v47  ;;  %v6858_v36 = vpop.permute.xlu1 %6857  ;;  %8534 = vmatmul.mubr.msk.f32.gmra.mrb[24].mxu0 %vm485_vm2, %v8518_v20  ;;  %v4771_v47 = vld [vmem:[%s14447_s3 + $0x58] sm:$0xff]  ;;  %v8524_v20 = vld [vmem:[%s14447_s3 + $0x350] sm:$0xff] }
 0x641   : > { %v9020_v61 = vpack.c.bf16 %v5329_v53, %v5327_v37  ;;  %v6844_v33 = vpop.permute.xlu0 %6843  ;;  %5214 = vmatprep.mubr.f32.mxu1 %v9996_v16  ;;  %6738 = vmatprep.mubr.f32.mxu0 %v9996_v16  ;;  %v9018_v60 = vpack.c.bf16 %v5330_v0, %v5328_v15  ;;  %v6871_v22 = vsel %vm1943_vm7, %v6842_v42, %v6858_v36 }
 0x642   : > { %v6879_v51 = vsel %vm1943_vm7, %v6858_v36, %v6842_v42  ;;  %v6889_v24 = vmul.f32 %v6871_v22, %v11083_v5 }
 0x643   : > { %9019 = vmatprep.subr.bf16.mxu1 %v9018_v60  ;;  %v6890_v34 = vmul.f32 %v6879_v51, %v11008_v56  ;;  %v8525_v60 = vld [vmem:[%s14447_s3 + $0x358] sm:$0xff]  ;;  %v4773_v51 = vld [vmem:[%s14447_s3 + $0x68] sm:$0xff] }
 0x644   : > { %8376 = vmatmul.mubr.msk.f32.gmra.mrb[28].mxu1 %vm485_vm2, %v4766_v10  ;;  %v5284_v30 = vpop.permute.xlu1 %5283  ;;  %8535 = vmatmul.mubr.msk.f32.gmra.mrb[26].mxu0 %vm485_vm2, %v8519_v38 }
 0x645   : > { %9021 = vmatpush1.bf16.msra.mxu1 %v9020_v61  ;;  %v6860_v48 = vpop.permute.xlu0 %6859  ;;  %5220 = vmatprep.mubr.f32.mxu1 %v9996_v16 }
 0x646   : > { %v6872_v8 = vsel %vm1943_vm7, %v6844_v33, %v6860_v48  ;;  %v6880_v3 = vsel %vm1943_vm7, %v6860_v48, %v6844_v33  ;;  %6744 = vmatprep.mubr.f32.mxu0 %v9996_v16  ;;  %v4772_v33 = vld [vmem:[%s14447_s3 + $0x60] sm:$0xff] }
 0x647   : > { %v6891_v63 = vmul.f32 %v6872_v8, %v11083_v5  ;;  %v6892_v50 = vmul.f32 %v6880_v3, %v11008_v56  ;;  %v8526_v48 = vld [vmem:[%s14447_s3 + $0x360] sm:$0xff] }
 0x648   : > { %8377 = vmatmul.mubr.msk.f32.gmra.mrb[30].mxu1 %vm485_vm2, %v4767_v21  ;;  %v5300_v55 = vpop.permute.xlu1 %5299  ;;  %8536 = vmatmul.mubr.msk.f32.gmra.mrb[28].mxu0 %vm485_vm2, %v8520_v4 }
 0x649   : > { %v5286_v27 = vpop.permute.xlu0 %5285  ;;  %5226 = vmatprep.mubr.f32.mxu1 %v9996_v16  ;;  %v9100_v41 = vpack.c.bf16 %v6891_v63, %v6889_v24  ;;  %6750 = vmatprep.mubr.f32.mxu0 %v9996_v16  ;;  %v9098_v2 = vpack.c.bf16 %v6892_v50, %v6890_v34  ;;  %v5319_v1 = vsel %vm792_vm3, %v5300_v55, %v5284_v30  ;;  %v4774_v63 = vld [vmem:[%s14447_s3 + $0x70] sm:$0xff]  ;;  %v8527_v34 = vld [vmem:[%s14447_s3 + $0x368] sm:$0xff] }
 0x64a   : > { %v5311_v13 = vsel %vm792_vm3, %v5284_v30, %v5300_v55  ;;  %v5331_v7 = vmul.f32 %v5319_v1, %v10460_v26 }
 0x64b   : > { %9099 = vmatprep.subr.bf16.mxu0 %v9098_v2  ;;  %v5332_v57 = vmul.f32 %v5311_v13, %v10463_v28 }
 0x64c   : > { %8378 = vmatmul.mubr.msk.f32.gmra.mrb[32].mxu1 %vm485_vm2, %v4768_v25  ;;  %v6846_v14 = vpop.permute.xlu1 %6845  ;;  %8537 = vmatmul.mubr.msk.f32.gmra.mrb[30].mxu0 %vm485_vm2, %v8521_v44 }
 0x64d   : > { %v5302_v31 = vpop.permute.xlu0 %5301  ;;  %5232 = vmatprep.mubr.f32.mxu1 %v9996_v16  ;;  %9101 = vmatpush1.bf16.msra.mxu0 %v9100_v41 }
 0x64e   : > { %v5312_v6 = vsel %vm792_vm3, %v5286_v27, %v5302_v31  ;;  %v5320_v32 = vsel %vm792_vm3, %v5302_v31, %v5286_v27  ;;  %6756 = vmatprep.mubr.f32.mxu0 %v9996_v16 }
 0x64f   : > { %v5333_v29 = vmul.f32 %v5320_v32, %v10460_v26  ;;  %v5334_v18 = vmul.f32 %v5312_v6, %v10463_v28  ;;  %v8528_v6 = vld [vmem:[%s14447_s3 + $0x370] sm:$0xff] }
 0x650   : > { %8379 = vmatmul.mubr.msk.f32.gmra.mrb[34].mxu1 %vm485_vm2, %v4769_v52  ;;  %v6862_v11 = vpop.permute.xlu1 %6861  ;;  %8538 = vmatmul.mubr.msk.f32.gmra.mrb[32].mxu0 %vm485_vm2, %v8522_v62 }
 0x651   : > { %v9024_v46 = vpack.c.bf16 %v5333_v29, %v5331_v7  ;;  %v6848_v9 = vpop.permute.xlu0 %6847  ;;  %5238 = vmatprep.mubr.f32.mxu1 %v9996_v16  ;;  %6762 = vmatprep.mubr.f32.mxu0 %v9996_v16  ;;  %v9022_v49 = vpack.c.bf16 %v5334_v18, %v5332_v57  ;;  %v6873_v42 = vsel %vm1943_vm7, %v6846_v14, %v6862_v11  ;;  %v10005_v7 = vmov 1  }
 0x652   : > { %v6881_v43 = vsel %vm1943_vm7, %v6862_v11, %v6846_v14  ;;  %v6893_v0 = vmul.f32 %v6873_v42, %v11083_v5  ;;  %9691 = vset.pattern.permute.xlu1 %v10005_v7  ;;  %v9971_v11 = vld [vmem:[%s14448_s4] sm:$0xff]  ;;  %9692 = vset.pattern.permute.xlu0 %v10005_v7  ;;  %v8391_v7 = vld [vmem:[%s14447_s3 + $0x128] sm:$0xff] }
 0x653   : > { %9023 = vmatprep.subr.bf16.mxu1 %v9022_v49  ;;  %v6894_v15 = vmul.f32 %v6881_v43, %v11008_v56  ;;  %7482 = vperm.xlu1 %9691, %v9971_v11   ;;  %v8387_v43 = vld [vmem:[%s14447_s3 + $0x108] sm:$0xff] }
 0x654   : > { %8380 = vmatmul.mubr.msk.f32.gmra.mrb[36].mxu1 %vm485_vm2, %v4770_v23  ;;  %v5288_v54 = vpop.permute.xlu1 %5287  ;;  %8539 = vmatmul.mubr.msk.f32.gmra.mrb[34].mxu0 %vm485_vm2, %v8523_v39 }
 0x655   : > { %9025 = vmatpush1.bf16.msra.mxu1 %v9024_v46  ;;  %v6864_v45 = vpop.permute.xlu0 %6863  ;;  %5244 = vmatprep.mubr.f32.mxu1 %v9996_v16 }
 0x656   : > { %v6874_v17 = vsel %vm1943_vm7, %v6848_v9, %v6864_v45  ;;  %v6882_v35 = vsel %vm1943_vm7, %v6864_v45, %v6848_v9  ;;  %6768 = vmatprep.mubr.f32.mxu0 %v9996_v16  ;;  %v8386_v9 = vld [vmem:[%s14447_s3 + $0x100] sm:$0xff] }
 0x657   : > { %v6895_v37 = vmul.f32 %v6874_v17, %v11083_v5  ;;  %v6896_v53 = vmul.f32 %v6882_v35, %v11008_v56  ;;  %v8546_v17 = vld [vmem:[%s14447_s3 + $0x380] sm:$0xff] }
 0x658   : > { %8381 = vmatmul.mubr.msk.f32.gmra.mrb[38].mxu1 %vm485_vm2, %v4771_v47  ;;  %v5304_v36 = vpop.permute.xlu1 %5303  ;;  %8540 = vmatmul.mubr.msk.f32.gmra.mrb[36].mxu0 %vm485_vm2, %v8524_v20 }
 0x659   : > { %v5290_v61 = vpop.permute.xlu0 %5289  ;;  %5250 = vmatprep.mubr.f32.mxu1 %v9996_v16  ;;  %v9104_v10 = vpack.c.bf16 %v6895_v37, %v6893_v0  ;;  %6774 = vmatprep.mubr.f32.mxu0 %v9996_v16  ;;  %v9102_v38 = vpack.c.bf16 %v6896_v53, %v6894_v15  ;;  %v5313_v21 = vsel %vm792_vm3, %v5288_v54, %v5304_v36  ;;  %v9972_v53 = vld [vmem:[%s14448_s4 + $0x10] sm:$0xff]  ;;  %v9973_v0 = vld [vmem:[%s14448_s4 + $0x8] sm:$0xff] }
 0x65a   : > { %v5321_v8 = vsel %vm792_vm3, %v5304_v36, %v5288_v54  ;;  %v5336_v27 = vmul.f32 %v5313_v21, %v10463_v28  ;;  %7490 = vperm.xlu1 %9691, %v9972_v53   ;;  %7486 = vperm.xlu0 %9692, %v9973_v0   ;;  %v8393_v0 = vld [vmem:[%s14447_s3 + $0x138] sm:$0xff] }
 0x65b   : > { %9103 = vmatprep.subr.bf16.mxu0 %v9102_v38  ;;  %v5335_v55 = vmul.f32 %v5321_v8, %v10460_v26  ;;  %v8547_v38 = vld [vmem:[%s14447_s3 + $0x388] sm:$0xff] }
 0x65c   : > { %8382 = vmatmul.mubr.msk.f32.gmra.mrb[40].mxu1 %vm485_vm2, %v4772_v33  ;;  %v6850_v30 = vpop.permute.xlu1 %6849  ;;  %8541 = vmatmul.mubr.msk.f32.gmra.mrb[38].mxu0 %vm485_vm2, %v8525_v60 }
 0x65d   : > { %v6852_v22 = vpop.permute.xlu0 %6851  ;;  %5256 = vmatprep.mubr.f32.mxu1 %v9996_v16  ;;  %9105 = vmatpush1.bf16.msra.mxu0 %v9104_v10  ;;  %v8388_v10 = vld [vmem:[%s14447_s3 + $0x110] sm:$0xff] }
 0x65e   : > { %6780 = vmatprep.mubr.f32.mxu0 %v9996_v16 }
 0x660   : > { %8383 = vmatmul.mubr.msk.f32.gmra.mrb[42].mxu1 %vm485_vm2, %v4773_v51  ;;  %v6866_v3 = vpop.permute.xlu1 %6865  ;;  %8542 = vmatmul.mubr.msk.f32.gmra.mrb[40].mxu0 %vm485_vm2, %v8526_v48 }
 0x661   : > { %v5306_v4 = vpop.permute.xlu0 %5305  ;;  %5262 = vmatprep.mubr.f32.mxu1 %v9996_v16  ;;  %6786 = vmatprep.mubr.f32.mxu0 %v9996_v16  ;;  %v6875_v44 = vsel %vm1943_vm7, %v6850_v30, %v6866_v3  ;;  %v6883_v1 = vsel %vm1943_vm7, %v6866_v3, %v6850_v30  ;;  %v9974_v30 = vld [vmem:[%s14448_s4 + $0x18] sm:$0xff] }
 0x662   : > { %v5314_v50 = vsel %vm792_vm3, %v5290_v61, %v5306_v4  ;;  %v5322_v24 = vsel %vm792_vm3, %v5306_v4, %v5290_v61  ;;  %v6897_v29 = vmul.f32 %v6875_v44, %v11083_v5  ;;  %v6898_v18 = vmul.f32 %v6883_v1, %v11008_v56  ;;  %7494 = vperm.xlu1 %9691, %v9974_v30   ;;  %v8389_v3 = vld [vmem:[%s14447_s3 + $0x118] sm:$0xff]  ;;  %v8390_v1 = vld [vmem:[%s14447_s3 + $0x120] sm:$0xff] }
 0x663   : > { %v5337_v25 = vmul.f32 %v5322_v24, %v10460_v26  ;;  %v5338_v41 = vmul.f32 %v5314_v50, %v10463_v28  ;;  %v4775_v26 = vld [vmem:[%s14447_s3 + $0x78] sm:$0xff]  ;;  %v8548_v50 = vld [vmem:[%s14447_s3 + $0x390] sm:$0xff] }
 0x664   : > { %8384 = vmatmul.mubr.msk.f32.gmra.mrb[44].mxu1 %vm485_vm2, %v4774_v63  ;;  %v5598_v2 = vpop.permute.xlu1 %5597  ;;  %8543 = vmatmul.mubr.msk.f32.gmra.mrb[42].mxu0 %vm485_vm2, %v8527_v34 }
 0x665   : > { %v9028_v14 = vpack.c.bf16 %v5337_v25, %v5335_v55  ;;  %v6868_v13 = vpop.permute.xlu0 %6867  ;;  %5268 = vmatprep.mubr.f32.mxu1 %v9996_v16  ;;  %v9026_v28 = vpack.c.bf16 %v5338_v41, %v5336_v27  ;;  %6792 = vmatprep.mubr.f32.mxu0 %v9996_v16  ;;  %v9976_v55 = vld [vmem:[%s14448_s4 + $0x28] sm:$0xff]  ;;  %v9977_v27 = vld [vmem:[%s14448_s4 + $0x30] sm:$0xff] }
 0x666   : > { %v6876_v31 = vsel %vm1943_vm7, %v6852_v22, %v6868_v13  ;;  %v6884_v52 = vsel %vm1943_vm7, %v6868_v13, %v6852_v22  ;;  %v9975_v22 = vld [vmem:[%s14448_s4 + $0x20] sm:$0xff]  ;;  %7502 = vperm.xlu1 %9691, %v9976_v55   ;;  %v8549_v13 = vld [vmem:[%s14447_s3 + $0x398] sm:$0xff] }
 0x667   : > { %v6899_v32 = vmul.f32 %v6876_v31, %v11083_v5  ;;  %v6900_v62 = vmul.f32 %v6884_v52, %v11008_v56  ;;  %9027 = vmatprep.subr.bf16.mxu1 %v9026_v28  ;;  %v8529_v56 = vld [vmem:[%s14447_s3 + $0x378] sm:$0xff]  ;;  %7498 = vperm.xlu0 %9692, %v9975_v22   ;;  %v9979_v31 = vld [vmem:[%s14448_s4 + $0x40] sm:$0xff] }
 0x668   : > { %8385 = vmatmul.mubr.msk.f32.gmra.mrb[46].mxu1 %vm485_vm2, %v4775_v26  ;;  %v5614_v57 = vpop.permute.xlu1 %5613  ;;  %8544 = vmatmul.mubr.msk.f32.gmra.mrb[44].mxu0 %vm485_vm2, %v8528_v6  ;;  %v9978_v28 = vld [vmem:[%s14448_s4 + $0x38] sm:$0xff] }
 0x669   : > { %9029 = vmatpush1.bf16.msra.mxu1 %v9028_v14  ;;  %v5600_v46 = vpop.permute.xlu0 %5599  ;;  %v9108_v23 = vpack.c.bf16 %v6899_v32, %v6897_v29  ;;  %5468 = vmatprep.mubr.f32.mxu1 %v9996_v16  ;;  %v9106_v5 = vpack.c.bf16 %v6900_v62, %v6898_v18  ;;  %v5637_v49 = vsel %vm1032_vm4, %v5614_v57, %v5598_v2 }
 0x66a   : > { %6798 = vmatprep.mubr.f32.mxu0 %v9996_v16  ;;  %v5629_v54 = vsel %vm1032_vm4, %v5598_v2, %v5614_v57  ;;  %v5645_v35 = vmul.f32 %v5637_v49, %v10590_v58  ;;  %7510 = vperm.xlu1 %9691, %v9978_v28   ;;  %v8550_v57 = vld [vmem:[%s14447_s3 + $0x3a0] sm:$0xff] }
 0x66b   : > { %9107 = vmatprep.subr.bf16.mxu0 %v9106_v5  ;;  %v5646_v15 = vmul.f32 %v5629_v54, %v10593_v59  ;;  %7506 = vperm.xlu0 %9692, %v9977_v27   ;;  %v8395_v27 = vld [vmem:[%s14447_s3 + $0x148] sm:$0xff] }
 0x66c   : > { %8402 = vmatmul.mubr.msk.f32.vlgmr.msra.gmra.mrb[16].mxu1 %vm485_vm2, %v8386_v9  ;;  %v7160_v39 = vpop.permute.xlu1 %7159  ;;  %8545 = vmatmul.mubr.msk.f32.gmra.mrb[46].mxu0 %vm485_vm2, %v8529_v56  ;;  %v9981_v56 = vld [vmem:[%s14448_s4 + $0x50] sm:$0xff] }
 0x66d   : > { %v5616_v42 = vpop.permute.xlu0 %5615  ;;  %5474 = vmatprep.mubr.f32.mxu1 %v9996_v16  ;;  %9109 = vmatpush1.bf16.msra.mxu0 %v9108_v23  ;;  %v9980_v23 = vld [vmem:[%s14448_s4 + $0x48] sm:$0xff] }
 0x66e   : > { %v5630_v45 = vsel %vm1032_vm4, %v5600_v46, %v5616_v42  ;;  %v5638_v47 = vsel %vm1032_vm4, %v5616_v42, %v5600_v46  ;;  %7030 = vmatprep.mubr.f32.mxu0 %v9996_v16  ;;  %7518 = vperm.xlu1 %9691, %v9980_v23   ;;  %v8392_v42 = vld [vmem:[%s14447_s3 + $0x130] sm:$0xff] }
 0x66f   : > { %v5647_v20 = vmul.f32 %v5638_v47, %v10590_v58  ;;  %v5648_v37 = vmul.f32 %v5630_v45, %v10593_v59  ;;  %7514 = vperm.xlu0 %9692, %v9979_v31   ;;  %v8551_v45 = vld [vmem:[%s14447_s3 + $0x3a8] sm:$0xff]  ;;  %v9982_v47 = vld [vmem:[%s14448_s4 + $0x58] sm:$0xff] }
 0x670   : > { %8403 = vmatmul.mubr.msk.f32.gmra.mrb[18].mxu1 %vm485_vm2, %v8387_v43  ;;  %v7176_v36 = vpop.permute.xlu1 %7175  ;;  %8562 = vmatmul.mubr.msk.f32.vlgmr.msra.gmra.mrb[16].mxu0 %vm485_vm2, %v8546_v17  ;;  %v9983_v17 = vld [vmem:[%s14448_s4 + $0x60] sm:$0xff] }
 0x671   : > { %v9032_v61 = vpack.c.bf16 %v5647_v20, %v5645_v35  ;;  %v7162_v33 = vpop.permute.xlu0 %7161  ;;  %5480 = vmatprep.mubr.f32.mxu1 %v9996_v16  ;;  %7036 = vmatprep.mubr.f32.mxu0 %v9996_v16  ;;  %v9030_v60 = vpack.c.bf16 %v5648_v37, %v5646_v15  ;;  %v7191_v48 = vsel %vm2183_vm8, %v7160_v39, %v7176_v36 }
 0x672   : > { %v7199_v21 = vsel %vm2183_vm8, %v7176_v36, %v7160_v39  ;;  %v7207_v25 = vmul.f32 %v7191_v48, %v11191_v12  ;;  %7526 = vperm.xlu1 %9691, %v9982_v47  }
 0x673   : > { %9031 = vmatprep.subr.bf16.mxu1 %v9030_v60  ;;  %v7208_v41 = vmul.f32 %v7199_v21, %v11141_v40  ;;  %7522 = vperm.xlu0 %9692, %v9981_v56   ;;  %v9984_v60 = vld [vmem:[%s14448_s4 + $0x68] sm:$0xff]  ;;  %v8394_v21 = vld [vmem:[%s14447_s3 + $0x140] sm:$0xff] }
 0x674   : > { %8404 = vmatmul.mubr.msk.f32.gmra.mrb[20].mxu1 %vm485_vm2, %v8388_v10  ;;  %v5602_v51 = vpop.permute.xlu1 %5601  ;;  %8563 = vmatmul.mubr.msk.f32.gmra.mrb[18].mxu0 %vm485_vm2, %v8547_v38  ;;  %v9985_v38 = vld [vmem:[%s14448_s4 + $0x70] sm:$0xff] }
 0x675   : > { %9033 = vmatpush1.bf16.msra.mxu1 %v9032_v61  ;;  %v7178_v8 = vpop.permute.xlu0 %7177  ;;  %5486 = vmatprep.mubr.f32.mxu1 %v9996_v16  ;;  %v8552_v61 = vld [vmem:[%s14447_s3 + $0x3b0] sm:$0xff] }
 0x676   : > { %v7192_v4 = vsel %vm2183_vm8, %v7162_v33, %v7178_v8  ;;  %v7200_v63 = vsel %vm2183_vm8, %v7178_v8, %v7162_v33  ;;  %7042 = vmatprep.mubr.f32.mxu0 %v9996_v16  ;;  %7534 = vperm.xlu1 %9691, %v9984_v60   ;;  %v8559_v60 = vld [vmem:[%s14447_s3 + $0x3e8] sm:$0xff] }
 0x677   : > { %v7209_v24 = vmul.f32 %v7192_v4, %v11191_v12  ;;  %v7210_v34 = vmul.f32 %v7200_v63, %v11141_v40  ;;  %7530 = vperm.xlu0 %9692, %v9983_v17   ;;  %v9986_v63 = vld [vmem:[%s14448_s4 + $0x78] sm:$0xff] }
 0x678   : > { %8405 = vmatmul.mubr.msk.f32.gmra.mrb[22].mxu1 %vm485_vm2, %v8389_v3  ;;  %v5618_v44 = vpop.permute.xlu1 %5617  ;;  %8564 = vmatmul.mubr.msk.f32.gmra.mrb[20].mxu0 %vm485_vm2, %v8548_v50  ;;  %v8553_v3 = vld [vmem:[%s14447_s3 + $0x3b8] sm:$0xff] }
 0x679   : > { %v5604_v2 = vpop.permute.xlu0 %5603  ;;  %5492 = vmatprep.mubr.f32.mxu1 %v9996_v16  ;;  %v9112_v14 = vpack.c.bf16 %v7209_v24, %v7207_v25  ;;  %7048 = vmatprep.mubr.f32.mxu0 %v9996_v16  ;;  %v9110_v26 = vpack.c.bf16 %v7210_v34, %v7208_v41  ;;  %v5639_v52 = vsel %vm1032_vm4, %v5618_v44, %v5602_v51 }
 0x67a   : > { %v5631_v32 = vsel %vm1032_vm4, %v5602_v51, %v5618_v44  ;;  %v5649_v11 = vmul.f32 %v5639_v52, %v10590_v58  ;;  %7542 = vperm.xlu1 %9691, %v9986_v63   ;;  %v8554_v44 = vld [vmem:[%s14447_s3 + $0x3c0] sm:$0xff]  ;;  %v8396_v52 = vld [vmem:[%s14447_s3 + $0x150] sm:$0xff] }
 0x67b   : > { %9111 = vmatprep.subr.bf16.mxu0 %v9110_v26  ;;  %v5650_v5 = vmul.f32 %v5631_v32, %v10593_v59  ;;  %7538 = vperm.xlu0 %9692, %v9985_v38   ;;  %v8555_v32 = vld [vmem:[%s14447_s3 + $0x3c8] sm:$0xff] }
 0x67c   : > { %8406 = vmatmul.mubr.msk.f32.gmra.mrb[24].mxu1 %vm485_vm2, %v8390_v1  ;;  %v7164_v6 = vpop.permute.xlu1 %7163  ;;  %8565 = vmatmul.mubr.msk.f32.gmra.mrb[22].mxu0 %vm485_vm2, %v8549_v13 }
 0x67d   : > { %v5620_v62 = vpop.permute.xlu0 %5619  ;;  %5498 = vmatprep.mubr.f32.mxu1 %v9996_v16  ;;  %9113 = vmatpush1.bf16.msra.mxu0 %v9112_v14 }
 0x67e   : > { %v5632_v29 = vsel %vm1032_vm4, %v5604_v2, %v5620_v62  ;;  %v5640_v18 = vsel %vm1032_vm4, %v5620_v62, %v5604_v2  ;;  %7054 = vmatprep.mubr.f32.mxu0 %v9996_v16 }
 0x67f   : > { %v5651_v46 = vmul.f32 %v5640_v18, %v10590_v58  ;;  %v5652_v9 = vmul.f32 %v5632_v29, %v10593_v59 }
 0x680   : > { %8407 = vmatmul.mubr.msk.f32.gmra.mrb[26].mxu1 %vm485_vm2, %v8391_v7  ;;  %v7180_v49 = vpop.permute.xlu1 %7179  ;;  %8566 = vmatmul.mubr.msk.f32.gmra.mrb[24].mxu0 %vm485_vm2, %v8550_v57  ;;  %v8397_v57 = vld [vmem:[%s14447_s3 + $0x158] sm:$0xff] }
 0x681   : > { %v9036_v39 = vpack.c.bf16 %v5651_v46, %v5649_v11  ;;  %v7166_v54 = vpop.permute.xlu0 %7165  ;;  %5504 = vmatprep.mubr.f32.mxu1 %v9996_v16  ;;  %7060 = vmatprep.mubr.f32.mxu0 %v9996_v16  ;;  %v9034_v43 = vpack.c.bf16 %v5652_v9, %v5650_v5  ;;  %v7193_v20 = vsel %vm2183_vm8, %v7164_v6, %v7180_v49  ;;  %v8556_v9 = vld [vmem:[%s14447_s3 + $0x3d0] sm:$0xff] }
 0x682   : > { %v7201_v37 = vsel %vm2183_vm8, %v7180_v49, %v7164_v6  ;;  %v7211_v30 = vmul.f32 %v7193_v20, %v11191_v12  ;;  %v8399_v20 = vld [vmem:[%s14447_s3 + $0x168] sm:$0xff] }
 0x683   : > { %9035 = vmatprep.subr.bf16.mxu1 %v9034_v43  ;;  %v7212_v22 = vmul.f32 %v7201_v37, %v11141_v40  ;;  %v8558_v37 = vld [vmem:[%s14447_s3 + $0x3e0] sm:$0xff] }
 0x684   : > { %8408 = vmatmul.mubr.msk.f32.gmra.mrb[28].mxu1 %vm485_vm2, %v8392_v42  ;;  %v5606_v35 = vpop.permute.xlu1 %5605  ;;  %8567 = vmatmul.mubr.msk.f32.gmra.mrb[26].mxu0 %vm485_vm2, %v8551_v45  ;;  %v8398_v42 = vld [vmem:[%s14447_s3 + $0x160] sm:$0xff]  ;;  %v8557_v45 = vld [vmem:[%s14447_s3 + $0x3d8] sm:$0xff] }
 0x685   : > { %9037 = vmatpush1.bf16.msra.mxu1 %v9036_v39  ;;  %v7182_v53 = vpop.permute.xlu0 %7181  ;;  %5510 = vmatprep.mubr.f32.mxu1 %v9996_v16 }
 0x686   : > { %v7194_v15 = vsel %vm2183_vm8, %v7166_v54, %v7182_v53  ;;  %v7202_v36 = vsel %vm2183_vm8, %v7182_v53, %v7166_v54  ;;  %7066 = vmatprep.mubr.f32.mxu0 %v9996_v16 }
 0x687   : > { %v7213_v33 = vmul.f32 %v7194_v15, %v11191_v12  ;;  %v7214_v10 = vmul.f32 %v7202_v36, %v11141_v40 }
 0x688   : > { %8409 = vmatmul.mubr.msk.f32.gmra.mrb[30].mxu1 %vm485_vm2, %v8393_v0  ;;  %v5622_v51 = vpop.permute.xlu1 %5621  ;;  %8568 = vmatmul.mubr.msk.f32.gmra.mrb[28].mxu0 %vm485_vm2, %v8552_v61  ;;  %v8400_v61 = vld [vmem:[%s14447_s3 + $0x170] sm:$0xff] }
 0x689   : > { %v5608_v48 = vpop.permute.xlu0 %5607  ;;  %5516 = vmatprep.mubr.f32.mxu1 %v9996_v16  ;;  %v9116_v8 = vpack.c.bf16 %v7213_v33, %v7211_v30  ;;  %7072 = vmatprep.mubr.f32.mxu0 %v9996_v16  ;;  %v9114_v4 = vpack.c.bf16 %v7214_v10, %v7212_v22  ;;  %v5641_v50 = vsel %vm1032_vm4, %v5622_v51, %v5606_v35 }
 0x68a   : > { %v5633_v34 = vsel %vm1032_vm4, %v5606_v35, %v5622_v51  ;;  %v5653_v2 = vmul.f32 %v5641_v50, %v10590_v58 }
 0x68b   : > { %9115 = vmatprep.subr.bf16.mxu0 %v9114_v4  ;;  %v5654_v13 = vmul.f32 %v5633_v34, %v10593_v59  ;;  %v8560_v34 = vld [vmem:[%s14447_s3 + $0x3f0] sm:$0xff] }
 0x68c   : > { %8410 = vmatmul.mubr.msk.f32.gmra.mrb[32].mxu1 %vm485_vm2, %v8394_v21  ;;  %v7168_v24 = vpop.permute.xlu1 %7167  ;;  %8569 = vmatmul.mubr.msk.f32.gmra.mrb[30].mxu0 %vm485_vm2, %v8553_v3  ;;  %v7818_v21 = vld [vmem:[%s14450_s6 + $0x88] sm:$0xff] }
 0x68d   : > { %v5624_v55 = vpop.permute.xlu0 %5623  ;;  %5522 = vmatprep.mubr.f32.mxu1 %v9996_v16  ;;  %9117 = vmatpush1.bf16.msra.mxu0 %v9116_v8 }
 0x68e   : > { %v5634_v25 = vsel %vm1032_vm4, %v5608_v48, %v5624_v55  ;;  %v5642_v41 = vsel %vm1032_vm4, %v5624_v55, %v5608_v48  ;;  %7078 = vmatprep.mubr.f32.mxu0 %v9996_v16  ;;  %v7817_v48 = vld [vmem:[%s14450_s6 + $0x80] sm:$0xff] }
 0x68f   : > { %v5655_v1 = vmul.f32 %v5642_v41, %v10590_v58  ;;  %v5656_v14 = vmul.f32 %v5634_v25, %v10593_v59  ;;  %v9126_v55 = vpack.c.bf16 %v7818_v21, %v7817_v48  ;;  %v7805_v48 = vld [vmem:[%s14450_s6 + $0x20] sm:$0xff] }
 0x690   : > { %8411 = vmatmul.mubr.msk.f32.gmra.mrb[34].mxu1 %vm485_vm2, %v8395_v27  ;;  %v7184_v26 = vpop.permute.xlu1 %7183  ;;  %8570 = vmatmul.mubr.msk.f32.gmra.mrb[32].mxu0 %vm485_vm2, %v8554_v44 }
 0x691   : > { %v9040_v28 = vpack.c.bf16 %v5655_v1, %v5653_v2  ;;  %v7170_v31 = vpop.permute.xlu0 %7169  ;;  %5528 = vmatprep.mubr.f32.mxu1 %v9996_v16  ;;  %7084 = vmatprep.mubr.f32.mxu0 %v9996_v16  ;;  %v9038_v6 = vpack.c.bf16 %v5656_v14, %v5654_v13  ;;  %v7195_v7 = vsel %vm2183_vm8, %v7168_v24, %v7184_v26  ;;  %v7802_v2 = vld [vmem:[%s14450_s6 + $0x8] sm:$0xff]  ;;  %v7819_v1 = vld [vmem:[%s14450_s6 + $0x90] sm:$0xff]  ;;  %v8418_v14 = vld [vmem:[%s14447_s3 + $0x180] sm:$0xff] }
 0x692   : > { %v7203_v29 = vsel %vm2183_vm8, %v7184_v26, %v7168_v24  ;;  %v7215_v5 = vmul.f32 %v7195_v7, %v11191_v12  ;;  %v8561_v26 = vld [vmem:[%s14447_s3 + $0x3f8] sm:$0xff] }
 0x693   : > { %9039 = vmatprep.subr.bf16.mxu1 %v9038_v6  ;;  %v7216_v49 = vmul.f32 %v7203_v29, %v11141_v40  ;;  %v7804_v6 = vld [vmem:[%s14450_s6 + $0x18] sm:$0xff]  ;;  %v8420_v29 = vld [vmem:[%s14447_s3 + $0x190] sm:$0xff] }
 0x694   : > { %8412 = vmatmul.mubr.msk.f32.gmra.mrb[36].mxu1 %vm485_vm2, %v8396_v52  ;;  %v5610_v62 = vpop.permute.xlu1 %5609  ;;  %8571 = vmatmul.mubr.msk.f32.gmra.mrb[34].mxu0 %vm485_vm2, %v8555_v32  ;;  %v7803_v52 = vld [vmem:[%s14450_s6 + $0x10] sm:$0xff]  ;;  %v8419_v32 = vld [vmem:[%s14447_s3 + $0x188] sm:$0xff] }
 0x695   : > { %9041 = vmatpush1.bf16.msra.mxu1 %v9040_v28  ;;  %v7186_v18 = vpop.permute.xlu0 %7185  ;;  %5534 = vmatprep.mubr.f32.mxu1 %v9996_v16  ;;  %v9128_v28 = vpack.c.bf16 %v7802_v2, %v7801_v19  ;;  %v9132_v7 = vpack.c.bf16 %v7804_v6, %v7803_v52  ;;  %v7811_v2 = vld [vmem:[%s14450_s6 + $0x50] sm:$0xff]  ;;  %v7832_v6 = vld [vmem:[%s14450_s6 + $0xf8] sm:$0xff] }
 0x696   : > { %v7196_v11 = vsel %vm2183_vm8, %v7170_v31, %v7186_v18  ;;  %v7204_v46 = vsel %vm2183_vm8, %v7186_v18, %v7170_v31  ;;  %7090 = vmatprep.mubr.f32.mxu0 %v9996_v16  ;;  %v8579_v18 = vld [vmem:[%s14447_s3 + $0x408] sm:$0xff]  ;;  %v7831_v52 = vld [vmem:[%s14450_s6 + $0xf0] sm:$0xff] }
 0x697   : > { %v7217_v23 = vmul.f32 %v7196_v11, %v11191_v12  ;;  %v7218_v56 = vmul.f32 %v7204_v46, %v11141_v40  ;;  %v8580_v11 = vld [vmem:[%s14447_s3 + $0x410] sm:$0xff]  ;;  %v8422_v46 = vld [vmem:[%s14447_s3 + $0x1a0] sm:$0xff] }
 0x698   : > { %8413 = vmatmul.mubr.msk.f32.gmra.mrb[38].mxu1 %vm485_vm2, %v8397_v57  ;;  %v5626_v39 = vpop.permute.xlu1 %5625  ;;  %8572 = vmatmul.mubr.msk.f32.gmra.mrb[36].mxu0 %vm485_vm2, %v8556_v9  ;;  %v8421_v57 = vld [vmem:[%s14447_s3 + $0x198] sm:$0xff] }
 0x699   : > { %v5612_v54 = vpop.permute.xlu0 %5611  ;;  %5540 = vmatprep.mubr.f32.mxu1 %v9996_v16  ;;  %v9120_v43 = vpack.c.bf16 %v7217_v23, %v7215_v5  ;;  %7096 = vmatprep.mubr.f32.mxu0 %v9996_v16  ;;  %v9118_v47 = vpack.c.bf16 %v7218_v56, %v7216_v49  ;;  %v5635_v53 = vsel %vm1032_vm4, %v5610_v62, %v5626_v39  ;;  %v8581_v9 = vld [vmem:[%s14447_s3 + $0x418] sm:$0xff]  ;;  %v8423_v23 = vld [vmem:[%s14447_s3 + $0x1a8] sm:$0xff]  ;;  %v8582_v56 = vld [vmem:[%s14447_s3 + $0x420] sm:$0xff] }
 0x69a   : > { %v5643_v0 = vsel %vm1032_vm4, %v5626_v39, %v5610_v62  ;;  %v5658_v30 = vmul.f32 %v5635_v53, %v10593_v59  ;;  %v8578_v62 = vld [vmem:[%s14447_s3 + $0x400] sm:$0xff]  ;;  %v8424_v5 = vld [vmem:[%s14447_s3 + $0x1b0] sm:$0xff]  ;;  %v8583_v49 = vld [vmem:[%s14447_s3 + $0x428] sm:$0xff] }
 0x69b   : > { %9119 = vmatprep.subr.bf16.mxu0 %v9118_v47  ;;  %v5657_v38 = vmul.f32 %v5643_v0, %v10590_v58  ;;  %v8425_v39 = vld [vmem:[%s14447_s3 + $0x1b8] sm:$0xff]  ;;  %v8586_v47 = vld [vmem:[%s14447_s3 + $0x440] sm:$0xff] }
 0x69c   : > { %8414 = vmatmul.mubr.msk.f32.gmra.mrb[40].mxu1 %vm485_vm2, %v8398_v42  ;;  %v7172_v17 = vpop.permute.xlu1 %7171  ;;  %8573 = vmatmul.mubr.msk.f32.gmra.mrb[38].mxu0 %vm485_vm2, %v8557_v45  ;;  %v8426_v42 = vld [vmem:[%s14447_s3 + $0x1c0] sm:$0xff]  ;;  %v8427_v45 = vld [vmem:[%s14447_s3 + $0x1c8] sm:$0xff]  ;;  %v8589_v0 = vld [vmem:[%s14447_s3 + $0x458] sm:$0xff] }
 0x69d   : > { %v7174_v35 = vpop.permute.xlu0 %7173  ;;  %5546 = vmatprep.mubr.f32.mxu1 %v9996_v16  ;;  %9121 = vmatpush1.bf16.msra.mxu0 %v9120_v43  ;;  %v8585_v43 = vld [vmem:[%s14447_s3 + $0x438] sm:$0xff]  ;;  %v8430_v53 = vld [vmem:[%s14447_s3 + $0x1e0] sm:$0xff] }
 0x69e   : > { %7102 = vmatprep.mubr.f32.mxu0 %v9996_v16 }
 0x6a0   : > { %8415 = vmatmul.mubr.msk.f32.gmra.mrb[42].mxu1 %vm485_vm2, %v8399_v20  ;;  %8574 = vmatmul.mubr.msk.f32.gmra.mrb[40].mxu0 %vm485_vm2, %v8558_v37  ;;  %v7188_v15 = vpop.permute.xlu1 %7187  ;;  %v8429_v20 = vld [vmem:[%s14447_s3 + $0x1d8] sm:$0xff]  ;;  %v8588_v37 = vld [vmem:[%s14447_s3 + $0x450] sm:$0xff] }
 0x6a1   : > { %v5628_v36 = vpop.permute.xlu0 %5627  ;;  %5552 = vmatprep.mubr.f32.mxu1 %v9996_v16  ;;  %7108 = vmatprep.mubr.f32.mxu0 %v9996_v16  ;;  %v7197_v8 = vsel %vm2183_vm8, %v7172_v17, %v7188_v15  ;;  %v7205_v3 = vsel %vm2183_vm8, %v7188_v15, %v7172_v17  ;;  %v8428_v17 = vld [vmem:[%s14447_s3 + $0x1d0] sm:$0xff]  ;;  %v8431_v15 = vld [vmem:[%s14447_s3 + $0x1e8] sm:$0xff] }
 0x6a2   : > { %v5636_v33 = vsel %vm1032_vm4, %v5612_v54, %v5628_v36  ;;  %v5644_v10 = vsel %vm1032_vm4, %v5628_v36, %v5612_v54  ;;  %v7219_v27 = vmul.f32 %v7197_v8, %v11191_v12  ;;  %v7220_v25 = vmul.f32 %v7205_v3, %v11141_v40  ;;  %v8584_v54 = vld [vmem:[%s14447_s3 + $0x430] sm:$0xff]  ;;  %v8590_v36 = vld [vmem:[%s14447_s3 + $0x460] sm:$0xff]  ;;  %v7824_v3 = vld [vmem:[%s14450_s6 + $0xb8] sm:$0xff] }
 0x6a3   : > { %v5659_v22 = vmul.f32 %v5644_v10, %v10590_v58  ;;  %v5660_v51 = vmul.f32 %v5636_v33, %v10593_v59  ;;  %v8401_v59 = vld [vmem:[%s14447_s3 + $0x178] sm:$0xff]  ;;  %v8591_v33 = vld [vmem:[%s14447_s3 + $0x468] sm:$0xff]  ;;  %v7823_v8 = vld [vmem:[%s14450_s6 + $0xb0] sm:$0xff] }
 0x6a4   : > { %8416 = vmatmul.mubr.msk.f32.gmra.mrb[44].mxu1 %vm485_vm2, %v8400_v61  ;;  %8575 = vmatmul.mubr.msk.f32.gmra.mrb[42].mxu0 %vm485_vm2, %v8559_v60  ;;  %v8432_v61 = vld [vmem:[%s14447_s3 + $0x1f0] sm:$0xff]  ;;  %v8433_v10 = vld [vmem:[%s14447_s3 + $0x1f8] sm:$0xff] }
 0x6a5   : > { %v9044_v4 = vpack.c.bf16 %v5659_v22, %v5657_v38  ;;  %v7190_v58 = vpop.permute.xlu0 %7189  ;;  %5558 = vmatprep.mubr.f32.mxu1 %v9996_v16  ;;  %v9042_v63 = vpack.c.bf16 %v5660_v51, %v5658_v30  ;;  %7114 = vmatprep.mubr.f32.mxu0 %v9996_v16  ;;  %v8592_v60 = vld [vmem:[%s14447_s3 + $0x470] sm:$0xff]  ;;  %v8593_v38 = vld [vmem:[%s14447_s3 + $0x478] sm:$0xff]  ;;  %v7821_v30 = vld [vmem:[%s14450_s6 + $0xa0] sm:$0xff] }
 0x6a6   : > { %v7198_v50 = vsel %vm2183_vm8, %v7174_v35, %v7190_v58  ;;  %v7206_v24 = vsel %vm2183_vm8, %v7190_v58, %v7174_v35  ;;  %v8587_v35 = vld [vmem:[%s14447_s3 + $0x448] sm:$0xff]  ;;  %v7807_v58 = vld [vmem:[%s14450_s6 + $0x30] sm:$0xff] }
 0x6a7   : > { %v7221_v41 = vmul.f32 %v7198_v50, %v11191_v12  ;;  %v7222_v44 = vmul.f32 %v7206_v24, %v11141_v40  ;;  %9043 = vmatprep.subr.bf16.mxu1 %v9042_v63  ;;  %v7820_v12 = vld [vmem:[%s14450_s6 + $0x98] sm:$0xff]  ;;  %v7822_v22 = vld [vmem:[%s14450_s6 + $0xa8] sm:$0xff]  ;;  %v7825_v50 = vld [vmem:[%s14450_s6 + $0xc0] sm:$0xff] }
 0x6a8   : > { %8417 = vmatmul.mubr.msk.f32.gmra.mrb[46].mxu1 %vm485_vm2, %v8401_v59  ;;  %8576 = vmatmul.mubr.msk.f32.gmra.mrb[44].mxu0 %vm485_vm2, %v8560_v34  ;;  %v9130_v31 = vpack.c.bf16 %v7820_v12, %v7819_v1  ;;  %v9134_v51 = vpack.c.bf16 %v7822_v22, %v7821_v30  ;;  %v7808_v59 = vld [vmem:[%s14450_s6 + $0x38] sm:$0xff]  ;;  %v7826_v24 = vld [vmem:[%s14450_s6 + $0xc8] sm:$0xff] }
 0x6a9   : > { %v9124_v40 = vpack.c.bf16 %v7221_v41, %v7219_v27  ;;  %9045 = vmatpush1.bf16.msra.mxu1 %v9044_v4  ;;  %v9122_v13 = vpack.c.bf16 %v7222_v44, %v7220_v25  ;;  %5790 = vmatprep.mubr.f32.mxu1 %v9996_v16  ;;  %v9138_v4 = vpack.c.bf16 %v7824_v3, %v7823_v8  ;;  %v7810_v27 = vld [vmem:[%s14450_s6 + $0x48] sm:$0xff]  ;;  %v7827_v41 = vld [vmem:[%s14450_s6 + $0xd0] sm:$0xff]  ;;  %v7828_v44 = vld [vmem:[%s14450_s6 + $0xd8] sm:$0xff] }
 0x6aa   : > { %7120 = vmatprep.mubr.f32.mxu0 %v9996_v16  ;;  %9127 = vmatprep.subr.bf16.mxu1 %v9126_v55  ;;  %v9140_v63 = vpack.c.bf16 %v7808_v59, %v7807_v58  ;;  %v9142_v34 = vpack.c.bf16 %v7826_v24, %v7825_v50  ;;  %v7809_v55 = vld [vmem:[%s14450_s6 + $0x40] sm:$0xff]  ;;  %v9146_v19 = vpack.c.bf16 %v7828_v44, %v7827_v41  ;;  %v7812_v1 = vld [vmem:[%s14450_s6 + $0x58] sm:$0xff] }
 0x6ab   : > { %9123 = vmatprep.subr.bf16.mxu0 %v9122_v13  ;;  %v9144_v25 = vpack.c.bf16 %v7810_v27, %v7809_v55  ;;  %v9148_v12 = vpack.c.bf16 %v7812_v1, %v7811_v2 }
 0x6ac   : > { %8434 = vmatmul.mubr.msk.f32.vlgmr.msra.gmra.mrb[16].mxu1 %vm485_vm2, %v8418_v14  ;;  %9125 = vmatpush1.bf16.msra.mxu0 %v9124_v40  ;;  %v7829_v40 = vld [vmem:[%s14450_s6 + $0xe0] sm:$0xff]  ;;  %v7830_v14 = vld [vmem:[%s14450_s6 + $0xe8] sm:$0xff] }
 0x6ad   : > { %8577 = vmatmul.mubr.msk.f32.gmra.mrb[46].mxu0 %vm485_vm2, %v8561_v26  ;;  %5796 = vmatprep.mubr.f32.mxu1 %v9996_v16  ;;  %v9150_v13 = vpack.c.bf16 %v7830_v14, %v7829_v40  ;;  %v7813_v26 = vld [vmem:[%s14450_s6 + $0x60] sm:$0xff] }
 0x6ae   : > { %7352 = vmatprep.mubr.f32.mxu0 %v9996_v16  ;;  %9129 = vmatpush3.bf16.msra.mxu1 %v9128_v28  ;;  %v7814_v28 = vld [vmem:[%s14450_s6 + $0x68] sm:$0xff] }
 0x6af   : > { %9131 = vmatprep.subr.bf16.mxu1 %v9130_v31  ;;  %v9152_v31 = vpack.c.bf16 %v7814_v28, %v7813_v26 }
 0x6b0   : > { %8435 = vmatmul.mubr.msk.f32.gmra.mrb[18].mxu1 %vm485_vm2, %v8419_v32  ;;  %v9154_v32 = vpack.c.bf16 %v7832_v6, %v7831_v52 }
 0x6b1   : > { %8594 = vmatmul.mubr.msk.f32.vlgmr.msra.gmra.mrb[16].mxu0 %vm485_vm2, %v8578_v62  ;;  %5802 = vmatprep.mubr.f32.mxu1 %v9996_v16  ;;  %v7815_v62 = vld [vmem:[%s14450_s6 + $0x70] sm:$0xff] }
 0x6b2   : > { %7358 = vmatprep.mubr.f32.mxu0 %v9996_v16  ;;  %9133 = vmatpush3.bf16.msra.mxu1 %v9132_v7  ;;  %v7816_v7 = vld [vmem:[%s14450_s6 + $0x78] sm:$0xff] }
 0x6b3   : > { %9135 = vmatprep.subr.bf16.mxu1 %v9134_v51 }
 0x6b4   : > { %8436 = vmatmul.mubr.msk.f32.gmra.mrb[20].mxu1 %vm485_vm2, %v8420_v29  ;;  %v9156_v29 = vpack.c.bf16 %v7816_v7, %v7815_v62 }
 0x6b5   : > { %8595 = vmatmul.mubr.msk.f32.gmra.mrb[18].mxu0 %vm485_vm2, %v8579_v18  ;;  %5808 = vmatprep.mubr.f32.mxu1 %v9996_v16 }
 0x6b6   : > { %7364 = vmatprep.mubr.f32.mxu0 %v9996_v16 }
 0x6b8   : > { %8437 = vmatmul.mubr.msk.f32.gmra.mrb[22].mxu1 %vm485_vm2, %v8421_v57 }
 0x6b9   : > { %8596 = vmatmul.mubr.msk.f32.gmra.mrb[20].mxu0 %vm485_vm2, %v8580_v11  ;;  %5814 = vmatprep.mubr.f32.mxu1 %v9996_v16 }
 0x6ba   : > { %7370 = vmatprep.mubr.f32.mxu0 %v9996_v16 }
 0x6bc   : > { %8438 = vmatmul.mubr.msk.f32.gmra.mrb[24].mxu1 %vm485_vm2, %v8422_v46 }
 0x6bd   : > { %8597 = vmatmul.mubr.msk.f32.gmra.mrb[22].mxu0 %vm485_vm2, %v8581_v9  ;;  %5820 = vmatprep.mubr.f32.mxu1 %v9996_v16 }
 0x6be   : > { %7376 = vmatprep.mubr.f32.mxu0 %v9996_v16 }
 0x6c0   : > { %8439 = vmatmul.mubr.msk.f32.gmra.mrb[26].mxu1 %vm485_vm2, %v8423_v23 }
 0x6c1   : > { %8598 = vmatmul.mubr.msk.f32.gmra.mrb[24].mxu0 %vm485_vm2, %v8582_v56  ;;  %5826 = vmatprep.mubr.f32.mxu1 %v9996_v16 }
 0x6c2   : > { %7382 = vmatprep.mubr.f32.mxu0 %v9996_v16 }
 0x6c4   : > { %8440 = vmatmul.mubr.msk.f32.gmra.mrb[28].mxu1 %vm485_vm2, %v8424_v5 }
 0x6c5   : > { %8599 = vmatmul.mubr.msk.f32.gmra.mrb[26].mxu0 %vm485_vm2, %v8583_v49  ;;  %5832 = vmatprep.mubr.f32.mxu1 %v9996_v16 }
 0x6c6   : > { %7388 = vmatprep.mubr.f32.mxu0 %v9996_v16 }
 0x6c8   : > { %8441 = vmatmul.mubr.msk.f32.gmra.mrb[30].mxu1 %vm485_vm2, %v8425_v39 }
 0x6c9   : > { %8600 = vmatmul.mubr.msk.f32.gmra.mrb[28].mxu0 %vm485_vm2, %v8584_v54  ;;  %5838 = vmatprep.mubr.f32.mxu1 %v9996_v16 }
 0x6ca   : > { %7394 = vmatprep.mubr.f32.mxu0 %v9996_v16 }
 0x6cc   : > { %8442 = vmatmul.mubr.msk.f32.gmra.mrb[32].mxu1 %vm485_vm2, %v8426_v42 }
 0x6cd   : > { %8601 = vmatmul.mubr.msk.f32.gmra.mrb[30].mxu0 %vm485_vm2, %v8585_v43  ;;  %5844 = vmatprep.mubr.f32.mxu1 %v9996_v16 }
 0x6ce   : > { %7400 = vmatprep.mubr.f32.mxu0 %v9996_v16 }
 0x6d0   : > { %8443 = vmatmul.mubr.msk.f32.gmra.mrb[34].mxu1 %vm485_vm2, %v8427_v45 }
 0x6d1   : > { %8602 = vmatmul.mubr.msk.f32.gmra.mrb[32].mxu0 %vm485_vm2, %v8586_v47  ;;  %5850 = vmatprep.mubr.f32.mxu1 %v9996_v16 }
 0x6d2   : > { %7406 = vmatprep.mubr.f32.mxu0 %v9996_v16  ;;  %v7483_v23 = vpop.permute.xlu1 %7482 }
 0x6d4   : > { %8444 = vmatmul.mubr.msk.f32.gmra.mrb[36].mxu1 %vm485_vm2, %v8428_v17 }
 0x6d5   : > { %8603 = vmatmul.mubr.msk.f32.gmra.mrb[34].mxu0 %vm485_vm2, %v8587_v35  ;;  %5856 = vmatprep.mubr.f32.mxu1 %v9996_v16 }
 0x6d6   : > { %7412 = vmatprep.mubr.f32.mxu0 %v9996_v16 }
 0x6d8   : > { %8445 = vmatmul.mubr.msk.f32.gmra.mrb[38].mxu1 %vm485_vm2, %v8429_v20 }
 0x6d9   : > { %8604 = vmatmul.mubr.msk.f32.gmra.mrb[36].mxu0 %vm485_vm2, %v8588_v37  ;;  %5862 = vmatprep.mubr.f32.mxu1 %v9996_v16  ;;  %v7487_v20 = vpop.permute.xlu0 %7486 }
 0x6da   : > { %7418 = vmatprep.mubr.f32.mxu0 %v9996_v16 }
 0x6dc   : > { %8446 = vmatmul.mubr.msk.f32.gmra.mrb[40].mxu1 %vm485_vm2, %v8430_v53 }
 0x6dd   : > { %8605 = vmatmul.mubr.msk.f32.gmra.mrb[38].mxu0 %vm485_vm2, %v8589_v0  ;;  %5868 = vmatprep.mubr.f32.mxu1 %v9996_v16  ;;  %v7491_v0 = vpop.permute.xlu1 %7490 }
 0x6de   : > { %7424 = vmatprep.mubr.f32.mxu0 %v9996_v16 }
 0x6e0   : > { %8447 = vmatmul.mubr.msk.f32.gmra.mrb[42].mxu1 %vm485_vm2, %v8431_v15 }
 0x6e1   : > { %8606 = vmatmul.mubr.msk.f32.gmra.mrb[40].mxu0 %vm485_vm2, %v8590_v36  ;;  %5874 = vmatprep.mubr.f32.mxu1 %v9996_v16  ;;  %v7495_v55 = vpop.permute.xlu1 %7494 }
 0x6e2   : > { %7430 = vmatprep.mubr.f32.mxu0 %v9996_v16 }
 0x6e4   : > { %8448 = vmatmul.mubr.msk.f32.gmra.mrb[44].mxu1 %vm485_vm2, %v8432_v61 }
 0x6e5   : > { %8607 = vmatmul.mubr.msk.f32.gmra.mrb[42].mxu0 %vm485_vm2, %v8591_v33  ;;  %5880 = vmatprep.mubr.f32.mxu1 %v9996_v16 }
 0x6e6   : > { %7436 = vmatprep.mubr.f32.mxu0 %v9996_v16  ;;  %v7499_v28 = vpop.permute.xlu0 %7498 }
 0x6e8   : > { %8449 = vmatmul.mubr.msk.f32.gmra.mrb[46].mxu1 %vm485_vm2, %v8433_v10 }
 0x6e9   : > { %8608 = vmatmul.mubr.msk.f32.gmra.mrb[44].mxu0 %vm485_vm2, %v8592_v60 }
 0x6ea   : > { %7442 = vmatprep.mubr.f32.mxu0 %v9996_v16  ;;  %v7806_v16 = vld [vmem:[%s14450_s6 + $0x28] sm:$0xff] }
 0x6eb   : > { %v9136_v21 = vpack.c.bf16 %v7806_v16, %v7805_v48 }
 0x6ed   : > { %8609 = vmatmul.mubr.msk.f32.gmra.mrb[46].mxu0 %vm485_vm2, %v8593_v38  ;;  %9137 = vmatpush3.bf16.msra.mxu1 %v9136_v21 }
 0x6ee   : > { %9139 = vmatprep.subr.bf16.mxu1 %v9138_v4 }
 0x6f1   : > { %9141 = vmatpush3.bf16.msra.mxu1 %v9140_v63 }
 0x6f2   : > { %9143 = vmatprep.subr.bf16.mxu1 %v9142_v34 }
 0x6f5   : > { %9145 = vmatpush3.bf16.msra.mxu1 %v9144_v25 }
 0x6f6   : > { %9147 = vmatprep.subr.bf16.mxu1 %v9146_v19 }
 0x6f9   : > { %9149 = vmatpush3.bf16.msra.mxu1 %v9148_v12 }
 0x6fa   : > { %9151 = vmatprep.subr.bf16.mxu1 %v9150_v13 }
 0x6fd   : > { %9153 = vmatpush3.bf16.msra.mxu1 %v9152_v31 }
 0x6fe   : > { %9155 = vmatprep.subr.bf16.mxu1 %v9154_v32 }
 0x701   : > { %9157 = vmatpush3.bf16.msra.mxu1 %v9156_v29 }
 0x77f   : > { %v5792_v18 = vpop.f32.mrb[16].mxu1 }
 0x780   : > { %v5794_v57 = vpop.f32.mrb[17].mxu1 }
 0x783   : > { %v5798_v11 = vpop.f32.mrb[18].mxu1 }
 0x784   : > { %v7354_v46 = vpop.f32.mrb[16].mxu0  ;;  %v5800_v9 = vpop.f32.mrb[19].mxu1 }
 0x785   : > { %v9158_v56 = vadd.f32 %v7354_v46, %v5792_v18  ;;  %v7356_v5 = vpop.f32.mrb[17].mxu0 }
 0x786   : > { %v9159_v49 = vadd.f32 %v7356_v5, %v5794_v57 }
 0x787   : > { %v14274_v39 = vadd.f32 %v9158_v56, %v7483_v23  ;;  %v5804_v54 = vpop.f32.mrb[20].mxu1 }
 0x788   : > { %v14276_v42 = vadd.f32 %v9159_v49, %v7483_v23  ;;  %v7360_v43 = vpop.f32.mrb[18].mxu0  ;;  %v5806_v45 = vpop.f32.mrb[21].mxu1 }
 0x789   : > { %v7577_v47 = vsub.f32 0.0, %v14274_v39  ;;  %v9160_v17 = vadd.f32 %v7360_v43, %v5798_v11  ;;  %v7362_v35 = vpop.f32.mrb[19].mxu0 }
 0x78a   : > { %v7578_v37 = vsub.f32 0.0, %v14276_v42  ;;  %v9161_v53 = vadd.f32 %v7362_v35, %v5800_v9 }
 0x78b   : > { %v7609_v15 = vmul.f32 1.442695, %v7577_v47  ;;  %v14280_v36 = vadd.f32 %v9160_v17, %v7487_v20  ;;  %v5810_v61 = vpop.f32.mrb[22].mxu1 }
 0x78c   : > { %v7611_v33 = vmul.f32 1.442695, %v7578_v37  ;;  %v14282_v10 = vadd.f32 %v9161_v53, %v7487_v20  ;;  %v7366_v60 = vpop.f32.mrb[20].mxu0  ;;  %v5812_v38 = vpop.f32.mrb[23].mxu1 }
 0x78d   : > { %9821 = vpow2.f32 %v7609_v15  ;;  %v7579_v30 = vsub.f32 0.0, %v14280_v36  ;;  %v9162_v22 = vadd.f32 %v7366_v60, %v5804_v54  ;;  %v7368_v51 = vpop.f32.mrb[21].mxu0  ;;  %v7503_v54 = vpop.permute.xlu1 %7502 }
 0x78e   : > { %9823 = vpow2.f32 %v7611_v33  ;;  %v7580_v48 = vsub.f32 0.0, %v14282_v10  ;;  %v9163_v16 = vadd.f32 %v7368_v51, %v5806_v45  ;;  %v7507_v51 = vpop.permute.xlu0 %7506 }
 0x78f   : > { %v7613_v21 = vmul.f32 1.442695, %v7579_v30  ;;  %v14286_v8 = vadd.f32 %v9162_v22, %v7491_v0  ;;  %v5816_v3 = vpop.f32.mrb[24].mxu1 }
 0x790   : > { %v7615_v4 = vmul.f32 1.442695, %v7580_v48  ;;  %v14288_v58 = vadd.f32 %v9163_v16, %v7491_v0  ;;  %v7372_v59 = vpop.f32.mrb[22].mxu0  ;;  %v5818_v63 = vpop.f32.mrb[25].mxu1 }
 0x791   : > { %9825 = vpow2.f32 %v7613_v21  ;;  %v7581_v50 = vsub.f32 0.0, %v14286_v8  ;;  %v9164_v24 = vadd.f32 %v7372_v59, %v5810_v61  ;;  %v7374_v34 = vpop.f32.mrb[23].mxu0 }
 0x792   : > { %9827 = vpow2.f32 %v7615_v4  ;;  %v7582_v27 = vsub.f32 0.0, %v14288_v58  ;;  %v9165_v25 = vadd.f32 %v7374_v34, %v5812_v38 }
 0x793   : > { %v7617_v41 = vmul.f32 1.442695, %v7581_v50  ;;  %v14292_v44 = vadd.f32 %v9164_v24, %v7495_v55  ;;  %v5822_v19 = vpop.f32.mrb[26].mxu1 }
 0x794   : > { %v7619_v2 = vmul.f32 1.442695, %v7582_v27  ;;  %v14294_v1 = vadd.f32 %v9165_v25, %v7495_v55  ;;  %v7378_v12 = vpop.f32.mrb[24].mxu0  ;;  %v5824_v40 = vpop.f32.mrb[27].mxu1 }
 0x795   : > { %9829 = vpow2.f32 %v7617_v41  ;;  %v7583_v14 = vsub.f32 0.0, %v14292_v44  ;;  %v9166_v13 = vadd.f32 %v7378_v12, %v5816_v3  ;;  %v7380_v26 = vpop.f32.mrb[25].mxu0  ;;  %v7511_v12 = vpop.permute.xlu1 %7510 }
 0x796   : > { %9831 = vpow2.f32 %v7619_v2  ;;  %v7584_v31 = vsub.f32 0.0, %v14294_v1  ;;  %v9167_v52 = vadd.f32 %v7380_v26, %v5818_v63 }
 0x797   : > { %v9822_v6 = vpop.eup %9821  ;;  %v7621_v32 = vmul.f32 1.442695, %v7583_v14  ;;  %v14298_v62 = vadd.f32 %v9166_v13, %v7499_v28  ;;  %v5828_v7 = vpop.f32.mrb[28].mxu1 }
 0x798   : > { %v9824_v29 = vpop.eup %9823  ;;  %v7673_v18 = vadd.f32 1.0, %v9822_v6  ;;  %v7623_v57 = vmul.f32 1.442695, %v7584_v31  ;;  %v14300_v11 = vadd.f32 %v9167_v52, %v7499_v28  ;;  %v7384_v46 = vpop.f32.mrb[26].mxu0 }
 0x799   : > { %v5830_v9 = vpop.f32.mrb[29].mxu1  ;;  %v7674_v23 = vadd.f32 1.0, %v9824_v29  ;;  %9833 = vpow2.f32 %v7621_v32  ;;  %v7585_v56 = vsub.f32 0.0, %v14298_v62  ;;  %v9168_v5 = vadd.f32 %v7384_v46, %v5822_v19  ;;  %v7386_v49 = vpop.f32.mrb[27].mxu0 }
 0x79a   : > { %9835 = vrcp.f32 %v7673_v18  ;;  %v7586_v43 = vsub.f32 0.0, %v14300_v11  ;;  %v9169_v45 = vadd.f32 %v7386_v49, %v5824_v40  ;;  %v7515_v49 = vpop.permute.xlu0 %7514 }
 0x79b   : > { %v9826_v47 = vpop.eup %9825  ;;  %9837 = vrcp.f32 %v7674_v23  ;;  %v7625_v17 = vmul.f32 1.442695, %v7585_v56  ;;  %v14304_v35 = vadd.f32 %v9168_v5, %v7503_v54  ;;  %v5834_v20 = vpop.f32.mrb[30].mxu1 }
 0x79c   : > { %v9828_v37 = vpop.eup %9827  ;;  %v7675_v53 = vadd.f32 1.0, %v9826_v47  ;;  %9839 = vpow2.f32 %v7623_v57  ;;  %v7627_v0 = vmul.f32 1.442695, %v7586_v43  ;;  %v14306_v15 = vadd.f32 %v9169_v45, %v7503_v54  ;;  %v7390_v61 = vpop.f32.mrb[28].mxu0 }
 0x79d   : > { %v5836_v33 = vpop.f32.mrb[31].mxu1  ;;  %v7676_v60 = vadd.f32 1.0, %v9828_v37  ;;  %9841 = vpow2.f32 %v7625_v17  ;;  %v7587_v38 = vsub.f32 0.0, %v14304_v35  ;;  %v9170_v30 = vadd.f32 %v7390_v61, %v5828_v7  ;;  %v7392_v22 = vpop.f32.mrb[29].mxu0 }
 0x79e   : > { %9843 = vrcp.f32 %v7675_v53  ;;  %v7588_v48 = vsub.f32 0.0, %v14306_v15  ;;  %v9171_v16 = vadd.f32 %v7392_v22, %v5830_v9 }
 0x79f   : > { %v9830_v21 = vpop.eup %9829  ;;  %9845 = vrcp.f32 %v7676_v60  ;;  %v7629_v3 = vmul.f32 1.442695, %v7587_v38  ;;  %v14310_v4 = vadd.f32 %v9170_v30, %v7507_v51  ;;  %v5840_v59 = vpop.f32.mrb[32].mxu1 }
 0x7a0   : > { %v9832_v63 = vpop.eup %9831  ;;  %v7677_v50 = vadd.f32 1.0, %v9830_v21  ;;  %9847 = vpow2.f32 %v7627_v0  ;;  %v7631_v24 = vmul.f32 1.442695, %v7588_v48  ;;  %v14312_v34 = vadd.f32 %v9171_v16, %v7507_v51  ;;  %v7396_v55 = vpop.f32.mrb[30].mxu0 }
 0x7a1   : > { %v5842_v27 = vpop.f32.mrb[33].mxu1  ;;  %v7678_v25 = vadd.f32 1.0, %v9832_v63  ;;  %9849 = vpow2.f32 %v7629_v3  ;;  %v7589_v41 = vsub.f32 0.0, %v14310_v4  ;;  %v9172_v19 = vadd.f32 %v7396_v55, %v5834_v20  ;;  %v7398_v2 = vpop.f32.mrb[31].mxu0 }
 0x7a2   : > { %9851 = vrcp.f32 %v7677_v50  ;;  %v7590_v40 = vsub.f32 0.0, %v14312_v34  ;;  %v9173_v14 = vadd.f32 %v7398_v2, %v5836_v33  ;;  %v7519_v21 = vpop.permute.xlu1 %7518 }
 0x7a3   : > { %v9834_v13 = vpop.eup %9833  ;;  %9853 = vrcp.f32 %v7678_v25  ;;  %v7633_v26 = vmul.f32 1.442695, %v7589_v41  ;;  %v14316_v28 = vadd.f32 %v9172_v19, %v7511_v12  ;;  %v5846_v31 = vpop.f32.mrb[34].mxu1 }
 0x7a4   : > { %v9836_v52 = vpop.eup %9835  ;;  %v7679_v6 = vadd.f32 1.0, %v9834_v13  ;;  %9855 = vpow2.f32 %v7631_v24  ;;  %v7635_v32 = vmul.f32 1.442695, %v7590_v40  ;;  %v14318_v7 = vadd.f32 %v9173_v14, %v7511_v12  ;;  %v7402_v29 = vpop.f32.mrb[32].mxu0 }
 0x7a5   : > { %v5848_v18 = vpop.f32.mrb[35].mxu1  ;;  %v9838_v57 = vpop.eup %9837  ;;  %v7769_v46 = vmul.f32 %v9836_v52, %v14274_v39  ;;  %9857 = vpow2.f32 %v7633_v26  ;;  %v7591_v9 = vsub.f32 0.0, %v14316_v28  ;;  %v9174_v23 = vadd.f32 %v7402_v29, %v5840_v59 }
 0x7a6   : > { %v7404_v56 = vpop.f32.mrb[33].mxu0  ;;  %v9840_v5 = vpop.eup %9839  ;;  %9859 = vrcp.f32 %v7679_v6  ;;  %v7592_v54 = vsub.f32 0.0, %v14318_v7  ;;  %v7770_v45 = vmul.f32 %v9838_v57, %v14276_v42 }
 0x7a7   : > { %v9175_v43 = vadd.f32 %v7404_v56, %v5842_v27  ;;  %v9842_v47 = vpop.eup %9841  ;;  %v7680_v17 = vadd.f32 1.0, %v9840_v5  ;;  %9861 = vpow2.f32 %v7635_v32  ;;  %v7637_v20 = vmul.f32 1.442695, %v7591_v9  ;;  %v5852_v39 = vpop.f32.mrb[36].mxu1 }
 0x7a8   : > { %v14324_v37 = vadd.f32 %v9174_v23, %v7515_v49  ;;  %v9844_v53 = vpop.eup %9843  ;;  %v7681_v0 = vadd.f32 1.0, %v9842_v47  ;;  %v7639_v61 = vmul.f32 1.442695, %v7592_v54  ;;  %v7408_v60 = vpop.f32.mrb[34].mxu0  ;;  %7897 = vmatprep.mubr.f32.mxu1 %v7770_v45 }
 0x7a9   : > { %v14326_v33 = vadd.f32 %v9175_v43, %v7515_v49  ;;  %v5854_v38 = vpop.f32.mrb[37].mxu1  ;;  %v9846_v30 = vpop.eup %9845  ;;  %9863 = vrcp.f32 %v7680_v17  ;;  %v9176_v42 = vadd.f32 %v7408_v60, %v5846_v31  ;;  %7898 = vmatmul.mubr.f32.vlgmr.msra.gmra.mrb[48].mxu1 %v7769_v46  ;;  %v7771_v48 = vmul.f32 %v9844_v53, %v14280_v36 }
 0x7aa   : > { %v7593_v22 = vsub.f32 0.0, %v14324_v37  ;;  %v7410_v51 = vpop.f32.mrb[35].mxu0  ;;  %v9848_v16 = vpop.eup %9847  ;;  %9865 = vrcp.f32 %v7681_v0  ;;  %v7772_v63 = vmul.f32 %v9846_v30, %v14282_v10 }
 0x7ab   : > { %v7594_v3 = vsub.f32 0.0, %v14326_v33  ;;  %v9177_v59 = vadd.f32 %v7410_v51, %v5848_v18  ;;  %v9850_v50 = vpop.eup %9849  ;;  %v7682_v24 = vadd.f32 1.0, %v9848_v16  ;;  %9867 = vpow2.f32 %v7637_v20  ;;  %v5858_v25 = vpop.f32.mrb[38].mxu1 }
 0x7ac   : > { %v7641_v55 = vmul.f32 1.442695, %v7593_v22  ;;  %v14332_v27 = vadd.f32 %v9176_v42, %v7519_v21  ;;  %v9852_v41 = vpop.eup %9851  ;;  %v7683_v19 = vadd.f32 1.0, %v9850_v50  ;;  %9869 = vpow2.f32 %v7639_v61  ;;  %v7414_v12 = vpop.f32.mrb[36].mxu0  ;;  %7902 = vmatprep.mubr.f32.mxu1 %v7772_v63 }
 0x7ad   : > { %v7643_v2 = vmul.f32 1.442695, %v7594_v3  ;;  %v14334_v36 = vadd.f32 %v9177_v59, %v7519_v21  ;;  %v5860_v40 = vpop.f32.mrb[39].mxu1  ;;  %v9854_v14 = vpop.eup %9853  ;;  %9871 = vrcp.f32 %v7682_v24  ;;  %v9178_v13 = vadd.f32 %v7414_v12, %v5852_v39  ;;  %7903 = vmatmul.mubr.f32.gmra.mrb[50].mxu1 %v7771_v48 }
 0x7ae   : > { %v7595_v10 = vsub.f32 0.0, %v14332_v27  ;;  %v7416_v26 = vpop.f32.mrb[37].mxu0  ;;  %v7773_v31 = vmul.f32 %v9852_v41, %v14286_v8  ;;  %v9856_v52 = vpop.eup %9855  ;;  %9873 = vrcp.f32 %v7683_v19  ;;  %v7774_v18 = vmul.f32 %v9854_v14, %v14288_v58 }
 0x7af   : > { %v7523_v6 = vpop.permute.xlu0 %7522  ;;  %v7596_v32 = vsub.f32 0.0, %v14334_v36  ;;  %v9179_v29 = vadd.f32 %v7416_v26, %v5854_v38  ;;  %v9858_v57 = vpop.eup %9857  ;;  %v7684_v46 = vadd.f32 1.0, %v9856_v52  ;;  %9875 = vpow2.f32 %v7641_v55 }
 0x7b0   : > { %v7645_v9 = vmul.f32 1.442695, %v7595_v10  ;;  %v14340_v23 = vadd.f32 %v9178_v13, %v7523_v6  ;;  %v5864_v56 = vpop.f32.mrb[40].mxu1  ;;  %v9860_v5 = vpop.eup %9859  ;;  %v7685_v49 = vadd.f32 1.0, %v9858_v57  ;;  %9877 = vpow2.f32 %v7643_v2  ;;  %7907 = vmatprep.mubr.f32.mxu1 %v7774_v18 }
 0x7b1   : > { %v14342_v54 = vadd.f32 %v9179_v29, %v7523_v6  ;;  %v7420_v8 = vpop.f32.mrb[38].mxu0  ;;  %v5866_v43 = vpop.f32.mrb[41].mxu1  ;;  %9879 = vrcp.f32 %v7684_v46  ;;  %v7647_v47 = vmul.f32 1.442695, %v7596_v32  ;;  %7908 = vmatmul.mubr.f32.gmra.mrb[52].mxu1 %v7773_v31  ;;  %v7775_v42 = vmul.f32 %v9860_v5, %v14292_v44 }
 0x7b2   : > { %v9862_v45 = vpop.eup %9861  ;;  %v7597_v58 = vsub.f32 0.0, %v14340_v23  ;;  %v9180_v17 = vadd.f32 %v7420_v8, %v5858_v25  ;;  %v7422_v20 = vpop.f32.mrb[39].mxu0  ;;  %9881 = vrcp.f32 %v7685_v49 }
 0x7b3   : > { %v7527_v39 = vpop.permute.xlu1 %7526  ;;  %v7686_v53 = vadd.f32 1.0, %v9862_v45  ;;  %v7598_v0 = vsub.f32 0.0, %v14342_v54  ;;  %v9181_v61 = vadd.f32 %v7422_v20, %v5860_v40  ;;  %v9864_v60 = vpop.eup %9863  ;;  %9883 = vpow2.f32 %v7645_v9 }
 0x7b4   : > { %v7649_v38 = vmul.f32 1.442695, %v7597_v58  ;;  %v14346_v30 = vadd.f32 %v9180_v17, %v7527_v39  ;;  %v5870_v22 = vpop.f32.mrb[42].mxu1  ;;  %v9866_v51 = vpop.eup %9865  ;;  %v7776_v3 = vmul.f32 %v9864_v60, %v14294_v1 }
 0x7b5   : > { %9885 = vrcp.f32 %v7686_v53  ;;  %v7651_v48 = vmul.f32 1.442695, %v7598_v0  ;;  %v14349_v16 = vadd.f32 %v9181_v61, %v7527_v39  ;;  %v7426_v21 = vpop.f32.mrb[40].mxu0  ;;  %v5872_v59 = vpop.f32.mrb[43].mxu1  ;;  %v7777_v25 = vmul.f32 %v9866_v51, %v14298_v62 }
 0x7b6   : > { %v9868_v63 = vpop.eup %9867  ;;  %9887 = vpow2.f32 %v7647_v47  ;;  %v7599_v50 = vsub.f32 0.0, %v14346_v30  ;;  %v9182_v24 = vadd.f32 %v7426_v21, %v5864_v56  ;;  %v7428_v55 = vpop.f32.mrb[41].mxu0  ;;  %7912 = vmatprep.mubr.f32.mxu1 %v7776_v3 }
 0x7b7   : > { %v9870_v41 = vpop.eup %9869  ;;  %v7531_v19 = vpop.permute.xlu0 %7530  ;;  %v7687_v44 = vadd.f32 1.0, %v9868_v63  ;;  %9889 = vpow2.f32 %v7649_v38  ;;  %v7600_v2 = vsub.f32 0.0, %v14349_v16  ;;  %v9183_v12 = vadd.f32 %v7428_v55, %v5866_v43  ;;  %7913 = vmatmul.mubr.f32.gmra.mrb[54].mxu1 %v7775_v42 }
 0x7b8   : > { %v9872_v40 = vpop.eup %9871  ;;  %v7688_v14 = vadd.f32 1.0, %v9870_v41  ;;  %9891 = vpow2.f32 %v7651_v48  ;;  %v7653_v1 = vmul.f32 1.442695, %v7599_v50  ;;  %v14355_v10 = vadd.f32 %v9182_v24, %v7531_v19  ;;  %v5876_v13 = vpop.f32.mrb[44].mxu1 }
 0x7b9   : > { %v9874_v26 = vpop.eup %9873  ;;  %9893 = vrcp.f32 %v7687_v44  ;;  %v7655_v31 = vmul.f32 1.442695, %v7600_v2  ;;  %v14357_v62 = vadd.f32 %v9183_v12, %v7531_v19  ;;  %v7432_v52 = vpop.f32.mrb[42].mxu0  ;;  %v7778_v6 = vmul.f32 %v9872_v40, %v14300_v11 }
 0x7ba   : > { %v5878_v32 = vpop.f32.mrb[45].mxu1  ;;  %v9876_v29 = vpop.eup %9875  ;;  %9895 = vrcp.f32 %v7688_v14  ;;  %v7601_v18 = vsub.f32 0.0, %v14355_v10  ;;  %v9184_v57 = vadd.f32 %v7432_v52, %v5870_v22  ;;  %v7779_v9 = vmul.f32 %v9874_v26, %v14304_v35 }
 0x7bb   : > { %v7434_v46 = vpop.f32.mrb[43].mxu0  ;;  %v9878_v56 = vpop.eup %9877  ;;  %v7689_v49 = vadd.f32 1.0, %v9876_v29  ;;  %9897 = vpow2.f32 %v7653_v1  ;;  %v7602_v8 = vsub.f32 0.0, %v14357_v62  ;;  %7917 = vmatprep.mubr.f32.mxu1 %v7778_v6 }
 0x7bc   : > { %v7535_v5 = vpop.permute.xlu1 %7534  ;;  %v9185_v43 = vadd.f32 %v7434_v46, %v5872_v59  ;;  %v9880_v45 = vpop.eup %9879  ;;  %v7690_v47 = vadd.f32 1.0, %v9878_v56  ;;  %9899 = vpow2.f32 %v7655_v31  ;;  %v7657_v11 = vmul.f32 1.442695, %v7601_v18  ;;  %7918 = vmatmul.mubr.f32.gmra.mrb[56].mxu1 %v7777_v25 }
 0x7bd   : > { %v14363_v58 = vadd.f32 %v9184_v57, %v7535_v5  ;;  %v5882_v17 = vpop.f32.mrb[46].mxu1  ;;  %v9882_v20 = vpop.eup %9881  ;;  %9901 = vrcp.f32 %v7689_v49  ;;  %v7659_v39 = vmul.f32 1.442695, %v7602_v8  ;;  %v7780_v0 = vmul.f32 %v9880_v45, %v14306_v15 }
 0x7be   : > { %v14365_v35 = vadd.f32 %v9185_v43, %v7535_v5  ;;  %v7438_v53 = vpop.f32.mrb[44].mxu0  ;;  %v5884_v61 = vpop.f32.mrb[47].mxu1  ;;  %9903 = vrcp.f32 %v7690_v47  ;;  %v7781_v51 = vmul.f32 %v9882_v20, %v14310_v4 }
 0x7bf   : > { %v9884_v60 = vpop.eup %9883  ;;  %v7603_v38 = vsub.f32 0.0, %v14363_v58  ;;  %v9186_v22 = vadd.f32 %v7438_v53, %v5876_v13  ;;  %v7440_v42 = vpop.f32.mrb[45].mxu0  ;;  %9905 = vpow2.f32 %v7657_v11  ;;  %7922 = vmatprep.mubr.f32.mxu1 %v7780_v0 }
 0x7c0   : > { %v9886_v48 = vpop.eup %9885  ;;  %v7539_v21 = vpop.permute.xlu0 %7538  ;;  %v7691_v3 = vadd.f32 1.0, %v9884_v60  ;;  %v7604_v59 = vsub.f32 0.0, %v14365_v35  ;;  %v9187_v63 = vadd.f32 %v7440_v42, %v5878_v32  ;;  %9907 = vpow2.f32 %v7659_v39  ;;  %7923 = vmatmul.mubr.f32.gmra.mrb[58].mxu1 %v7779_v9 }
 0x7c1   : > { %v9888_v50 = vpop.eup %9887  ;;  %v7661_v15 = vmul.f32 1.442695, %v7603_v38  ;;  %v14371_v24 = vadd.f32 %v9186_v22, %v7539_v21  ;;  %v7782_v55 = vmul.f32 %v9886_v48, %v14312_v34  ;;  %v7444_v44 = vpop.f32.mrb[46].mxu0 }
 0x7c2   : > { %v9890_v25 = vpop.eup %9889  ;;  %9909 = vrcp.f32 %v7691_v3  ;;  %v7692_v41 = vadd.f32 1.0, %v9888_v50  ;;  %v7663_v4 = vmul.f32 1.442695, %v7604_v59  ;;  %v14374_v19 = vadd.f32 %v9187_v63, %v7539_v21  ;;  %v7446_v1 = vpop.f32.mrb[47].mxu0 }
 0x7c3   : > { %v9892_v2 = vpop.eup %9891  ;;  %v7693_v12 = vadd.f32 1.0, %v9890_v25  ;;  %9911 = vpow2.f32 %v7661_v15  ;;  %v7605_v40 = vsub.f32 0.0, %v14371_v24  ;;  %v9188_v14 = vadd.f32 %v7444_v44, %v5882_v17  ;;  %7927 = vmatprep.mubr.f32.mxu1 %v7782_v55  ;;  %v7543_v26 = vpop.permute.xlu1 %7542 }
 0x7c4   : > { %v9894_v13 = vpop.eup %9893  ;;  %9913 = vrcp.f32 %v7692_v41  ;;  %v7694_v31 = vadd.f32 1.0, %v9892_v2  ;;  %v7606_v34 = vsub.f32 0.0, %v14374_v19  ;;  %v9189_v52 = vadd.f32 %v7446_v1, %v5884_v61  ;;  %7928 = vmatmul.mubr.f32.gmra.mrb[60].mxu1 %v7781_v51 }
 0x7c5   : > { %v9896_v6 = vpop.eup %9895  ;;  %9915 = vrcp.f32 %v7693_v12  ;;  %v7665_v32 = vmul.f32 1.442695, %v7605_v40  ;;  %v14378_v29 = vadd.f32 %v9188_v14, %v7543_v26  ;;  %v7783_v9 = vmul.f32 %v9894_v13, %v14316_v28 }
 0x7c6   : > { %v9898_v18 = vpop.eup %9897  ;;  %9917 = vrcp.f32 %v7694_v31  ;;  %v14380_v57 = vadd.f32 %v9189_v52, %v7543_v26  ;;  %v7784_v46 = vmul.f32 %v9896_v6, %v14318_v7  ;;  %v7667_v49 = vmul.f32 1.442695, %v7606_v34 }
 0x7c7   : > { %v9900_v56 = vpop.eup %9899  ;;  %v7695_v5 = vadd.f32 1.0, %v9898_v18  ;;  %9919 = vpow2.f32 %v7663_v4  ;;  %v7607_v8 = vsub.f32 0.0, %v14378_v29 }
 0x7c8   : > { %v9902_v43 = vpop.eup %9901  ;;  %v7696_v45 = vadd.f32 1.0, %v9900_v56  ;;  %9921 = vpow2.f32 %v7665_v32  ;;  %v7608_v47 = vsub.f32 0.0, %v14380_v57  ;;  %7932 = vmatprep.mubr.f32.mxu1 %v7784_v46 }
 0x7c9   : > { %v9904_v11 = vpop.eup %9903  ;;  %9923 = vrcp.f32 %v7695_v5  ;;  %v7669_v17 = vmul.f32 1.442695, %v7607_v8  ;;  %7933 = vmatmul.mubr.f32.gmra.mrb[62].mxu1 %v7783_v9  ;;  %v7785_v0 = vmul.f32 %v9902_v43, %v14324_v37 }
 0x7ca   : > { %v9906_v20 = vpop.eup %9905  ;;  %9925 = vrcp.f32 %v7696_v45  ;;  %v7786_v28 = vmul.f32 %v9904_v11, %v14326_v33  ;;  %v7671_v53 = vmul.f32 1.442695, %v7608_v47 }
 0x7cb   : > { %v9908_v7 = vpop.eup %9907  ;;  %v7697_v39 = vadd.f32 1.0, %v9906_v20  ;;  %9927 = vpow2.f32 %v7667_v49 }
 0x7cc   : > { %v9910_v61 = vpop.eup %9909  ;;  %v7698_v60 = vadd.f32 1.0, %v9908_v7  ;;  %9929 = vpow2.f32 %v7669_v17  ;;  %7937 = vmatprep.mubr.f32.mxu1 %v7786_v28 }
 0x7cd   : > { %v9912_v38 = vpop.eup %9911  ;;  %9931 = vrcp.f32 %v7697_v39  ;;  %7938 = vmatmul.mubr.f32.gmra.mrb[64].mxu1 %v7785_v0  ;;  %v7787_v21 = vmul.f32 %v9910_v61, %v14332_v27 }
 0x7ce   : > { %v9914_v22 = vpop.eup %9913  ;;  %9933 = vrcp.f32 %v7698_v60  ;;  %v7699_v51 = vadd.f32 1.0, %v9912_v38 }
 0x7cf   : > { %v9916_v42 = vpop.eup %9915  ;;  %9935 = vpow2.f32 %v7671_v53  ;;  %v7788_v33 = vmul.f32 %v9914_v22, %v14334_v36 }
 0x7d0   : > { %v9918_v48 = vpop.eup %9917  ;;  %9937 = vrcp.f32 %v7699_v51  ;;  %v7789_v25 = vmul.f32 %v9916_v42, %v14340_v23 }
 0x7d1   : > { %v9920_v3 = vpop.eup %9919  ;;  %7942 = vmatprep.mubr.f32.mxu1 %v7788_v33  ;;  %v7790_v37 = vmul.f32 %v9918_v48, %v14342_v54 }
 0x7d2   : > { %v9922_v59 = vpop.eup %9921  ;;  %v7700_v63 = vadd.f32 1.0, %v9920_v3  ;;  %7943 = vmatmul.mubr.f32.gmra.mrb[66].mxu1 %v7787_v21 }
 0x7d3   : > { %v9924_v50 = vpop.eup %9923  ;;  %v7701_v15 = vadd.f32 1.0, %v9922_v59  ;;  %7947 = vmatprep.mubr.f32.mxu1 %v7790_v37 }
 0x7d4   : > { %v9926_v55 = vpop.eup %9925  ;;  %9939 = vrcp.f32 %v7700_v63  ;;  %v7791_v12 = vmul.f32 %v9924_v50, %v14346_v30 }
 0x7d5   : > { %v9928_v41 = vpop.eup %9927  ;;  %v7792_v36 = vmul.f32 %v9926_v55, %v14349_v16  ;;  %9941 = vrcp.f32 %v7701_v15 }
 0x7d6   : > { %v9930_v4 = vpop.eup %9929  ;;  %v7702_v27 = vadd.f32 1.0, %v9928_v41  ;;  %7948 = vmatmul.mubr.f32.gmra.mrb[68].mxu1 %v7789_v25 }
 0x7d7   : > { %v9932_v44 = vpop.eup %9931  ;;  %v7703_v54 = vadd.f32 1.0, %v9930_v4  ;;  %7952 = vmatprep.mubr.f32.mxu1 %v7792_v36 }
 0x7d8   : > { %v9934_v2 = vpop.eup %9933  ;;  %9943 = vrcp.f32 %v7702_v27  ;;  %v7793_v23 = vmul.f32 %v9932_v44, %v14355_v10 }
 0x7d9   : > { %v9936_v40 = vpop.eup %9935  ;;  %v7794_v14 = vmul.f32 %v9934_v2, %v14357_v62  ;;  %9945 = vrcp.f32 %v7703_v54 }
 0x7da   : > { %v7704_v1 = vadd.f32 1.0, %v9936_v40  ;;  %7953 = vmatmul.mubr.f32.gmra.mrb[70].mxu1 %v7791_v12  ;;  %v9938_v16 = vpop.eup %9937 }
 0x7db   : > { %7957 = vmatprep.mubr.f32.mxu1 %v7794_v14  ;;  %v7795_v31 = vmul.f32 %v9938_v16, %v14363_v58 }
 0x7dc   : > { %9947 = vrcp.f32 %v7704_v1 }
 0x7de   : > { %v9940_v13 = vpop.eup %9939  ;;  %7958 = vmatmul.mubr.f32.gmra.mrb[72].mxu1 %v7793_v23 }
 0x7df   : > { %v7796_v26 = vmul.f32 %v9940_v13, %v14365_v35  ;;  %v9942_v34 = vpop.eup %9941 }
 0x7e0   : > { %v7797_v52 = vmul.f32 %v9942_v34, %v14371_v24 }
 0x7e1   : > { %7962 = vmatprep.mubr.f32.mxu1 %v7796_v26 }
 0x7e2   : > { %v9944_v30 = vpop.eup %9943  ;;  %7963 = vmatmul.mubr.f32.gmra.mrb[74].mxu1 %v7795_v31 }
 0x7e3   : > { %v7798_v62 = vmul.f32 %v9944_v30, %v14374_v19  ;;  %v9946_v6 = vpop.eup %9945 }
 0x7e4   : > { %v7799_v18 = vmul.f32 %v9946_v6, %v14378_v29 }
 0x7e5   : > { %7967 = vmatprep.mubr.f32.mxu1 %v7798_v62 }
 0x7e6   : > { %v9948_v32 = vpop.eup %9947  ;;  %7968 = vmatmul.mubr.f32.gmra.mrb[76].mxu1 %v7797_v52 }
 0x7e7   : > { %v7800_v10 = vmul.f32 %v9948_v32, %v14380_v57 }
 0x7e9   : > { %7972 = vmatprep.mubr.f32.mxu1 %v7800_v10 }
 0x7ea   : > { %7973 = vmatmul.mubr.f32.gmra.mrb[78].mxu1 %v7799_v18 }
 0x87c   : > { %v8646_v58 = vpop.f32.mrb[48].mxu1 }
 0x87d   : > { %v8647_v35 = vpop.f32.mrb[49].mxu1 }
 0x87e   : > { %v8648_v24 = vadd.f32 %v8647_v35, %v8646_v58 }
 0x880   : > { %7978 = vst.msk [vmem:[%s14407_s27] sm:$0xff] %vm485_vm2, %v8648_v24  ;;  %v8649_v19 = vpop.f32.mrb[50].mxu1 }
 0x881   : > { %v8650_v29 = vpop.f32.mrb[51].mxu1 }
 0x882   : > { %v8651_v57 = vadd.f32 %v8650_v29, %v8649_v19 }
 0x884   : > { %7979 = vst.msk [vmem:[%s14407_s27 + $0x8] sm:$0xff] %vm485_vm2, %v8651_v57  ;;  %v8652_v46 = vpop.f32.mrb[52].mxu1 }
 0x885   : > { %v8653_v9 = vpop.f32.mrb[53].mxu1 }
 0x886   : > { %v8654_v56 = vadd.f32 %v8653_v9, %v8652_v46 }
 0x888   : > { %7980 = vst.msk [vmem:[%s14407_s27 + $0x10] sm:$0xff] %vm485_vm2, %v8654_v56 }
 0x88a   : > { %v8655_v5 = vpop.f32.mrb[54].mxu1 }
 0x88b   : > { %v8656_v49 = vpop.f32.mrb[55].mxu1 }
 0x88c   : > { %v8657_v8 = vadd.f32 %v8656_v49, %v8655_v5 }
 0x88e   : > { %7981 = vst.msk [vmem:[%s14407_s27 + $0x18] sm:$0xff] %vm485_vm2, %v8657_v8 }
 0x88f   : > { %v8658_v43 = vpop.f32.mrb[56].mxu1 }
 0x890   : > { %v8659_v45 = vpop.f32.mrb[57].mxu1 }
 0x891   : > { %v8660_v47 = vadd.f32 %v8659_v45, %v8658_v43 }
 0x893   : > { %7982 = vst.msk [vmem:[%s14407_s27 + $0x20] sm:$0xff] %vm485_vm2, %v8660_v47  ;;  %v8661_v11 = vpop.f32.mrb[58].mxu1 }
 0x894   : > { %v8662_v17 = vpop.f32.mrb[59].mxu1 }
 0x895   : > { %v8663_v20 = vadd.f32 %v8662_v17, %v8661_v11 }
 0x897   : > { %7983 = vst.msk [vmem:[%s14407_s27 + $0x28] sm:$0xff] %vm485_vm2, %v8663_v20  ;;  %v8664_v28 = vpop.f32.mrb[60].mxu1 }
 0x898   : > { %v8665_v7 = vpop.f32.mrb[61].mxu1 }
 0x899   : > { %v8666_v39 = vadd.f32 %v8665_v7, %v8664_v28 }
 0x89b   : > { %7984 = vst.msk [vmem:[%s14407_s27 + $0x30] sm:$0xff] %vm485_vm2, %v8666_v39 }
 0x89c   : > { %v8667_v53 = vpop.f32.mrb[62].mxu1 }
 0x89d   : > { %v8668_v0 = vpop.f32.mrb[63].mxu1 }
 0x89e   : > { %v8669_v61 = vadd.f32 %v8668_v0, %v8667_v53 }
 0x8a0   : > { %7985 = vst.msk [vmem:[%s14407_s27 + $0x38] sm:$0xff] %vm485_vm2, %v8669_v61  ;;  %v8670_v60 = vpop.f32.mrb[64].mxu1 }
 0x8a1   : > { %v8671_v38 = vpop.f32.mrb[65].mxu1 }
 0x8a2   : > { %v8672_v22 = vadd.f32 %v8671_v38, %v8670_v60 }
 0x8a4   : > { %7986 = vst.msk [vmem:[%s14407_s27 + $0x40] sm:$0xff] %vm485_vm2, %v8672_v22 }
 0x8a5   : > { %v8673_v42 = vpop.f32.mrb[66].mxu1 }
 0x8a6   : > { %v8674_v51 = vpop.f32.mrb[67].mxu1 }
 0x8a7   : > { %v8675_v33 = vadd.f32 %v8674_v51, %v8673_v42 }
 0x8a9   : > { %7987 = vst.msk [vmem:[%s14407_s27 + $0x48] sm:$0xff] %vm485_vm2, %v8675_v33  ;;  %v8676_v48 = vpop.f32.mrb[68].mxu1 }
 0x8aa   : > { %v8677_v21 = vpop.f32.mrb[69].mxu1 }
 0x8ab   : > { %v8678_v3 = vadd.f32 %v8677_v21, %v8676_v48 }
 0x8ad   : > { %7988 = vst.msk [vmem:[%s14407_s27 + $0x50] sm:$0xff] %vm485_vm2, %v8678_v3  ;;  %v8679_v37 = vpop.f32.mrb[70].mxu1 }
 0x8ae   : > { %v8680_v59 = vpop.f32.mrb[71].mxu1 }
 0x8af   : > { %v8681_v63 = vadd.f32 %v8680_v59, %v8679_v37 }
 0x8b1   : > { %7989 = vst.msk [vmem:[%s14407_s27 + $0x58] sm:$0xff] %vm485_vm2, %v8681_v63  ;;  %v8682_v50 = vpop.f32.mrb[72].mxu1 }
 0x8b2   : > { %v8683_v15 = vpop.f32.mrb[73].mxu1 }
 0x8b3   : > { %v8684_v55 = vadd.f32 %v8683_v15, %v8682_v50 }
 0x8b5   : > { %7990 = vst.msk [vmem:[%s14407_s27 + $0x60] sm:$0xff] %vm485_vm2, %v8684_v55  ;;  %v8685_v25 = vpop.f32.mrb[74].mxu1 }
 0x8b6   : > { %v8686_v41 = vpop.f32.mrb[75].mxu1 }
 0x8b7   : > { %v8687_v36 = vadd.f32 %v8686_v41, %v8685_v25 }
 0x8b9   : > { %7991 = vst.msk [vmem:[%s14407_s27 + $0x68] sm:$0xff] %vm485_vm2, %v8687_v36  ;;  %v8688_v4 = vpop.f32.mrb[76].mxu1 }
 0x8ba   : > { %v8689_v27 = vpop.f32.mrb[77].mxu1 }
 0x8bb   : > { %v8690_v44 = vadd.f32 %v8689_v27, %v8688_v4 }
 0x8bd   : > { %7992 = vst.msk [vmem:[%s14407_s27 + $0x70] sm:$0xff] %vm485_vm2, %v8690_v44  ;;  %v8691_v54 = vpop.f32.mrb[78].mxu1 }
 0x8be   : > { %v8692_v2 = vpop.f32.mrb[79].mxu1 }
 0x8bf   : > { %v8693_v12 = vadd.f32 %v8692_v2, %v8691_v54 }
 0x8c1   : > { %7993 = vst.msk [vmem:[%s14407_s27 + $0x78] sm:$0xff] %vm485_vm2, %v8693_v12 }
 0x8c2 PF: > { %s17_s24 = sadd.s32 1, %s9993_s24  }
 0x8c3   : > { %p14_p4 = scmp.ge.s32.totalorder %s17_s24, 4  }
 0x8c5   :  { %16 = sbr.rel (!%p14_p4) target bundleno = 1 (0x1), region = 110 }

</bundles_post_ra>
